<compile_context>
chip_gen: v7x
topology: tpu7x:2x2x1
jax: 0.10.0
libtpu: 0.0.40
codegen_flags: <defaults>
</compile_context>

<pallas_src>
import functools

import jax
import jax.numpy as jnp
from jax.experimental import pallas as pl
from jax.experimental.pallas import tpu as pltpu

NUM_LAYERS = 17
NUM_FEATURES = 64
BN_EPS = 1e-5

_COMPUTE_DTYPE = jnp.bfloat16           # activation / weight storage + MXU input dtype
_VMEM_TILE_BUDGET = 6 * 1024 * 1024     # per-grid-step working-set target (bytes)
_VMEM_LIMIT = 32 * 1024 * 1024          # safe on v5e/v6e/v7x (>=64 MiB physical)


# ----------------------------------------------------------------------------
# Fused per-layer kernel:  [affine+ReLU prologue] -> 3x3 conv -> [stats | -x]
# ----------------------------------------------------------------------------
def _conv_block_kernel(*refs, TH, W, Cin, Cout, relu_prologue, emit_stats,
                       fuse_residual, use_im2row):
    it = iter(refs)
    z_top_ref = next(it)       # (1, 1,  W, Cin)  row above this tile (clamped)
    z_main_ref = next(it)      # (1, TH, W, Cin)  tile body
    z_bot_ref = next(it)       # (1, 1,  W, Cin)  row below this tile (clamped)
    a_ref = next(it)           # (1, Cin)  prologue scale (folded BN / identity)
    c_ref = next(it)           # (1, Cin)  prologue shift
    w_ref = next(it)           # (9*Cin, Cout)  conv weights, (dy,dx,cin) flattened
    b_ref = next(it)           # (1, Cout)  conv bias
    x_ref = next(it) if fuse_residual else None   # (1, TH, W, Cout) original image
    out_ref = next(it)         # (1, TH, W, Cout)  raw conv output (or x - conv)
    stats_ref = next(it) if emit_stats else None  # (1, 1, 8, Cout)

    t = pl.program_id(1)
    num_t = pl.num_programs(1)

    a_vec = a_ref[...].astype(jnp.float32)         # (1, Cin), broadcast over (R, W, Cin)
    c_vec = c_ref[...].astype(jnp.float32)

    def prologue(raw):                              # raw: (R, W, Cin)
        y = raw.astype(jnp.float32) * a_vec + c_vec
        if relu_prologue:
            y = jnp.maximum(y, 0.0)
        return y

    # ---- assemble the zero-padded, activated (TH+2, W+2, Cin) tile ----------
    # Halo rows are masked to zero at the image border AFTER the prologue so the
    # conv's zero padding is preserved (affine maps 0 -> c, not 0).
    top = prologue(z_top_ref[0]) * (t > 0).astype(jnp.float32)
    mid = prologue(z_main_ref[0])
    bot = prologue(z_bot_ref[0]) * (t + 1 < num_t).astype(jnp.float32)
    rows = jnp.concatenate([top, mid, bot], axis=0).astype(_COMPUTE_DTYPE)
    zcol = jnp.zeros((TH + 2, 1, Cin), _COMPUTE_DTYPE)
    p = jnp.concatenate([zcol, rows, zcol], axis=1)          # (TH+2, W+2, Cin)

    # ---- 3x3 conv ------------------------------------------------------------
    if use_im2row:
        # Single MXU matmul: M = TH*W, K = 9*Cin, N = Cout (K=576 for 64-ch layers).
        taps = [p[dy:dy + TH, dx:dx + W, :] for dy in range(3) for dx in range(3)]
        patch = jnp.concatenate(taps, axis=-1)               # (TH, W, 9*Cin)
        acc = jnp.einsum('hwk,ko->hwo', patch, w_ref[...],
                         preferred_element_type=jnp.float32)
    else:
        # Tiny-Cin path (first layer, Cin=3) or lane-concat fallback: 9 shifted matmuls.
        w_all = w_ref[...]
        acc = jnp.zeros((TH, W, Cout), jnp.float32)
        for k in range(9):
            dy, dx = divmod(k, 3)
            acc = acc + jnp.einsum('hwc,co->hwo',
                                   p[dy:dy + TH, dx:dx + W, :],
                                   w_all[k * Cin:(k + 1) * Cin, :],
                                   preferred_element_type=jnp.float32)

    acc = acc + b_ref[...].astype(jnp.float32)                # bias, broadcast once

    # ---- per-channel stats for the NEXT layer's BatchNorm --------------------
    if emit_stats:
        s = jnp.sum(acc, axis=(0, 1), keepdims=True)          # (1, 1, Cout)
        sq = jnp.sum(acc * acc, axis=(0, 1), keepdims=True)   # (1, 1, Cout)
        zpad = jnp.zeros((1, 6, Cout), jnp.float32)
        stats_ref[0] = jnp.concatenate([s, sq, zpad], axis=1)  # (1, 8, Cout)

    # ---- epilogue -------------------------------------------------------------
    if fuse_residual:
        acc = x_ref[0].astype(jnp.float32) - acc               # fused `inputs - residual`
    out_ref[0] = acc.astype(out_ref.dtype)


# ----------------------------------------------------------------------------
# Wrapper: one fused layer = one pallas_call
# ----------------------------------------------------------------------------
def _pick_tile_h(H, W, cin, cout):
    """Largest divisor of H whose per-tile working set fits the VMEM budget."""
    per_row = W * (22 * cin + 8 * cout) + 1   # patch + padded tile + blocks + f32 acc
    cap = max(1, _VMEM_TILE_BUDGET // per_row)
    th = 1
    for d in range(1, H + 1):
        if H % d == 0 and d <= cap:
            th = d
    return th


def _conv_layer(z_prev, aff_a, aff_c, w, b, *, relu_prologue, emit_stats,
                out_dtype, x_orig=None, force_im2row=None):
    N, H, W, Cin = z_prev.shape
    Cout = w.shape[-1]
    TH = _pick_tile_h(H, W, Cin, Cout)
    T = H // TH
    fuse_residual = x_orig is not None
    if force_im2row is not None:
        use_im2row = force_im2row
    else:
        use_im2row = (Cin % 8 == 0) and _IM2ROW_OK

    w9 = w.reshape(9 * Cin, Cout).astype(_COMPUTE_DTYPE)
    b2 = b.reshape(1, Cout).astype(jnp.float32)
    a2 = aff_a.reshape(1, Cin).astype(jnp.float32)
    c2 = aff_c.reshape(1, Cin).astype(jnp.float32)

    in_specs = [
        # one halo row above, the tile body, one halo row below (same array 3x)
        pl.BlockSpec((1, 1, W, Cin),
                     lambda n, t: (n, jnp.maximum(t * TH - 1, 0), 0, 0)),
        pl.BlockSpec((1, TH, W, Cin), lambda n, t: (n, t, 0, 0)),
        pl.BlockSpec((1, 1, W, Cin),
                     lambda n, t: (n, jnp.minimum((t + 1) * TH, H - 1), 0, 0)),
        pl.BlockSpec((1, Cin), lambda n, t: (0, 0)),
        pl.BlockSpec((1, Cin), lambda n, t: (0, 0)),
        pl.BlockSpec((9 * Cin, Cout), lambda n, t: (0, 0)),
        pl.BlockSpec((1, Cout), lambda n, t: (0, 0)),
    ]
    args = [z_prev, z_prev, z_prev, a2, c2, w9, b2]
    if fuse_residual:
        in_specs.append(pl.BlockSpec((1, TH, W, x_orig.shape[-1]),
                                     lambda n, t: (n, t, 0, 0)))
        args.append(x_orig)

    if emit_stats:
        out_shape = (jax.ShapeDtypeStruct((N, H, W, Cout), out_dtype),
                     jax.ShapeDtypeStruct((N, T, 8, Cout), jnp.float32))
        out_specs = (pl.BlockSpec((1, TH, W, Cout), lambda n, t: (n, t, 0, 0)),
                     pl.BlockSpec((1, 1, 8, Cout), lambda n, t: (n, t, 0, 0)))
    else:
        out_shape = jax.ShapeDtypeStruct((N, H, W, Cout), out_dtype)
        out_specs = pl.BlockSpec((1, TH, W, Cout), lambda n, t: (n, t, 0, 0))

    kern = functools.partial(
        _conv_block_kernel, TH=TH, W=W, Cin=Cin, Cout=Cout,
        relu_prologue=relu_prologue, emit_stats=emit_stats,
        fuse_residual=fuse_residual, use_im2row=use_im2row)

    return pl.pallas_call(
        kern,
        out_shape=out_shape,
        grid_spec=pltpu.PrefetchScalarGridSpec(
            num_scalar_prefetch=0,
            grid=(N, T),
            in_specs=in_specs,
            out_specs=out_specs,
        ),
        compiler_params=pltpu.CompilerParams(
            dimension_semantics=("parallel", "parallel"),
            vmem_limit_bytes=_VMEM_LIMIT,
        ),
    )(*args)


# ----------------------------------------------------------------------------
# Probe: is minor-dim (lane) concatenation of 64-lane bf16 pieces lowerable?
# If not, silently fall back to the proven 9-tap matmul path (K = Cin).
# ----------------------------------------------------------------------------
def _probe_im2row():
    try:
        z = jnp.zeros((1, 8, 8, NUM_FEATURES), _COMPUTE_DTYPE)
        w = jnp.zeros((3, 3, NUM_FEATURES, NUM_FEATURES), jnp.float32)
        b = jnp.zeros((1, NUM_FEATURES), jnp.float32)
        a = jnp.ones((1, NUM_FEATURES), jnp.float32)
        c = jnp.zeros((1, NUM_FEATURES), jnp.float32)
        out = _conv_layer(z, a, c, w, b, relu_prologue=True, emit_stats=False,
                          out_dtype=_COMPUTE_DTYPE, force_im2row=True)
        jax.block_until_ready(out)
        return True
    except Exception:
        return False


_IM2ROW_OK = _probe_im2row()


# ----------------------------------------------------------------------------
# BatchNorm folding (tiny XLA glue on per-channel scalars)
# ----------------------------------------------------------------------------
def _fold_bn(stats, count, gamma, beta):
    """Training-mode BN (batch stats, biased var) folded into per-channel a,c."""
    tot = jnp.sum(stats, axis=(0, 1))            # (8, C): row0 = sum, row1 = sum sq
    mean = tot[0] / count
    var = jnp.maximum(tot[1] / count - mean * mean, 0.0)
    inv = gamma * jax.lax.rsqrt(var + BN_EPS)
    return inv.reshape(1, -1), (beta - mean * inv).reshape(1, -1)


# ----------------------------------------------------------------------------
# Parameter init (deterministic, mirrors DnCNN._initialize_weights)
# ----------------------------------------------------------------------------
def init_params(key):
    channels = [3] + [NUM_FEATURES] * (NUM_LAYERS - 1) + [3]
    params = []
    for i in range(NUM_LAYERS):
        cin, cout = channels[i], channels[i + 1]
        key, kw, kb = jax.random.split(key, 3)
        fan_in = cin * 3 * 3
        std = (2.0 / fan_in) ** 0.5                       # kaiming_normal_
        w = jax.random.normal(kw, (3, 3, cin, cout), jnp.float32) * std
        bound = 1.0 / (fan_in ** 0.5)                     # PyTorch conv bias default
        b = jax.random.uniform(kb, (1, cout), jnp.float32, -bound, bound)
        has_bn = 0 < i < NUM_LAYERS - 1
        gamma = jnp.ones((cout,), jnp.float32) if has_bn else None
        beta = jnp.zeros((cout,), jnp.float32) if has_bn else None
        params.append((w, b, gamma, beta))
    return params


# ----------------------------------------------------------------------------
# Full forward pass
# ----------------------------------------------------------------------------
def dncnn_forward(x_nchw, params):
    x = jnp.transpose(x_nchw, (0, 2, 3, 1)).astype(jnp.float32)   # NCHW -> NHWC
    N, H, W, _ = x.shape
    count = float(N * H * W)

    # layer 0: conv(3->64); its ReLU is applied as the prologue of layer 1.
    w0, b0, _, _ = params[0]
    z = _conv_layer(x, jnp.ones((1, 3), jnp.float32), jnp.zeros((1, 3), jnp.float32),
                    w0, b0, relu_prologue=False, emit_stats=False,
                    out_dtype=_COMPUTE_DTYPE)

    # layers 1..15: prologue = ReLU(a*z + c)  (previous layer's BN+ReLU; plain ReLU
    # for layer 1), then conv; the kernel also emits channel sum / sum-of-squares
    # of its own conv output so the next layer's BN can be folded without an
    # extra pass over the activation.
    aff_a = jnp.ones((1, NUM_FEATURES), jnp.float32)
    aff_c = jnp.zeros((1, NUM_FEATURES), jnp.float32)
    for i in range(1, NUM_LAYERS - 1):
        w, b, gamma, beta = params[i]
        z, stats = _conv_layer(z, aff_a, aff_c, w, b, relu_prologue=True,
                               emit_stats=True, out_dtype=_COMPUTE_DTYPE)
        # TODO(synk): the cross-batch reduction of BN stats to per-channel scalars
        # stays in tiny XLA glue (N*T*8*64 floats); all full-activation work is in Pallas.
        aff_a, aff_c = _fold_bn(stats, count, gamma, beta)

    # layer 16: prologue = BN+ReLU of layer 15, conv(64->3), fused `x - residual`.
    w16, b16, _, _ = params[-1]
    out = _conv_layer(z, aff_a, aff_c, w16, b16, relu_prologue=True,
                      emit_stats=False, out_dtype=jnp.float32, x_orig=x)
    return jnp.transpose(out, (0, 3, 1, 2))                       # NHWC -> NCHW


if __name__ == "__main__":
    key = jax.random.PRNGKey(0)
    k_param, k_x = jax.random.split(key)
    params = init_params(k_param)
    x = jax.random.normal(k_x, (2, 3, 16, 16), jnp.float32)       # NCHW, like PyTorch

    fwd = jax.jit(lambda inp: dncnn_forward(inp, params))
    out = fwd(x)
    jax.block_until_ready(out)
    assert out.shape == x.shape and out.dtype == jnp.float32
    assert bool(jnp.all(jnp.isfinite(out)))
    print("KERNEL_OK")
</pallas_src>

<mosaic_0001>
module attributes {stable_mosaic.version = 11 : i64} {
  func.func @_conv_block_kernel(%arg0: i32, %arg1: i32, %arg2: memref<1x1x8x64xbf16, #tpu.memory_space<vmem>>, %arg3: memref<1x8x8x64xbf16, #tpu.memory_space<vmem>>, %arg4: memref<1x1x8x64xbf16, #tpu.memory_space<vmem>>, %arg5: memref<1x64xf32, #tpu.memory_space<vmem>>, %arg6: memref<1x64xf32, #tpu.memory_space<vmem>>, %arg7: memref<576x64xbf16, #tpu.memory_space<vmem>>, %arg8: memref<1x64xf32, #tpu.memory_space<vmem>>, %arg9: memref<1x8x8x64xbf16, #tpu.memory_space<vmem>>) attributes {dimension_semantics = [#tpu.dimension_semantics<parallel>, #tpu.dimension_semantics<parallel>], iteration_bounds = array<i64: 1, 1>, scalar_prefetch = 0 : i64, scratch_operands = 0 : i64, tpu.core_type = #tpu.core_type<tc>, window_params = [{transform_indices = @transform_0, window_bounds = array<i64: 1, 1, 8, 64>}, {transform_indices = @transform_1, window_bounds = array<i64: 1, 8, 8, 64>}, {transform_indices = @transform_2, window_bounds = array<i64: 1, 1, 8, 64>}, {pipeline_mode = #tpu.pipeline_mode<synchronous>, transform_indices = @transform_3, window_bounds = array<i64: 1, 64>}, {pipeline_mode = #tpu.pipeline_mode<synchronous>, transform_indices = @transform_4, window_bounds = array<i64: 1, 64>}, {pipeline_mode = #tpu.pipeline_mode<synchronous>, transform_indices = @transform_5, window_bounds = array<i64: 576, 64>}, {pipeline_mode = #tpu.pipeline_mode<synchronous>, transform_indices = @transform_6, window_bounds = array<i64: 1, 64>}, {transform_indices = @transform_7, window_bounds = array<i64: 1, 8, 8, 64>}]} {
    %c0 = arith.constant 0 : index
    %c0_0 = arith.constant 0 : index
    %0 = vector.load %arg5[%c0, %c0_0] : memref<1x64xf32, #tpu.memory_space<vmem>>, vector<1x64xf32>
    %c0_1 = arith.constant 0 : index
    %c0_2 = arith.constant 0 : index
    %1 = vector.load %arg6[%c0_1, %c0_2] : memref<1x64xf32, #tpu.memory_space<vmem>>, vector<1x64xf32>
    %c0_3 = arith.constant 0 : index
    %c0_4 = arith.constant 0 : index
    %c0_5 = arith.constant 0 : index
    %c0_6 = arith.constant 0 : index
    %2 = vector.load %arg2[%c0_3, %c0_4, %c0_5, %c0_6] : memref<1x1x8x64xbf16, #tpu.memory_space<vmem>>, vector<1x1x8x64xbf16>
    %3 = vector.shape_cast %2 : vector<1x1x8x64xbf16> to vector<1x8x64xbf16>
    %4 = arith.extf %3 : vector<1x8x64xbf16> to vector<1x8x64xf32>
    %5 = vector.shape_cast %0 : vector<1x64xf32> to vector<1x1x64xf32>
    %6 = vector.broadcast %5 : vector<1x1x64xf32> to vector<1x8x64xf32>
    %7 = arith.mulf %4, %6 : vector<1x8x64xf32>
    %8 = vector.shape_cast %1 : vector<1x64xf32> to vector<1x1x64xf32>
    %9 = vector.broadcast %8 : vector<1x1x64xf32> to vector<1x8x64xf32>
    %10 = arith.addf %7, %9 : vector<1x8x64xf32>
    %cst = arith.constant 0.000000e+00 : f32
    %11 = vector.broadcast %cst : f32 to vector<1x8x64xf32>
    %12 = arith.maximumf %10, %11 : vector<1x8x64xf32>
    %c0_i32 = arith.constant 0 : i32
    %13 = arith.cmpi sgt, %arg1, %c0_i32 : i32
    %14 = arith.extui %13 : i1 to i32
    %15 = arith.sitofp %14 : i32 to f32
    %16 = vector.broadcast %15 : f32 to vector<1x8x64xf32>
    %17 = arith.mulf %12, %16 : vector<1x8x64xf32>
    %c0_7 = arith.constant 0 : index
    %c0_8 = arith.constant 0 : index
    %c0_9 = arith.constant 0 : index
    %c0_10 = arith.constant 0 : index
    %18 = vector.load %arg3[%c0_7, %c0_8, %c0_9, %c0_10] : memref<1x8x8x64xbf16, #tpu.memory_space<vmem>>, vector<1x8x8x64xbf16>
    %19 = vector.shape_cast %18 : vector<1x8x8x64xbf16> to vector<8x8x64xbf16>
    %20 = arith.extf %19 : vector<8x8x64xbf16> to vector<8x8x64xf32>
    %21 = vector.shape_cast %0 : vector<1x64xf32> to vector<1x1x64xf32>
    %22 = vector.broadcast %21 : vector<1x1x64xf32> to vector<8x8x64xf32>
    %23 = arith.mulf %20, %22 : vector<8x8x64xf32>
    %24 = vector.shape_cast %1 : vector<1x64xf32> to vector<1x1x64xf32>
    %25 = vector.broadcast %24 : vector<1x1x64xf32> to vector<8x8x64xf32>
    %26 = arith.addf %23, %25 : vector<8x8x64xf32>
    %cst_11 = arith.constant 0.000000e+00 : f32
    %27 = vector.broadcast %cst_11 : f32 to vector<8x8x64xf32>
    %28 = arith.maximumf %26, %27 : vector<8x8x64xf32>
    %c0_12 = arith.constant 0 : index
    %c0_13 = arith.constant 0 : index
    %c0_14 = arith.constant 0 : index
    %c0_15 = arith.constant 0 : index
    %29 = vector.load %arg4[%c0_12, %c0_13, %c0_14, %c0_15] : memref<1x1x8x64xbf16, #tpu.memory_space<vmem>>, vector<1x1x8x64xbf16>
    %30 = vector.shape_cast %29 : vector<1x1x8x64xbf16> to vector<1x8x64xbf16>
    %31 = arith.extf %30 : vector<1x8x64xbf16> to vector<1x8x64xf32>
    %32 = vector.shape_cast %0 : vector<1x64xf32> to vector<1x1x64xf32>
    %33 = vector.broadcast %32 : vector<1x1x64xf32> to vector<1x8x64xf32>
    %34 = arith.mulf %31, %33 : vector<1x8x64xf32>
    %35 = vector.shape_cast %1 : vector<1x64xf32> to vector<1x1x64xf32>
    %36 = vector.broadcast %35 : vector<1x1x64xf32> to vector<1x8x64xf32>
    %37 = arith.addf %34, %36 : vector<1x8x64xf32>
    %cst_16 = arith.constant 0.000000e+00 : f32
    %38 = vector.broadcast %cst_16 : f32 to vector<1x8x64xf32>
    %39 = arith.maximumf %37, %38 : vector<1x8x64xf32>
    %c1_i32 = arith.constant 1 : i32
    %40 = arith.addi %arg1, %c1_i32 : i32
    %c1_i32_17 = arith.constant 1 : i32
    %41 = arith.cmpi slt, %40, %c1_i32_17 : i32
    %42 = arith.extui %41 : i1 to i32
    %43 = arith.sitofp %42 : i32 to f32
    %44 = vector.broadcast %43 : f32 to vector<1x8x64xf32>
    %45 = arith.mulf %39, %44 : vector<1x8x64xf32>
    %46 = tpu.concatenate %17, %28, %45 in 0 : vector<1x8x64xf32>, vector<8x8x64xf32>, vector<1x8x64xf32> -> vector<10x8x64xf32>
    %47 = arith.truncf %46 : vector<10x8x64xf32> to vector<10x8x64xbf16>
    %cst_18 = arith.constant 0.000000e+00 : bf16
    %48 = vector.broadcast %cst_18 : bf16 to vector<10x1x64xbf16>
    %49 = tpu.concatenate %48, %47, %48 in 1 : vector<10x1x64xbf16>, vector<10x8x64xbf16>, vector<10x1x64xbf16> -> vector<10x10x64xbf16>
    %50 = vector.extract_strided_slice %49 {offsets = [0, 0, 0], sizes = [8, 8, 64], strides = [1, 1, 1]} : vector<10x10x64xbf16> to vector<8x8x64xbf16>
    %51 = vector.extract_strided_slice %49 {offsets = [0, 1, 0], sizes = [8, 8, 64], strides = [1, 1, 1]} : vector<10x10x64xbf16> to vector<8x8x64xbf16>
    %52 = vector.extract_strided_slice %49 {offsets = [0, 2, 0], sizes = [8, 8, 64], strides = [1, 1, 1]} : vector<10x10x64xbf16> to vector<8x8x64xbf16>
    %53 = vector.extract_strided_slice %49 {offsets = [1, 0, 0], sizes = [8, 8, 64], strides = [1, 1, 1]} : vector<10x10x64xbf16> to vector<8x8x64xbf16>
    %54 = vector.extract_strided_slice %49 {offsets = [1, 1, 0], sizes = [8, 8, 64], strides = [1, 1, 1]} : vector<10x10x64xbf16> to vector<8x8x64xbf16>
    %55 = vector.extract_strided_slice %49 {offsets = [1, 2, 0], sizes = [8, 8, 64], strides = [1, 1, 1]} : vector<10x10x64xbf16> to vector<8x8x64xbf16>
    %56 = vector.extract_strided_slice %49 {offsets = [2, 0, 0], sizes = [8, 8, 64], strides = [1, 1, 1]} : vector<10x10x64xbf16> to vector<8x8x64xbf16>
    %57 = vector.extract_strided_slice %49 {offsets = [2, 1, 0], sizes = [8, 8, 64], strides = [1, 1, 1]} : vector<10x10x64xbf16> to vector<8x8x64xbf16>
    %58 = vector.extract_strided_slice %49 {offsets = [2, 2, 0], sizes = [8, 8, 64], strides = [1, 1, 1]} : vector<10x10x64xbf16> to vector<8x8x64xbf16>
    %59 = tpu.concatenate %50, %51, %52, %53, %54, %55, %56, %57, %58 in 2 : vector<8x8x64xbf16>, vector<8x8x64xbf16>, vector<8x8x64xbf16>, vector<8x8x64xbf16>, vector<8x8x64xbf16>, vector<8x8x64xbf16>, vector<8x8x64xbf16>, vector<8x8x64xbf16>, vector<8x8x64xbf16> -> vector<8x8x576xbf16>
    %c0_19 = arith.constant 0 : index
    %c0_20 = arith.constant 0 : index
    %60 = vector.load %arg7[%c0_19, %c0_20] : memref<576x64xbf16, #tpu.memory_space<vmem>>, vector<576x64xbf16>
    "tpu.trace_start"() <{level = 10 : i32, message = "hwk,ko->hwo"}> : () -> ()
    %cst_21 = arith.constant dense<0.000000e+00> : vector<8x8x64xf32>
    %61 = tpu.matmul %59, %60, %cst_21 {dimension_numbers = #tpu.dot_dimension_numbers<[2], [0], [0, 1], [1], [0, 0, 0, 1, 1, 1], [], []>} : vector<8x8x576xbf16>, vector<576x64xbf16>, vector<8x8x64xf32> -> vector<8x8x64xf32>
    "tpu.trace_stop"() : () -> ()
    %c0_22 = arith.constant 0 : index
    %c0_23 = arith.constant 0 : index
    %62 = vector.load %arg8[%c0_22, %c0_23] : memref<1x64xf32, #tpu.memory_space<vmem>>, vector<1x64xf32>
    %63 = vector.shape_cast %62 : vector<1x64xf32> to vector<1x1x64xf32>
    %64 = vector.broadcast %63 : vector<1x1x64xf32> to vector<8x8x64xf32>
    %65 = arith.addf %61, %64 : vector<8x8x64xf32>
    %66 = arith.truncf %65 : vector<8x8x64xf32> to vector<8x8x64xbf16>
    %c0_24 = arith.constant 0 : index
    %c0_25 = arith.constant 0 : index
    %c0_26 = arith.constant 0 : index
    %c0_27 = arith.constant 0 : index
    %67 = vector.load %arg9[%c0_24, %c0_25, %c0_26, %c0_27] : memref<1x8x8x64xbf16, #tpu.memory_space<vmem>>, vector<1x8x8x64xbf16>
    %68 = vector.shape_cast %67 : vector<1x8x8x64xbf16> to vector<8x8x64xbf16>
    %69 = vector.shape_cast %66 : vector<8x8x64xbf16> to vector<1x8x8x64xbf16>
    tpu.vector_store %arg9[%c0_24, %c0_25, %c0_26, %c0_27], %69 {strides = array<i32>} : memref<1x8x8x64xbf16, #tpu.memory_space<vmem>>, vector<1x8x8x64xbf16>,
    return
  }
  func.func @transform_0(%arg0: i32, %arg1: i32) -> (i32, i32, i32, i32) {
    %c8_i32 = arith.constant 8 : i32
    %0 = arith.muli %arg1, %c8_i32 : i32
    %c1_i32 = arith.constant 1 : i32
    %1 = arith.subi %0, %c1_i32 : i32
    %c0_i32 = arith.constant 0 : i32
    %2 = arith.maxsi %1, %c0_i32 : i32
    %c0_i32_0 = arith.constant 0 : i32
    %c0_i32_1 = arith.constant 0 : i32
    %c0_i32_2 = arith.constant 0 : i32
    return %arg0, %2, %c0_i32_0, %c0_i32_1 : i32, i32, i32, i32
  }
  func.func @transform_1(%arg0: i32, %arg1: i32) -> (i32, i32, i32, i32) {
    %c0_i32 = arith.constant 0 : i32
    %c0_i32_0 = arith.constant 0 : i32
    %c0_i32_1 = arith.constant 0 : i32
    return %arg0, %arg1, %c0_i32, %c0_i32_0 : i32, i32, i32, i32
  }
  func.func @transform_2(%arg0: i32, %arg1: i32) -> (i32, i32, i32, i32) {
    %c1_i32 = arith.constant 1 : i32
    %0 = arith.addi %arg1, %c1_i32 : i32
    %c8_i32 = arith.constant 8 : i32
    %1 = arith.muli %0, %c8_i32 : i32
    %c7_i32 = arith.constant 7 : i32
    %2 = arith.minsi %1, %c7_i32 : i32
    %c0_i32 = arith.constant 0 : i32
    %c0_i32_0 = arith.constant 0 : i32
    %c0_i32_1 = arith.constant 0 : i32
    return %arg0, %2, %c0_i32, %c0_i32_0 : i32, i32, i32, i32
  }
  func.func @transform_3(%arg0: i32, %arg1: i32) -> (i32, i32) {
    %c0_i32 = arith.constant 0 : i32
    %c0_i32_0 = arith.constant 0 : i32
    %c0_i32_1 = arith.constant 0 : i32
    return %c0_i32, %c0_i32_0 : i32, i32
  }
  func.func @transform_4(%arg0: i32, %arg1: i32) -> (i32, i32) {
    %c0_i32 = arith.constant 0 : i32
    %c0_i32_0 = arith.constant 0 : i32
    %c0_i32_1 = arith.constant 0 : i32
    return %c0_i32, %c0_i32_0 : i32, i32
  }
  func.func @transform_5(%arg0: i32, %arg1: i32) -> (i32, i32) {
    %c0_i32 = arith.constant 0 : i32
    %c0_i32_0 = arith.constant 0 : i32
    %c0_i32_1 = arith.constant 0 : i32
    return %c0_i32, %c0_i32_0 : i32, i32
  }
  func.func @transform_6(%arg0: i32, %arg1: i32) -> (i32, i32) {
    %c0_i32 = arith.constant 0 : i32
    %c0_i32_0 = arith.constant 0 : i32
    %c0_i32_1 = arith.constant 0 : i32
    return %c0_i32, %c0_i32_0 : i32, i32
  }
  func.func @transform_7(%arg0: i32, %arg1: i32) -> (i32, i32, i32, i32) {
    %c0_i32 = arith.constant 0 : i32
    %c0_i32_0 = arith.constant 0 : i32
    %c0_i32_1 = arith.constant 0 : i32
    return %arg0, %arg1, %c0_i32, %c0_i32_0 : i32, i32, i32, i32
  }
}

module attributes {stable_mosaic.version = 11 : i64} {
  func.func @_conv_block_kernel(%arg0: i32, %arg1: i32, %arg2: memref<1x1x16x64xbf16, #tpu.memory_space<vmem>>, %arg3: memref<1x16x16x64xbf16, #tpu.memory_space<vmem>>, %arg4: memref<1x1x16x64xbf16, #tpu.memory_space<vmem>>, %arg5: memref<1x64xf32, #tpu.memory_space<vmem>>, %arg6: memref<1x64xf32, #tpu.memory_space<vmem>>, %arg7: memref<576x64xbf16, #tpu.memory_space<vmem>>, %arg8: memref<1x64xf32, #tpu.memory_space<vmem>>, %arg9: memref<1x16x16x64xbf16, #tpu.memory_space<vmem>>, %arg10: memref<1x1x8x64xf32, #tpu.memory_space<vmem>>) attributes {dimension_semantics = [#tpu.dimension_semantics<parallel>, #tpu.dimension_semantics<parallel>], iteration_bounds = array<i64: 2, 1>, scalar_prefetch = 0 : i64, scratch_operands = 0 : i64, tpu.core_type = #tpu.core_type<tc>, window_params = [{transform_indices = @transform_0, window_bounds = array<i64: 1, 1, 16, 64>}, {transform_indices = @transform_1, window_bounds = array<i64: 1, 16, 16, 64>}, {transform_indices = @transform_2, window_bounds = array<i64: 1, 1, 16, 64>}, {pipeline_mode = #tpu.pipeline_mode<synchronous>, transform_indices = @transform_3, window_bounds = array<i64: 1, 64>}, {pipeline_mode = #tpu.pipeline_mode<synchronous>, transform_indices = @transform_4, window_bounds = array<i64: 1, 64>}, {pipeline_mode = #tpu.pipeline_mode<synchronous>, transform_indices = @transform_5, window_bounds = array<i64: 576, 64>}, {pipeline_mode = #tpu.pipeline_mode<synchronous>, transform_indices = @transform_6, window_bounds = array<i64: 1, 64>}, {transform_indices = @transform_7, window_bounds = array<i64: 1, 16, 16, 64>}, {transform_indices = @transform_8, window_bounds = array<i64: 1, 1, 8, 64>}]} {
    %c0 = arith.constant 0 : index
    %c0_0 = arith.constant 0 : index
    %0 = vector.load %arg5[%c0, %c0_0] : memref<1x64xf32, #tpu.memory_space<vmem>>, vector<1x64xf32>
    %c0_1 = arith.constant 0 : index
    %c0_2 = arith.constant 0 : index
    %1 = vector.load %arg6[%c0_1, %c0_2] : memref<1x64xf32, #tpu.memory_space<vmem>>, vector<1x64xf32>
    %c0_3 = arith.constant 0 : index
    %c0_4 = arith.constant 0 : index
    %c0_5 = arith.constant 0 : index
    %c0_6 = arith.constant 0 : index
    %2 = vector.load %arg2[%c0_3, %c0_4, %c0_5, %c0_6] : memref<1x1x16x64xbf16, #tpu.memory_space<vmem>>, vector<1x1x16x64xbf16>
    %3 = vector.shape_cast %2 : vector<1x1x16x64xbf16> to vector<1x16x64xbf16>
    %4 = arith.extf %3 : vector<1x16x64xbf16> to vector<1x16x64xf32>
    %5 = vector.shape_cast %0 : vector<1x64xf32> to vector<1x1x64xf32>
    %6 = vector.broadcast %5 : vector<1x1x64xf32> to vector<1x16x64xf32>
    %7 = arith.mulf %4, %6 : vector<1x16x64xf32>
    %8 = vector.shape_cast %1 : vector<1x64xf32> to vector<1x1x64xf32>
    %9 = vector.broadcast %8 : vector<1x1x64xf32> to vector<1x16x64xf32>
    %10 = arith.addf %7, %9 : vector<1x16x64xf32>
    %cst = arith.constant 0.000000e+00 : f32
    %11 = vector.broadcast %cst : f32 to vector<1x16x64xf32>
    %12 = arith.maximumf %10, %11 : vector<1x16x64xf32>
    %c0_i32 = arith.constant 0 : i32
    %13 = arith.cmpi sgt, %arg1, %c0_i32 : i32
    %14 = arith.extui %13 : i1 to i32
    %15 = arith.sitofp %14 : i32 to f32
    %16 = vector.broadcast %15 : f32 to vector<1x16x64xf32>
    %17 = arith.mulf %12, %16 : vector<1x16x64xf32>
    %c0_7 = arith.constant 0 : index
    %c0_8 = arith.constant 0 : index
    %c0_9 = arith.constant 0 : index
    %c0_10 = arith.constant 0 : index
    %18 = vector.load %arg3[%c0_7, %c0_8, %c0_9, %c0_10] : memref<1x16x16x64xbf16, #tpu.memory_space<vmem>>, vector<1x16x16x64xbf16>
    %19 = vector.shape_cast %18 : vector<1x16x16x64xbf16> to vector<16x16x64xbf16>
    %20 = arith.extf %19 : vector<16x16x64xbf16> to vector<16x16x64xf32>
    %21 = vector.shape_cast %0 : vector<1x64xf32> to vector<1x1x64xf32>
    %22 = vector.broadcast %21 : vector<1x1x64xf32> to vector<16x16x64xf32>
    %23 = arith.mulf %20, %22 : vector<16x16x64xf32>
    %24 = vector.shape_cast %1 : vector<1x64xf32> to vector<1x1x64xf32>
    %25 = vector.broadcast %24 : vector<1x1x64xf32> to vector<16x16x64xf32>
    %26 = arith.addf %23, %25 : vector<16x16x64xf32>
    %cst_11 = arith.constant 0.000000e+00 : f32
    %27 = vector.broadcast %cst_11 : f32 to vector<16x16x64xf32>
    %28 = arith.maximumf %26, %27 : vector<16x16x64xf32>
    %c0_12 = arith.constant 0 : index
    %c0_13 = arith.constant 0 : index
    %c0_14 = arith.constant 0 : index
    %c0_15 = arith.constant 0 : index
    %29 = vector.load %arg4[%c0_12, %c0_13, %c0_14, %c0_15] : memref<1x1x16x64xbf16, #tpu.memory_space<vmem>>, vector<1x1x16x64xbf16>
    %30 = vector.shape_cast %29 : vector<1x1x16x64xbf16> to vector<1x16x64xbf16>
    %31 = arith.extf %30 : vector<1x16x64xbf16> to vector<1x16x64xf32>
    %32 = vector.shape_cast %0 : vector<1x64xf32> to vector<1x1x64xf32>
    %33 = vector.broadcast %32 : vector<1x1x64xf32> to vector<1x16x64xf32>
    %34 = arith.mulf %31, %33 : vector<1x16x64xf32>
    %35 = vector.shape_cast %1 : vector<1x64xf32> to vector<1x1x64xf32>
    %36 = vector.broadcast %35 : vector<1x1x64xf32> to vector<1x16x64xf32>
    %37 = arith.addf %34, %36 : vector<1x16x64xf32>
    %cst_16 = arith.constant 0.000000e+00 : f32
    %38 = vector.broadcast %cst_16 : f32 to vector<1x16x64xf32>
    %39 = arith.maximumf %37, %38 : vector<1x16x64xf32>
    %c1_i32 = arith.constant 1 : i32
    %40 = arith.addi %arg1, %c1_i32 : i32
    %c1_i32_17 = arith.constant 1 : i32
    %41 = arith.cmpi slt, %40, %c1_i32_17 : i32
    %42 = arith.extui %41 : i1 to i32
    %43 = arith.sitofp %42 : i32 to f32
    %44 = vector.broadcast %43 : f32 to vector<1x16x64xf32>
    %45 = arith.mulf %39, %44 : vector<1x16x64xf32>
    %46 = tpu.concatenate %17, %28, %45 in 0 : vector<1x16x64xf32>, vector<16x16x64xf32>, vector<1x16x64xf32> -> vector<18x16x64xf32>
    %47 = arith.truncf %46 : vector<18x16x64xf32> to vector<18x16x64xbf16>
    %cst_18 = arith.constant 0.000000e+00 : bf16
    %48 = vector.broadcast %cst_18 : bf16 to vector<18x1x64xbf16>
    %49 = tpu.concatenate %48, %47, %48 in 1 : vector<18x1x64xbf16>, vector<18x16x64xbf16>, vector<18x1x64xbf16> -> vector<18x18x64xbf16>
    %c0_19 = arith.constant 0 : index
    %c0_20 = arith.constant 0 : index
    %50 = vector.load %arg7[%c0_19, %c0_20] : memref<576x64xbf16, #tpu.memory_space<vmem>>, vector<576x64xbf16>
    %cst_21 = arith.constant 0.000000e+00 : f32
    %51 = vector.broadcast %cst_21 : f32 to vector<16x16x64xf32>
    %52 = vector.extract_strided_slice %49 {offsets = [0, 0, 0], sizes = [16, 16, 64], strides = [1, 1, 1]} : vector<18x18x64xbf16> to vector<16x16x64xbf16>
    %53 = vector.extract_strided_slice %50 {offsets = [0, 0], sizes = [64, 64], strides = [1, 1]} : vector<576x64xbf16> to vector<64x64xbf16>
    "tpu.trace_start"() <{level = 10 : i32, message = "hwc,co->hwo"}> : () -> ()
    %cst_22 = arith.constant dense<0.000000e+00> : vector<16x16x64xf32>
    %54 = tpu.matmul %52, %53, %cst_22 {dimension_numbers = #tpu.dot_dimension_numbers<[2], [0], [0, 1], [1], [0, 0, 0, 1, 1, 1], [], []>} : vector<16x16x64xbf16>, vector<64x64xbf16>, vector<16x16x64xf32> -> vector<16x16x64xf32>
    "tpu.trace_stop"() : () -> ()
    %55 = arith.addf %51, %54 : vector<16x16x64xf32>
    %56 = vector.extract_strided_slice %49 {offsets = [0, 1, 0], sizes = [16, 16, 64], strides = [1, 1, 1]} : vector<18x18x64xbf16> to vector<16x16x64xbf16>
    %57 = vector.extract_strided_slice %50 {offsets = [64, 0], sizes = [64, 64], strides = [1, 1]} : vector<576x64xbf16> to vector<64x64xbf16>
    "tpu.trace_start"() <{level = 10 : i32, message = "hwc,co->hwo"}> : () -> ()
    %cst_23 = arith.constant dense<0.000000e+00> : vector<16x16x64xf32>
    %58 = tpu.matmul %56, %57, %cst_23 {dimension_numbers = #tpu.dot_dimension_numbers<[2], [0], [0, 1], [1], [0, 0, 0, 1, 1, 1], [], []>} : vector<16x16x64xbf16>, vector<64x64xbf16>, vector<16x16x64xf32> -> vector<16x16x64xf32>
    "tpu.trace_stop"() : () -> ()
    %59 = arith.addf %55, %58 : vector<16x16x64xf32>
    %60 = vector.extract_strided_slice %49 {offsets = [0, 2, 0], sizes = [16, 16, 64], strides = [1, 1, 1]} : vector<18x18x64xbf16> to vector<16x16x64xbf16>
    %61 = vector.extract_strided_slice %50 {offsets = [128, 0], sizes = [64, 64], strides = [1, 1]} : vector<576x64xbf16> to vector<64x64xbf16>
    "tpu.trace_start"() <{level = 10 : i32, message = "hwc,co->hwo"}> : () -> ()
    %cst_24 = arith.constant dense<0.000000e+00> : vector<16x16x64xf32>
    %62 = tpu.matmul %60, %61, %cst_24 {dimension_numbers = #tpu.dot_dimension_numbers<[2], [0], [0, 1], [1], [0, 0, 0, 1, 1, 1], [], []>} : vector<16x16x64xbf16>, vector<64x64xbf16>, vector<16x16x64xf32> -> vector<16x16x64xf32>
    "tpu.trace_stop"() : () -> ()
    %63 = arith.addf %59, %62 : vector<16x16x64xf32>
    %64 = vector.extract_strided_slice %49 {offsets = [1, 0, 0], sizes = [16, 16, 64], strides = [1, 1, 1]} : vector<18x18x64xbf16> to vector<16x16x64xbf16>
    %65 = vector.extract_strided_slice %50 {offsets = [192, 0], sizes = [64, 64], strides = [1, 1]} : vector<576x64xbf16> to vector<64x64xbf16>
    "tpu.trace_start"() <{level = 10 : i32, message = "hwc,co->hwo"}> : () -> ()
    %cst_25 = arith.constant dense<0.000000e+00> : vector<16x16x64xf32>
    %66 = tpu.matmul %64, %65, %cst_25 {dimension_numbers = #tpu.dot_dimension_numbers<[2], [0], [0, 1], [1], [0, 0, 0, 1, 1, 1], [], []>} : vector<16x16x64xbf16>, vector<64x64xbf16>, vector<16x16x64xf32> -> vector<16x16x64xf32>
    "tpu.trace_stop"() : () -> ()
    %67 = arith.addf %63, %66 : vector<16x16x64xf32>
    %68 = vector.extract_strided_slice %49 {offsets = [1, 1, 0], sizes = [16, 16, 64], strides = [1, 1, 1]} : vector<18x18x64xbf16> to vector<16x16x64xbf16>
    %69 = vector.extract_strided_slice %50 {offsets = [256, 0], sizes = [64, 64], strides = [1, 1]} : vector<576x64xbf16> to vector<64x64xbf16>
    "tpu.trace_start"() <{level = 10 : i32, message = "hwc,co->hwo"}> : () -> ()
    %cst_26 = arith.constant dense<0.000000e+00> : vector<16x16x64xf32>
    %70 = tpu.matmul %68, %69, %cst_26 {dimension_numbers = #tpu.dot_dimension_numbers<[2], [0], [0, 1], [1], [0, 0, 0, 1, 1, 1], [], []>} : vector<16x16x64xbf16>, vector<64x64xbf16>, vector<16x16x64xf32> -> vector<16x16x64xf32>
    "tpu.trace_stop"() : () -> ()
    %71 = arith.addf %67, %70 : vector<16x16x64xf32>
    %72 = vector.extract_strided_slice %49 {offsets = [1, 2, 0], sizes = [16, 16, 64], strides = [1, 1, 1]} : vector<18x18x64xbf16> to vector<16x16x64xbf16>
    %73 = vector.extract_strided_slice %50 {offsets = [320, 0], sizes = [64, 64], strides = [1, 1]} : vector<576x64xbf16> to vector<64x64xbf16>
    "tpu.trace_start"() <{level = 10 : i32, message = "hwc,co->hwo"}> : () -> ()
    %cst_27 = arith.constant dense<0.000000e+00> : vector<16x16x64xf32>
    %74 = tpu.matmul %72, %73, %cst_27 {dimension_numbers = #tpu.dot_dimension_numbers<[2], [0], [0, 1], [1], [0, 0, 0, 1, 1, 1], [], []>} : vector<16x16x64xbf16>, vector<64x64xbf16>, vector<16x16x64xf32> -> vector<16x16x64xf32>
    "tpu.trace_stop"() : () -> ()
    %75 = arith.addf %71, %74 : vector<16x16x64xf32>
    %76 = vector.extract_strided_slice %49 {offsets = [2, 0, 0], sizes = [16, 16, 64], strides = [1, 1, 1]} : vector<18x18x64xbf16> to vector<16x16x64xbf16>
    %77 = vector.extract_strided_slice %50 {offsets = [384, 0], sizes = [64, 64], strides = [1, 1]} : vector<576x64xbf16> to vector<64x64xbf16>
    "tpu.trace_start"() <{level = 10 : i32, message = "hwc,co->hwo"}> : () -> ()
    %cst_28 = arith.constant dense<0.000000e+00> : vector<16x16x64xf32>
    %78 = tpu.matmul %76, %77, %cst_28 {dimension_numbers = #tpu.dot_dimension_numbers<[2], [0], [0, 1], [1], [0, 0, 0, 1, 1, 1], [], []>} : vector<16x16x64xbf16>, vector<64x64xbf16>, vector<16x16x64xf32> -> vector<16x16x64xf32>
    "tpu.trace_stop"() : () -> ()
    %79 = arith.addf %75, %78 : vector<16x16x64xf32>
    %80 = vector.extract_strided_slice %49 {offsets = [2, 1, 0], sizes = [16, 16, 64], strides = [1, 1, 1]} : vector<18x18x64xbf16> to vector<16x16x64xbf16>
    %81 = vector.extract_strided_slice %50 {offsets = [448, 0], sizes = [64, 64], strides = [1, 1]} : vector<576x64xbf16> to vector<64x64xbf16>
    "tpu.trace_start"() <{level = 10 : i32, message = "hwc,co->hwo"}> : () -> ()
    %cst_29 = arith.constant dense<0.000000e+00> : vector<16x16x64xf32>
    %82 = tpu.matmul %80, %81, %cst_29 {dimension_numbers = #tpu.dot_dimension_numbers<[2], [0], [0, 1], [1], [0, 0, 0, 1, 1, 1], [], []>} : vector<16x16x64xbf16>, vector<64x64xbf16>, vector<16x16x64xf32> -> vector<16x16x64xf32>
    "tpu.trace_stop"() : () -> ()
    %83 = arith.addf %79, %82 : vector<16x16x64xf32>
    %84 = vector.extract_strided_slice %49 {offsets = [2, 2, 0], sizes = [16, 16, 64], strides = [1, 1, 1]} : vector<18x18x64xbf16> to vector<16x16x64xbf16>
    %85 = vector.extract_strided_slice %50 {offsets = [512, 0], sizes = [64, 64], strides = [1, 1]} : vector<576x64xbf16> to vector<64x64xbf16>
    "tpu.trace_start"() <{level = 10 : i32, message = "hwc,co->hwo"}> : () -> ()
    %cst_30 = arith.constant dense<0.000000e+00> : vector<16x16x64xf32>
    %86 = tpu.matmul %84, %85, %cst_30 {dimension_numbers = #tpu.dot_dimension_numbers<[2], [0], [0, 1], [1], [0, 0, 0, 1, 1, 1], [], []>} : vector<16x16x64xbf16>, vector<64x64xbf16>, vector<16x16x64xf32> -> vector<16x16x64xf32>
    "tpu.trace_stop"() : () -> ()
    %87 = arith.addf %83, %86 : vector<16x16x64xf32>
    %c0_31 = arith.constant 0 : index
    %c0_32 = arith.constant 0 : index
    %88 = vector.load %arg8[%c0_31, %c0_32] : memref<1x64xf32, #tpu.memory_space<vmem>>, vector<1x64xf32>
    %89 = vector.shape_cast %88 : vector<1x64xf32> to vector<1x1x64xf32>
    %90 = vector.broadcast %89 : vector<1x1x64xf32> to vector<16x16x64xf32>
    %91 = arith.addf %87, %90 : vector<16x16x64xf32>
    %cst_33 = arith.constant dense<0.000000e+00> : vector<64xf32>
    %92 = vector.multi_reduction <add>, %91, %cst_33 [0, 1] : vector<16x16x64xf32> to vector<64xf32>
    %93 = vector.shape_cast %92 : vector<64xf32> to vector<1x1x64xf32>
    %94 = arith.mulf %91, %91 : vector<16x16x64xf32>
    %cst_34 = arith.constant dense<0.000000e+00> : vector<64xf32>
    %95 = vector.multi_reduction <add>, %94, %cst_34 [0, 1] : vector<16x16x64xf32> to vector<64xf32>
    %96 = vector.shape_cast %95 : vector<64xf32> to vector<1x1x64xf32>
    %cst_35 = arith.constant 0.000000e+00 : f32
    %97 = vector.broadcast %cst_35 : f32 to vector<1x6x64xf32>
    %98 = tpu.concatenate %93, %96, %97 in 1 : vector<1x1x64xf32>, vector<1x1x64xf32>, vector<1x6x64xf32> -> vector<1x8x64xf32>
    %c0_36 = arith.constant 0 : index
    %c0_37 = arith.constant 0 : index
    %c0_38 = arith.constant 0 : index
    %c0_39 = arith.constant 0 : index
    %99 = vector.load %arg10[%c0_36, %c0_37, %c0_38, %c0_39] : memref<1x1x8x64xf32, #tpu.memory_space<vmem>>, vector<1x1x8x64xf32>
    %100 = vector.shape_cast %99 : vector<1x1x8x64xf32> to vector<1x8x64xf32>
    %101 = vector.shape_cast %98 : vector<1x8x64xf32> to vector<1x1x8x64xf32>
    tpu.vector_store %arg10[%c0_36, %c0_37, %c0_38, %c0_39], %101 {strides = array<i32>} : memref<1x1x8x64xf32, #tpu.memory_space<vmem>>, vector<1x1x8x64xf32>,
    %102 = arith.truncf %91 : vector<16x16x64xf32> to vector<16x16x64xbf16>
    %c0_40 = arith.constant 0 : index
    %c0_41 = arith.constant 0 : index
    %c0_42 = arith.constant 0 : index
    %c0_43 = arith.constant 0 : index
    %103 = vector.load %arg9[%c0_40, %c0_41, %c0_42, %c0_43] : memref<1x16x16x64xbf16, #tpu.memory_space<vmem>>, vector<1x16x16x64xbf16>
    %104 = vector.shape_cast %103 : vector<1x16x16x64xbf16> to vector<16x16x64xbf16>
    %105 = vector.shape_cast %102 : vector<16x16x64xbf16> to vector<1x16x16x64xbf16>
    tpu.vector_store %arg9[%c0_40, %c0_41, %c0_42, %c0_43], %105 {strides = array<i32>} : memref<1x16x16x64xbf16, #tpu.memory_space<vmem>>, vector<1x16x16x64xbf16>,
    return
  }
  func.func @transform_0(%arg0: i32, %arg1: i32) -> (i32, i32, i32, i32) {
    %c16_i32 = arith.constant 16 : i32
    %0 = arith.muli %arg1, %c16_i32 : i32
    %c1_i32 = arith.constant 1 : i32
    %1 = arith.subi %0, %c1_i32 : i32
    %c0_i32 = arith.constant 0 : i32
    %2 = arith.maxsi %1, %c0_i32 : i32
    %c0_i32_0 = arith.constant 0 : i32
    %c0_i32_1 = arith.constant 0 : i32
    %c0_i32_2 = arith.constant 0 : i32
    return %arg0, %2, %c0_i32_0, %c0_i32_1 : i32, i32, i32, i32
  }
  func.func @transform_1(%arg0: i32, %arg1: i32) -> (i32, i32, i32, i32) {
    %c0_i32 = arith.constant 0 : i32
    %c0_i32_0 = arith.constant 0 : i32
    %c0_i32_1 = arith.constant 0 : i32
    return %arg0, %arg1, %c0_i32, %c0_i32_0 : i32, i32, i32, i32
  }
  func.func @transform_2(%arg0: i32, %arg1: i32) -> (i32, i32, i32, i32) {
    %c1_i32 = arith.constant 1 : i32
    %0 = arith.addi %arg1, %c1_i32 : i32
    %c16_i32 = arith.constant 16 : i32
    %1 = arith.muli %0, %c16_i32 : i32
    %c15_i32 = arith.constant 15 : i32
    %2 = arith.minsi %1, %c15_i32 : i32
    %c0_i32 = arith.constant 0 : i32
    %c0_i32_0 = arith.constant 0 : i32
    %c0_i32_1 = arith.constant 0 : i32
    return %arg0, %2, %c0_i32, %c0_i32_0 : i32, i32, i32, i32
  }
  func.func @transform_3(%arg0: i32, %arg1: i32) -> (i32, i32) {
    %c0_i32 = arith.constant 0 : i32
    %c0_i32_0 = arith.constant 0 : i32
    %c0_i32_1 = arith.constant 0 : i32
    return %c0_i32, %c0_i32_0 : i32, i32
  }
  func.func @transform_4(%arg0: i32, %arg1: i32) -> (i32, i32) {
    %c0_i32 = arith.constant 0 : i32
    %c0_i32_0 = arith.constant 0 : i32
    %c0_i32_1 = arith.constant 0 : i32
    return %c0_i32, %c0_i32_0 : i32, i32
  }
  func.func @transform_5(%arg0: i32, %arg1: i32) -> (i32, i32) {
    %c0_i32 = arith.constant 0 : i32
    %c0_i32_0 = arith.constant 0 : i32
    %c0_i32_1 = arith.constant 0 : i32
    return %c0_i32, %c0_i32_0 : i32, i32
  }
  func.func @transform_6(%arg0: i32, %arg1: i32) -> (i32, i32) {
    %c0_i32 = arith.constant 0 : i32
    %c0_i32_0 = arith.constant 0 : i32
    %c0_i32_1 = arith.constant 0 : i32
    return %c0_i32, %c0_i32_0 : i32, i32
  }
  func.func @transform_7(%arg0: i32, %arg1: i32) -> (i32, i32, i32, i32) {
    %c0_i32 = arith.constant 0 : i32
    %c0_i32_0 = arith.constant 0 : i32
    %c0_i32_1 = arith.constant 0 : i32
    return %arg0, %arg1, %c0_i32, %c0_i32_0 : i32, i32, i32, i32
  }
  func.func @transform_8(%arg0: i32, %arg1: i32) -> (i32, i32, i32, i32) {
    %c0_i32 = arith.constant 0 : i32
    %c0_i32_0 = arith.constant 0 : i32
    %c0_i32_1 = arith.constant 0 : i32
    return %arg0, %arg1, %c0_i32, %c0_i32_0 : i32, i32, i32, i32
  }
}

module attributes {stable_mosaic.version = 11 : i64} {
  func.func @_conv_block_kernel(%arg0: i32, %arg1: i32, %arg2: memref<1x1x16x3xf32, #tpu.memory_space<vmem>>, %arg3: memref<1x16x16x3xf32, #tpu.memory_space<vmem>>, %arg4: memref<1x1x16x3xf32, #tpu.memory_space<vmem>>, %arg5: memref<1x3xf32, #tpu.memory_space<vmem>>, %arg6: memref<1x3xf32, #tpu.memory_space<vmem>>, %arg7: memref<27x64xbf16, #tpu.memory_space<vmem>>, %arg8: memref<1x64xf32, #tpu.memory_space<vmem>>, %arg9: memref<1x16x16x64xbf16, #tpu.memory_space<vmem>>) attributes {dimension_semantics = [#tpu.dimension_semantics<parallel>, #tpu.dimension_semantics<parallel>], iteration_bounds = array<i64: 2, 1>, scalar_prefetch = 0 : i64, scratch_operands = 0 : i64, tpu.core_type = #tpu.core_type<tc>, window_params = [{transform_indices = @transform_0, window_bounds = array<i64: 1, 1, 16, 3>}, {transform_indices = @transform_1, window_bounds = array<i64: 1, 16, 16, 3>}, {transform_indices = @transform_2, window_bounds = array<i64: 1, 1, 16, 3>}, {pipeline_mode = #tpu.pipeline_mode<synchronous>, transform_indices = @transform_3, window_bounds = array<i64: 1, 3>}, {pipeline_mode = #tpu.pipeline_mode<synchronous>, transform_indices = @transform_4, window_bounds = array<i64: 1, 3>}, {pipeline_mode = #tpu.pipeline_mode<synchronous>, transform_indices = @transform_5, window_bounds = array<i64: 27, 64>}, {pipeline_mode = #tpu.pipeline_mode<synchronous>, transform_indices = @transform_6, window_bounds = array<i64: 1, 64>}, {transform_indices = @transform_7, window_bounds = array<i64: 1, 16, 16, 64>}]} {
    %c0 = arith.constant 0 : index
    %c0_0 = arith.constant 0 : index
    %0 = vector.load %arg5[%c0, %c0_0] : memref<1x3xf32, #tpu.memory_space<vmem>>, vector<1x3xf32>
    %c0_1 = arith.constant 0 : index
    %c0_2 = arith.constant 0 : index
    %1 = vector.load %arg6[%c0_1, %c0_2] : memref<1x3xf32, #tpu.memory_space<vmem>>, vector<1x3xf32>
    %c0_3 = arith.constant 0 : index
    %c0_4 = arith.constant 0 : index
    %c0_5 = arith.constant 0 : index
    %c0_6 = arith.constant 0 : index
    %2 = vector.load %arg2[%c0_3, %c0_4, %c0_5, %c0_6] : memref<1x1x16x3xf32, #tpu.memory_space<vmem>>, vector<1x1x16x3xf32>
    %3 = vector.shape_cast %2 : vector<1x1x16x3xf32> to vector<1x16x3xf32>
    %4 = vector.shape_cast %0 : vector<1x3xf32> to vector<1x1x3xf32>
    %5 = vector.broadcast %4 : vector<1x1x3xf32> to vector<1x16x3xf32>
    %6 = arith.mulf %3, %5 : vector<1x16x3xf32>
    %7 = vector.shape_cast %1 : vector<1x3xf32> to vector<1x1x3xf32>
    %8 = vector.broadcast %7 : vector<1x1x3xf32> to vector<1x16x3xf32>
    %9 = arith.addf %6, %8 : vector<1x16x3xf32>
    %c0_i32 = arith.constant 0 : i32
    %10 = arith.cmpi sgt, %arg1, %c0_i32 : i32
    %11 = arith.extui %10 : i1 to i32
    %12 = arith.sitofp %11 : i32 to f32
    %13 = vector.broadcast %12 : f32 to vector<1x16x3xf32>
    %14 = arith.mulf %9, %13 : vector<1x16x3xf32>
    %c0_7 = arith.constant 0 : index
    %c0_8 = arith.constant 0 : index
    %c0_9 = arith.constant 0 : index
    %c0_10 = arith.constant 0 : index
    %15 = vector.load %arg3[%c0_7, %c0_8, %c0_9, %c0_10] : memref<1x16x16x3xf32, #tpu.memory_space<vmem>>, vector<1x16x16x3xf32>
    %16 = vector.shape_cast %15 : vector<1x16x16x3xf32> to vector<16x16x3xf32>
    %17 = vector.shape_cast %0 : vector<1x3xf32> to vector<1x1x3xf32>
    %18 = vector.broadcast %17 : vector<1x1x3xf32> to vector<16x16x3xf32>
    %19 = arith.mulf %16, %18 : vector<16x16x3xf32>
    %20 = vector.shape_cast %1 : vector<1x3xf32> to vector<1x1x3xf32>
    %21 = vector.broadcast %20 : vector<1x1x3xf32> to vector<16x16x3xf32>
    %22 = arith.addf %19, %21 : vector<16x16x3xf32>
    %c0_11 = arith.constant 0 : index
    %c0_12 = arith.constant 0 : index
    %c0_13 = arith.constant 0 : index
    %c0_14 = arith.constant 0 : index
    %23 = vector.load %arg4[%c0_11, %c0_12, %c0_13, %c0_14] : memref<1x1x16x3xf32, #tpu.memory_space<vmem>>, vector<1x1x16x3xf32>
    %24 = vector.shape_cast %23 : vector<1x1x16x3xf32> to vector<1x16x3xf32>
    %25 = vector.shape_cast %0 : vector<1x3xf32> to vector<1x1x3xf32>
    %26 = vector.broadcast %25 : vector<1x1x3xf32> to vector<1x16x3xf32>
    %27 = arith.mulf %24, %26 : vector<1x16x3xf32>
    %28 = vector.shape_cast %1 : vector<1x3xf32> to vector<1x1x3xf32>
    %29 = vector.broadcast %28 : vector<1x1x3xf32> to vector<1x16x3xf32>
    %30 = arith.addf %27, %29 : vector<1x16x3xf32>
    %c1_i32 = arith.constant 1 : i32
    %31 = arith.addi %arg1, %c1_i32 : i32
    %c1_i32_15 = arith.constant 1 : i32
    %32 = arith.cmpi slt, %31, %c1_i32_15 : i32
    %33 = arith.extui %32 : i1 to i32
    %34 = arith.sitofp %33 : i32 to f32
    %35 = vector.broadcast %34 : f32 to vector<1x16x3xf32>
    %36 = arith.mulf %30, %35 : vector<1x16x3xf32>
    %37 = tpu.concatenate %14, %22, %36 in 0 : vector<1x16x3xf32>, vector<16x16x3xf32>, vector<1x16x3xf32> -> vector<18x16x3xf32>
    %38 = arith.truncf %37 : vector<18x16x3xf32> to vector<18x16x3xbf16>
    %cst = arith.constant 0.000000e+00 : bf16
    %39 = vector.broadcast %cst : bf16 to vector<18x1x3xbf16>
    %40 = tpu.concatenate %39, %38, %39 in 1 : vector<18x1x3xbf16>, vector<18x16x3xbf16>, vector<18x1x3xbf16> -> vector<18x18x3xbf16>
    %c0_16 = arith.constant 0 : index
    %c0_17 = arith.constant 0 : index
    %41 = vector.load %arg7[%c0_16, %c0_17] : memref<27x64xbf16, #tpu.memory_space<vmem>>, vector<27x64xbf16>
    %cst_18 = arith.constant 0.000000e+00 : f32
    %42 = vector.broadcast %cst_18 : f32 to vector<16x16x64xf32>
    %43 = vector.extract_strided_slice %40 {offsets = [0, 0, 0], sizes = [16, 16, 3], strides = [1, 1, 1]} : vector<18x18x3xbf16> to vector<16x16x3xbf16>
    %44 = vector.extract_strided_slice %41 {offsets = [0, 0], sizes = [3, 64], strides = [1, 1]} : vector<27x64xbf16> to vector<3x64xbf16>
    "tpu.trace_start"() <{level = 10 : i32, message = "hwc,co->hwo"}> : () -> ()
    %cst_19 = arith.constant dense<0.000000e+00> : vector<16x16x64xf32>
    %45 = tpu.matmul %43, %44, %cst_19 {dimension_numbers = #tpu.dot_dimension_numbers<[2], [0], [0, 1], [1], [0, 0, 0, 1, 1, 1], [], []>} : vector<16x16x3xbf16>, vector<3x64xbf16>, vector<16x16x64xf32> -> vector<16x16x64xf32>
    "tpu.trace_stop"() : () -> ()
    %46 = arith.addf %42, %45 : vector<16x16x64xf32>
    %47 = vector.extract_strided_slice %40 {offsets = [0, 1, 0], sizes = [16, 16, 3], strides = [1, 1, 1]} : vector<18x18x3xbf16> to vector<16x16x3xbf16>
    %48 = vector.extract_strided_slice %41 {offsets = [3, 0], sizes = [3, 64], strides = [1, 1]} : vector<27x64xbf16> to vector<3x64xbf16>
    "tpu.trace_start"() <{level = 10 : i32, message = "hwc,co->hwo"}> : () -> ()
    %cst_20 = arith.constant dense<0.000000e+00> : vector<16x16x64xf32>
    %49 = tpu.matmul %47, %48, %cst_20 {dimension_numbers = #tpu.dot_dimension_numbers<[2], [0], [0, 1], [1], [0, 0, 0, 1, 1, 1], [], []>} : vector<16x16x3xbf16>, vector<3x64xbf16>, vector<16x16x64xf32> -> vector<16x16x64xf32>
    "tpu.trace_stop"() : () -> ()
    %50 = arith.addf %46, %49 : vector<16x16x64xf32>
    %51 = vector.extract_strided_slice %40 {offsets = [0, 2, 0], sizes = [16, 16, 3], strides = [1, 1, 1]} : vector<18x18x3xbf16> to vector<16x16x3xbf16>
    %52 = vector.extract_strided_slice %41 {offsets = [6, 0], sizes = [3, 64], strides = [1, 1]} : vector<27x64xbf16> to vector<3x64xbf16>
    "tpu.trace_start"() <{level = 10 : i32, message = "hwc,co->hwo"}> : () -> ()
    %cst_21 = arith.constant dense<0.000000e+00> : vector<16x16x64xf32>
    %53 = tpu.matmul %51, %52, %cst_21 {dimension_numbers = #tpu.dot_dimension_numbers<[2], [0], [0, 1], [1], [0, 0, 0, 1, 1, 1], [], []>} : vector<16x16x3xbf16>, vector<3x64xbf16>, vector<16x16x64xf32> -> vector<16x16x64xf32>
    "tpu.trace_stop"() : () -> ()
    %54 = arith.addf %50, %53 : vector<16x16x64xf32>
    %55 = vector.extract_strided_slice %40 {offsets = [1, 0, 0], sizes = [16, 16, 3], strides = [1, 1, 1]} : vector<18x18x3xbf16> to vector<16x16x3xbf16>
    %56 = vector.extract_strided_slice %41 {offsets = [9, 0], sizes = [3, 64], strides = [1, 1]} : vector<27x64xbf16> to vector<3x64xbf16>
    "tpu.trace_start"() <{level = 10 : i32, message = "hwc,co->hwo"}> : () -> ()
    %cst_22 = arith.constant dense<0.000000e+00> : vector<16x16x64xf32>
    %57 = tpu.matmul %55, %56, %cst_22 {dimension_numbers = #tpu.dot_dimension_numbers<[2], [0], [0, 1], [1], [0, 0, 0, 1, 1, 1], [], []>} : vector<16x16x3xbf16>, vector<3x64xbf16>, vector<16x16x64xf32> -> vector<16x16x64xf32>
    "tpu.trace_stop"() : () -> ()
    %58 = arith.addf %54, %57 : vector<16x16x64xf32>
    %59 = vector.extract_strided_slice %40 {offsets = [1, 1, 0], sizes = [16, 16, 3], strides = [1, 1, 1]} : vector<18x18x3xbf16> to vector<16x16x3xbf16>
    %60 = vector.extract_strided_slice %41 {offsets = [12, 0], sizes = [3, 64], strides = [1, 1]} : vector<27x64xbf16> to vector<3x64xbf16>
    "tpu.trace_start"() <{level = 10 : i32, message = "hwc,co->hwo"}> : () -> ()
    %cst_23 = arith.constant dense<0.000000e+00> : vector<16x16x64xf32>
    %61 = tpu.matmul %59, %60, %cst_23 {dimension_numbers = #tpu.dot_dimension_numbers<[2], [0], [0, 1], [1], [0, 0, 0, 1, 1, 1], [], []>} : vector<16x16x3xbf16>, vector<3x64xbf16>, vector<16x16x64xf32> -> vector<16x16x64xf32>
    "tpu.trace_stop"() : () -> ()
    %62 = arith.addf %58, %61 : vector<16x16x64xf32>
    %63 = vector.extract_strided_slice %40 {offsets = [1, 2, 0], sizes = [16, 16, 3], strides = [1, 1, 1]} : vector<18x18x3xbf16> to vector<16x16x3xbf16>
    %64 = vector.extract_strided_slice %41 {offsets = [15, 0], sizes = [3, 64], strides = [1, 1]} : vector<27x64xbf16> to vector<3x64xbf16>
    "tpu.trace_start"() <{level = 10 : i32, message = "hwc,co->hwo"}> : () -> ()
    %cst_24 = arith.constant dense<0.000000e+00> : vector<16x16x64xf32>
    %65 = tpu.matmul %63, %64, %cst_24 {dimension_numbers = #tpu.dot_dimension_numbers<[2], [0], [0, 1], [1], [0, 0, 0, 1, 1, 1], [], []>} : vector<16x16x3xbf16>, vector<3x64xbf16>, vector<16x16x64xf32> -> vector<16x16x64xf32>
    "tpu.trace_stop"() : () -> ()
    %66 = arith.addf %62, %65 : vector<16x16x64xf32>
    %67 = vector.extract_strided_slice %40 {offsets = [2, 0, 0], sizes = [16, 16, 3], strides = [1, 1, 1]} : vector<18x18x3xbf16> to vector<16x16x3xbf16>
    %68 = vector.extract_strided_slice %41 {offsets = [18, 0], sizes = [3, 64], strides = [1, 1]} : vector<27x64xbf16> to vector<3x64xbf16>
    "tpu.trace_start"() <{level = 10 : i32, message = "hwc,co->hwo"}> : () -> ()
    %cst_25 = arith.constant dense<0.000000e+00> : vector<16x16x64xf32>
    %69 = tpu.matmul %67, %68, %cst_25 {dimension_numbers = #tpu.dot_dimension_numbers<[2], [0], [0, 1], [1], [0, 0, 0, 1, 1, 1], [], []>} : vector<16x16x3xbf16>, vector<3x64xbf16>, vector<16x16x64xf32> -> vector<16x16x64xf32>
    "tpu.trace_stop"() : () -> ()
    %70 = arith.addf %66, %69 : vector<16x16x64xf32>
    %71 = vector.extract_strided_slice %40 {offsets = [2, 1, 0], sizes = [16, 16, 3], strides = [1, 1, 1]} : vector<18x18x3xbf16> to vector<16x16x3xbf16>
    %72 = vector.extract_strided_slice %41 {offsets = [21, 0], sizes = [3, 64], strides = [1, 1]} : vector<27x64xbf16> to vector<3x64xbf16>
    "tpu.trace_start"() <{level = 10 : i32, message = "hwc,co->hwo"}> : () -> ()
    %cst_26 = arith.constant dense<0.000000e+00> : vector<16x16x64xf32>
    %73 = tpu.matmul %71, %72, %cst_26 {dimension_numbers = #tpu.dot_dimension_numbers<[2], [0], [0, 1], [1], [0, 0, 0, 1, 1, 1], [], []>} : vector<16x16x3xbf16>, vector<3x64xbf16>, vector<16x16x64xf32> -> vector<16x16x64xf32>
    "tpu.trace_stop"() : () -> ()
    %74 = arith.addf %70, %73 : vector<16x16x64xf32>
    %75 = vector.extract_strided_slice %40 {offsets = [2, 2, 0], sizes = [16, 16, 3], strides = [1, 1, 1]} : vector<18x18x3xbf16> to vector<16x16x3xbf16>
    %76 = vector.extract_strided_slice %41 {offsets = [24, 0], sizes = [3, 64], strides = [1, 1]} : vector<27x64xbf16> to vector<3x64xbf16>
    "tpu.trace_start"() <{level = 10 : i32, message = "hwc,co->hwo"}> : () -> ()
    %cst_27 = arith.constant dense<0.000000e+00> : vector<16x16x64xf32>
    %77 = tpu.matmul %75, %76, %cst_27 {dimension_numbers = #tpu.dot_dimension_numbers<[2], [0], [0, 1], [1], [0, 0, 0, 1, 1, 1], [], []>} : vector<16x16x3xbf16>, vector<3x64xbf16>, vector<16x16x64xf32> -> vector<16x16x64xf32>
    "tpu.trace_stop"() : () -> ()
    %78 = arith.addf %74, %77 : vector<16x16x64xf32>
    %c0_28 = arith.constant 0 : index
    %c0_29 = arith.constant 0 : index
    %79 = vector.load %arg8[%c0_28, %c0_29] : memref<1x64xf32, #tpu.memory_space<vmem>>, vector<1x64xf32>
    %80 = vector.shape_cast %79 : vector<1x64xf32> to vector<1x1x64xf32>
    %81 = vector.broadcast %80 : vector<1x1x64xf32> to vector<16x16x64xf32>
    %82 = arith.addf %78, %81 : vector<16x16x64xf32>
    %83 = arith.truncf %82 : vector<16x16x64xf32> to vector<16x16x64xbf16>
    %c0_30 = arith.constant 0 : index
    %c0_31 = arith.constant 0 : index
    %c0_32 = arith.constant 0 : index
    %c0_33 = arith.constant 0 : index
    %84 = vector.load %arg9[%c0_30, %c0_31, %c0_32, %c0_33] : memref<1x16x16x64xbf16, #tpu.memory_space<vmem>>, vector<1x16x16x64xbf16>
    %85 = vector.shape_cast %84 : vector<1x16x16x64xbf16> to vector<16x16x64xbf16>
    %86 = vector.shape_cast %83 : vector<16x16x64xbf16> to vector<1x16x16x64xbf16>
    tpu.vector_store %arg9[%c0_30, %c0_31, %c0_32, %c0_33], %86 {strides = array<i32>} : memref<1x16x16x64xbf16, #tpu.memory_space<vmem>>, vector<1x16x16x64xbf16>,
    return
  }
  func.func @transform_0(%arg0: i32, %arg1: i32) -> (i32, i32, i32, i32) {
    %c16_i32 = arith.constant 16 : i32
    %0 = arith.muli %arg1, %c16_i32 : i32
    %c1_i32 = arith.constant 1 : i32
    %1 = arith.subi %0, %c1_i32 : i32
    %c0_i32 = arith.constant 0 : i32
    %2 = arith.maxsi %1, %c0_i32 : i32
    %c0_i32_0 = arith.constant 0 : i32
    %c0_i32_1 = arith.constant 0 : i32
    %c0_i32_2 = arith.constant 0 : i32
    return %arg0, %2, %c0_i32_0, %c0_i32_1 : i32, i32, i32, i32
  }
  func.func @transform_1(%arg0: i32, %arg1: i32) -> (i32, i32, i32, i32) {
    %c0_i32 = arith.constant 0 : i32
    %c0_i32_0 = arith.constant 0 : i32
    %c0_i32_1 = arith.constant 0 : i32
    return %arg0, %arg1, %c0_i32, %c0_i32_0 : i32, i32, i32, i32
  }
  func.func @transform_2(%arg0: i32, %arg1: i32) -> (i32, i32, i32, i32) {
    %c1_i32 = arith.constant 1 : i32
    %0 = arith.addi %arg1, %c1_i32 : i32
    %c16_i32 = arith.constant 16 : i32
    %1 = arith.muli %0, %c16_i32 : i32
    %c15_i32 = arith.constant 15 : i32
    %2 = arith.minsi %1, %c15_i32 : i32
    %c0_i32 = arith.constant 0 : i32
    %c0_i32_0 = arith.constant 0 : i32
    %c0_i32_1 = arith.constant 0 : i32
    return %arg0, %2, %c0_i32, %c0_i32_0 : i32, i32, i32, i32
  }
  func.func @transform_3(%arg0: i32, %arg1: i32) -> (i32, i32) {
    %c0_i32 = arith.constant 0 : i32
    %c0_i32_0 = arith.constant 0 : i32
    %c0_i32_1 = arith.constant 0 : i32
    return %c0_i32, %c0_i32_0 : i32, i32
  }
  func.func @transform_4(%arg0: i32, %arg1: i32) -> (i32, i32) {
    %c0_i32 = arith.constant 0 : i32
    %c0_i32_0 = arith.constant 0 : i32
    %c0_i32_1 = arith.constant 0 : i32
    return %c0_i32, %c0_i32_0 : i32, i32
  }
  func.func @transform_5(%arg0: i32, %arg1: i32) -> (i32, i32) {
    %c0_i32 = arith.constant 0 : i32
    %c0_i32_0 = arith.constant 0 : i32
    %c0_i32_1 = arith.constant 0 : i32
    return %c0_i32, %c0_i32_0 : i32, i32
  }
  func.func @transform_6(%arg0: i32, %arg1: i32) -> (i32, i32) {
    %c0_i32 = arith.constant 0 : i32
    %c0_i32_0 = arith.constant 0 : i32
    %c0_i32_1 = arith.constant 0 : i32
    return %c0_i32, %c0_i32_0 : i32, i32
  }
  func.func @transform_7(%arg0: i32, %arg1: i32) -> (i32, i32, i32, i32) {
    %c0_i32 = arith.constant 0 : i32
    %c0_i32_0 = arith.constant 0 : i32
    %c0_i32_1 = arith.constant 0 : i32
    return %arg0, %arg1, %c0_i32, %c0_i32_0 : i32, i32, i32, i32
  }
}

module attributes {stable_mosaic.version = 11 : i64} {
  func.func @_conv_block_kernel(%arg0: i32, %arg1: i32, %arg2: memref<1x1x16x64xbf16, #tpu.memory_space<vmem>>, %arg3: memref<1x16x16x64xbf16, #tpu.memory_space<vmem>>, %arg4: memref<1x1x16x64xbf16, #tpu.memory_space<vmem>>, %arg5: memref<1x64xf32, #tpu.memory_space<vmem>>, %arg6: memref<1x64xf32, #tpu.memory_space<vmem>>, %arg7: memref<576x3xbf16, #tpu.memory_space<vmem>>, %arg8: memref<1x3xf32, #tpu.memory_space<vmem>>, %arg9: memref<1x16x16x3xf32, #tpu.memory_space<vmem>>, %arg10: memref<1x16x16x3xf32, #tpu.memory_space<vmem>>) attributes {dimension_semantics = [#tpu.dimension_semantics<parallel>, #tpu.dimension_semantics<parallel>], iteration_bounds = array<i64: 2, 1>, scalar_prefetch = 0 : i64, scratch_operands = 0 : i64, tpu.core_type = #tpu.core_type<tc>, window_params = [{transform_indices = @transform_0, window_bounds = array<i64: 1, 1, 16, 64>}, {transform_indices = @transform_1, window_bounds = array<i64: 1, 16, 16, 64>}, {transform_indices = @transform_2, window_bounds = array<i64: 1, 1, 16, 64>}, {pipeline_mode = #tpu.pipeline_mode<synchronous>, transform_indices = @transform_3, window_bounds = array<i64: 1, 64>}, {pipeline_mode = #tpu.pipeline_mode<synchronous>, transform_indices = @transform_4, window_bounds = array<i64: 1, 64>}, {pipeline_mode = #tpu.pipeline_mode<synchronous>, transform_indices = @transform_5, window_bounds = array<i64: 576, 3>}, {pipeline_mode = #tpu.pipeline_mode<synchronous>, transform_indices = @transform_6, window_bounds = array<i64: 1, 3>}, {transform_indices = @transform_7, window_bounds = array<i64: 1, 16, 16, 3>}, {transform_indices = @transform_8, window_bounds = array<i64: 1, 16, 16, 3>}]} {
    %c0 = arith.constant 0 : index
    %c0_0 = arith.constant 0 : index
    %0 = vector.load %arg5[%c0, %c0_0] : memref<1x64xf32, #tpu.memory_space<vmem>>, vector<1x64xf32>
    %c0_1 = arith.constant 0 : index
    %c0_2 = arith.constant 0 : index
    %1 = vector.load %arg6[%c0_1, %c0_2] : memref<1x64xf32, #tpu.memory_space<vmem>>, vector<1x64xf32>
    %c0_3 = arith.constant 0 : index
    %c0_4 = arith.constant 0 : index
    %c0_5 = arith.constant 0 : index
    %c0_6 = arith.constant 0 : index
    %2 = vector.load %arg2[%c0_3, %c0_4, %c0_5, %c0_6] : memref<1x1x16x64xbf16, #tpu.memory_space<vmem>>, vector<1x1x16x64xbf16>
    %3 = vector.shape_cast %2 : vector<1x1x16x64xbf16> to vector<1x16x64xbf16>
    %4 = arith.extf %3 : vector<1x16x64xbf16> to vector<1x16x64xf32>
    %5 = vector.shape_cast %0 : vector<1x64xf32> to vector<1x1x64xf32>
    %6 = vector.broadcast %5 : vector<1x1x64xf32> to vector<1x16x64xf32>
    %7 = arith.mulf %4, %6 : vector<1x16x64xf32>
    %8 = vector.shape_cast %1 : vector<1x64xf32> to vector<1x1x64xf32>
    %9 = vector.broadcast %8 : vector<1x1x64xf32> to vector<1x16x64xf32>
    %10 = arith.addf %7, %9 : vector<1x16x64xf32>
    %cst = arith.constant 0.000000e+00 : f32
    %11 = vector.broadcast %cst : f32 to vector<1x16x64xf32>
    %12 = arith.maximumf %10, %11 : vector<1x16x64xf32>
    %c0_i32 = arith.constant 0 : i32
    %13 = arith.cmpi sgt, %arg1, %c0_i32 : i32
    %14 = arith.extui %13 : i1 to i32
    %15 = arith.sitofp %14 : i32 to f32
    %16 = vector.broadcast %15 : f32 to vector<1x16x64xf32>
    %17 = arith.mulf %12, %16 : vector<1x16x64xf32>
    %c0_7 = arith.constant 0 : index
    %c0_8 = arith.constant 0 : index
    %c0_9 = arith.constant 0 : index
    %c0_10 = arith.constant 0 : index
    %18 = vector.load %arg3[%c0_7, %c0_8, %c0_9, %c0_10] : memref<1x16x16x64xbf16, #tpu.memory_space<vmem>>, vector<1x16x16x64xbf16>
    %19 = vector.shape_cast %18 : vector<1x16x16x64xbf16> to vector<16x16x64xbf16>
    %20 = arith.extf %19 : vector<16x16x64xbf16> to vector<16x16x64xf32>
    %21 = vector.shape_cast %0 : vector<1x64xf32> to vector<1x1x64xf32>
    %22 = vector.broadcast %21 : vector<1x1x64xf32> to vector<16x16x64xf32>
    %23 = arith.mulf %20, %22 : vector<16x16x64xf32>
    %24 = vector.shape_cast %1 : vector<1x64xf32> to vector<1x1x64xf32>
    %25 = vector.broadcast %24 : vector<1x1x64xf32> to vector<16x16x64xf32>
    %26 = arith.addf %23, %25 : vector<16x16x64xf32>
    %cst_11 = arith.constant 0.000000e+00 : f32
    %27 = vector.broadcast %cst_11 : f32 to vector<16x16x64xf32>
    %28 = arith.maximumf %26, %27 : vector<16x16x64xf32>
    %c0_12 = arith.constant 0 : index
    %c0_13 = arith.constant 0 : index
    %c0_14 = arith.constant 0 : index
    %c0_15 = arith.constant 0 : index
    %29 = vector.load %arg4[%c0_12, %c0_13, %c0_14, %c0_15] : memref<1x1x16x64xbf16, #tpu.memory_space<vmem>>, vector<1x1x16x64xbf16>
    %30 = vector.shape_cast %29 : vector<1x1x16x64xbf16> to vector<1x16x64xbf16>
    %31 = arith.extf %30 : vector<1x16x64xbf16> to vector<1x16x64xf32>
    %32 = vector.shape_cast %0 : vector<1x64xf32> to vector<1x1x64xf32>
    %33 = vector.broadcast %32 : vector<1x1x64xf32> to vector<1x16x64xf32>
    %34 = arith.mulf %31, %33 : vector<1x16x64xf32>
    %35 = vector.shape_cast %1 : vector<1x64xf32> to vector<1x1x64xf32>
    %36 = vector.broadcast %35 : vector<1x1x64xf32> to vector<1x16x64xf32>
    %37 = arith.addf %34, %36 : vector<1x16x64xf32>
    %cst_16 = arith.constant 0.000000e+00 : f32
    %38 = vector.broadcast %cst_16 : f32 to vector<1x16x64xf32>
    %39 = arith.maximumf %37, %38 : vector<1x16x64xf32>
    %c1_i32 = arith.constant 1 : i32
    %40 = arith.addi %arg1, %c1_i32 : i32
    %c1_i32_17 = arith.constant 1 : i32
    %41 = arith.cmpi slt, %40, %c1_i32_17 : i32
    %42 = arith.extui %41 : i1 to i32
    %43 = arith.sitofp %42 : i32 to f32
    %44 = vector.broadcast %43 : f32 to vector<1x16x64xf32>
    %45 = arith.mulf %39, %44 : vector<1x16x64xf32>
    %46 = tpu.concatenate %17, %28, %45 in 0 : vector<1x16x64xf32>, vector<16x16x64xf32>, vector<1x16x64xf32> -> vector<18x16x64xf32>
    %47 = arith.truncf %46 : vector<18x16x64xf32> to vector<18x16x64xbf16>
    %cst_18 = arith.constant 0.000000e+00 : bf16
    %48 = vector.broadcast %cst_18 : bf16 to vector<18x1x64xbf16>
    %49 = tpu.concatenate %48, %47, %48 in 1 : vector<18x1x64xbf16>, vector<18x16x64xbf16>, vector<18x1x64xbf16> -> vector<18x18x64xbf16>
    %c0_19 = arith.constant 0 : index
    %c0_20 = arith.constant 0 : index
    %50 = vector.load %arg7[%c0_19, %c0_20] : memref<576x3xbf16, #tpu.memory_space<vmem>>, vector<576x3xbf16>
    %cst_21 = arith.constant 0.000000e+00 : f32
    %51 = vector.broadcast %cst_21 : f32 to vector<16x16x3xf32>
    %52 = vector.extract_strided_slice %49 {offsets = [0, 0, 0], sizes = [16, 16, 64], strides = [1, 1, 1]} : vector<18x18x64xbf16> to vector<16x16x64xbf16>
    %53 = vector.extract_strided_slice %50 {offsets = [0, 0], sizes = [64, 3], strides = [1, 1]} : vector<576x3xbf16> to vector<64x3xbf16>
    "tpu.trace_start"() <{level = 10 : i32, message = "hwc,co->hwo"}> : () -> ()
    %cst_22 = arith.constant dense<0.000000e+00> : vector<16x16x3xf32>
    %54 = tpu.matmul %52, %53, %cst_22 {dimension_numbers = #tpu.dot_dimension_numbers<[2], [0], [0, 1], [1], [0, 0, 0, 1, 1, 1], [], []>} : vector<16x16x64xbf16>, vector<64x3xbf16>, vector<16x16x3xf32> -> vector<16x16x3xf32>
    "tpu.trace_stop"() : () -> ()
    %55 = arith.addf %51, %54 : vector<16x16x3xf32>
    %56 = vector.extract_strided_slice %49 {offsets = [0, 1, 0], sizes = [16, 16, 64], strides = [1, 1, 1]} : vector<18x18x64xbf16> to vector<16x16x64xbf16>
    %57 = vector.extract_strided_slice %50 {offsets = [64, 0], sizes = [64, 3], strides = [1, 1]} : vector<576x3xbf16> to vector<64x3xbf16>
    "tpu.trace_start"() <{level = 10 : i32, message = "hwc,co->hwo"}> : () -> ()
    %cst_23 = arith.constant dense<0.000000e+00> : vector<16x16x3xf32>
    %58 = tpu.matmul %56, %57, %cst_23 {dimension_numbers = #tpu.dot_dimension_numbers<[2], [0], [0, 1], [1], [0, 0, 0, 1, 1, 1], [], []>} : vector<16x16x64xbf16>, vector<64x3xbf16>, vector<16x16x3xf32> -> vector<16x16x3xf32>
    "tpu.trace_stop"() : () -> ()
    %59 = arith.addf %55, %58 : vector<16x16x3xf32>
    %60 = vector.extract_strided_slice %49 {offsets = [0, 2, 0], sizes = [16, 16, 64], strides = [1, 1, 1]} : vector<18x18x64xbf16> to vector<16x16x64xbf16>
    %61 = vector.extract_strided_slice %50 {offsets = [128, 0], sizes = [64, 3], strides = [1, 1]} : vector<576x3xbf16> to vector<64x3xbf16>
    "tpu.trace_start"() <{level = 10 : i32, message = "hwc,co->hwo"}> : () -> ()
    %cst_24 = arith.constant dense<0.000000e+00> : vector<16x16x3xf32>
    %62 = tpu.matmul %60, %61, %cst_24 {dimension_numbers = #tpu.dot_dimension_numbers<[2], [0], [0, 1], [1], [0, 0, 0, 1, 1, 1], [], []>} : vector<16x16x64xbf16>, vector<64x3xbf16>, vector<16x16x3xf32> -> vector<16x16x3xf32>
    "tpu.trace_stop"() : () -> ()
    %63 = arith.addf %59, %62 : vector<16x16x3xf32>
    %64 = vector.extract_strided_slice %49 {offsets = [1, 0, 0], sizes = [16, 16, 64], strides = [1, 1, 1]} : vector<18x18x64xbf16> to vector<16x16x64xbf16>
    %65 = vector.extract_strided_slice %50 {offsets = [192, 0], sizes = [64, 3], strides = [1, 1]} : vector<576x3xbf16> to vector<64x3xbf16>
    "tpu.trace_start"() <{level = 10 : i32, message = "hwc,co->hwo"}> : () -> ()
    %cst_25 = arith.constant dense<0.000000e+00> : vector<16x16x3xf32>
    %66 = tpu.matmul %64, %65, %cst_25 {dimension_numbers = #tpu.dot_dimension_numbers<[2], [0], [0, 1], [1], [0, 0, 0, 1, 1, 1], [], []>} : vector<16x16x64xbf16>, vector<64x3xbf16>, vector<16x16x3xf32> -> vector<16x16x3xf32>
    "tpu.trace_stop"() : () -> ()
    %67 = arith.addf %63, %66 : vector<16x16x3xf32>
    %68 = vector.extract_strided_slice %49 {offsets = [1, 1, 0], sizes = [16, 16, 64], strides = [1, 1, 1]} : vector<18x18x64xbf16> to vector<16x16x64xbf16>
    %69 = vector.extract_strided_slice %50 {offsets = [256, 0], sizes = [64, 3], strides = [1, 1]} : vector<576x3xbf16> to vector<64x3xbf16>
    "tpu.trace_start"() <{level = 10 : i32, message = "hwc,co->hwo"}> : () -> ()
    %cst_26 = arith.constant dense<0.000000e+00> : vector<16x16x3xf32>
    %70 = tpu.matmul %68, %69, %cst_26 {dimension_numbers = #tpu.dot_dimension_numbers<[2], [0], [0, 1], [1], [0, 0, 0, 1, 1, 1], [], []>} : vector<16x16x64xbf16>, vector<64x3xbf16>, vector<16x16x3xf32> -> vector<16x16x3xf32>
    "tpu.trace_stop"() : () -> ()
    %71 = arith.addf %67, %70 : vector<16x16x3xf32>
    %72 = vector.extract_strided_slice %49 {offsets = [1, 2, 0], sizes = [16, 16, 64], strides = [1, 1, 1]} : vector<18x18x64xbf16> to vector<16x16x64xbf16>
    %73 = vector.extract_strided_slice %50 {offsets = [320, 0], sizes = [64, 3], strides = [1, 1]} : vector<576x3xbf16> to vector<64x3xbf16>
    "tpu.trace_start"() <{level = 10 : i32, message = "hwc,co->hwo"}> : () -> ()
    %cst_27 = arith.constant dense<0.000000e+00> : vector<16x16x3xf32>
    %74 = tpu.matmul %72, %73, %cst_27 {dimension_numbers = #tpu.dot_dimension_numbers<[2], [0], [0, 1], [1], [0, 0, 0, 1, 1, 1], [], []>} : vector<16x16x64xbf16>, vector<64x3xbf16>, vector<16x16x3xf32> -> vector<16x16x3xf32>
    "tpu.trace_stop"() : () -> ()
    %75 = arith.addf %71, %74 : vector<16x16x3xf32>
    %76 = vector.extract_strided_slice %49 {offsets = [2, 0, 0], sizes = [16, 16, 64], strides = [1, 1, 1]} : vector<18x18x64xbf16> to vector<16x16x64xbf16>
    %77 = vector.extract_strided_slice %50 {offsets = [384, 0], sizes = [64, 3], strides = [1, 1]} : vector<576x3xbf16> to vector<64x3xbf16>
    "tpu.trace_start"() <{level = 10 : i32, message = "hwc,co->hwo"}> : () -> ()
    %cst_28 = arith.constant dense<0.000000e+00> : vector<16x16x3xf32>
    %78 = tpu.matmul %76, %77, %cst_28 {dimension_numbers = #tpu.dot_dimension_numbers<[2], [0], [0, 1], [1], [0, 0, 0, 1, 1, 1], [], []>} : vector<16x16x64xbf16>, vector<64x3xbf16>, vector<16x16x3xf32> -> vector<16x16x3xf32>
    "tpu.trace_stop"() : () -> ()
    %79 = arith.addf %75, %78 : vector<16x16x3xf32>
    %80 = vector.extract_strided_slice %49 {offsets = [2, 1, 0], sizes = [16, 16, 64], strides = [1, 1, 1]} : vector<18x18x64xbf16> to vector<16x16x64xbf16>
    %81 = vector.extract_strided_slice %50 {offsets = [448, 0], sizes = [64, 3], strides = [1, 1]} : vector<576x3xbf16> to vector<64x3xbf16>
    "tpu.trace_start"() <{level = 10 : i32, message = "hwc,co->hwo"}> : () -> ()
    %cst_29 = arith.constant dense<0.000000e+00> : vector<16x16x3xf32>
    %82 = tpu.matmul %80, %81, %cst_29 {dimension_numbers = #tpu.dot_dimension_numbers<[2], [0], [0, 1], [1], [0, 0, 0, 1, 1, 1], [], []>} : vector<16x16x64xbf16>, vector<64x3xbf16>, vector<16x16x3xf32> -> vector<16x16x3xf32>
    "tpu.trace_stop"() : () -> ()
    %83 = arith.addf %79, %82 : vector<16x16x3xf32>
    %84 = vector.extract_strided_slice %49 {offsets = [2, 2, 0], sizes = [16, 16, 64], strides = [1, 1, 1]} : vector<18x18x64xbf16> to vector<16x16x64xbf16>
    %85 = vector.extract_strided_slice %50 {offsets = [512, 0], sizes = [64, 3], strides = [1, 1]} : vector<576x3xbf16> to vector<64x3xbf16>
    "tpu.trace_start"() <{level = 10 : i32, message = "hwc,co->hwo"}> : () -> ()
    %cst_30 = arith.constant dense<0.000000e+00> : vector<16x16x3xf32>
    %86 = tpu.matmul %84, %85, %cst_30 {dimension_numbers = #tpu.dot_dimension_numbers<[2], [0], [0, 1], [1], [0, 0, 0, 1, 1, 1], [], []>} : vector<16x16x64xbf16>, vector<64x3xbf16>, vector<16x16x3xf32> -> vector<16x16x3xf32>
    "tpu.trace_stop"() : () -> ()
    %87 = arith.addf %83, %86 : vector<16x16x3xf32>
    %c0_31 = arith.constant 0 : index
    %c0_32 = arith.constant 0 : index
    %88 = vector.load %arg8[%c0_31, %c0_32] : memref<1x3xf32, #tpu.memory_space<vmem>>, vector<1x3xf32>
    %89 = vector.shape_cast %88 : vector<1x3xf32> to vector<1x1x3xf32>
    %90 = vector.broadcast %89 : vector<1x1x3xf32> to vector<16x16x3xf32>
    %91 = arith.addf %87, %90 : vector<16x16x3xf32>
    %c0_33 = arith.constant 0 : index
    %c0_34 = arith.constant 0 : index
    %c0_35 = arith.constant 0 : index
    %c0_36 = arith.constant 0 : index
    %92 = vector.load %arg9[%c0_33, %c0_34, %c0_35, %c0_36] : memref<1x16x16x3xf32, #tpu.memory_space<vmem>>, vector<1x16x16x3xf32>
    %93 = vector.shape_cast %92 : vector<1x16x16x3xf32> to vector<16x16x3xf32>
    %94 = arith.subf %93, %91 : vector<16x16x3xf32>
    %c0_37 = arith.constant 0 : index
    %c0_38 = arith.constant 0 : index
    %c0_39 = arith.constant 0 : index
    %c0_40 = arith.constant 0 : index
    %95 = vector.load %arg10[%c0_37, %c0_38, %c0_39, %c0_40] : memref<1x16x16x3xf32, #tpu.memory_space<vmem>>, vector<1x16x16x3xf32>
    %96 = vector.shape_cast %95 : vector<1x16x16x3xf32> to vector<16x16x3xf32>
    %97 = vector.shape_cast %94 : vector<16x16x3xf32> to vector<1x16x16x3xf32>
    tpu.vector_store %arg10[%c0_37, %c0_38, %c0_39, %c0_40], %97 {strides = array<i32>} : memref<1x16x16x3xf32, #tpu.memory_space<vmem>>, vector<1x16x16x3xf32>,
    return
  }
  func.func @transform_0(%arg0: i32, %arg1: i32) -> (i32, i32, i32, i32) {
    %c16_i32 = arith.constant 16 : i32
    %0 = arith.muli %arg1, %c16_i32 : i32
    %c1_i32 = arith.constant 1 : i32
    %1 = arith.subi %0, %c1_i32 : i32
    %c0_i32 = arith.constant 0 : i32
    %2 = arith.maxsi %1, %c0_i32 : i32
    %c0_i32_0 = arith.constant 0 : i32
    %c0_i32_1 = arith.constant 0 : i32
    %c0_i32_2 = arith.constant 0 : i32
    return %arg0, %2, %c0_i32_0, %c0_i32_1 : i32, i32, i32, i32
  }
  func.func @transform_1(%arg0: i32, %arg1: i32) -> (i32, i32, i32, i32) {
    %c0_i32 = arith.constant 0 : i32
    %c0_i32_0 = arith.constant 0 : i32
    %c0_i32_1 = arith.constant 0 : i32
    return %arg0, %arg1, %c0_i32, %c0_i32_0 : i32, i32, i32, i32
  }
  func.func @transform_2(%arg0: i32, %arg1: i32) -> (i32, i32, i32, i32) {
    %c1_i32 = arith.constant 1 : i32
    %0 = arith.addi %arg1, %c1_i32 : i32
    %c16_i32 = arith.constant 16 : i32
    %1 = arith.muli %0, %c16_i32 : i32
    %c15_i32 = arith.constant 15 : i32
    %2 = arith.minsi %1, %c15_i32 : i32
    %c0_i32 = arith.constant 0 : i32
    %c0_i32_0 = arith.constant 0 : i32
    %c0_i32_1 = arith.constant 0 : i32
    return %arg0, %2, %c0_i32, %c0_i32_0 : i32, i32, i32, i32
  }
  func.func @transform_3(%arg0: i32, %arg1: i32) -> (i32, i32) {
    %c0_i32 = arith.constant 0 : i32
    %c0_i32_0 = arith.constant 0 : i32
    %c0_i32_1 = arith.constant 0 : i32
    return %c0_i32, %c0_i32_0 : i32, i32
  }
  func.func @transform_4(%arg0: i32, %arg1: i32) -> (i32, i32) {
    %c0_i32 = arith.constant 0 : i32
    %c0_i32_0 = arith.constant 0 : i32
    %c0_i32_1 = arith.constant 0 : i32
    return %c0_i32, %c0_i32_0 : i32, i32
  }
  func.func @transform_5(%arg0: i32, %arg1: i32) -> (i32, i32) {
    %c0_i32 = arith.constant 0 : i32
    %c0_i32_0 = arith.constant 0 : i32
    %c0_i32_1 = arith.constant 0 : i32
    return %c0_i32, %c0_i32_0 : i32, i32
  }
  func.func @transform_6(%arg0: i32, %arg1: i32) -> (i32, i32) {
    %c0_i32 = arith.constant 0 : i32
    %c0_i32_0 = arith.constant 0 : i32
    %c0_i32_1 = arith.constant 0 : i32
    return %c0_i32, %c0_i32_0 : i32, i32
  }
  func.func @transform_7(%arg0: i32, %arg1: i32) -> (i32, i32, i32, i32) {
    %c0_i32 = arith.constant 0 : i32
    %c0_i32_0 = arith.constant 0 : i32
    %c0_i32_1 = arith.constant 0 : i32
    return %arg0, %arg1, %c0_i32, %c0_i32_0 : i32, i32, i32, i32
  }
  func.func @transform_8(%arg0: i32, %arg1: i32) -> (i32, i32, i32, i32) {
    %c0_i32 = arith.constant 0 : i32
    %c0_i32_0 = arith.constant 0 : i32
    %c0_i32_1 = arith.constant 0 : i32
    return %arg0, %arg1, %c0_i32, %c0_i32_0 : i32, i32, i32, i32
  }
}

</mosaic_0001>

<bundles_post_ra>
// kernel: tpu_custom_call.1
= control target key start
LH: loop header
LB: loop body
LE: loop exit
PB: predicated region body
PF: predicated region fallthrough
CT: control target
= control target key end

     0   :  { %vm257_vm0 = vcmask 1040384   ;;  %vm258_vm1 = vsmask.f32 256  ;;  %vm270_vm2 = vcmask 1044480   ;;  %vm271_vm3 = vsmask.f32 4352  ;;  %s1869_s0 = inlined_call_operand.vmem [shape: bf16[1,8,8,64], index: 0, kind: input, shape index: {}]   ;;  %s1870_s1 = inlined_call_operand.vmem [shape: bf16[1,8,8,64], index: 1, kind: input, shape index: {}]   ;;  %s1871_s2 = inlined_call_operand.vmem [shape: bf16[1,8,8,64], index: 2, kind: input, shape index: {}]   ;;  %s1872_s3 = inlined_call_operand.vmem [shape: f32[1,64], index: 3, kind: input, shape index: {}]   ;;  %s1873_s4 = inlined_call_operand.vmem [shape: f32[1,64], index: 4, kind: input, shape index: {}]   ;;  %s1874_s5 = inlined_call_operand.vmem [shape: bf16[576,64], index: 5, kind: input, shape index: {}]   ;;  %s1875_s6 = inlined_call_operand.vmem [shape: f32[1,64], index: 6, kind: input, shape index: {}]   ;;  %s1876_s7 = inlined_call_operand.hbm [shape: bf16[1,8,8,64], index: 7, kind: output, shape index: {}]  }
   0x1   :  { %v1432_v0 = vld [vmem:[%s1872_s3] ss:$0 sm:$0xff]  ;;  %v1208_v1 = vld [vmem:[%s1870_s1 + $0x8] sm:$0xff]   ;;  %v1209_v6 = vld [vmem:[%s1870_s1 + $0x10] sm:$0xff]   ;;  %s1386_s10 = smov 64  }
   0x2   :  { %v1198_v2 = vunpack.c.l.bf16 %v1208_v1  ;;  %v1440_v3 = vld [vmem:[%s1873_s4] ss:$0 sm:$0xff]  ;;  %v1199_v5 = vunpack.c.h.bf16 %v1208_v1  ;;  %v1202_v10 = vunpack.c.l.bf16 %v1209_v6  ;;  %v1455_v12 = vld [vmem:[%s1870_s1 + $0x18] sm:$0xff]   ;;  %v1203_v16 = vunpack.c.h.bf16 %v1209_v6  ;;  %v1328_v31 = vld [vmem:[%s1874_s5 + $0xc8] sm:$0xff]  }
   0x3   :  { %v1193_v4 = vld [vmem:[%s1870_s1] sm:$0xff]   ;;  %v1206_v15 = vunpack.c.l.bf16 %v1455_v12  ;;  %v1329_v35 = vld [vmem:[%s1874_s5 + $0x88] sm:$0xff]   ;;  %v1332_v54 = vld [vmem:[%s1874_s5 + $0xd0] sm:$0xff]  }
   0x4   :  { %v134_v7 = vmul.f32 %v1198_v2, %v1432_v0  ;;  %v1194_v8 = vunpack.c.l.bf16 %v1193_v4  ;;  %v1195_v9 = vunpack.c.h.bf16 %v1193_v4  ;;  %v94_v11 = vld [vmem:[%s1869_s0] sm:$0xf]  ;;  %v135_v13 = vmul.f32 %v1199_v5, %v1432_v0  ;;  %vm1499_vm4 = vmand %vm257_vm0, %vm258_vm1  ;;  %v1333_v1 = vld [vmem:[%s1874_s5 + $0x90] sm:$0xff]  }
   0x5   :  { %v95_v14 = vunpack.c.l.bf16 %v94_v11  ;;  %v136_v20 = vmul.f32 %v1202_v10, %v1432_v0  ;;  %v1326_v21 = vld [vmem:[%s1874_s5 + $0xc0] sm:$0xff]   ;;  %v138_v24 = vmul.f32 %v1206_v15, %v1432_v0  ;;  %v137_v25 = vmul.f32 %v1203_v16, %v1432_v0  ;;  %v1334_v2 = vld [vmem:[%s1874_s5 + $0x48] sm:$0xff]   ;;  %vm1511_vm5 = vmand %vm270_vm2, %vm271_vm3 }
   0x6   :  { %v142_v17 = vadd.f32 %v1440_v3, %v134_v7  ;;  %v132_v18 = vmul.f32 %v1194_v8, %v1432_v0  ;;  %v133_v19 = vmul.f32 %v1195_v9, %v1432_v0  ;;  %v143_v22 = vadd.f32 %v1440_v3, %v135_v13  ;;  %v1327_v26 = vld [vmem:[%s1874_s5 + $0x80] sm:$0xff]   ;;  %1251 = vmatprep.subr.bf16.mxu1 %v1326_v21  ;;  %v1335_v11 = vld [vmem:[%s1874_s5 + $0x8] sm:$0xff]  }
   0x7   :  { %v102_v23 = vmul.f32 %v1432_v0, %v95_v14  ;;  %v144_v30 = vadd.f32 %v1440_v3, %v136_v20  ;;  %v1481_v34 = vadd.f32 %v1440_v3, %v138_v24  ;;  %1252 = vmatpush3.bf16.msra.mxu1 %v1327_v26  ;;  %v1330_v40 = vld [vmem:[%s1874_s5 + $0x40] sm:$0xff]   ;;  %v145_v44 = vadd.f32 %v1440_v3, %v137_v25 }
   0x8   :  { %v150_v27 = vmax.f32 %v142_v17, 0.0  ;;  %v140_v28 = vadd.f32 %v1440_v3, %v132_v18  ;;  %v141_v29 = vadd.f32 %v1440_v3, %v133_v19  ;;  %v151_v32 = vmax.f32 %v143_v22, 0.0  ;;  %1253 = vmatprep.subr.bf16.mxu1 %v1328_v31  ;;  %v1331_v45 = vld [vmem:[%s1874_s5] sm:$0xff]   ;;  %1211 = vmatprep.subr.bf16.mxu0 %v1330_v40  ;;  %v1336_v18 = vld [vmem:[%s1874_s5 + $0xd8] sm:$0xff]  }
   0x9   :  { %v109_v33 = vadd.f32 %v1440_v3, %v102_v23  ;;  %v152_v39 = vmax.f32 %v144_v30, 0.0  ;;  %v154_v43 = vmax.f32 %v1481_v34, 0.0  ;;  %1212 = vmatpush3.bf16.msra.mxu0 %v1331_v45  ;;  %v153_v16 = vmax.f32 %v145_v44, 0.0 }
   0xa   :  { %v170_v36 = vpack.c.bf16 %v150_v27, %v150_v27  ;;  %v148_v37 = vmax.f32 %v140_v28, 0.0  ;;  %v149_v38 = vmax.f32 %v141_v29, 0.0  ;;  %v171_v41 = vpack.c.bf16 %v151_v32, %v151_v32  ;;  %1213 = vmatprep.subr.bf16.mxu0 %v1334_v2  ;;  %v1337_v27 = vld [vmem:[%s1874_s5 + $0x98] sm:$0xff]   ;;  %v1338_v28 = vld [vmem:[%s1874_s5 + $0x50] sm:$0xff]  }
   0xb   :  { %v110_v42 = vmax.f32 %v109_v33, 0.0  ;;  %v172_v52 = vpack.c.bf16 %v152_v39, %v152_v39  ;;  %1254 = vmatpush3.bf16.msra.mxu1 %v1329_v35  ;;  %v174_v26 = vpack.c.bf16 %v154_v43, %v154_v43  ;;  %v173_v31 = vpack.c.bf16 %v153_v16, %v153_v16 }
   0xc   :  { %v199_v46 = vshrl.u32 %v170_v36, 16  ;;  %v202_v47 = vshll.u32 %v170_v36, 16  ;;  %v168_v48 = vpack.c.bf16 %v148_v37, %v148_v37  ;;  %v169_v49 = vpack.c.bf16 %v149_v38, %v149_v38  ;;  %1255 = vmatprep.subr.bf16.mxu1 %v1332_v54 }
   0xd   :  { %v206_v50 = vshrl.u32 %v171_v41, 16  ;;  %v209_v51 = vshll.u32 %v171_v41, 16  ;;  %v115_v53 = vmul.f32 0.0, %v110_v42  ;;  %v213_v62 = vshrl.u32 %v172_v52, 16  ;;  %1214 = vmatpush3.bf16.msra.mxu0 %v1335_v11 }
   0xe   :  { %v201_v55 = vrot.slane %v199_v46, 7  ;;  %v185_v56 = vshrl.u32 %v168_v48, 16  ;;  %v188_v57 = vshll.u32 %v168_v48, 16  ;;  %v192_v58 = vshrl.u32 %v169_v49, 16  ;;  %1215 = vmatprep.subr.bf16.mxu0 %v1338_v28 }
   0xf   :  { %v195_v60 = vshll.u32 %v169_v49, 16  ;;  %v208_v61 = vrot.slane %v206_v50, 7  ;;  %v216_v63 = vshll.u32 %v172_v52, 16  ;;  %v167_v8 = vpack.c.bf16 %v115_v53, %v115_v53  ;;  %1256 = vmatpush3.bf16.msra.mxu1 %v1333_v1  ;;  %v1133_v50 = vld [vmem:[%s1871_s2 + $0x1c] sm:$0xf] }
  0x10   :  { %v204_v4 = vor.u32 %v202_v47, %v201_v55  ;;  %v187_v6 = vrot.slane %v185_v56, 7  ;;  %v194_v7 = vrot.slane %v192_v58, 7  ;;  %v215_v10 = vrot.slane %v213_v62, 7  ;;  %1257 = vmatprep.subr.bf16.mxu1 %v1336_v18  ;;  %v1339_v47 = vld [vmem:[%s1874_s5 + $0x10] sm:$0xff]   ;;  %v1341_v56 = vld [vmem:[%s1874_s5 + $0xa0] sm:$0xff]   ;;  %v1342_v62 = vld [vmem:[%s1874_s5 + $0x58] sm:$0xff]  }
  0x11   :  { %v211_v9 = vor.u32 %v209_v51, %v208_v61  ;;  %v178_v22 = vshrl.u32 %v167_v8, 16  ;;  %v181_v35 = vshll.u32 %v167_v8, 16  ;;  %v227_v43 = vshrl.u32 %v174_v26, 16  ;;  %v1340_v51 = vld [vmem:[%s1874_s5 + $0xe0] sm:$0xff]   ;;  %1216 = vmatpush3.bf16.msra.mxu0 %v1339_v47  ;;  %v1343_v8 = vld [vmem:[%s1874_s5 + $0x18] sm:$0xff]  }
  0x12   :  { %v263_v13 = vsel %vm1499_vm4, 0, %v204_v4  ;;  %v190_v14 = vor.u32 %v188_v57, %v187_v6  ;;  %v197_v15 = vor.u32 %v195_v60, %v194_v7  ;;  %v218_v25 = vor.u32 %v216_v63, %v215_v10  ;;  %1217 = vmatprep.subr.bf16.mxu0 %v1342_v62  ;;  %v1352_v62 = vld [vmem:[%s1874_s5 + $0xf8] sm:$0xff]  }
  0x13   :  { %v1522_v17 = vsel %vm1511_vm5, %v263_v13, 0  ;;  %v264_v21 = vsel %vm1499_vm4, 0, %v211_v9  ;;  %1258 = vmatpush3.bf16.msra.mxu1 %v1337_v27  ;;  %v180_v39 = vrot.slane %v178_v22, 7  ;;  %v229_v49 = vrot.slane %v227_v43, 7  ;;  %v1344_v9 = vld [vmem:[%s1874_s5 + $0xe8] sm:$0xff]  }
  0x14   :  { %376 = vrot.lane.b32.xlu0 %v1522_v17, %s1386_s10  ;;  %v261_v19 = vsel %vm1499_vm4, 0, %v190_v14  ;;  %v262_v20 = vsel %vm1499_vm4, 0, %v197_v15  ;;  %v1555_v32 = vsel %vm1511_vm5, %v264_v21, 0  ;;  %v1558_v33 = vrot.slane %v1522_v17, 1  ;;  %1259 = vmatprep.subr.bf16.mxu1 %v1340_v51  ;;  %v1350_v51 = vld [vmem:[%s1874_s5 + $0x68] sm:$0xff]  }
  0x15   :  { %v1537_v23 = vsel %vm1511_vm5, %v261_v19, 0  ;;  %v1541_v24 = vsel %vm1511_vm5, %v262_v20, 0  ;;  %v307_v34 = vshll.u32 %v1522_v17, 16  ;;  %v1566_v38 = vrot.slane %v1555_v32, 1  ;;  %1218 = vmatpush3.bf16.msra.mxu0 %v1343_v8 }
  0x16   :  { %372 = vrot.lane.b32.xlu1 %v1537_v23, %s1386_s10  ;;  %v364_v29 = vrot.slane %v1537_v23, 1  ;;  %v300_v30 = vshll.u32 %v1541_v24, 16  ;;  %v298_v36 = vshrl.u32 %v1541_v24, 16  ;;  %v1569_v40 = vrot.slane %v1541_v24, 1 }
  0x17   :  { %v305_v41 = vshrl.u32 %v1522_v17, 16  ;;  %v265_v42 = vsel %vm1499_vm4, 0, %v218_v25  ;;  %v309_v44 = vrot.slane %v307_v34, 1  ;;  %v312_v45 = vshrl.u32 %v1555_v32, 16  ;;  %1260 = vmatpush3.bf16.msra.mxu1 %v1341_v56  ;;  %v1345_v25 = vld [vmem:[%s1874_s5 + $0xa8] sm:$0xff]  }
  0x18   :  { %396 = vrot.lane.b32.xlu0 %v364_v29, %s1386_s10  ;;  %v302_v37 = vrot.slane %v300_v30, 1  ;;  %v314_v46 = vshll.u32 %v1555_v32, 16  ;;  %v183_v48 = vor.u32 %v181_v35, %v180_v39  ;;  %v1593_v53 = vsel %vm1511_vm5, %v265_v42, 0  ;;  %1261 = vmatprep.subr.bf16.mxu1 %v1344_v9  ;;  %v1347_v42 = vld [vmem:[%s1874_s5 + $0x20] sm:$0xff]  }
  0x19   :  { %v230_v54 = vshll.u32 %v174_v26, 16  ;;  %v220_v55 = vshrl.u32 %v173_v31, 16  ;;  %v293_v57 = vshll.u32 %v1537_v23, 16  ;;  %v223_v60 = vshll.u32 %v173_v31, 16  ;;  %v1346_v31 = vld [vmem:[%s1874_s5 + $0x60] sm:$0xff]  }
  0x1a   :  { %374 = vrot.lane.b32.xlu1 %v1541_v24, %s1386_s10  ;;  %v1589_v52 = vor.u32 %v302_v37, %v298_v36  ;;  %v260_v58 = vsel %vm1499_vm4, 0, %v183_v48  ;;  %v1207_v61 = vunpack.c.h.bf16 %v1455_v12  ;;  %v1611_v4 = vor.u32 %v309_v44, %v305_v41  ;;  %1219 = vmatprep.subr.bf16.mxu0 %v1346_v31 }
  0x1b   :  { %v1609_v63 = vsel %vm1511_vm5, %v260_v58, 0  ;;  %v232_v1 = vor.u32 %v230_v54, %v229_v49  ;;  %v222_v2 = vrot.slane %v220_v55, 7  ;;  %v316_v6 = vrot.slane %v314_v46, 1  ;;  %1262 = vmatpush3.bf16.msra.mxu1 %v1345_v25  ;;  %1220 = vmatpush3.bf16.msra.mxu0 %v1347_v42  ;;  %v1351_v58 = vld [vmem:[%s1874_s5 + $0x28] sm:$0xff]  }
  0x1c   :  { %400 = vrot.lane.b32.xlu0 %v1558_v33, %s1386_s10  ;;  %v321_v12 = vshll.u32 %v1593_v53, 16  ;;  %v139_v7 = vmul.f32 %v1207_v61, %v1432_v0  ;;  %v286_v10 = vshll.u32 %v1609_v63, 16  ;;  %v157_v14 = vunpack.c.l.bf16 %v1133_v50  ;;  %1221 = vmatprep.subr.bf16.mxu0 %v1350_v51 }
  0x1d   :  { %v267_v11 = vsel %vm1499_vm4, 0, %v232_v1  ;;  %v225_v13 = vor.u32 %v223_v60, %v222_v2  ;;  %v291_v15 = vshrl.u32 %v1537_v23, 16  ;;  %v295_v16 = vrot.slane %v293_v57, 1  ;;  %v1353_v2 = vld [vmem:[%s1874_s5 + $0xb8] sm:$0xff]  }
  0x1e   :  { %378 = vrot.lane.b32.xlu1 %v1555_v32, %s1386_s10  ;;  %v147_v18 = vadd.f32 %v1440_v3, %v139_v7  ;;  %v319_v19 = vshrl.u32 %v1593_v53, 16  ;;  %v1633_v20 = vsel %vm1511_vm5, %v267_v11, 0  ;;  %v158_v22 = vmul.f32 %v1432_v0, %v157_v14  ;;  %v1354_v7 = vld [vmem:[%s1874_s5 + $0x70] sm:$0xff]  }
  0x1f   :  { %v266_v21 = vsel %vm1499_vm4, 0, %v225_v13  ;;  %v1641_v26 = vor.u32 %v316_v6, %v312_v45  ;;  %v323_v27 = vrot.slane %v321_v12, 1  ;;  %v284_v0 = vshrl.u32 %v1609_v63, 16  ;;  %v1348_v45 = vld [vmem:[%s1874_s5 + $0xf0] sm:$0xff]   ;;  %1222 = vmatpush3.bf16.msra.mxu0 %v1351_v58  ;;  %v1356_v13 = vld [vmem:[%s1874_s5 + $0x78] sm:$0xff]  }
  0x20   :  { %343 = vrot.lane.b32.xlu0 %v1589_v52, %s1386_s10  ;;  %v1645_v28 = vsel %vm1511_vm5, %v266_v21, 0  ;;  %v155_v30 = vmax.f32 %v147_v18, 0.0  ;;  %v288_v34 = vrot.slane %v286_v10, 1  ;;  %v333_v35 = vshrl.u32 %v1633_v20, 16  ;;  %1263 = vmatprep.subr.bf16.mxu1 %v1348_v45  ;;  %v1355_v10 = vld [vmem:[%s1874_s5 + $0x30] sm:$0xff]   ;;  %v1721_v18 = vld [vmem:[%s1874_s5 + $0x100] sm:$0xff]  }
  0x21   :  { %v328_v36 = vshll.u32 %v1645_v28, 16  ;;  %v335_v37 = vshll.u32 %v1633_v20, 16  ;;  %v159_v41 = vadd.f32 %v1440_v3, %v158_v22  ;;  %v1662_v43 = vor.u32 %v295_v16, %v291_v15  ;;  %v1349_v3 = vld [vmem:[%s1874_s5 + $0xb0] sm:$0xff]   ;;  %1223 = vmatprep.subr.bf16.mxu0 %v1354_v7  ;;  %v1357_v16 = vld [vmem:[%s1874_s5 + $0x38] sm:$0xff]  }
  0x22   :  { %398 = vrot.lane.b32.xlu1 %v1569_v40, %s1386_s10  ;;  %v175_v39 = vpack.c.bf16 %v155_v30, %v155_v30  ;;  %v326_v44 = vshrl.u32 %v1645_v28, 16  ;;  %v289_v49 = vor.u32 %v288_v34, %v284_v0  ;;  %1264 = vmatpush3.bf16.msra.mxu1 %v1349_v3  ;;  %v1678_v56 = vor.u32 %v323_v27, %v319_v19 }
  0x23   :  { %v160_v48 = vmax.f32 %v159_v41, 0.0  ;;  %v330_v50 = vrot.slane %v328_v36, 1  ;;  %v337_v57 = vrot.slane %v335_v37, 1  ;;  %1265 = vmatprep.subr.bf16.mxu1 %v1352_v62  ;;  %1224 = vmatpush3.bf16.msra.mxu0 %v1355_v10  ;;  %v1724_v19 = vrot.slane %v1593_v53, 1 }
  0x24   :  { %345 = vrot.lane.b32.xlu0 %v1611_v4, %s1386_s10  ;;  %v234_v46 = vshrl.u32 %v175_v39, 16  ;;  %v237_v47 = vshll.u32 %v175_v39, 16  ;;  %1225 = vmatprep.subr.bf16.mxu0 %v1356_v13 }
  0x25   :  { %v166_v55 = vmul.f32 0.0, %v160_v48  ;;  %v1687_v1 = vor.u32 %v330_v50, %v326_v44  ;;  %v1697_v8 = vor.u32 %v337_v57, %v333_v35 }
  0x26   :  { %402 = vrot.lane.b32.xlu1 %v1566_v38, %s1386_s10  ;;  %v236_v54 = vrot.slane %v234_v46, 7  ;;  %1266 = vmatpush3.bf16.msra.mxu1 %v1353_v2 }
  0x27   :  { %v176_v61 = vpack.c.bf16 %v166_v55, %v166_v55  ;;  %1226 = vmatpush3.bf16.msra.mxu0 %v1357_v16  ;;  %1315 = vmatprep.subr.bf16.mxu1 %v1721_v18 }
  0x28   :  { %347 = vrot.lane.b32.xlu0 %v1641_v26, %s1386_s10  ;;  %v239_v60 = vor.u32 %v237_v47, %v236_v54  ;;  %1299 = vmatprep.subr.bf16.mxu0 %v1721_v18 }
  0x29   :  { %v241_v6 = vshrl.u32 %v176_v61, 16  ;;  %v244_v12 = vshll.u32 %v176_v61, 16 }
  0x2a   :  { %341 = vrot.lane.b32.xlu1 %v1662_v43, %s1386_s10  ;;  %v268_v9 = vsel %vm1499_vm4, 0, %v239_v60 }
  0x2b   :  { %v243_v11 = vrot.slane %v241_v6, 7  ;;  %v1711_v14 = vsel %vm1511_vm5, %v268_v9, 0 }
  0x2c   :  { %339 = vrot.lane.b32.xlu0 %v289_v49, %s1386_s10  ;;  %v391_v25 = vshll.u32 %v1711_v14, 16 }
  0x2d   :  { %v246_v15 = vor.u32 %v244_v12, %v243_v11 }
  0x2e   :  { %349 = vrot.lane.b32.xlu1 %v1678_v56, %s1386_s10 }
  0x2f   :  { %v269_v21 = vsel %vm1499_vm4, 0, %v246_v15 }
  0x30   :  { %351 = vrot.lane.b32.xlu0 %v1687_v1, %s1386_s10  ;;  %v1732_v22 = vsel %vm1511_vm5, %v269_v21, 0 }
  0x32   :  { %353 = vrot.lane.b32.xlu1 %v1697_v8, %s1386_s10 }
  0x34   :  { %380 = vrot.lane.b32.xlu0 %v1593_v53, %s1386_s10 }
  0x35   :  { %12 = vsyncpa [#allocation3], 0  ;;  %v1740_v59 = vrot.slane %v1645_v28, 1  ;;  %v415_v27 = vshll.u32 %v1732_v22, 16  ;;  %v389_v5 = vshrl.u32 %v1711_v14, 16  ;;  %v393_v30 = vrot.slane %v391_v25, 1 }
  0x36   :  { %382 = vrot.lane.b32.xlu1 %v1645_v28, %s1386_s10  ;;  %v413_v31 = vshrl.u32 %v1732_v22, 16  ;;  %v1758_v36 = vrot.slane %v1633_v20, 1  ;;  %v395_v37 = vrot.slane %v1711_v14, 1  ;;  %v363_v42 = vrot.slane %v1609_v63, 1  ;;  %v1359_v2 = vld [vmem:[%s1874_s5 + $0x108] sm:$0xff]  }
  0x37   :  { %v417_v0 = vrot.slane %v415_v27, 1  ;;  %v1751_v34 = vor.u32 %v393_v30, %v389_v5  ;;  %vm425_vm6 = vcmask 523264   ;;  %vm1094_vm7 = vcmask 519168  }
  0x38   :  { %404 = vrot.lane.b32.xlu0 %v1724_v19, %s1386_s10 }
  0x39   :  { %v418_v35 = vor.u32 %v417_v0, %v413_v31 }
  0x3a   :  { %406 = vrot.lane.b32.xlu1 %v1740_v59, %s1386_s10 }
  0x3c   :  { %384 = vrot.lane.b32.xlu0 %v1633_v20, %s1386_s10 }
  0x3e   :  { %386 = vrot.lane.b32.xlu1 %v1711_v14, %s1386_s10 }
  0x40   :  { %419 = vrot.lane.b32.xlu0 %v1751_v34, %s1386_s10 }
  0x42   :  { %421 = vrot.lane.b32.xlu1 %v418_v35, %s1386_s10 }
  0x44   :  { %408 = vrot.lane.b32.xlu0 %v1758_v36, %s1386_s10 }
  0x46   :  { %410 = vrot.lane.b32.xlu1 %v395_v37, %s1386_s10 }
  0x86   :  { %v377_v39 = vpop.permute.xlu0 %376 }
  0x87   :  { %v450_v9 = vsel %vm425_vm6, %v1569_v40, %v377_v39 }
  0x88   :  { %v373_v41 = vpop.permute.xlu1 %372 }
  0x89   :  { %v444_v46 = vsel %vm425_vm6, %v363_v42, %v373_v41 }
  0x8a   :  { %v397_v44 = vpop.permute.xlu0 %396 }
  0x8b   :  { %v468_v60 = vsel %vm425_vm6, %v1662_v43, %v397_v44 }
  0x8c   :  { %v375_v45 = vpop.permute.xlu1 %374 }
  0x8d   :  { %v447_v47 = vsel %vm425_vm6, %v364_v29, %v375_v45 }
  0x8e   :  { %v401_v48 = vpop.permute.xlu0 %400  ;;  %v1136_v3 = vcombine.low %v444_v46, %v447_v47 }
  0x90   :  { %v379_v49 = vpop.permute.xlu1 %378  ;;  %923 = vmatprep.mubr.bf16.mxu0 %v1136_v3 }
  0x92   :  { %v344_v50 = vpop.permute.xlu0 %343 }
  0x93   :  { %v431_v57 = vsel %vm425_vm6, %v1541_v24, %v344_v50  ;;  %v453_v24 = vsel %vm425_vm6, %v1558_v33, %v379_v49 }
  0x94   :  { %v399_v51 = vpop.permute.xlu1 %398  ;;  %v1140_v15 = vcombine.low %v450_v9, %v453_v24 }
  0x95   :  { %v471_v54 = vsel %vm425_vm6, %v1589_v52, %v399_v51 }
  0x96   :  { %v346_v55 = vpop.permute.xlu0 %345  ;;  %v1137_v62 = vcombine.low %v468_v60, %v471_v54  ;;  %v1147_v60 = vcombine.low %v1740_v59, %v1758_v36 }
  0x97   :  { %v433_v58 = vsel %vm425_vm6, %v1522_v17, %v346_v55  ;;  %v1360_v17 = vld [vmem:[%s1874_s5 + $0x110] sm:$0xff]   ;;  %v1139_v55 = vcombine.low %v1569_v40, %v1558_v33  ;;  %v1143_v33 = vcombine.low %v1566_v38, %v1724_v19 }
  0x98   :  { %v403_v29 = vpop.permute.xlu1 %402  ;;  %v1138_v61 = vcombine.low %v431_v57, %v433_v58 }
  0x99   :  { %v477_v10 = vsel %vm425_vm6, %v1641_v26, %v403_v29 }
  0x9a   :  { %988 = vmatprep.mubr.bf16.mxu1 %v1138_v61  ;;  %v348_v6 = vpop.permute.xlu0 %347 }
  0x9b   :  { %989 = vmatmul.mubr.bf16.vlgmr.msra.gmra.mrb[0].mxu1 %v1137_v62  ;;  %v435_v16 = vsel %vm425_vm6, %v1555_v32, %v348_v6  ;;  %v1361_v32 = vld [vmem:[%s1874_s5 + $0x118] sm:$0xff]   ;;  %v1134_v6 = vld [vmem:[%s1875_s6] ss:$0 sm:$0xff]  ;;  %s1387_s6 = smov [#allocation2]  }
  0x9c   :  { %v342_v52 = vpop.permute.xlu1 %341  ;;  %1319 = vmatpush3.bf16.msra.mxu1 %v1721_v18  ;;  %s1108_s9 = sshll.u32 %s1387_s6, 4  ;;  %s1109_s9 = int_to_ptr.vmem [resolvable:$true] %s1108_s9 }
  0x9d   :  { %1316 = vmatprep.subr.bf16.mxu1 %v1359_v2  ;;  %v429_v12 = vsel %vm425_vm6, %v1537_v23, %v342_v52  ;;  %v474_v23 = vsel %vm425_vm6, %v1611_v4, %v401_v48  ;;  %s1362_s3 = scalar_lea.vmem %s1109_s9, 512  ;;  %p1367_p1 = scmp.lt.s32.totalorder %s1109_s9, %s1109_s9 }
  0x9e   :  { %v340_v43 = vpop.permute.xlu0 %339  ;;  %v1141_v27 = vcombine.low %v474_v23, %v477_v10  ;;  %p1363_p0 = scmp.ne.s32.totalorder %s1109_s9, %s1362_s3  ;;  %p1368_p2 = scmp.lt.s32.totalorder %s1362_s3, %s1362_s3 }
  0x9f   :  { %v427_v7 = vsel %vm425_vm6, %v1609_v63, %v340_v43 }
  0xa0   :  { %v350_v11 = vpop.permute.xlu1 %349  ;;  %v1135_v13 = vcombine.low %v427_v7, %v429_v12  ;;  %1320 = vmatpush3.bf16.msra.mxu1 %v1359_v2  ;;  %p1369_p3 = por %p1368_p2, %p1367_p1 }
  0xa1   :  { %v437_v21 = vsel %vm425_vm6, %v1593_v53, %v350_v11  ;;  %1317 = vmatprep.subr.bf16.mxu1 %v1360_v17 }
  0xa2   :  { %v1142_v63 = vcombine.low %v435_v16, %v437_v21  ;;  %924 = vmatmul.mubr.bf16.vlgmr.msra.gmra.mrb[0].mxu0 %v1135_v13  ;;  %v352_v25 = vpop.permute.xlu0 %351  ;;  %p1370_p4 = pnand %p1369_p3, %p1363_p0 }
  0xa3   :  { %1300 = vmatpush3.bf16.msra.mxu0 %v1721_v18  ;;  %v439_v26 = vsel %vm425_vm6, %v1645_v28, %v352_v25  ;;  %931 = vmatprep.mubr.bf16.mxu0 %v1140_v15 }
  0xa4   :  { %v354_v5 = vpop.permute.xlu1 %353  ;;  %996 = vmatprep.mubr.bf16.mxu1 %v1142_v63  ;;  %1301 = vmatprep.subr.bf16.mxu0 %v1359_v2 }
  0xa5   :  { %v441_v53 = vsel %vm425_vm6, %v1633_v20, %v354_v5  ;;  %997 = vmatmul.mubr.bf16.gmra.mrb[4].mxu1 %v1141_v27 }
  0xa6   :  { %v1146_v4 = vcombine.low %v439_v26, %v441_v53  ;;  %v381_v30 = vpop.permute.xlu0 %380  ;;  %1321 = vmatpush3.bf16.msra.mxu1 %v1360_v17 }
  0xa7   :  { %v456_v18 = vsel %vm425_vm6, %v1566_v38, %v381_v30  ;;  %1302 = vmatpush3.bf16.msra.mxu0 %v1359_v2  ;;  %1318 = vmatprep.subr.bf16.mxu1 %v1361_v32 }
  0xa8   :  { %v383_v28 = vpop.permute.xlu1 %382  ;;  %1004 = vmatprep.mubr.bf16.mxu1 %v1146_v4  ;;  %1303 = vmatprep.subr.bf16.mxu0 %v1360_v17 }
  0xa9   :  { %v459_v31 = vsel %vm425_vm6, %v1724_v19, %v383_v28 }
  0xaa   :  { %v1144_v0 = vcombine.low %v456_v18, %v459_v31  ;;  %932 = vmatmul.mubr.bf16.gmra.mrb[4].mxu0 %v1138_v61  ;;  %v405_v35 = vpop.permute.xlu0 %404  ;;  %1322 = vmatpush3.bf16.msra.mxu1 %v1361_v32  ;;  %v424_v61 = vrot.slane %v1732_v22, 1 }
  0xab   :  { %v480_v20 = vsel %vm425_vm6, %v1678_v56, %v405_v35  ;;  %1304 = vmatpush3.bf16.msra.mxu0 %v1360_v17 }
  0xac   :  { %v407_v39 = vpop.permute.xlu1 %406  ;;  %939 = vmatprep.mubr.bf16.mxu0 %v1144_v0  ;;  %1305 = vmatprep.subr.bf16.mxu0 %v1361_v32  ;;  %v1151_v40 = vcombine.low %v395_v37, %v424_v61 }
  0xad   :  { %v483_v41 = vsel %vm425_vm6, %v1687_v1, %v407_v39 }
  0xae   :  { %v1145_v42 = vcombine.low %v480_v20, %v483_v41  ;;  %v385_v44 = vpop.permute.xlu0 %384 }
  0xaf   :  { %v462_v45 = vsel %vm425_vm6, %v1740_v59, %v385_v44  ;;  %1306 = vmatpush3.bf16.msra.mxu0 %v1361_v32 }
  0xb0   :  { %v387_v46 = vpop.permute.xlu1 %386  ;;  %1005 = vmatmul.mubr.bf16.gmra.mrb[8].mxu1 %v1145_v42 }
  0xb1   :  { %v465_v47 = vsel %vm425_vm6, %v1758_v36, %v387_v46 }
  0xb2   :  { %v1148_v48 = vcombine.low %v462_v45, %v465_v47  ;;  %940 = vmatmul.mubr.bf16.gmra.mrb[8].mxu0 %v1142_v63  ;;  %v420_v56 = vpop.permute.xlu0 %419 }
  0xb3   :  { %v491_v3 = vsel %vm425_vm6, %v1711_v14, %v420_v56 }
  0xb4   :  { %v422_v49 = vpop.permute.xlu1 %421  ;;  %947 = vmatprep.mubr.bf16.mxu0 %v1148_v48 }
  0xb5   :  { %v493_v1 = vsel %vm425_vm6, %v1732_v22, %v422_v49 }
  0xb6   :  { %v1150_v50 = vcombine.low %v491_v3, %v493_v1  ;;  %v409_v51 = vpop.permute.xlu0 %408 }
  0xb7   :  { %v486_v54 = vsel %vm425_vm6, %v1697_v8, %v409_v51 }
  0xb8   :  { %v411_v57 = vpop.permute.xlu1 %410  ;;  %1012 = vmatprep.mubr.bf16.mxu1 %v1150_v50 }
  0xb9   :  { %v489_v58 = vsel %vm425_vm6, %v1751_v34, %v411_v57 }
  0xba   :  { %v1149_v29 = vcombine.low %v486_v54, %v489_v58  ;;  %948 = vmatmul.mubr.bf16.gmra.mrb[12].mxu0 %v1146_v4 }
  0xbb   :  { %1307 = vmatprep.mubr.msk.bf16.mxu0 %vm425_vm6, %v1139_v55 }
  0xbc   :  { %1013 = vmatmul.mubr.bf16.gmra.mrb[12].mxu1 %v1149_v29 }
  0xbd   :  { %1311 = vmatprep.mubr.msk.bf16.mxu1 %vm425_vm6, %v1147_v60 }
  0xc2   :  { %1308 = vmatmul.mubr.msk.bf16.vlgmr.msra.gmra.mrb[16].mxu0 %vm425_vm6, %v1143_v33 }
  0xc4   :  { %1312 = vmatmul.mubr.msk.bf16.vlgmr.msra.gmra.mrb[16].mxu1 %vm425_vm6, %v1151_v40 }
 0x16e   :  { %v1267_v8 = vpop.f32.mrb[0].mxu1 }
 0x16f   :  { %v1268_v59 = vpop.f32.mrb[1].mxu1 }
 0x170   :  { %v1269_v34 = vadd.f32 %v1268_v59, %v1267_v8  ;;  %v1270_v36 = vpop.f32.mrb[2].mxu1 }
 0x171   :  { %v1271_v62 = vpop.f32.mrb[3].mxu1 }
 0x172   :  { %v1272_v2 = vadd.f32 %v1271_v62, %v1270_v36 }
 0x175   :  { %v1227_v22 = vpop.f32.mrb[0].mxu0 }
 0x176   :  { %v1228_v52 = vpop.f32.mrb[1].mxu0 }
 0x177   :  { %v1229_v38 = vadd.f32 %v1228_v52, %v1227_v22  ;;  %v1230_v19 = vpop.f32.mrb[2].mxu0 }
 0x178   :  { %v1273_v14 = vpop.f32.mrb[4].mxu1  ;;  %v1231_v37 = vpop.f32.mrb[3].mxu0 }
 0x179   :  { %v926_v17 = vadd.f32 %v1229_v38, %v1134_v6  ;;  %v1274_v24 = vpop.f32.mrb[5].mxu1  ;;  %v1232_v43 = vadd.f32 %v1231_v37, %v1230_v19 }
 0x17a   :  { %v1275_v12 = vadd.f32 %v1274_v24, %v1273_v14  ;;  %v1276_v7 = vpop.f32.mrb[6].mxu1 }
 0x17b   :  { %v929_v9 = vadd.f32 %v1232_v43, %v1134_v6  ;;  %v1277_v10 = vpop.f32.mrb[7].mxu1  ;;  %v991_v11 = vadd.f32 %v1269_v34, %v926_v17 }
 0x17c   :  { %v1278_v13 = vadd.f32 %v1277_v10, %v1276_v7 }
 0x17d   :  { %v1233_v15 = vpop.f32.mrb[4].mxu0  ;;  %v994_v16 = vadd.f32 %v1272_v2, %v929_v9 }
 0x17e   :  { %v1234_v21 = vpop.f32.mrb[5].mxu0 }
 0x17f   :  { %v1235_v23 = vadd.f32 %v1234_v21, %v1233_v15  ;;  %v1236_v63 = vpop.f32.mrb[6].mxu0 }
 0x180   :  { %v1237_v25 = vpop.f32.mrb[7].mxu0 }
 0x181   :  { %v934_v27 = vadd.f32 %v1235_v23, %v1134_v6  ;;  %v1238_v26 = vadd.f32 %v1237_v25, %v1236_v63 }
 0x183   :  { %v937_v32 = vadd.f32 %v1238_v26, %v1134_v6  ;;  %v1279_v5 = vpop.f32.mrb[8].mxu1  ;;  %v999_v53 = vadd.f32 %v1275_v12, %v934_v27 }
 0x184   :  { %v1280_v4 = vpop.f32.mrb[9].mxu1 }
 0x185   :  { %v1281_v30 = vadd.f32 %v1280_v4, %v1279_v5  ;;  %v1282_v18 = vpop.f32.mrb[10].mxu1  ;;  %v1239_v28 = vpop.f32.mrb[8].mxu0  ;;  %v1002_v31 = vadd.f32 %v1278_v13, %v937_v32 }
 0x186   :  { %v1283_v0 = vpop.f32.mrb[11].mxu1  ;;  %v1240_v35 = vpop.f32.mrb[9].mxu0 }
 0x187   :  { %v1284_v20 = vadd.f32 %v1283_v0, %v1282_v18  ;;  %v1241_v39 = vadd.f32 %v1240_v35, %v1239_v28  ;;  %v1242_v41 = vpop.f32.mrb[10].mxu0 }
 0x188   :  { %v1243_v42 = vpop.f32.mrb[11].mxu0 }
 0x189   :  { %v942_v44 = vadd.f32 %v1241_v39, %v1134_v6  ;;  %v1244_v45 = vadd.f32 %v1243_v42, %v1242_v41 }
 0x18b   :  { %v945_v46 = vadd.f32 %v1244_v45, %v1134_v6  ;;  %v1007_v47 = vadd.f32 %v1281_v30, %v942_v44 }
 0x18d   :  { %v1245_v48 = vpop.f32.mrb[12].mxu0  ;;  %v1010_v56 = vadd.f32 %v1284_v20, %v945_v46 }
 0x18e   :  { %v1246_v3 = vpop.f32.mrb[13].mxu0 }
 0x18f   :  { %v1285_v49 = vpop.f32.mrb[12].mxu1  ;;  %v1247_v1 = vadd.f32 %v1246_v3, %v1245_v48  ;;  %v1248_v50 = vpop.f32.mrb[14].mxu0 }
 0x190   :  { %v1286_v51 = vpop.f32.mrb[13].mxu1  ;;  %v1249_v54 = vpop.f32.mrb[15].mxu0 }
 0x191   :  { %v950_v55 = vadd.f32 %v1247_v1, %v1134_v6  ;;  %v1287_v57 = vadd.f32 %v1286_v51, %v1285_v49  ;;  %v1288_v58 = vpop.f32.mrb[14].mxu1  ;;  %v1250_v60 = vadd.f32 %v1249_v54, %v1248_v50 }
 0x192   :  { %v1289_v29 = vpop.f32.mrb[15].mxu1 }
 0x193   :  { %v953_v61 = vadd.f32 %v1250_v60, %v1134_v6  ;;  %v1290_v33 = vadd.f32 %v1289_v29, %v1288_v58  ;;  %v1015_v40 = vadd.f32 %v1287_v57, %v950_v55 }
 0x195   :  { %v1309_v8 = vpop.f32.mrb[16].mxu0  ;;  %v1018_v59 = vadd.f32 %v1290_v33, %v953_v61 }
 0x196   :  { %v1064_v34 = vadd.f32 %v1309_v8, %v999_v53  ;;  %v1055_v36 = vpop.f32.mrb[17].mxu0 }
 0x197   :  { %v1313_v62 = vpop.f32.mrb[16].mxu1  ;;  %v1056_v2 = vadd.f32 %v1055_v36, %v991_v11  ;;  %v1310_v22 = vpop.f32.mrb[18].mxu0 }
 0x198   :  { %v1088_v52 = vpack.c.bf16 %v1064_v34, %v1064_v34  ;;  %v1080_v38 = vadd.f32 %v1313_v62, %v1015_v40  ;;  %v1071_v19 = vpop.f32.mrb[17].mxu1  ;;  %v1067_v14 = vadd.f32 %v1310_v22, %v1002_v31  ;;  %v1058_v37 = vpop.f32.mrb[19].mxu0 }
 0x199   :  { %v1086_v17 = vpack.c.bf16 %v1056_v2, %v1056_v2  ;;  %v1072_v24 = vadd.f32 %v1071_v19, %v1007_v47  ;;  %v1314_v43 = vpop.f32.mrb[18].mxu1  ;;  %v1059_v12 = vadd.f32 %v1058_v37, %v994_v16 }
 0x19a   :  { %1097 = vst.msk [vmem:[#allocation2 + $0x8] sm:$0xf] %vm1094_vm7, %v1088_v52  ;;  %v1092_v6 = vpack.c.bf16 %v1080_v38, %v1080_v38  ;;  %v1089_v7 = vpack.c.bf16 %v1067_v14, %v1067_v14  ;;  %v1083_v9 = vadd.f32 %v1314_v43, %v1018_v59  ;;  %v1074_v10 = vpop.f32.mrb[19].mxu1 }
 0x19b   :  { %1095 = vst.msk [vmem:[#allocation2] sm:$0xf] %vm1094_vm7, %v1086_v17  ;;  %v1090_v11 = vpack.c.bf16 %v1072_v24, %v1072_v24  ;;  %v1087_v13 = vpack.c.bf16 %v1059_v12, %v1059_v12  ;;  %v1075_v15 = vadd.f32 %v1074_v10, %v1010_v56 }
 0x19c   :  { %1101 = vst.msk [vmem:[#allocation2 + $0x18] sm:$0xf] %vm1094_vm7, %v1092_v6  ;;  %1098 = vst.msk [vmem:[#allocation2 + $0xc] sm:$0xf] %vm1094_vm7, %v1089_v7  ;;  %v1093_v21 = vpack.c.bf16 %v1083_v9, %v1083_v9 }
 0x19d   :  { %1099 = vst.msk [vmem:[#allocation2 + $0x10] sm:$0xf] %vm1094_vm7, %v1090_v11  ;;  %1096 = vst.msk [vmem:[#allocation2 + $0x4] sm:$0xf] %vm1094_vm7, %v1087_v13  ;;  %v1091_v16 = vpack.c.bf16 %v1075_v15, %v1075_v15 }
 0x19e   :  { %1102 = vst.msk [vmem:[#allocation2 + $0x1c] sm:$0xf] %vm1094_vm7, %v1093_v21 }
 0x19f   :  { %1100 = vst.msk [vmem:[#allocation2 + $0x14] sm:$0xf] %vm1094_vm7, %v1091_v16 }
 0x1a0   :  { %1373 = shalt.err (!%p1370_p4)
}
 0x1a1   :  { %s1374_s12 = scalar_lea.hbm %s1876_s7, 512 }
 0x1a2   :  { %p1375_p5 = scmp.ne.s32.totalorder %s1876_s7, %s1374_s12  ;;  %p1378_p6 = scmp.lt.u32.totalorder %s1374_s12, %s1876_s7 }
 0x1a4   :  { %p1380_p7 = pnand %p1378_p6, %p1375_p5 }
 0x1a6   :  { %1383 = shalt.err (!%p1380_p7)
}
 0x1a7   :  { %s1388_s15 = smov 4  }
 0x1a8   :  { %1114 = dma.vmem_to_hbm [thread:$0]  %s1109_s9, 512, %s1876_s7, [#allocation3], %s1386_s10, %s1386_s10, %s1388_s15  }
 0x1a9   :  { %1384 = dma.done.wait [#allocation3], 512  }
 0x1aa   :  { %1385 = vsyncadd [#allocation3], 4294966784 }
 0x1ab   :  { %1118 = vsyncpa [#allocation3], 1 }

// kernel: _lambda_.17
= control target key start
LH: loop header
LB: loop body
LE: loop exit
PB: predicated region body
PF: predicated region fallthrough
CT: control target
= control target key end

     0   :  { %s4395_s24 = smov 0   ;;  %s4397_s25 = smov 0   ;;  %s5355_s0 = inlined_call_operand.vmem [shape: f32[2,16,16,3], index: 0, kind: input, shape index: {}, may-alias: {0,1,2}]   ;;  %s5356_s1 = inlined_call_operand.vmem [shape: f32[2,16,16,3], index: 1, kind: input, shape index: {}, may-alias: {0,1,2}]   ;;  %s5357_s2 = inlined_call_operand.vmem [shape: f32[2,16,16,3], index: 2, kind: input, shape index: {}, may-alias: {0,1,2}]   ;;  %s5358_s3 = inlined_call_operand.vmem [shape: f32[1,3], index: 3, kind: input, shape index: {}]   ;;  %s5359_s4 = inlined_call_operand.vmem [shape: f32[1,3], index: 4, kind: input, shape index: {}]   ;;  %s5360_s5 = inlined_call_operand.vmem [shape: bf16[27,64], index: 5, kind: input, shape index: {}]   ;;  %s5361_s6 = inlined_call_operand.vmem [shape: f32[1,64], index: 6, kind: input, shape index: {}]   ;;  %s5362_s7 = inlined_call_operand.vmem [shape: bf16[2,16,16,64], index: 7, kind: output, shape index: {}]  }
   0x1   :  { %s4399_s26 = smov 0  }
   0x2 LB: > { %s29_s27 = sadd.s32 1, %s4348_s25  ;;  %p3350_p0 = scmp.ge.s32.totalorder %s4352_s26, 1  ;;  %s4352_s26 = sphi %s4399_s26, %s17_s26   ;;  %s4348_s25 = sphi %s4397_s25, %s5398_s25   ;;  %s4344_s24 = sphi %s4395_s24, %s5397_s24  }
   0x3   : > { %p31_p1 = scmp.ge.s32.totalorder %s29_s27, 2  ;;  %p323_p2 = scmp.lt.s32.totalorder %s4352_s26, 3 }
   0x5   : > { %s5400_s27 = smov (%p31_p1, %s29_s27), 0  ;;  %p324_p3 = pnand %p3350_p0, %p323_p2 }
   0x7   : > { %327 = sbr.rel (%p324_p3) target bundleno = 555 (0x22b), region = 48 }
   0xe   : > { %v803_v0 = vld [vmem:[%s5360_s5 + $0x4] sm:$0xf]  ;;  %vm1060_vm0 = vcmask 1041408   ;;  %vm763_vm1 = vcmask 1040384   ;;  %v802_v2 = vld [vmem:[%s5360_s5] sm:$0xf] }
   0xf   : > { %v4416_v1 = vcombine.low %v803_v0, %v803_v0  ;;  %p395_p4 = scmp.lt.s32.totalorder %s4344_s24, 1  ;;  %v4354_v3 = vmov 65535   ;;  %v3361_v5 = vcombine.low %v802_v2, %v802_v2  ;;  %v4430_v8 = vld [vmem:[%s5360_s5 + $0x8] sm:$0xf]  ;;  %v3394_v9 = vcombine.low %v802_v2, %v803_v0  ;;  %v4442_v14 = vld [vmem:[%s5358_s3] ss:$0 sm:$0xff] }
  0x10   : > { %v1061_v4 = vsel %vm763_vm1, 4294967295, %v4354_v3  ;;  %v3444_v12 = vcombine.low %v803_v0, %v4430_v8  ;;  %vm764_vm2 = vsmask.f32 256  ;;  %v4453_v17 = vld [vmem:[%s5359_s4] ss:$0 sm:$0xff]  ;;  %vm1010_vm5 = vcmask 23552  }
  0x11   : > { %v4422_v6 = vsel %vm1060_vm0, %v1061_v4, 0  ;;  %v1970_v7 = vrot.slane %v4416_v1, 2  ;;  %s5402_s24 = smov (!%p395_p4, %s4344_s24), 1  ;;  %v1003_v10 = vshrl.u32 %v3361_v5, 16  ;;  %v1006_v11 = vshll.u32 %v3361_v5, 16  ;;  %vm4496_vm4 = vmand %vm763_vm1, %vm764_vm2 }
  0x12   : > { %s4437_s11 = sshll.u32 %s5402_s24, 8  ;;  %v2179_v18 = vshrl.u32 %v3444_v12, 16  ;;  %v4464_v22 = vand.u32 %v4422_v6, %v802_v2  ;;  %v2182_v23 = vshll.u32 %v3444_v12, 16  ;;  %v1507_v24 = vrot.slane %v3394_v9, 3 }
  0x13   : > { %v4434_v13 = vand.u32 %v1970_v7, %v4422_v6  ;;  %v1005_v15 = vrot.slane %v1003_v10, 1  ;;  %v1008_v16 = vrot.slane %v1006_v11, 2  ;;  %s4448_s16 = scalar_lea.vmem %s5356_s1, %s4437_s11  ;;  %s403_s21 = scalar_lea.vmem %s5355_s0, %s4437_s11  ;;  %vm806_vm3 = vsmask.f32 7424 }
  0x14   : > { %v474_v19 = vld [vmem:[%s4448_s16] sm:$0xff]  ;;  %v475_v20 = vld [vmem:[%s4448_s16 + $0x8] sm:$0xff]  ;;  %v476_v21 = vld [vmem:[%s4448_s16 + $0x10] sm:$0xff]  ;;  %v2181_v35 = vrot.slane %v2179_v18, 3  ;;  %v2184_v46 = vrot.slane %v2182_v23, 4  ;;  %v4504_v10 = vand.u32 %v1507_v24, %v4422_v6  ;;  %vm1455_vm6 = vcmask 1046528  }
  0x15   : > { %3872 = vmatprep.subr.bf16.mxu0 %v4434_v13  ;;  %v1009_v25 = vor.u32 %v1008_v16, %v1005_v15  ;;  %v506_v26 = vmul.f32 %v4442_v14, %v474_v19  ;;  %v507_v27 = vmul.f32 %v4442_v14, %v475_v20  ;;  %v477_v28 = vld [vmem:[%s4448_s16 + $0x18] sm:$0xff]  ;;  %v508_v29 = vmul.f32 %v4442_v14, %v476_v21  ;;  %v450_v30 = vld [vmem:[%s403_s21] sm:$0xff]  ;;  %v451_v31 = vld [vmem:[%s403_s21 + $0x8] sm:$0xff]  ;;  %s3548_s28 = sadd.s32 240, %s4437_s11  ;;  %s3549_s11 = sshll.u32 %s5402_s24, 7 }
  0x16   : > { %3873 = vmatpush3.bf16.msra.mxu0 %v4434_v13  ;;  %v509_v32 = vmul.f32 %v4442_v14, %v477_v28  ;;  %v458_v33 = vmul.f32 %v4442_v14, %v450_v30  ;;  %v459_v34 = vmul.f32 %v4442_v14, %v451_v31  ;;  %v478_v36 = vld [vmem:[%s4448_s16 + $0x20] sm:$0xff]  ;;  %v479_v37 = vld [vmem:[%s4448_s16 + $0x28] sm:$0xff]  ;;  %v480_v38 = vld [vmem:[%s4448_s16 + $0x30] sm:$0xff]  ;;  %v2185_v54 = vor.u32 %v2184_v46, %v2181_v35  ;;  %s431_s8 = scalar_lea.vmem %s5357_s2, %s3548_s28  ;;  %s5245_s14 = scalar_lea.vmem %s5362_s7, %s3549_s11 }
  0x17   : > { %v1064_v39 = vand.u32 %v4422_v6, %v1009_v25  ;;  %v538_v40 = vadd.f32 %v4453_v17, %v506_v26  ;;  %v539_v41 = vadd.f32 %v4453_v17, %v507_v27  ;;  %v540_v42 = vadd.f32 %v4453_v17, %v508_v29  ;;  %v481_v59 = vld [vmem:[%s4448_s16 + $0x38] sm:$0xff]  ;;  %v482_v9 = vld [vmem:[%s4448_s16 + $0x40] sm:$0xff] }
  0x18   : > { %v541_v43 = vadd.f32 %v4453_v17, %v509_v32  ;;  %v466_v44 = vadd.f32 %v4453_v17, %v458_v33  ;;  %v467_v45 = vadd.f32 %v4453_v17, %v459_v34  ;;  %v510_v48 = vmul.f32 %v4442_v14, %v478_v36 }
  0x19   : > { %3736 = vmatprep.subr.bf16.mxu1 %v1064_v39  ;;  %v584_v47 = vpack.c.bf16 %v539_v41, %v538_v40  ;;  %v511_v49 = vmul.f32 %v4442_v14, %v479_v37  ;;  %v512_v50 = vmul.f32 %v4442_v14, %v480_v38  ;;  %v4492_v63 = vand.u32 %v2185_v54, %v4422_v6 }
  0x1a   : > { %3737 = vmatpush3.bf16.msra.mxu1 %v1064_v39  ;;  %v585_v51 = vpack.c.bf16 %v541_v43, %v540_v42  ;;  %v472_v52 = vmul.f32 0.0, %v466_v44  ;;  %v473_v53 = vmul.f32 0.0, %v467_v45  ;;  %v542_v57 = vadd.f32 %v4453_v17, %v510_v48 }
  0x1b   : > { %v609_v55 = vshrl.u32 %v584_v47, 16  ;;  %v612_v56 = vshll.u32 %v584_v47, 16  ;;  %3770 = vmatprep.subr.bf16.mxu1 %v4464_v22  ;;  %v543_v58 = vadd.f32 %v4453_v17, %v511_v49  ;;  %3906 = vmatprep.subr.bf16.mxu0 %v4492_v63  ;;  %v513_v7 = vmul.f32 %v4442_v14, %v481_v59 }
  0x1c   : > { %v616_v60 = vshrl.u32 %v585_v51, 16  ;;  %v619_v61 = vshll.u32 %v585_v51, 16  ;;  %v583_v62 = vpack.c.bf16 %v473_v53, %v472_v52  ;;  %v544_v16 = vadd.f32 %v4453_v17, %v512_v50  ;;  %v483_v51 = vld [vmem:[%s4448_s16 + $0x48] sm:$0xff] }
  0x1d   : > { %v611_v0 = vrot.slane %v609_v55, 7  ;;  %v586_v2 = vpack.c.bf16 %v543_v58, %v542_v57  ;;  %v514_v26 = vmul.f32 %v4442_v14, %v482_v9  ;;  %v545_v38 = vadd.f32 %v4453_v17, %v513_v7 }
  0x1e   : > { %v618_v4 = vrot.slane %v616_v60, 7  ;;  %v602_v5 = vshrl.u32 %v583_v62, 16  ;;  %v605_v15 = vshll.u32 %v583_v62, 16  ;;  %v486_v62 = vld [vmem:[%s4448_s16 + $0x60] sm:$0xff]  ;;  %vm3175_vm7 = vcmask 519168  }
  0x1f   : > { %v614_v11 = vor.u32 %v612_v56, %v611_v0  ;;  %v4508_v12 = vsel %vm4496_vm4, %v611_v0, 0  ;;  %v623_v21 = vshrl.u32 %v586_v2, 16  ;;  %v626_v30 = vshll.u32 %v586_v2, 16  ;;  %v484_v56 = vld [vmem:[%s4448_s16 + $0x50] sm:$0xff] }
  0x20   : > { %v827_v18 = vshll.u32 %v4508_v12, 16  ;;  %v621_v19 = vor.u32 %v619_v61, %v618_v4  ;;  %v4514_v20 = vsel %vm4496_vm4, %v618_v4, 0  ;;  %v604_v25 = vrot.slane %v602_v5, 7  ;;  %v485_v61 = vld [vmem:[%s4448_s16 + $0x58] sm:$0xff] }
  0x21   : > { %v4518_v23 = vsel %vm4496_vm4, 0, %v614_v11  ;;  %v839_v24 = vshll.u32 %v4514_v20, 16  ;;  %v625_v37 = vrot.slane %v623_v21, 7  ;;  %v587_v50 = vpack.c.bf16 %v545_v38, %v544_v16  ;;  %v487_v16 = vld [vmem:[%s4448_s16 + $0x68] sm:$0xff] }
  0x22   : > { %v820_v27 = vshrl.u32 %v4518_v23, 16  ;;  %v822_v28 = vshll.u32 %v4518_v23, 16  ;;  %v4526_v29 = vsel %vm4496_vm4, 0, %v621_v19  ;;  %v829_v31 = vrot.slane %v827_v18, 1 }
  0x23   : > { %v832_v32 = vshrl.u32 %v4526_v29, 16  ;;  %v834_v33 = vshll.u32 %v4526_v29, 16  ;;  %v607_v34 = vor.u32 %v605_v15, %v604_v25  ;;  %v4532_v36 = vsel %vm4496_vm4, %v604_v25, 0  ;;  %v488_v25 = vld [vmem:[%s4448_s16 + $0x70] sm:$0xff] }
  0x24   : > { %v824_v35 = vrot.slane %v822_v28, 1  ;;  %v841_v40 = vrot.slane %v839_v24, 1  ;;  %v815_v42 = vshll.u32 %v4532_v36, 16  ;;  %v628_v46 = vor.u32 %v626_v30, %v625_v37 }
  0x25   : > { %v836_v39 = vrot.slane %v834_v33, 1  ;;  %v4537_v41 = vsel %vm4496_vm4, 0, %v607_v34  ;;  %v4544_v49 = vsel %vm4496_vm4, %v625_v37, 0  ;;  %v630_v60 = vshrl.u32 %v587_v50, 16  ;;  %v489_v34 = vld [vmem:[%s4448_s16 + $0x78] sm:$0xff] }
  0x26   : > { %v825_v43 = vor.u32 %v824_v35, %v820_v27  ;;  %v808_v44 = vshrl.u32 %v4537_v41, 16  ;;  %v810_v45 = vshll.u32 %v4537_v41, 16  ;;  %v817_v48 = vrot.slane %v815_v42, 1 }
  0x27   : > { %v837_v47 = vor.u32 %v836_v39, %v832_v32  ;;  %v4550_v54 = vsel %vm4496_vm4, 0, %v628_v46  ;;  %v851_v55 = vshll.u32 %v4544_v49, 16  ;;  %v633_v4 = vshll.u32 %v587_v50, 16 }
  0x28   : > { %v830_v52 = vsel %vm806_vm3, %v825_v43, %v829_v31  ;;  %v812_v53 = vrot.slane %v810_v45, 1  ;;  %v844_v58 = vshrl.u32 %v4550_v54, 16  ;;  %v846_v59 = vshll.u32 %v4550_v54, 16 }
  0x29   : > { %3874 = vmatprep.mubr.msk.bf16.mxu0 %vm1010_vm5, %v830_v52  ;;  %v4556_v57 = vsel %vm806_vm3, %v837_v47, %v841_v40  ;;  %v853_v2 = vrot.slane %v851_v55, 1  ;;  %v515_v5 = vmul.f32 %v4442_v14, %v483_v51  ;;  %v632_v9 = vrot.slane %v630_v60, 7 }
  0x2a   : > { %3875 = vmatmul.mubr.msk.bf16.vlgmr.msra.gmra.mrb[0].mxu0 %vm1010_vm5, %v4556_v57  ;;  %v813_v0 = vor.u32 %v812_v53, %v808_v44  ;;  %v848_v7 = vrot.slane %v846_v59, 1  ;;  %v546_v11 = vadd.f32 %v4453_v17, %v514_v26  ;;  %v516_v15 = vmul.f32 %v4442_v14, %v484_v56 }
  0x2b   : > { %3907 = vmatpush3.bf16.msra.mxu0 %v4492_v63  ;;  %v547_v19 = vadd.f32 %v4453_v17, %v515_v5  ;;  %v517_v21 = vmul.f32 %v4442_v14, %v485_v61  ;;  %v518_v24 = vmul.f32 %v4442_v14, %v486_v62  ;;  %v635_v27 = vor.u32 %v633_v4, %v632_v9 }
  0x2c   : > { %v818_v18 = vsel %vm806_vm3, %v813_v0, %v817_v48  ;;  %v849_v63 = vor.u32 %v848_v7, %v844_v58  ;;  %v4577_v26 = vsel %vm4496_vm4, %v632_v9, 0  ;;  %v548_v28 = vadd.f32 %v4453_v17, %v516_v15 }
  0x2d   : > { %3738 = vmatprep.mubr.msk.bf16.mxu1 %vm1010_vm5, %v818_v18  ;;  %v863_v30 = vshll.u32 %v4577_v26, 16  ;;  %v588_v31 = vpack.c.bf16 %v547_v19, %v546_v11  ;;  %v549_v32 = vadd.f32 %v4453_v17, %v517_v21  ;;  %v519_v33 = vmul.f32 %v4442_v14, %v487_v16 }
  0x2e   : > { %3739 = vmatmul.mubr.msk.bf16.vlgmr.msra.gmra.mrb[0].mxu1 %vm1010_vm5, %v830_v52  ;;  %v4587_v35 = vsel %vm806_vm3, %v849_v63, %v853_v2  ;;  %v4591_v37 = vsel %vm4496_vm4, 0, %v635_v27  ;;  %v550_v38 = vadd.f32 %v4453_v17, %v518_v24  ;;  %v520_v39 = vmul.f32 %v4442_v14, %v488_v25 }
  0x2f   : > { %3771 = vmatpush3.bf16.msra.mxu1 %v4464_v22  ;;  %3742 = vmatprep.mubr.msk.bf16.mxu1 %vm1010_vm5, %v4556_v57  ;;  %v856_v40 = vshrl.u32 %v4591_v37, 16  ;;  %v858_v22 = vshll.u32 %v4591_v37, 16  ;;  %v637_v42 = vshrl.u32 %v588_v31, 16  ;;  %v4603_v43 = vcombine.low %v4430_v8, %v4430_v8 }
  0x30   : > { %3878 = vmatprep.mubr.msk.bf16.mxu0 %vm1010_vm5, %v4587_v35  ;;  %3804 = vmatprep.subr.bf16.mxu1 %v4504_v10  ;;  %v640_v44 = vshll.u32 %v588_v31, 16  ;;  %v589_v45 = vpack.c.bf16 %v549_v32, %v548_v28  ;;  %v551_v46 = vadd.f32 %v4453_v17, %v519_v33  ;;  %v521_v47 = vmul.f32 %v4442_v14, %v489_v34  ;;  %v490_v32 = vld [vmem:[%s4448_s16 + $0x80] sm:$0xff] }
  0x31   : > { %v860_v48 = vrot.slane %v858_v22, 1  ;;  %v865_v50 = vrot.slane %v863_v30, 1  ;;  %v639_v51 = vrot.slane %v637_v42, 7  ;;  %v552_v52 = vadd.f32 %v4453_v17, %v520_v39 }
  0x32   : > { %v644_v53 = vshrl.u32 %v589_v45, 16  ;;  %v647_v55 = vshll.u32 %v589_v45, 16  ;;  %v590_v56 = vpack.c.bf16 %v551_v46, %v550_v38  ;;  %v553_v58 = vadd.f32 %v4453_v17, %v521_v47  ;;  %v491_v45 = vld [vmem:[%s4448_s16 + $0x88] sm:$0xff] }
  0x33   : > { %v861_v8 = vor.u32 %v860_v48, %v856_v40  ;;  %v642_v59 = vor.u32 %v640_v44, %v639_v51  ;;  %v4612_v60 = vsel %vm4496_vm4, %v639_v51, 0  ;;  %v2386_v61 = vrot.slane %v4603_v43, 1 }
  0x34   : > { %v1460_v62 = vrot.slane %v4508_v12, 1  ;;  %v875_v0 = vshll.u32 %v4612_v60, 16  ;;  %v646_v2 = vrot.slane %v644_v53, 7  ;;  %v651_v4 = vshrl.u32 %v590_v56, 16 }
  0x35   : > { %v4618_v5 = vsel %vm806_vm3, %v861_v8, %v865_v50  ;;  %v4624_v7 = vsel %vm4496_vm4, 0, %v642_v59  ;;  %v654_v9 = vshll.u32 %v590_v56, 16  ;;  %v591_v11 = vpack.c.bf16 %v553_v58, %v552_v52 }
  0x36   : > { %3743 = vmatmul.mubr.msk.bf16.gmra.mrb[4].mxu1 %vm1010_vm5, %v4587_v35  ;;  %v1463_v15 = vrot.slane %v4514_v20, 1  ;;  %3879 = vmatmul.mubr.msk.bf16.gmra.mrb[4].mxu0 %vm1010_vm5, %v4618_v5  ;;  %v868_v16 = vshrl.u32 %v4624_v7, 16  ;;  %v870_v18 = vshll.u32 %v4624_v7, 16  ;;  %v649_v19 = vor.u32 %v647_v55, %v646_v2 }
  0x37   : > { %3746 = vmatprep.mubr.msk.bf16.mxu1 %vm1010_vm5, %v4618_v5  ;;  %v877_v21 = vrot.slane %v875_v0, 1  ;;  %v4635_v24 = vsel %vm4496_vm4, %v646_v2, 0  ;;  %v653_v25 = vrot.slane %v651_v4, 7  ;;  %v658_v63 = vshrl.u32 %v591_v11, 16 }
  0x38   : > { %v872_v27 = vrot.slane %v870_v18, 1  ;;  %v4639_v28 = vsel %vm4496_vm4, 0, %v649_v19  ;;  %v887_v30 = vshll.u32 %v4635_v24, 16  ;;  %v661_v31 = vshll.u32 %v591_v11, 16  ;;  %v492_v19 = vld [vmem:[%s4448_s16 + $0x90] sm:$0xff] }
  0x39   : > { %v880_v33 = vshrl.u32 %v4639_v28, 16  ;;  %v882_v34 = vshll.u32 %v4639_v28, 16  ;;  %v656_v38 = vor.u32 %v654_v9, %v653_v25  ;;  %v4647_v39 = vsel %vm4496_vm4, %v653_v25, 0 }
  0x3a   : > { %v873_v40 = vor.u32 %v872_v27, %v868_v16  ;;  %v889_v22 = vrot.slane %v887_v30, 1  ;;  %v899_v42 = vshll.u32 %v4647_v39, 16  ;;  %v660_v44 = vrot.slane %v658_v63, 7 }
  0x3b   : > { %v884_v46 = vrot.slane %v882_v34, 1  ;;  %v4653_v47 = vsel %vm4496_vm4, 0, %v656_v38  ;;  %v4656_v48 = vand.u32 %v2386_v61, %v4422_v6  ;;  %v522_v50 = vmul.f32 %v4442_v14, %v490_v32 }
  0x3c   : > { %v4660_v51 = vsel %vm806_vm3, %v873_v40, %v877_v21  ;;  %v892_v52 = vshrl.u32 %v4653_v47, 16  ;;  %v894_v53 = vshll.u32 %v4653_v47, 16  ;;  %v1459_v55 = vrot.slane %v4518_v23, 1  ;;  %v493_v21 = vld [vmem:[%s4448_s16 + $0x98] sm:$0xff]  ;;  %v495_v40 = vld [vmem:[%s4448_s16 + $0xa8] sm:$0xff] }
  0x3d   : > { %5379 = vst [vmem:[#allocation2_spill] sm:$0xff] %v4660_v51  ;;  %3882 = vmatprep.mubr.msk.bf16.mxu0 %vm1010_vm5, %v4660_v51  ;;  %v885_v56 = vor.u32 %v884_v46, %v880_v33  ;;  %v663_v58 = vor.u32 %v661_v31, %v660_v44  ;;  %v4671_v8 = vsel %vm4496_vm4, %v660_v44, 0  ;;  %v523_v59 = vmul.f32 %v4442_v14, %v491_v45  ;;  %v494_v31 = vld [vmem:[%s4448_s16 + $0xa0] sm:$0xff] }
  0x3e   : > { %3747 = vmatmul.mubr.msk.bf16.gmra.mrb[8].mxu1 %vm1010_vm5, %v4660_v51  ;;  %v896_v61 = vrot.slane %v894_v53, 1  ;;  %v901_v0 = vrot.slane %v899_v42, 1  ;;  %v911_v2 = vshll.u32 %v4671_v8, 16  ;;  %3940 = vmatprep.subr.bf16.mxu0 %v4656_v48  ;;  %v554_v4 = vadd.f32 %v4453_v17, %v522_v50 }
  0x3f   : > { %v4678_v9 = vsel %vm806_vm3, %v885_v56, %v889_v22  ;;  %v4682_v11 = vsel %vm4496_vm4, 0, %v663_v58  ;;  %v1462_v16 = vrot.slane %v4526_v29, 1  ;;  %v555_v18 = vadd.f32 %v4453_v17, %v523_v59 }
  0x40   : > { %5380 = vst [vmem:[#allocation3_spill] sm:$0xff] %v4678_v9  ;;  %3883 = vmatmul.mubr.msk.bf16.gmra.mrb[8].mxu0 %vm1010_vm5, %v4678_v9  ;;  %v897_v25 = vor.u32 %v896_v61, %v892_v52  ;;  %v904_v63 = vshrl.u32 %v4682_v11, 16  ;;  %v906_v27 = vshll.u32 %v4682_v11, 16  ;;  %3750 = vmatprep.mubr.msk.bf16.mxu1 %vm1010_vm5, %v4678_v9  ;;  %v1465_v30 = vrot.slane %v4550_v54, 1 }
  0x41   : > { %v913_v32 = vrot.slane %v911_v2, 1  ;;  %v592_v33 = vpack.c.bf16 %v555_v18, %v554_v4  ;;  %v1466_v34 = vrot.slane %v4544_v49, 1  ;;  %v1468_v38 = vrot.slane %v4591_v37, 1 }
  0x42   : > { %v4700_v22 = vsel %vm806_vm3, %v897_v25, %v901_v0  ;;  %v908_v42 = vrot.slane %v906_v27, 1  ;;  %v524_v44 = vmul.f32 %v4442_v14, %v492_v19  ;;  %v525_v45 = vmul.f32 %v4442_v14, %v493_v21  ;;  %v496_v21 = vld [vmem:[%s4448_s16 + $0xb0] sm:$0xff]  ;;  %v497_v25 = vld [vmem:[%s4448_s16 + $0xb8] sm:$0xff] }
  0x43   : > { %5381 = vst [vmem:[#allocation4_spill] sm:$0xff] %v4700_v22  ;;  %3886 = vmatprep.mubr.msk.bf16.mxu0 %vm1010_vm5, %v4700_v22  ;;  %v665_v46 = vshrl.u32 %v592_v33, 16  ;;  %v668_v50 = vshll.u32 %v592_v33, 16  ;;  %v1469_v49 = vrot.slane %v4577_v26, 1  ;;  %v526_v52 = vmul.f32 %v4442_v14, %v494_v31 }
  0x44   : > { %v909_v53 = vor.u32 %v908_v42, %v904_v63  ;;  %v556_v56 = vadd.f32 %v4453_v17, %v524_v44  ;;  %v557_v58 = vadd.f32 %v4453_v17, %v525_v45  ;;  %v527_v59 = vmul.f32 %v4442_v14, %v495_v40  ;;  %v499_v45 = vld [vmem:[%s4448_s16 + $0xc8] sm:$0xff] }
  0x45   : > { %v4716_v61 = vsel %vm1455_vm6, %v1459_v55, %v1460_v62  ;;  %v667_v0 = vrot.slane %v665_v46, 7  ;;  %v558_v26 = vadd.f32 %v4453_v17, %v526_v52  ;;  %v4725_v4 = vsel %vm1455_vm6, %v1462_v16, %v1463_v15 }
  0x46   : > { %3751 = vmatmul.mubr.msk.bf16.gmra.mrb[12].mxu1 %vm1010_vm5, %v4700_v22  ;;  %v4720_v2 = vsel %vm806_vm3, %v909_v53, %v913_v32  ;;  %v593_v18 = vpack.c.bf16 %v557_v58, %v556_v56  ;;  %v559_v19 = vadd.f32 %v4453_v17, %v527_v59  ;;  %v4737_v55 = vsel %vm1455_vm6, %v1465_v30, %v1466_v34  ;;  %v498_v34 = vld [vmem:[%s4448_s16 + $0xc0] sm:$0xff] }
  0x47   : > { %5382 = vst [vmem:[#allocation5_spill] sm:$0xff] %v4720_v2  ;;  %3754 = vmatprep.mubr.msk.bf16.mxu1 %vm1010_vm5, %v4720_v2  ;;  %v670_v12 = vor.u32 %v668_v50, %v667_v0  ;;  %v4734_v62 = vsel %vm4496_vm4, %v667_v0, 0  ;;  %v4740_v20 = vsel %vm1455_vm6, %v1468_v38, %v1469_v49  ;;  %v1471_v30 = vrot.slane %v4624_v7, 1 }
  0x48   : > { %3887 = vmatmul.mubr.msk.bf16.gmra.mrb[12].mxu0 %vm1010_vm5, %v4720_v2  ;;  %v923_v15 = vshll.u32 %v4734_v62, 16  ;;  %v672_v16 = vshrl.u32 %v593_v18, 16  ;;  %v675_v63 = vshll.u32 %v593_v18, 16  ;;  %v594_v27 = vpack.c.bf16 %v559_v19, %v558_v26 }
  0x49   : > { %3908 = vmatprep.mubr.msk.bf16.mxu0 %vm1010_vm5, %v4716_v61  ;;  %v4749_v31 = vsel %vm4496_vm4, 0, %v670_v12  ;;  %v528_v32 = vmul.f32 %v4442_v14, %v496_v21  ;;  %v529_v33 = vmul.f32 %v4442_v14, %v497_v25  ;;  %v530_v59 = vmul.f32 %v4442_v14, %v498_v34 }
  0x4a   : > { %v916_v38 = vshrl.u32 %v4749_v31, 16  ;;  %v918_v40 = vshll.u32 %v4749_v31, 16  ;;  %v925_v42 = vrot.slane %v923_v15, 1  ;;  %v674_v44 = vrot.slane %v672_v16, 7 }
  0x4b   : > { %v679_v46 = vshrl.u32 %v594_v27, 16  ;;  %v682_v50 = vshll.u32 %v594_v27, 16  ;;  %v560_v49 = vadd.f32 %v4453_v17, %v528_v32  ;;  %v561_v52 = vadd.f32 %v4453_v17, %v529_v33 }
  0x4c   : > { %v920_v53 = vrot.slane %v918_v40, 1  ;;  %v677_v56 = vor.u32 %v675_v63, %v674_v44  ;;  %v4762_v58 = vsel %vm4496_vm4, %v674_v44, 0  ;;  %v531_v19 = vmul.f32 %v4442_v14, %v499_v45 }
  0x4d   : > { %v935_v0 = vshll.u32 %v4762_v58, 16  ;;  %v681_v26 = vrot.slane %v679_v46, 7  ;;  %v595_v18 = vpack.c.bf16 %v561_v52, %v560_v49  ;;  %v1472_v12 = vrot.slane %v4612_v60, 1 }
  0x4e   : > { %v921_v21 = vor.u32 %v920_v53, %v916_v38  ;;  %v4769_v25 = vsel %vm4496_vm4, 0, %v677_v56  ;;  %v562_v15 = vadd.f32 %v4453_v17, %v530_v59  ;;  %v563_v45 = vadd.f32 %v4453_v17, %v531_v19 }
  0x4f   : > { %v928_v16 = vshrl.u32 %v4769_v25, 16  ;;  %v930_v63 = vshll.u32 %v4769_v25, 16  ;;  %v937_v27 = vrot.slane %v935_v0, 1  ;;  %v684_v32 = vor.u32 %v682_v50, %v681_v26  ;;  %v500_v0 = vld [vmem:[%s4448_s16 + $0xd0] sm:$0xff] }
  0x50   : > { %3909 = vmatmul.mubr.msk.bf16.vlgmr.msra.gmra.mrb[0].mxu0 %vm1010_vm5, %v4725_v4  ;;  %v4778_v33 = vsel %vm806_vm3, %v921_v21, %v925_v42  ;;  %v4782_v34 = vsel %vm4496_vm4, %v681_v26, 0  ;;  %v686_v38 = vshrl.u32 %v595_v18, 16  ;;  %v689_v60 = vshll.u32 %v595_v18, 16 }
  0x51   : > { %5383 = vst [vmem:[#allocation6_spill] sm:$0xff] %v4778_v33  ;;  %3755 = vmatmul.mubr.msk.bf16.gmra.mrb[16].mxu1 %vm1010_vm5, %v4778_v33  ;;  %3941 = vmatpush3.bf16.msra.mxu0 %v4656_v48  ;;  %v932_v40 = vrot.slane %v930_v63, 1  ;;  %v4789_v44 = vsel %vm4496_vm4, 0, %v684_v32  ;;  %v947_v42 = vshll.u32 %v4782_v34, 16  ;;  %v1474_v49 = vrot.slane %v4639_v28, 1  ;;  %v501_v32 = vld [vmem:[%s4448_s16 + $0xd8] sm:$0xff] }
  0x52   : > { %3912 = vmatprep.mubr.msk.bf16.mxu0 %vm1010_vm5, %v4737_v55  ;;  %v940_v46 = vshrl.u32 %v4789_v44, 16  ;;  %v942_v50 = vshll.u32 %v4789_v44, 16  ;;  %v688_v48 = vrot.slane %v686_v38, 7  ;;  %v4799_v53 = vsel %vm1455_vm6, %v1471_v30, %v1472_v12 }
  0x53   : > { %v933_v52 = vor.u32 %v932_v40, %v928_v16  ;;  %v1475_v56 = vrot.slane %v4635_v24, 1  ;;  %v596_v59 = vpack.c.bf16 %v563_v45, %v562_v15  ;;  %v949_v18 = vrot.slane %v947_v42, 1  ;;  %v502_v40 = vld [vmem:[%s4448_s16 + $0xe0] sm:$0xff] }
  0x54   : > { %v944_v26 = vrot.slane %v942_v50, 1  ;;  %v691_v19 = vor.u32 %v689_v60, %v688_v48  ;;  %v4805_v21 = vsel %vm4496_vm4, %v688_v48, 0  ;;  %v1477_v38 = vrot.slane %v4653_v47, 1  ;;  %v503_v48 = vld [vmem:[%s4448_s16 + $0xe8] sm:$0xff] }
  0x55   : > { %v4808_v63 = vsel %vm806_vm3, %v933_v52, %v937_v27  ;;  %v959_v16 = vshll.u32 %v4805_v21, 16  ;;  %v693_v30 = vshrl.u32 %v596_v59, 16  ;;  %v696_v12 = vshll.u32 %v596_v59, 16 }
  0x56   : > { %5384 = vst [vmem:[#allocation7_spill] sm:$0xff] %v4808_v63  ;;  %3758 = vmatprep.mubr.msk.bf16.mxu1 %vm1010_vm5, %v4808_v63  ;;  %v945_v24 = vor.u32 %v944_v26, %v940_v46  ;;  %v4816_v15 = vsel %vm4496_vm4, 0, %v691_v19  ;;  %v532_v60 = vmul.f32 %v4442_v14, %v500_v0  ;;  %v1478_v50 = vrot.slane %v4647_v39, 1 }
  0x57   : > { %v952_v27 = vshrl.u32 %v4816_v15, 16  ;;  %v954_v42 = vshll.u32 %v4816_v15, 16  ;;  %v695_v45 = vrot.slane %v693_v30, 7  ;;  %v961_v52 = vrot.slane %v959_v16, 1 }
  0x58   : > { %3913 = vmatmul.mubr.msk.bf16.gmra.mrb[4].mxu0 %vm1010_vm5, %v4740_v20  ;;  %v4828_v46 = vsel %vm806_vm3, %v945_v24, %v949_v18  ;;  %v533_v59 = vmul.f32 %v4442_v14, %v501_v32  ;;  %v564_v0 = vadd.f32 %v4453_v17, %v532_v60  ;;  %v534_v18 = vmul.f32 %v4442_v14, %v502_v40 }
  0x59   : > { %5385 = vst [vmem:[#allocation8_spill] sm:$0xff] %v4828_v46  ;;  %3759 = vmatmul.mubr.msk.bf16.gmra.mrb[20].mxu1 %vm1010_vm5, %v4828_v46  ;;  %3916 = vmatprep.mubr.msk.bf16.mxu0 %vm1010_vm5, %v4799_v53  ;;  %v956_v26 = vrot.slane %v954_v42, 1  ;;  %v698_v39 = vor.u32 %v696_v12, %v695_v45  ;;  %v4838_v19 = vsel %vm4496_vm4, %v695_v45, 0  ;;  %v535_v32 = vmul.f32 %v4442_v14, %v503_v48 }
  0x5a   : > { %v971_v16 = vshll.u32 %v4838_v19, 16  ;;  %v565_v30 = vadd.f32 %v4453_v17, %v533_v59  ;;  %v566_v42 = vadd.f32 %v4453_v17, %v534_v18  ;;  %v4852_v40 = vsel %vm1455_vm6, %v1474_v49, %v1475_v56 }
  0x5b   : > { %v957_v24 = vor.u32 %v956_v26, %v952_v27  ;;  %v4846_v60 = vsel %vm4496_vm4, 0, %v698_v39  ;;  %v4858_v48 = vsel %vm1455_vm6, %v1477_v38, %v1478_v50  ;;  %v567_v27 = vadd.f32 %v4453_v17, %v535_v32 }
  0x5c   : > { %v964_v12 = vshrl.u32 %v4846_v60, 16  ;;  %v966_v45 = vshll.u32 %v4846_v60, 16  ;;  %v597_v46 = vpack.c.bf16 %v565_v30, %v564_v0  ;;  %v973_v26 = vrot.slane %v971_v16, 1 }
  0x5d   : > { %v4855_v63 = vsel %vm806_vm3, %v957_v24, %v961_v52  ;;  %v598_v33 = vpack.c.bf16 %v567_v27, %v566_v42  ;;  %v1480_v56 = vrot.slane %v4682_v11, 1  ;;  %v1481_v38 = vrot.slane %v4671_v8, 1 }
  0x5e   : > { %5386 = vst [vmem:[#allocation9_spill] sm:$0xff] %v4855_v63  ;;  %3762 = vmatprep.mubr.msk.bf16.mxu1 %vm1010_vm5, %v4855_v63  ;;  %v968_v59 = vrot.slane %v966_v45, 1  ;;  %v700_v39 = vshrl.u32 %v597_v46, 16  ;;  %v703_v18 = vshll.u32 %v597_v46, 16  ;;  %v1483_v16 = vrot.slane %v4749_v31, 1  ;;  %v505_v45 = vld [vmem:[%s4448_s16 + $0xf8] sm:$0xff] }
  0x5f   : > { %v707_v52 = vshrl.u32 %v598_v33, 16  ;;  %v710_v0 = vshll.u32 %v598_v33, 16  ;;  %v1484_v46 = vrot.slane %v4734_v62, 1  ;;  %v2598_v8 = vshrl.u32 %v4603_v43, 16 }
  0x60   : > { %3917 = vmatmul.mubr.msk.bf16.gmra.mrb[8].mxu0 %vm1010_vm5, %v4852_v40  ;;  %v969_v49 = vor.u32 %v968_v59, %v964_v12  ;;  %v702_v50 = vrot.slane %v700_v39, 7  ;;  %v504_v12 = vld [vmem:[%s4448_s16 + $0xf0] sm:$0xff]  ;;  %v4885_v62 = vsel %vm1455_vm6, %v1480_v56, %v1481_v38  ;;  %v2601_v59 = vshll.u32 %v4603_v43, 16 }
  0x61   : > { %3920 = vmatprep.mubr.msk.bf16.mxu0 %vm1010_vm5, %v4858_v48  ;;  %v709_v33 = vrot.slane %v707_v52, 7  ;;  %v536_v56 = vmul.f32 %v4442_v14, %v504_v12  ;;  %v537_v38 = vmul.f32 %v4442_v14, %v505_v45  ;;  %v2600_v52 = vrot.slane %v2598_v8, 2 }
  0x62   : > { %v4872_v30 = vsel %vm806_vm3, %v969_v49, %v973_v26  ;;  %v705_v32 = vor.u32 %v703_v18, %v702_v50  ;;  %v4876_v24 = vsel %vm4496_vm4, %v702_v50, 0  ;;  %v4895_v49 = vsel %vm1455_vm6, %v1483_v16, %v1484_v46 }
  0x63   : > { %5387 = vst [vmem:[#allocation10_spill] sm:$0xff] %v4872_v30  ;;  %3763 = vmatmul.mubr.msk.bf16.gmra.mrb[24].mxu1 %vm1010_vm5, %v4872_v30  ;;  %v983_v42 = vshll.u32 %v4876_v24, 16  ;;  %v712_v18 = vor.u32 %v710_v0, %v709_v33  ;;  %v4899_v50 = vsel %vm4496_vm4, %v709_v33, 0  ;;  %v1486_v33 = vrot.slane %v4769_v25, 1 }
  0x64   : > { %v4889_v27 = vsel %vm4496_vm4, 0, %v705_v32  ;;  %v995_v0 = vshll.u32 %v4899_v50, 16  ;;  %v1487_v12 = vrot.slane %v4762_v58, 1  ;;  %v1490_v45 = vrot.slane %v4782_v34, 1 }
  0x65   : > { %v976_v26 = vshrl.u32 %v4889_v27, 16  ;;  %v978_v39 = vshll.u32 %v4889_v27, 16  ;;  %v985_v30 = vrot.slane %v983_v42, 1  ;;  %v4905_v43 = vsel %vm4496_vm4, 0, %v712_v18 }
  0x66   : > { %v988_v16 = vshrl.u32 %v4905_v43, 16  ;;  %v990_v46 = vshll.u32 %v4905_v43, 16  ;;  %v1489_v42 = vrot.slane %v4789_v44, 1  ;;  %v997_v63 = vrot.slane %v995_v0, 1 }
  0x67   : > { %v980_v32 = vrot.slane %v978_v39, 1  ;;  %v2603_v39 = vrot.slane %v2601_v59, 3  ;;  %v568_v2 = vadd.f32 %v4453_v17, %v536_v56  ;;  %v569_v22 = vadd.f32 %v4453_v17, %v537_v38 }
  0x68   : > { %3921 = vmatmul.mubr.msk.bf16.gmra.mrb[12].mxu0 %vm1010_vm5, %v4885_v62  ;;  %v992_v18 = vrot.slane %v990_v46, 1  ;;  %v1756_v58 = vshll.u32 %v4416_v1, 16  ;;  %v4930_v34 = vsel %vm1455_vm6, %v1489_v42, %v1490_v45  ;;  %v1754_v38 = vshrl.u32 %v4416_v1, 16 }
  0x69   : > { %v981_v8 = vor.u32 %v980_v32, %v976_v26  ;;  %3924 = vmatprep.mubr.msk.bf16.mxu0 %vm1010_vm5, %v4895_v49  ;;  %v2604_v51 = vor.u32 %v2603_v39, %v2600_v52  ;;  %v4927_v32 = vsel %vm1455_vm6, %v1486_v33, %v1487_v12  ;;  %v1495_v1 = vrot.slane %v4846_v60, 1 }
  0x6a   : > { %v993_v26 = vor.u32 %v992_v18, %v988_v16  ;;  %v1758_v52 = vrot.slane %v1756_v58, 1  ;;  %v1501_v42 = vrot.slane %v4905_v43, 1  ;;  %v1502_v45 = vrot.slane %v4899_v50, 1 }
  0x6b   : > { %v4921_v9 = vsel %vm806_vm3, %v981_v8, %v985_v30  ;;  %v2609_v59 = vand.u32 %v2604_v51, %v4422_v6  ;;  %v599_v30 = vpack.c.bf16 %v569_v22, %v568_v2  ;;  %v1492_v51 = vrot.slane %v4816_v15, 1 }
  0x6c   : > { %3766 = vmatprep.mubr.msk.bf16.mxu1 %vm1010_vm5, %v4921_v9  ;;  %v4934_v56 = vsel %vm806_vm3, %v993_v26, %v997_v63  ;;  %v1493_v22 = vrot.slane %v4805_v21, 1  ;;  %v1496_v2 = vrot.slane %v4838_v19, 1  ;;  %v1759_v0 = vor.u32 %v1758_v52, %v1754_v38  ;;  %v805_v38 = vld [vmem:[%s5360_s5 + $0xc] sm:$0x3] }
  0x6d   : > { %3767 = vmatmul.mubr.msk.bf16.gmra.mrb[28].mxu1 %vm1010_vm5, %v4934_v56  ;;  %3974 = vmatprep.subr.bf16.mxu0 %v2609_v59  ;;  %v714_v63 = vshrl.u32 %v599_v30, 16  ;;  %v717_v12 = vshll.u32 %v599_v30, 16  ;;  %v1498_v21 = vrot.slane %v4889_v27, 1  ;;  %v1499_v19 = vrot.slane %v4876_v24, 1 }
  0x6e   : > { %3772 = vmatprep.mubr.msk.bf16.mxu1 %vm1010_vm5, %v4537_v41  ;;  %v4950_v16 = vsel %vm1455_vm6, %v1492_v51, %v1493_v22  ;;  %v4953_v46 = vsel %vm1455_vm6, %v1495_v1, %v1496_v2  ;;  %v4956_v8 = vand.u32 %v1759_v0, %v4422_v6  ;;  %v4976_v18 = vsel %vm1455_vm6, %v1501_v42, %v1502_v45  ;;  %v5392_v42 = vld [vmem:[#allocation6_spill] sm:$0xff]  ;;  %v5393_v45 = vld [vmem:[#allocation7_spill] sm:$0xff] }
  0x6f   : > { %v716_v33 = vrot.slane %v714_v63, 7  ;;  %v2813_v52 = vand.u32 %v4422_v6, %v805_v38  ;;  %v570_v6 = vld [vmem:[%s431_s8] sm:$0xff]  ;;  %v1457_v51 = vrot.slane %v4532_v36, 1  ;;  %v1456_v22 = vrot.slane %v4537_v41, 1 }
  0x70   : > { %3925 = vmatmul.mubr.msk.bf16.gmra.mrb[16].mxu0 %vm1010_vm5, %v4927_v32  ;;  %v572_v1 = vmul.f32 %v4442_v14, %v570_v6 }
  0x71   : > { %3928 = vmatprep.mubr.msk.bf16.mxu0 %vm1010_vm5, %v4930_v34  ;;  %v719_v39 = vor.u32 %v717_v12, %v716_v33  ;;  %v4984_v24 = vsel %vm4496_vm4, %v716_v33, 0  ;;  %v1458_v63 = vsel %vm1455_vm6, %v1456_v22, %v1457_v51 }
  0x72   : > { %v2173_v26 = vrot.slane %v4984_v24, 1  ;;  %v574_v0 = vadd.f32 %v4453_v17, %v572_v1  ;;  %v1966_v6 = vshll.u32 %v4984_v24, 16 }
  0x73   : > { %v4980_v58 = vsel %vm4496_vm4, 0, %v719_v39  ;;  %v5394_v39 = vld [vmem:[#allocation8_spill] sm:$0xff] }
  0x74   : > { %v2172_v50 = vrot.slane %v4980_v58, 1  ;;  %v581_v36 = vmul.f32 0.0, %v574_v0  ;;  %v1959_v38 = vshrl.u32 %v4980_v58, 16  ;;  %v1968_v22 = vrot.slane %v1966_v6, 1 }
  0x75   : > { %3773 = vmatmul.mubr.msk.bf16.vlgmr.msra.gmra.mrb[0].mxu1 %vm1010_vm5, %v4518_v23 }
  0x76   : > { %3805 = vmatpush3.bf16.msra.mxu1 %v4504_v10  ;;  %3776 = vmatprep.mubr.msk.bf16.mxu1 %vm1010_vm5, %v4526_v29  ;;  %v4973_v10 = vsel %vm1455_vm6, %v1498_v21, %v1499_v19  ;;  %v4997_v30 = vsel %vm1455_vm6, %v2172_v50, %v2173_v26  ;;  %v5388_v19 = vld [vmem:[#allocation2_spill] sm:$0xff]  ;;  %v5395_v50 = vld [vmem:[#allocation9_spill] sm:$0xff]  ;;  %v1961_v26 = vshll.u32 %v4980_v58, 16 }
  0x77   : > { %3838 = vmatprep.subr.bf16.mxu1 %v4956_v8 }
  0x78   : > { %3929 = vmatmul.mubr.msk.bf16.gmra.mrb[20].mxu0 %vm1010_vm5, %v4950_v16 }
  0x79   : > { %3932 = vmatprep.mubr.msk.bf16.mxu0 %vm1010_vm5, %v4953_v46 }
  0x7d   : > { %3777 = vmatmul.mubr.msk.bf16.gmra.mrb[4].mxu1 %vm1010_vm5, %v4550_v54 }
  0x7e   : > { %3780 = vmatprep.mubr.msk.bf16.mxu1 %vm1010_vm5, %v4591_v37 }
  0x80   : > { %3933 = vmatmul.mubr.msk.bf16.gmra.mrb[24].mxu0 %vm1010_vm5, %v4973_v10 }
  0x81   : > { %3936 = vmatprep.mubr.msk.bf16.mxu0 %vm1010_vm5, %v4976_v18 }
  0x85   : > { %3781 = vmatmul.mubr.msk.bf16.gmra.mrb[8].mxu1 %vm1010_vm5, %v4624_v7 }
  0x86   : > { %3784 = vmatprep.mubr.msk.bf16.mxu1 %vm1010_vm5, %v4639_v28 }
  0x88   : > { %3937 = vmatmul.mubr.msk.bf16.gmra.mrb[28].mxu0 %vm1010_vm5, %v4997_v30 }
  0x89   : > { %3942 = vmatprep.mubr.msk.bf16.mxu0 %vm1010_vm5, %v4526_v29 }
  0x8d   : > { %3785 = vmatmul.mubr.msk.bf16.gmra.mrb[12].mxu1 %vm1010_vm5, %v4653_v47 }
  0x8e   : > { %3788 = vmatprep.mubr.msk.bf16.mxu1 %vm1010_vm5, %v4682_v11 }
  0x90   : > { %3943 = vmatmul.mubr.msk.bf16.vlgmr.msra.gmra.mrb[0].mxu0 %vm1010_vm5, %v4550_v54 }
  0x91   : > { %3975 = vmatpush3.bf16.msra.mxu0 %v2609_v59  ;;  %3946 = vmatprep.mubr.msk.bf16.mxu0 %vm1010_vm5, %v4591_v37  ;;  %v571_v59 = vld [vmem:[%s431_s8 + $0x8] sm:$0xff] }
  0x92   : > { %4008 = vmatprep.subr.bf16.mxu0 %v2813_v52  ;;  %v573_v2 = vmul.f32 %v4442_v14, %v571_v59  ;;  %v5396_v59 = vld [vmem:[#allocation10_spill] sm:$0xff] }
  0x94   : > { %v575_v33 = vadd.f32 %v4453_v17, %v573_v2 }
  0x95   : > { %3789 = vmatmul.mubr.msk.bf16.gmra.mrb[16].mxu1 %vm1010_vm5, %v4749_v31 }
  0x96   : > { %3792 = vmatprep.mubr.msk.bf16.mxu1 %vm1010_vm5, %v4769_v25  ;;  %v582_v41 = vmul.f32 0.0, %v575_v33 }
  0x98   : > { %3947 = vmatmul.mubr.msk.bf16.gmra.mrb[4].mxu0 %vm1010_vm5, %v4624_v7  ;;  %v600_v14 = vpack.c.bf16 %v582_v41, %v581_v36 }
  0x99   : > { %3950 = vmatprep.mubr.msk.bf16.mxu0 %vm1010_vm5, %v4639_v28 }
  0x9a   : > { %v721_v17 = vshrl.u32 %v600_v14, 16  ;;  %v724_v21 = vshll.u32 %v600_v14, 16 }
  0x9c   : > { %v723_v12 = vrot.slane %v721_v17, 7 }
  0x9d   : > { %3793 = vmatmul.mubr.msk.bf16.gmra.mrb[20].mxu1 %vm1010_vm5, %v4789_v44 }
  0x9e   : > { %3796 = vmatprep.mubr.msk.bf16.mxu1 %vm1010_vm5, %v4816_v15  ;;  %v801_v24 = vsel %vm4496_vm4, %v723_v12, 0 }
  0xa0   : > { %3951 = vmatmul.mubr.msk.bf16.gmra.mrb[8].mxu0 %vm1010_vm5, %v4653_v47 }
  0xa1   : > { %3954 = vmatprep.mubr.msk.bf16.mxu0 %vm1010_vm5, %v4682_v11 }
  0xa5   : > { %3797 = vmatmul.mubr.msk.bf16.gmra.mrb[24].mxu1 %vm1010_vm5, %v4846_v60 }
  0xa6   : > { %3800 = vmatprep.mubr.msk.bf16.mxu1 %vm1010_vm5, %v4889_v27 }
  0xa8   : > { %3955 = vmatmul.mubr.msk.bf16.gmra.mrb[12].mxu0 %vm1010_vm5, %v4749_v31 }
  0xa9   : > { %3958 = vmatprep.mubr.msk.bf16.mxu0 %vm1010_vm5, %v4769_v25 }
  0xad   : > { %3801 = vmatmul.mubr.msk.bf16.gmra.mrb[28].mxu1 %vm1010_vm5, %v4905_v43 }
  0xae   : > { %3806 = vmatprep.mubr.msk.bf16.mxu1 %vm1010_vm5, %v1458_v63 }
  0xb0   : > { %3959 = vmatmul.mubr.msk.bf16.gmra.mrb[16].mxu0 %vm1010_vm5, %v4789_v44 }
  0xb1   : > { %3962 = vmatprep.mubr.msk.bf16.mxu0 %vm1010_vm5, %v4816_v15 }
  0xb5   : > { %3807 = vmatmul.mubr.msk.bf16.vlgmr.msra.gmra.mrb[0].mxu1 %vm1010_vm5, %v4716_v61  ;;  %v726_v61 = vor.u32 %v724_v21, %v723_v12 }
  0xb6   : > { %3839 = vmatpush3.bf16.msra.mxu1 %v4956_v8  ;;  %3810 = vmatprep.mubr.msk.bf16.mxu1 %vm1010_vm5, %v4725_v4 }
  0xb7   : > { %4042 = vmatprep.subr.bf16.mxu1 %v4434_v13  ;;  %v5081_v8 = vsel %vm4496_vm4, 0, %v726_v61 }
  0xb8   : > { %3963 = vmatmul.mubr.msk.bf16.gmra.mrb[20].mxu0 %vm1010_vm5, %v4846_v60 }
  0xb9   : > { %3966 = vmatprep.mubr.msk.bf16.mxu0 %vm1010_vm5, %v4889_v27 }
  0xbd   : > { %3811 = vmatmul.mubr.msk.bf16.gmra.mrb[4].mxu1 %vm1010_vm5, %v4737_v55 }
  0xbe   : > { %3814 = vmatprep.mubr.msk.bf16.mxu1 %vm1010_vm5, %v4740_v20 }
  0xc0   : > { %3967 = vmatmul.mubr.msk.bf16.gmra.mrb[24].mxu0 %vm1010_vm5, %v4905_v43 }
  0xc1   : > { %3970 = vmatprep.mubr.msk.bf16.mxu0 %vm1010_vm5, %v4980_v58 }
  0xc5   : > { %3815 = vmatmul.mubr.msk.bf16.gmra.mrb[8].mxu1 %vm1010_vm5, %v4799_v53 }
  0xc6   : > { %3818 = vmatprep.mubr.msk.bf16.mxu1 %vm1010_vm5, %v4852_v40 }
  0xc8   : > { %3971 = vmatmul.mubr.msk.bf16.gmra.mrb[28].mxu0 %vm1010_vm5, %v5081_v8 }
  0xc9   : > { %3976 = vmatprep.mubr.msk.bf16.mxu0 %vm1010_vm5, %v4556_v57  ;;  %v5389_v57 = vld [vmem:[#allocation3_spill] sm:$0xff] }
  0xcd   : > { %3819 = vmatmul.mubr.msk.bf16.gmra.mrb[12].mxu1 %vm1010_vm5, %v4858_v48 }
  0xce   : > { %3822 = vmatprep.mubr.msk.bf16.mxu1 %vm1010_vm5, %v4885_v62 }
  0xd0   : > { %3977 = vmatmul.mubr.msk.bf16.vlgmr.msra.gmra.mrb[0].mxu0 %vm1010_vm5, %v4587_v35  ;;  %v5390_v35 = vld [vmem:[#allocation4_spill] sm:$0xff] }
  0xd1   : > { %4009 = vmatpush3.bf16.msra.mxu0 %v2813_v52  ;;  %3980 = vmatprep.mubr.msk.bf16.mxu0 %vm1010_vm5, %v4618_v5  ;;  %v5391_v5 = vld [vmem:[#allocation5_spill] sm:$0xff]  ;;  %v1963_v52 = vrot.slane %v1961_v26, 1 }
  0xd3   : > { %v1964_v51 = vor.u32 %v1963_v52, %v1959_v38 }
  0xd5   : > { %3823 = vmatmul.mubr.msk.bf16.gmra.mrb[16].mxu1 %vm1010_vm5, %v4895_v49  ;;  %v1969_v2 = vsel %vm806_vm3, %v1964_v51, %v1968_v22 }
  0xd6   : > { %3826 = vmatprep.mubr.msk.bf16.mxu1 %vm1010_vm5, %v4927_v32 }
  0xd8   : > { %3981 = vmatmul.mubr.msk.bf16.gmra.mrb[4].mxu0 %vm1010_vm5, %v5388_v19 }
  0xd9   : > { %3984 = vmatprep.mubr.msk.bf16.mxu0 %vm1010_vm5, %v5389_v57 }
  0xdd   : > { %3827 = vmatmul.mubr.msk.bf16.gmra.mrb[20].mxu1 %vm1010_vm5, %v4930_v34 }
  0xde   : > { %3830 = vmatprep.mubr.msk.bf16.mxu1 %vm1010_vm5, %v4950_v16 }
  0xe0   : > { %3985 = vmatmul.mubr.msk.bf16.gmra.mrb[8].mxu0 %vm1010_vm5, %v5390_v35 }
  0xe1   : > { %3988 = vmatprep.mubr.msk.bf16.mxu0 %vm1010_vm5, %v5391_v5 }
  0xe5   : > { %3831 = vmatmul.mubr.msk.bf16.gmra.mrb[24].mxu1 %vm1010_vm5, %v4953_v46 }
  0xe6   : > { %3834 = vmatprep.mubr.msk.bf16.mxu1 %vm1010_vm5, %v4973_v10 }
  0xe8   : > { %3989 = vmatmul.mubr.msk.bf16.gmra.mrb[12].mxu0 %vm1010_vm5, %v5392_v42 }
  0xe9   : > { %3992 = vmatprep.mubr.msk.bf16.mxu0 %vm1010_vm5, %v5393_v45 }
  0xed   : > { %3835 = vmatmul.mubr.msk.bf16.gmra.mrb[28].mxu1 %vm1010_vm5, %v4976_v18 }
  0xee   : > { %3840 = vmatprep.mubr.msk.bf16.mxu1 %vm1010_vm5, %v4518_v23  ;;  %v2588_v23 = vshll.u32 %v5081_v8, 16 }
  0xf0   : > { %3993 = vmatmul.mubr.msk.bf16.gmra.mrb[16].mxu0 %vm1010_vm5, %v5394_v39  ;;  %v2590_v1 = vrot.slane %v2588_v23, 1 }
  0xf1   : > { %3996 = vmatprep.mubr.msk.bf16.mxu0 %vm1010_vm5, %v5395_v50 }
  0xf5   : > { %3841 = vmatmul.mubr.msk.bf16.vlgmr.msra.gmra.mrb[0].mxu1 %vm1010_vm5, %v4526_v29  ;;  %v2586_v29 = vshrl.u32 %v5081_v8, 16 }
  0xf6   : > { %4043 = vmatpush3.bf16.msra.mxu1 %v4434_v13  ;;  %3844 = vmatprep.mubr.msk.bf16.mxu1 %vm1010_vm5, %v4550_v54  ;;  %v2593_v13 = vshll.u32 %v801_v24, 16 }
  0xf7   : > { %v2591_v54 = vor.u32 %v2590_v1, %v2586_v29 }
  0xf8   : > { %3997 = vmatmul.mubr.msk.bf16.gmra.mrb[20].mxu0 %vm1010_vm5, %v5396_v59  ;;  %v2595_v3 = vrot.slane %v2593_v13, 1 }
  0xf9   : > { %4000 = vmatprep.mubr.msk.bf16.mxu0 %vm1010_vm5, %v4921_v9 }
  0xfa   : > { %v2596_v63 = vsel %vm806_vm3, %v2591_v54, %v2595_v3 }
  0xfd   : > { %3845 = vmatmul.mubr.msk.bf16.gmra.mrb[4].mxu1 %vm1010_vm5, %v4591_v37  ;;  %v2806_v37 = vrot.slane %v5081_v8, 1 }
  0xfe   : > { %3848 = vmatprep.mubr.msk.bf16.mxu1 %vm1010_vm5, %v4624_v7  ;;  %v2807_v7 = vrot.slane %v801_v24, 1 }
 0x100   : > { %4001 = vmatmul.mubr.msk.bf16.gmra.mrb[24].mxu0 %vm1010_vm5, %v4934_v56 }
 0x101   : > { %4004 = vmatprep.mubr.msk.bf16.mxu0 %vm1010_vm5, %v1969_v2 }
 0x105   : > { %3849 = vmatmul.mubr.msk.bf16.gmra.mrb[8].mxu1 %vm1010_vm5, %v4639_v28  ;;  %v2808_v28 = vsel %vm1455_vm6, %v2806_v37, %v2807_v7 }
 0x106   : > { %3852 = vmatprep.mubr.msk.bf16.mxu1 %vm1010_vm5, %v4653_v47 }
 0x108   : > { %4005 = vmatmul.mubr.msk.bf16.gmra.mrb[28].mxu0 %vm1010_vm5, %v2596_v63 }
 0x109   : > { %4010 = vmatprep.mubr.msk.bf16.mxu0 %vm1010_vm5, %v4725_v4 }
 0x10d   : > { %3853 = vmatmul.mubr.msk.bf16.gmra.mrb[12].mxu1 %vm1010_vm5, %v4682_v11 }
 0x10e   : > { %3856 = vmatprep.mubr.msk.bf16.mxu1 %vm1010_vm5, %v4749_v31 }
 0x110   : > { %4011 = vmatmul.mubr.msk.bf16.vlgmr.msra.gmra.mrb[0].mxu0 %vm1010_vm5, %v4737_v55 }
 0x111   : > { %4014 = vmatprep.mubr.msk.bf16.mxu0 %vm1010_vm5, %v4740_v20 }
 0x115   : > { %3857 = vmatmul.mubr.msk.bf16.gmra.mrb[16].mxu1 %vm1010_vm5, %v4769_v25 }
 0x116   : > { %3860 = vmatprep.mubr.msk.bf16.mxu1 %vm1010_vm5, %v4789_v44 }
 0x118   : > { %4015 = vmatmul.mubr.msk.bf16.gmra.mrb[4].mxu0 %vm1010_vm5, %v4799_v53 }
 0x119   : > { %4018 = vmatprep.mubr.msk.bf16.mxu0 %vm1010_vm5, %v4852_v40 }
 0x11d   : > { %3861 = vmatmul.mubr.msk.bf16.gmra.mrb[20].mxu1 %vm1010_vm5, %v4816_v15 }
 0x11e   : > { %3864 = vmatprep.mubr.msk.bf16.mxu1 %vm1010_vm5, %v4846_v60 }
 0x120   : > { %4019 = vmatmul.mubr.msk.bf16.gmra.mrb[8].mxu0 %vm1010_vm5, %v4858_v48 }
 0x121   : > { %4022 = vmatprep.mubr.msk.bf16.mxu0 %vm1010_vm5, %v4885_v62 }
 0x125   : > { %3865 = vmatmul.mubr.msk.bf16.gmra.mrb[24].mxu1 %vm1010_vm5, %v4889_v27  ;;  %v5234_v27 = vld [vmem:[%s5361_s6] ss:$0 sm:$0xff] }
 0x126   : > { %3868 = vmatprep.mubr.msk.bf16.mxu1 %vm1010_vm5, %v4905_v43 }
 0x128   : > { %4023 = vmatmul.mubr.msk.bf16.gmra.mrb[12].mxu0 %vm1010_vm5, %v4895_v49 }
 0x129   : > { %4026 = vmatprep.mubr.msk.bf16.mxu0 %vm1010_vm5, %v4927_v32 }
 0x12d   : > { %3869 = vmatmul.mubr.msk.bf16.gmra.mrb[28].mxu1 %vm1010_vm5, %v4980_v58 }
 0x12e   : > { %3890 = vmatprep.mubr.msk.bf16.mxu1 %vm1010_vm5, %v5392_v42 }
 0x130   : > { %4027 = vmatmul.mubr.msk.bf16.gmra.mrb[16].mxu0 %vm1010_vm5, %v4930_v34 }
 0x131   : > { %4030 = vmatprep.mubr.msk.bf16.mxu0 %vm1010_vm5, %v4950_v16 }
 0x135   : > { %3891 = vmatmul.mubr.msk.bf16.vlgmr.msra.gmra.mrb[16].mxu1 %vm1010_vm5, %v5393_v45 }
 0x136   : > { %3894 = vmatprep.mubr.msk.bf16.mxu1 %vm1010_vm5, %v5394_v39 }
 0x138   : > { %4031 = vmatmul.mubr.msk.bf16.gmra.mrb[20].mxu0 %vm1010_vm5, %v4953_v46 }
 0x139   : > { %4034 = vmatprep.mubr.msk.bf16.mxu0 %vm1010_vm5, %v4973_v10 }
 0x13d   : > { %3895 = vmatmul.mubr.msk.bf16.gmra.mrb[20].mxu1 %vm1010_vm5, %v5395_v50 }
 0x13e   : > { %3898 = vmatprep.mubr.msk.bf16.mxu1 %vm1010_vm5, %v5396_v59 }
 0x140   : > { %4035 = vmatmul.mubr.msk.bf16.gmra.mrb[24].mxu0 %vm1010_vm5, %v4976_v18 }
 0x141   : > { %4038 = vmatprep.mubr.msk.bf16.mxu0 %vm1010_vm5, %v4997_v30 }
 0x145   : > { %3899 = vmatmul.mubr.msk.bf16.gmra.mrb[24].mxu1 %vm1010_vm5, %v4921_v9 }
 0x146   : > { %3902 = vmatprep.mubr.msk.bf16.mxu1 %vm1010_vm5, %v4934_v56 }
 0x148   : > { %4039 = vmatmul.mubr.msk.bf16.gmra.mrb[28].mxu0 %vm1010_vm5, %v2808_v28 }
 0x14d   : > { %3903 = vmatmul.mubr.msk.bf16.gmra.mrb[28].mxu1 %vm1010_vm5, %v1969_v2 }
 0x1c8   : > { %v3842_v47 = vpop.f32.mrb[0].mxu1 }
 0x1c9   : > { %v1800_v11 = vpop.f32.mrb[1].mxu1 }
 0x1ca   : > { %v3843_v4 = vpop.f32.mrb[2].mxu1 }
 0x1cb   : > { %v1803_v55 = vpop.f32.mrb[3].mxu1 }
 0x1d0   : > { %v3846_v20 = vpop.f32.mrb[4].mxu1 }
 0x1d1   : > { %v1816_v31 = vpop.f32.mrb[5].mxu1 }
 0x1d2   : > { %v3847_v25 = vpop.f32.mrb[6].mxu1 }
 0x1d3   : > { %v1819_v44 = vpop.f32.mrb[7].mxu1 }
 0x1d8   : > { %v3850_v53 = vpop.f32.mrb[8].mxu1 }
 0x1d9   : > { %v1832_v15 = vpop.f32.mrb[9].mxu1 }
 0x1da   : > { %v3851_v60 = vpop.f32.mrb[10].mxu1 }
 0x1db   : > { %v1835_v9 = vpop.f32.mrb[11].mxu1 }
 0x1e0   : > { %v5227_v40 = vpop.f32.mrb[12].mxu1 }
 0x1e1   : > { %v5229_v48 = vpop.f32.mrb[13].mxu1 }
 0x1e2   : > { %v5236_v49 = vpop.f32.mrb[14].mxu1 }
 0x1e3   : > { %v4012_v62 = vpop.f32.mrb[0].mxu0  ;;  %v5239_v34 = vpop.f32.mrb[15].mxu1 }
 0x1e4   : > { %v4044_v43 = vadd.f32 %v4012_v62, %v3842_v47  ;;  %v2849_v32 = vpop.f32.mrb[1].mxu0 }
 0x1e5   : > { %v4045_v56 = vadd.f32 %v2849_v32, %v1800_v11  ;;  %v4013_v16 = vpop.f32.mrb[2].mxu0 }
 0x1e6   : > { %v3017_v46 = vadd.f32 %v4044_v43, %v5234_v27  ;;  %v4046_v10 = vadd.f32 %v4013_v16, %v3843_v4  ;;  %v2852_v18 = vpop.f32.mrb[3].mxu0 }
 0x1e7   : > { %v3015_v58 = vadd.f32 %v4045_v56, %v5234_v27  ;;  %v4047_v30 = vadd.f32 %v2852_v18, %v1803_v55 }
 0x1e8   : > { %v3552_v0 = vpack.c.bf16 %v3017_v46, %v3017_v46  ;;  %v3018_v33 = vadd.f32 %v4046_v10, %v5234_v27 }
 0x1e9   : > { %v3550_v36 = vpack.c.bf16 %v3015_v58, %v3015_v58  ;;  %v3016_v41 = vadd.f32 %v4047_v30, %v5234_v27 }
 0x1ea   : > { %3178 = vst.msk [vmem:[%s5245_s14 + $0x8] sm:$0xf] %vm3175_vm7, %v3552_v0  ;;  %v3553_v14 = vpack.c.bf16 %v3018_v33, %v3018_v33 }
 0x1eb   : > { %3176 = vst.msk [vmem:[%s5245_s14] sm:$0xf] %vm3175_vm7, %v3550_v36  ;;  %v3551_v17 = vpack.c.bf16 %v3016_v41, %v3016_v41  ;;  %v4016_v12 = vpop.f32.mrb[4].mxu0 }
 0x1ec   : > { %3179 = vst.msk [vmem:[%s5245_s14 + $0xc] sm:$0xf] %vm3175_vm7, %v3553_v14  ;;  %v4048_v21 = vadd.f32 %v4016_v12, %v3846_v20  ;;  %v2865_v61 = vpop.f32.mrb[5].mxu0 }
 0x1ed   : > { %3177 = vst.msk [vmem:[%s5245_s14 + $0x4] sm:$0xf] %vm3175_vm7, %v3551_v17  ;;  %v4049_v8 = vadd.f32 %v2865_v61, %v1816_v31  ;;  %v4017_v19 = vpop.f32.mrb[6].mxu0 }
 0x1ee   : > { %v3021_v57 = vadd.f32 %v4048_v21, %v5234_v27  ;;  %v4050_v35 = vadd.f32 %v4017_v19, %v3847_v25  ;;  %v2868_v5 = vpop.f32.mrb[7].mxu0 }
 0x1ef   : > { %v3019_v42 = vadd.f32 %v4049_v8, %v5234_v27  ;;  %v4051_v45 = vadd.f32 %v2868_v5, %v1819_v44 }
 0x1f0   : > { %v3556_v39 = vpack.c.bf16 %v3021_v57, %v3021_v57  ;;  %v3022_v50 = vadd.f32 %v4050_v35, %v5234_v27 }
 0x1f1   : > { %v3554_v26 = vpack.c.bf16 %v3019_v42, %v3019_v42  ;;  %v3020_v38 = vadd.f32 %v4051_v45, %v5234_v27 }
 0x1f2   : > { %3182 = vst.msk [vmem:[%s5245_s14 + $0x18] sm:$0xf] %vm3175_vm7, %v3556_v39  ;;  %v3557_v52 = vpack.c.bf16 %v3022_v50, %v3022_v50 }
 0x1f3   : > { %3180 = vst.msk [vmem:[%s5245_s14 + $0x10] sm:$0xf] %vm3175_vm7, %v3554_v26  ;;  %v3555_v6 = vpack.c.bf16 %v3020_v38, %v3020_v38  ;;  %v4020_v59 = vpop.f32.mrb[8].mxu0 }
 0x1f4   : > { %3183 = vst.msk [vmem:[%s5245_s14 + $0x1c] sm:$0xf] %vm3175_vm7, %v3557_v52  ;;  %v4052_v23 = vadd.f32 %v4020_v59, %v3850_v53  ;;  %v2881_v51 = vpop.f32.mrb[9].mxu0 }
 0x1f5   : > { %3181 = vst.msk [vmem:[%s5245_s14 + $0x14] sm:$0xf] %vm3175_vm7, %v3555_v6  ;;  %v4053_v22 = vadd.f32 %v2881_v51, %v1832_v15  ;;  %v4021_v24 = vpop.f32.mrb[10].mxu0 }
 0x1f6   : > { %v3025_v29 = vadd.f32 %v4052_v23, %v5234_v27  ;;  %v4054_v1 = vadd.f32 %v4021_v24, %v3851_v60  ;;  %v2884_v13 = vpop.f32.mrb[11].mxu0 }
 0x1f7   : > { %v3023_v2 = vadd.f32 %v4053_v22, %v5234_v27  ;;  %v4055_v54 = vadd.f32 %v2884_v13, %v1835_v9 }
 0x1f8   : > { %v3560_v3 = vpack.c.bf16 %v3025_v29, %v3025_v29  ;;  %v3026_v63 = vadd.f32 %v4054_v1, %v5234_v27 }
 0x1f9   : > { %v3558_v37 = vpack.c.bf16 %v3023_v2, %v3023_v2  ;;  %v3024_v7 = vadd.f32 %v4055_v54, %v5234_v27 }
 0x1fa   : > { %3186 = vst.msk [vmem:[%s5245_s14 + $0x28] sm:$0xf] %vm3175_vm7, %v3560_v3  ;;  %v3561_v28 = vpack.c.bf16 %v3026_v63, %v3026_v63 }
 0x1fb   : > { %3184 = vst.msk [vmem:[%s5245_s14 + $0x20] sm:$0xf] %vm3175_vm7, %v3558_v37  ;;  %v3559_v47 = vpack.c.bf16 %v3024_v7, %v3024_v7  ;;  %v4024_v11 = vpop.f32.mrb[12].mxu0 }
 0x1fc   : > { %3187 = vst.msk [vmem:[%s5245_s14 + $0x2c] sm:$0xf] %vm3175_vm7, %v3561_v28  ;;  %v4056_v4 = vadd.f32 %v4024_v11, %v5227_v40  ;;  %v2897_v55 = vpop.f32.mrb[13].mxu0 }
 0x1fd   : > { %3185 = vst.msk [vmem:[%s5245_s14 + $0x24] sm:$0xf] %vm3175_vm7, %v3559_v47  ;;  %v4057_v20 = vadd.f32 %v2897_v55, %v5229_v48  ;;  %v4025_v31 = vpop.f32.mrb[14].mxu0 }
 0x1fe   : > { %v3029_v25 = vadd.f32 %v4056_v4, %v5234_v27  ;;  %v4058_v44 = vadd.f32 %v4025_v31, %v5236_v49  ;;  %v2900_v53 = vpop.f32.mrb[15].mxu0 }
 0x1ff   : > { %v3027_v15 = vadd.f32 %v4057_v20, %v5234_v27  ;;  %v4059_v60 = vadd.f32 %v2900_v53, %v5239_v34 }
 0x200   : > { %v3564_v9 = vpack.c.bf16 %v3029_v25, %v3029_v25  ;;  %v3030_v40 = vadd.f32 %v4058_v44, %v5234_v27 }
 0x201   : > { %v3562_v62 = vpack.c.bf16 %v3027_v15, %v3027_v15  ;;  %v3028_v43 = vadd.f32 %v4059_v60, %v5234_v27 }
 0x202   : > { %3190 = vst.msk [vmem:[%s5245_s14 + $0x38] sm:$0xf] %vm3175_vm7, %v3564_v9  ;;  %v3565_v48 = vpack.c.bf16 %v3030_v40, %v3030_v40 }
 0x203   : > { %3188 = vst.msk [vmem:[%s5245_s14 + $0x30] sm:$0xf] %vm3175_vm7, %v3562_v62  ;;  %v3563_v32 = vpack.c.bf16 %v3028_v43, %v3028_v43  ;;  %v4028_v56 = vpop.f32.mrb[16].mxu0 }
 0x204   : > { %3191 = vst.msk [vmem:[%s5245_s14 + $0x3c] sm:$0xf] %vm3175_vm7, %v3565_v48  ;;  %v2913_v49 = vpop.f32.mrb[17].mxu0 }
 0x205   : > { %3189 = vst.msk [vmem:[%s5245_s14 + $0x34] sm:$0xf] %vm3175_vm7, %v3563_v32  ;;  %v4029_v16 = vpop.f32.mrb[18].mxu0 }
 0x206   : > { %v2916_v34 = vpop.f32.mrb[19].mxu0 }
 0x208   : > { %v3892_v46 = vpop.f32.mrb[16].mxu1 }
 0x209   : > { %v4060_v10 = vadd.f32 %v4028_v56, %v3892_v46  ;;  %v2075_v18 = vpop.f32.mrb[17].mxu1 }
 0x20a   : > { %v4061_v30 = vadd.f32 %v2913_v49, %v2075_v18  ;;  %v3893_v0 = vpop.f32.mrb[18].mxu1 }
 0x20b   : > { %v4032_v58 = vpop.f32.mrb[20].mxu0  ;;  %v3033_v36 = vadd.f32 %v4060_v10, %v5234_v27  ;;  %v4062_v41 = vadd.f32 %v4029_v16, %v3893_v0  ;;  %v2078_v14 = vpop.f32.mrb[19].mxu1 }
 0x20c   : > { %v2929_v33 = vpop.f32.mrb[21].mxu0  ;;  %v3031_v12 = vadd.f32 %v4061_v30, %v5234_v27  ;;  %v4063_v21 = vadd.f32 %v2916_v34, %v2078_v14 }
 0x20d   : > { %v4033_v17 = vpop.f32.mrb[22].mxu0  ;;  %v3568_v8 = vpack.c.bf16 %v3033_v36, %v3033_v36  ;;  %v3034_v19 = vadd.f32 %v4062_v41, %v5234_v27 }
 0x20e   : > { %v2932_v61 = vpop.f32.mrb[23].mxu0  ;;  %v3566_v57 = vpack.c.bf16 %v3031_v12, %v3031_v12  ;;  %v3032_v35 = vadd.f32 %v4063_v21, %v5234_v27 }
 0x20f   : > { %3194 = vst.msk [vmem:[%s5245_s14 + $0x48] sm:$0xf] %vm3175_vm7, %v3568_v8  ;;  %v3569_v5 = vpack.c.bf16 %v3034_v19, %v3034_v19 }
 0x210   : > { %3192 = vst.msk [vmem:[%s5245_s14 + $0x40] sm:$0xf] %vm3175_vm7, %v3566_v57  ;;  %v3567_v42 = vpack.c.bf16 %v3032_v35, %v3032_v35  ;;  %v3896_v45 = vpop.f32.mrb[20].mxu1 }
 0x211   : > { %3195 = vst.msk [vmem:[%s5245_s14 + $0x4c] sm:$0xf] %vm3175_vm7, %v3569_v5  ;;  %v4064_v39 = vadd.f32 %v4032_v58, %v3896_v45  ;;  %v2091_v50 = vpop.f32.mrb[21].mxu1 }
 0x212   : > { %3193 = vst.msk [vmem:[%s5245_s14 + $0x44] sm:$0xf] %vm3175_vm7, %v3567_v42  ;;  %v4065_v38 = vadd.f32 %v2929_v33, %v2091_v50  ;;  %v3897_v52 = vpop.f32.mrb[22].mxu1 }
 0x213   : > { %v4036_v26 = vpop.f32.mrb[24].mxu0  ;;  %v3037_v59 = vadd.f32 %v4064_v39, %v5234_v27  ;;  %v4066_v23 = vadd.f32 %v4033_v17, %v3897_v52  ;;  %v2094_v51 = vpop.f32.mrb[23].mxu1 }
 0x214   : > { %v2945_v6 = vpop.f32.mrb[25].mxu0  ;;  %v3035_v24 = vadd.f32 %v4065_v38, %v5234_v27  ;;  %v4067_v29 = vadd.f32 %v2932_v61, %v2094_v51 }
 0x215   : > { %v4037_v22 = vpop.f32.mrb[26].mxu0  ;;  %v3572_v13 = vpack.c.bf16 %v3037_v59, %v3037_v59  ;;  %v3038_v2 = vadd.f32 %v4066_v23, %v5234_v27 }
 0x216   : > { %v2948_v1 = vpop.f32.mrb[27].mxu0  ;;  %v3570_v54 = vpack.c.bf16 %v3035_v24, %v3035_v24  ;;  %v3036_v3 = vadd.f32 %v4067_v29, %v5234_v27 }
 0x217   : > { %3198 = vst.msk [vmem:[%s5245_s14 + $0x58] sm:$0xf] %vm3175_vm7, %v3572_v13  ;;  %v3573_v63 = vpack.c.bf16 %v3038_v2, %v3038_v2 }
 0x218   : > { %3196 = vst.msk [vmem:[%s5245_s14 + $0x50] sm:$0xf] %vm3175_vm7, %v3570_v54  ;;  %v3571_v37 = vpack.c.bf16 %v3036_v3, %v3036_v3  ;;  %v3900_v7 = vpop.f32.mrb[24].mxu1 }
 0x219   : > { %3199 = vst.msk [vmem:[%s5245_s14 + $0x5c] sm:$0xf] %vm3175_vm7, %v3573_v63  ;;  %v4068_v28 = vadd.f32 %v4036_v26, %v3900_v7  ;;  %v2107_v47 = vpop.f32.mrb[25].mxu1 }
 0x21a   : > { %3197 = vst.msk [vmem:[%s5245_s14 + $0x54] sm:$0xf] %vm3175_vm7, %v3571_v37  ;;  %v4069_v4 = vadd.f32 %v2945_v6, %v2107_v47  ;;  %v3901_v55 = vpop.f32.mrb[26].mxu1 }
 0x21b   : > { %v4040_v11 = vpop.f32.mrb[28].mxu0  ;;  %v3041_v31 = vadd.f32 %v4068_v28, %v5234_v27  ;;  %v4070_v25 = vadd.f32 %v4037_v22, %v3901_v55  ;;  %v2110_v44 = vpop.f32.mrb[27].mxu1 }
 0x21c   : > { %v2961_v20 = vpop.f32.mrb[29].mxu0  ;;  %v3039_v15 = vadd.f32 %v4069_v4, %v5234_v27  ;;  %v4071_v60 = vadd.f32 %v2948_v1, %v2110_v44 }
 0x21d   : > { %v4041_v53 = vpop.f32.mrb[30].mxu0  ;;  %v3576_v40 = vpack.c.bf16 %v3041_v31, %v3041_v31  ;;  %v3042_v62 = vadd.f32 %v4070_v25, %v5234_v27 }
 0x21e   : > { %v2964_v9 = vpop.f32.mrb[31].mxu0  ;;  %v3574_v43 = vpack.c.bf16 %v3039_v15, %v3039_v15  ;;  %v3040_v48 = vadd.f32 %v4071_v60, %v5234_v27 }
 0x21f   : > { %3202 = vst.msk [vmem:[%s5245_s14 + $0x68] sm:$0xf] %vm3175_vm7, %v3576_v40  ;;  %v3577_v32 = vpack.c.bf16 %v3042_v62, %v3042_v62 }
 0x220   : > { %3200 = vst.msk [vmem:[%s5245_s14 + $0x60] sm:$0xf] %vm3175_vm7, %v3574_v43  ;;  %v3575_v56 = vpack.c.bf16 %v3040_v48, %v3040_v48  ;;  %v3904_v49 = vpop.f32.mrb[28].mxu1 }
 0x221   : > { %3203 = vst.msk [vmem:[%s5245_s14 + $0x6c] sm:$0xf] %vm3175_vm7, %v3577_v32  ;;  %v4072_v16 = vadd.f32 %v4040_v11, %v3904_v49  ;;  %v2123_v34 = vpop.f32.mrb[29].mxu1 }
 0x222   : > { %3201 = vst.msk [vmem:[%s5245_s14 + $0x64] sm:$0xf] %vm3175_vm7, %v3575_v56  ;;  %v4073_v46 = vadd.f32 %v2961_v20, %v2123_v34  ;;  %v3905_v10 = vpop.f32.mrb[30].mxu1 }
 0x223   : > { %v3045_v18 = vadd.f32 %v4072_v16, %v5234_v27  ;;  %v4074_v58 = vadd.f32 %v4041_v53, %v3905_v10  ;;  %v2126_v30 = vpop.f32.mrb[31].mxu1 }
 0x224   : > { %v3043_v0 = vadd.f32 %v4073_v46, %v5234_v27  ;;  %v4075_v33 = vadd.f32 %v2964_v9, %v2126_v30 }
 0x225   : > { %v3580_v36 = vpack.c.bf16 %v3045_v18, %v3045_v18  ;;  %v3046_v41 = vadd.f32 %v4074_v58, %v5234_v27 }
 0x226   : > { %v3578_v14 = vpack.c.bf16 %v3043_v0, %v3043_v0  ;;  %v3044_v17 = vadd.f32 %v4075_v33, %v5234_v27 }
 0x227   : > { %3206 = vst.msk [vmem:[%s5245_s14 + $0x78] sm:$0xf] %vm3175_vm7, %v3580_v36  ;;  %v3581_v12 = vpack.c.bf16 %v3046_v41, %v3046_v41 }
 0x228   : > { %3204 = vst.msk [vmem:[%s5245_s14 + $0x70] sm:$0xf] %vm3175_vm7, %v3578_v14  ;;  %v3579_v21 = vpack.c.bf16 %v3044_v17, %v3044_v17 }
 0x229   : > { %3207 = vst.msk [vmem:[%s5245_s14 + $0x7c] sm:$0xf] %vm3175_vm7, %v3581_v12 }
 0x22a   : > { %3205 = vst.msk [vmem:[%s5245_s14 + $0x74] sm:$0xf] %vm3175_vm7, %v3579_v21 }
 0x22b PF: > { %s17_s26 = sadd.s32 1, %s4352_s26   ;;  %s5397_s24 = smov %s4348_s25 }
 0x22c   : > { %p14_p5 = scmp.ge.s32.totalorder %s17_s26, 4   ;;  %s5398_s25 = smov %s5400_s27 }
 0x22e   :  { %16 = sbr.rel (!%p14_p5) target bundleno = 2 (0x2), region = 84 }

// kernel: _lambda_.18
= control target key start
LH: loop header
LB: loop body
LE: loop exit
PB: predicated region body
PF: predicated region fallthrough
CT: control target
= control target key end

     0   :  { %s5183_s27 = smov 0   ;;  %s5185_s28 = smov 0   ;;  %s6322_s0 = inlined_call_operand.vmem [shape: bf16[2,16,16,64], index: 0, kind: input, shape index: {}, may-alias: {0,1,2}]   ;;  %s6323_s1 = inlined_call_operand.vmem [shape: bf16[2,16,16,64], index: 1, kind: input, shape index: {}, may-alias: {0,1,2}]   ;;  %s6324_s2 = inlined_call_operand.vmem [shape: bf16[2,16,16,64], index: 2, kind: input, shape index: {}, may-alias: {0,1,2}]   ;;  %s6325_s3 = inlined_call_operand.vmem [shape: f32[1,64], index: 3, kind: input, shape index: {}]   ;;  %s6326_s4 = inlined_call_operand.vmem [shape: f32[1,64], index: 4, kind: input, shape index: {}]   ;;  %s6327_s5 = inlined_call_operand.vmem [shape: bf16[576,64], index: 5, kind: input, shape index: {}]   ;;  %s6328_s6 = inlined_call_operand.vmem [shape: f32[1,64], index: 6, kind: input, shape index: {}]   ;;  %s6329_s7 = inlined_call_operand.vmem [shape: bf16[2,16,16,64], index: 7, kind: output, shape index: {0}]   ;;  %s6330_s8 = inlined_call_operand.vmem [shape: f32[2,1,8,64], index: 8, kind: output, shape index: {1}]  }
   0x1   :  { %s5187_s29 = smov 0  }
   0x2 LB: > { %s31_s30 = sadd.s32 1, %s5132_s28  ;;  %p3892_p0 = scmp.ge.s32.totalorder %s5136_s29, 1  ;;  %s5136_s29 = sphi %s5187_s29, %s19_s29   ;;  %s5132_s28 = sphi %s5185_s28, %s6350_s28   ;;  %s5128_s27 = sphi %s5183_s27, %s6349_s27  }
   0x3   : > { %p33_p1 = scmp.ge.s32.totalorder %s31_s30, 2  ;;  %p353_p2 = scmp.lt.s32.totalorder %s5136_s29, 3 }
   0x5   : > { %s6352_s30 = smov (%p33_p1, %s31_s30), 0  ;;  %p354_p3 = pnand %p3892_p0, %p353_p2 }
   0x7   : > { %357 = sbr.rel (%p354_p3) target bundleno = 594 (0x252), region = 48 }
   0xe   : > { %v5072_v0 = vld [vmem:[%s6327_s5 + $0x80] sm:$0xff]   ;;  %p434_p4 = scmp.lt.s32.totalorder %s5128_s27, 1  ;;  %v5074_v2 = vld [vmem:[%s6327_s5 + $0x88] sm:$0xff]   ;;  %v5076_v4 = vld [vmem:[%s6327_s5 + $0x90] sm:$0xff]   ;;  %vm881_vm0 = vcmask 1040384   ;;  %vm1209_vm4 = vcmask 523264  }
   0xf   : > { %v5073_v1 = vld [vmem:[%s6327_s5 + $0x20] sm:$0xff]   ;;  %4584 = vmatprep.subr.bf16.mxu0 %v5072_v0  ;;  %v5075_v3 = vld [vmem:[%s6327_s5 + $0x28] sm:$0xff]   ;;  %v5077_v5 = vld [vmem:[%s6327_s5 + $0x30] sm:$0xff]   ;;  %vm882_vm1 = vsmask.f32 256  ;;  %vm1668_vm5 = vcmask 1046528  }
  0x10   : > { %s6354_s27 = smov (!%p434_p4, %s5128_s27), 1  ;;  %4424 = vmatprep.subr.bf16.mxu1 %v5073_v1  ;;  %4585 = vmatpush3.bf16.msra.mxu0 %v5072_v0  ;;  %v5078_v6 = vld [vmem:[%s6327_s5 + $0x98] sm:$0xff]   ;;  %v5240_v7 = vld [vmem:[%s6325_s3] ss:$0 sm:$0xff]  ;;  %vm992_vm2 = vsmask.f32 7424  ;;  %vm5289_vm3 = vmand %vm881_vm0, %vm882_vm1 }
  0x11   : > { %4425 = vmatpush3.bf16.msra.mxu1 %v5073_v1  ;;  %4586 = vmatprep.subr.bf16.mxu0 %v5074_v2  ;;  %s5219_s19 = sshll.u32 %s6354_s27, 7  ;;  %v5079_v9 = vld [vmem:[%s6327_s5 + $0x38] sm:$0xff]   ;;  %v5250_v14 = vld [vmem:[%s6326_s4] ss:$0 sm:$0xff]  ;;  %v5111_v0 = vld [vmem:[%s6327_s5 + $0x88] sm:$0xff]   ;;  %vm3676_vm6 = vcmask 519168  }
  0x12   : > { %4426 = vmatprep.subr.bf16.mxu1 %v5075_v3  ;;  %s5228_s24 = scalar_lea.vmem %s6323_s1, %s5219_s19  ;;  %s442_s9 = scalar_lea.vmem %s6322_s0, %s5219_s19  ;;  %v5260_v24 = vld [vmem:[%s6327_s5 + $0xa0] sm:$0xff]   ;;  %vm3545_vm7 = vcmask 1041408  }
  0x13   : > { %v4161_v8 = vld [vmem:[%s5228_s24] sm:$0xff]   ;;  %v4229_v12 = vld [vmem:[%s5228_s24 + $0x8] sm:$0xff]   ;;  %v4230_v25 = vld [vmem:[%s5228_s24 + $0x10] sm:$0xff]   ;;  %s4122_s14 = sadd.s32 120, %s5219_s19  ;;  %s6106_s11 = scalar_lea.vmem %s6329_s7, %s5219_s19 }
  0x14   : > { %4587 = vmatpush3.bf16.msra.mxu0 %v5074_v2  ;;  %v4162_v10 = vunpack.c.l.bf16 %v4161_v8  ;;  %v4163_v11 = vunpack.c.h.bf16 %v4161_v8  ;;  %v4157_v13 = vld [vmem:[%s442_s9] sm:$0xff]   ;;  %v4166_v15 = vunpack.c.l.bf16 %v4229_v12  ;;  %v4167_v16 = vunpack.c.h.bf16 %v4229_v12  ;;  %v4231_v35 = vld [vmem:[%s5228_s24 + $0x18] sm:$0xff]   ;;  %s470_s20 = scalar_lea.vmem %s6324_s2, %s4122_s14  ;;  %s3901_s19 = sshll.u32 %s6354_s27, 3 }
  0x15   : > { %4427 = vmatpush3.bf16.msra.mxu1 %v5075_v3  ;;  %4588 = vmatprep.subr.bf16.mxu0 %v5076_v4  ;;  %v4158_v17 = vunpack.c.l.bf16 %v4157_v13  ;;  %v4159_v18 = vunpack.c.h.bf16 %v4157_v13  ;;  %v5269_v29 = vld [vmem:[%s6327_s5] sm:$0xff]   ;;  %v4170_v30 = vunpack.c.l.bf16 %v4230_v25  ;;  %v4171_v34 = vunpack.c.h.bf16 %v4230_v25 }
  0x16   : > { %4428 = vmatprep.subr.bf16.mxu1 %v5077_v5  ;;  %v588_v19 = vmul.f32 %v4162_v10, %v5240_v7  ;;  %v589_v20 = vmul.f32 %v4163_v11, %v5240_v7  ;;  %v590_v21 = vmul.f32 %v4166_v15, %v5240_v7  ;;  %v591_v22 = vmul.f32 %v4167_v16, %v5240_v7  ;;  %v5283_v52 = vld [vmem:[%s5228_s24 + $0x20] sm:$0xff]  }
  0x17   : > { %v506_v23 = vmul.f32 %v4158_v17, %v5240_v7  ;;  %v507_v28 = vmul.f32 %v4159_v18, %v5240_v7  ;;  %v592_v39 = vmul.f32 %v4170_v30, %v5240_v7  ;;  %v593_v43 = vmul.f32 %v4171_v34, %v5240_v7 }
  0x18   : > { %4589 = vmatpush3.bf16.msra.mxu0 %v5076_v4  ;;  %v620_v26 = vadd.f32 %v5250_v14, %v588_v19  ;;  %v621_v27 = vadd.f32 %v5250_v14, %v589_v20  ;;  %v622_v31 = vadd.f32 %v5250_v14, %v590_v21  ;;  %v623_v32 = vadd.f32 %v5250_v14, %v591_v22 }
  0x19   : > { %4429 = vmatpush3.bf16.msra.mxu1 %v5077_v5  ;;  %4590 = vmatprep.subr.bf16.mxu0 %v5078_v6  ;;  %v514_v33 = vadd.f32 %v5250_v14, %v506_v23  ;;  %v515_v38 = vadd.f32 %v5250_v14, %v507_v28  ;;  %v624_v46 = vadd.f32 %v5250_v14, %v592_v39  ;;  %v4174_v47 = vunpack.c.l.bf16 %v4231_v35 }
  0x1a   : > { %4430 = vmatprep.subr.bf16.mxu1 %v5079_v9  ;;  %v652_v36 = vmax.f32 %v620_v26, 0.0  ;;  %v653_v37 = vmax.f32 %v621_v27, 0.0  ;;  %v654_v40 = vmax.f32 %v622_v31, 0.0  ;;  %v655_v41 = vmax.f32 %v623_v32, 0.0 }
  0x1b   : > { %v516_v42 = vmax.f32 %v514_v33, 0.0  ;;  %v517_v45 = vmax.f32 %v515_v38, 0.0  ;;  %v625_v50 = vadd.f32 %v5250_v14, %v593_v43  ;;  %v4175_v51 = vunpack.c.h.bf16 %v4231_v35 }
  0x1c   : > { %4591 = vmatpush3.bf16.msra.mxu0 %v5078_v6  ;;  %v702_v44 = vpack.c.bf16 %v653_v37, %v652_v36  ;;  %v703_v48 = vpack.c.bf16 %v655_v41, %v654_v40  ;;  %v656_v56 = vmax.f32 %v624_v46, 0.0  ;;  %v594_v60 = vmul.f32 %v4174_v47, %v5240_v7  ;;  %v4233_v46 = vld [vmem:[%s5228_s24 + $0x28] sm:$0xff]  }
  0x1d   : > { %4431 = vmatpush3.bf16.msra.mxu1 %v5079_v9  ;;  %4624 = vmatprep.subr.bf16.mxu0 %v5260_v24  ;;  %v522_v49 = vmul.f32 0.0, %v516_v42  ;;  %v523_v55 = vmul.f32 0.0, %v517_v45  ;;  %v657_v59 = vmax.f32 %v625_v50, 0.0  ;;  %v595_v63 = vmul.f32 %v4175_v51, %v5240_v7  ;;  %v5082_v45 = vld [vmem:[%s6327_s5 + $0xa8] sm:$0xff]  }
  0x1e   : > { %4464 = vmatprep.subr.bf16.mxu1 %v5269_v29  ;;  %v727_v53 = vshrl.u32 %v702_v44, 16  ;;  %v730_v54 = vshll.u32 %v702_v44, 16  ;;  %v734_v57 = vshrl.u32 %v703_v48, 16  ;;  %v737_v58 = vshll.u32 %v703_v48, 16 }
  0x1f   : > { %v701_v62 = vpack.c.bf16 %v523_v55, %v522_v49  ;;  %v704_v2 = vpack.c.bf16 %v657_v59, %v656_v56  ;;  %v626_v3 = vadd.f32 %v5250_v14, %v594_v60  ;;  %v4178_v4 = vunpack.c.l.bf16 %v5283_v52  ;;  %v5083_v59 = vld [vmem:[%s6327_s5 + $0x8] sm:$0xff]  }
  0x20   : > { %v729_v61 = vrot.slane %v727_v53, 7  ;;  %v736_v1 = vrot.slane %v734_v57, 7  ;;  %v4179_v13 = vunpack.c.h.bf16 %v5283_v52  ;;  %v627_v43 = vadd.f32 %v5250_v14, %v595_v63 }
  0x21   : > { %v720_v8 = vshrl.u32 %v701_v62, 16  ;;  %v723_v9 = vshll.u32 %v701_v62, 16  ;;  %v741_v31 = vshrl.u32 %v704_v2, 16  ;;  %v744_v32 = vshll.u32 %v704_v2, 16 }
  0x22   : > { %v732_v5 = vor.u32 %v730_v54, %v729_v61  ;;  %v5297_v6 = vsel %vm5289_vm3, %v729_v61, 0  ;;  %v739_v11 = vor.u32 %v737_v58, %v736_v1  ;;  %v5302_v12 = vsel %vm5289_vm3, %v736_v1, 0  ;;  %v4234_v1 = vld [vmem:[%s5228_s24 + $0x30] sm:$0xff]  }
  0x23   : > { %v1013_v10 = vshll.u32 %v5297_v6, 16  ;;  %v1673_v16 = vrot.slane %v5297_v6, 1  ;;  %v1025_v17 = vshll.u32 %v5302_v12, 16  ;;  %v722_v18 = vrot.slane %v720_v8, 7 }
  0x24   : > { %v5307_v15 = vsel %vm5289_vm3, 0, %v732_v5  ;;  %v5315_v21 = vsel %vm5289_vm3, 0, %v739_v11  ;;  %v1676_v22 = vrot.slane %v5302_v12, 1  ;;  %v743_v40 = vrot.slane %v741_v31, 7  ;;  %v5086_v31 = vld [vmem:[%s6327_s5 + $0x10] sm:$0xff]  }
  0x25   : > { %v1006_v19 = vshrl.u32 %v5307_v15, 16  ;;  %v1008_v20 = vshll.u32 %v5307_v15, 16  ;;  %v1015_v23 = vrot.slane %v1013_v10, 1  ;;  %v1018_v25 = vshrl.u32 %v5315_v21, 16 }
  0x26   : > { %v1020_v26 = vshll.u32 %v5315_v21, 16  ;;  %v725_v27 = vor.u32 %v723_v9, %v722_v18  ;;  %v5322_v30 = vsel %vm5289_vm3, %v722_v18, 0  ;;  %v1027_v34 = vrot.slane %v1025_v17, 1 }
  0x27   : > { %v1010_v28 = vrot.slane %v1008_v20, 1  ;;  %v1001_v36 = vshll.u32 %v5322_v30, 16  ;;  %v658_v44 = vmax.f32 %v626_v3, 0.0  ;;  %v746_v49 = vor.u32 %v744_v32, %v743_v40 }
  0x28   : > { %v1022_v33 = vrot.slane %v1020_v26, 1  ;;  %v5326_v35 = vsel %vm5289_vm3, 0, %v725_v27  ;;  %v5339_v50 = vsel %vm5289_vm3, %v743_v40, 0  ;;  %v659_v53 = vmax.f32 %v627_v43, 0.0 }
  0x29   : > { %v1011_v37 = vor.u32 %v1010_v28, %v1006_v19  ;;  %v994_v38 = vshrl.u32 %v5326_v35, 16  ;;  %v996_v39 = vshll.u32 %v5326_v35, 16  ;;  %v1003_v42 = vrot.slane %v1001_v36, 1  ;;  %v5085_v28 = vld [vmem:[%s6327_s5 + $0xb8] sm:$0xff]  }
  0x2a   : > { %v1023_v41 = vor.u32 %v1022_v33, %v1018_v25  ;;  %v1037_v52 = vshll.u32 %v5339_v50, 16  ;;  %v596_v54 = vmul.f32 %v4178_v4, %v5240_v7  ;;  %v5351_v56 = vsel %vm5289_vm3, 0, %v746_v49 }
  0x2b   : > { %v1016_v47 = vsel %vm992_vm2, %v1011_v37, %v1015_v23  ;;  %v998_v48 = vrot.slane %v996_v39, 1  ;;  %v597_v57 = vmul.f32 %v4179_v13, %v5240_v7  ;;  %v4182_v58 = vunpack.c.l.bf16 %v4233_v46  ;;  %v4235_v13 = vld [vmem:[%s5228_s24 + $0x38] sm:$0xff]  }
  0x2c   : > { %4592 = vmatprep.mubr.msk.bf16.mxu0 %vm1209_vm4, %v1016_v47  ;;  %v5343_v51 = vsel %vm992_vm2, %v1023_v41, %v1027_v34  ;;  %v1030_v60 = vshrl.u32 %v5351_v56, 16  ;;  %v1032_v61 = vshll.u32 %v5351_v56, 16  ;;  %v1039_v62 = vrot.slane %v1037_v52, 1 }
  0x2d   : > { %4593 = vmatmul.mubr.msk.bf16.vlgmr.msra.gmra.mrb[0].mxu0 %vm1209_vm4, %v5343_v51  ;;  %v999_v55 = vor.u32 %v998_v48, %v994_v38  ;;  %v705_v63 = vpack.c.bf16 %v659_v53, %v658_v44  ;;  %v628_v3 = vadd.f32 %v5250_v14, %v596_v54  ;;  %v629_v4 = vadd.f32 %v5250_v14, %v597_v57  ;;  %v5088_v48 = vld [vmem:[%s6327_s5 + $0x18] sm:$0xff]  }
  0x2e   : > { %4625 = vmatpush3.bf16.msra.mxu0 %v5260_v24  ;;  %v4183_v5 = vunpack.c.h.bf16 %v4233_v46  ;;  %v5084_v24 = vld [vmem:[%s6327_s5 + $0xb0] sm:$0xff]   ;;  %v1034_v8 = vrot.slane %v1032_v61, 1  ;;  %v598_v11 = vmul.f32 %v4182_v58, %v5240_v7  ;;  %v4186_v20 = vunpack.c.l.bf16 %v4234_v1 }
  0x2f   : > { %v1004_v2 = vsel %vm992_vm2, %v999_v55, %v1003_v42  ;;  %4626 = vmatprep.subr.bf16.mxu0 %v5082_v45  ;;  %v748_v9 = vshrl.u32 %v705_v63, 16  ;;  %v751_v10 = vshll.u32 %v705_v63, 16  ;;  %v660_v17 = vmax.f32 %v628_v3, 0.0 }
  0x30   : > { %4432 = vmatprep.mubr.msk.bf16.mxu1 %vm1209_vm4, %v1004_v2  ;;  %v661_v18 = vmax.f32 %v629_v4, 0.0  ;;  %v599_v19 = vmul.f32 %v4183_v5, %v5240_v7  ;;  %v1035_v23 = vor.u32 %v1034_v8, %v1030_v60  ;;  %v630_v26 = vadd.f32 %v5250_v14, %v598_v11  ;;  %v5410_v60 = vld [vmem:[%s6327_s5 + $0xc0] sm:$0xff]  }
  0x31   : > { %4433 = vmatmul.mubr.msk.bf16.vlgmr.msra.gmra.mrb[0].mxu1 %vm1209_vm4, %v1016_v47  ;;  %v750_v25 = vrot.slane %v748_v9, 7  ;;  %v4187_v27 = vunpack.c.h.bf16 %v4234_v1  ;;  %v600_v33 = vmul.f32 %v4186_v20, %v5240_v7  ;;  %v4190_v34 = vunpack.c.l.bf16 %v4235_v13  ;;  %v5429_v11 = vld [vmem:[%s6327_s5 + $0x40] sm:$0xff]  }
  0x32   : > { %4465 = vmatpush3.bf16.msra.mxu1 %v5269_v29  ;;  %4436 = vmatprep.mubr.msk.bf16.mxu1 %vm1209_vm4, %v5343_v51  ;;  %v706_v32 = vpack.c.bf16 %v661_v18, %v660_v17  ;;  %v631_v29 = vadd.f32 %v5250_v14, %v599_v19  ;;  %v5385_v36 = vsel %vm992_vm2, %v1035_v23, %v1039_v62  ;;  %v662_v39 = vmax.f32 %v630_v26, 0.0 }
  0x33   : > { %4627 = vmatpush3.bf16.msra.mxu0 %v5082_v45  ;;  %4466 = vmatprep.subr.bf16.mxu1 %v5083_v59  ;;  %v753_v37 = vor.u32 %v751_v10, %v750_v25  ;;  %v5389_v38 = vsel %vm5289_vm3, %v750_v25, 0  ;;  %v601_v45 = vmul.f32 %v4187_v27, %v5240_v7  ;;  %v632_v46 = vadd.f32 %v5250_v14, %v600_v33 }
  0x34   : > { %4628 = vmatprep.subr.bf16.mxu0 %v5084_v24  ;;  %4596 = vmatprep.mubr.msk.bf16.mxu0 %vm1209_vm4, %v5385_v36  ;;  %v1049_v40 = vshll.u32 %v5389_v38, 16  ;;  %v755_v41 = vshrl.u32 %v706_v32, 16  ;;  %v758_v42 = vshll.u32 %v706_v32, 16  ;;  %v663_v43 = vmax.f32 %v631_v29, 0.0 }
  0x35   : > { %v5396_v44 = vsel %vm5289_vm3, 0, %v753_v37  ;;  %v4191_v47 = vunpack.c.h.bf16 %v4235_v13  ;;  %v633_v57 = vadd.f32 %v5250_v14, %v601_v45  ;;  %v664_v58 = vmax.f32 %v632_v46, 0.0 }
  0x36   : > { %4467 = vmatpush3.bf16.msra.mxu1 %v5083_v59  ;;  %v1042_v49 = vshrl.u32 %v5396_v44, 16  ;;  %v1044_v52 = vshll.u32 %v5396_v44, 16  ;;  %v1051_v53 = vrot.slane %v1049_v40, 1  ;;  %v757_v54 = vrot.slane %v755_v41, 7 }
  0x37   : > { %4629 = vmatpush3.bf16.msra.mxu0 %v5084_v24  ;;  %4468 = vmatprep.subr.bf16.mxu1 %v5086_v31  ;;  %v707_v55 = vpack.c.bf16 %v663_v43, %v662_v39  ;;  %v602_v59 = vmul.f32 %v4190_v34, %v5240_v7  ;;  %v603_v1 = vmul.f32 %v4191_v47, %v5240_v7  ;;  %v665_v5 = vmax.f32 %v633_v57, 0.0  ;;  %v4236_v43 = vld [vmem:[%s5228_s24 + $0x40] sm:$0xff]  }
  0x38   : > { %4630 = vmatprep.subr.bf16.mxu0 %v5085_v28  ;;  %v1046_v61 = vrot.slane %v1044_v52, 1  ;;  %v760_v62 = vor.u32 %v758_v42, %v757_v54  ;;  %v5416_v63 = vsel %vm5289_vm3, %v757_v54, 0  ;;  %v1672_v32 = vrot.slane %v5307_v15, 1 }
  0x39   : > { %4437 = vmatmul.mubr.msk.bf16.gmra.mrb[4].mxu1 %vm1209_vm4, %v5385_v36  ;;  %v1061_v2 = vshll.u32 %v5416_v63, 16  ;;  %v762_v3 = vshrl.u32 %v707_v55, 16  ;;  %v765_v4 = vshll.u32 %v707_v55, 16  ;;  %v634_v9 = vadd.f32 %v5250_v14, %v602_v59 }
  0x3a   : > { %4469 = vmatpush3.bf16.msra.mxu1 %v5086_v31  ;;  %v1047_v24 = vor.u32 %v1046_v61, %v1042_v49  ;;  %v5422_v8 = vsel %vm5289_vm3, 0, %v760_v62  ;;  %v635_v10 = vadd.f32 %v5250_v14, %v603_v1  ;;  %v708_v23 = vpack.c.bf16 %v665_v5, %v664_v58 }
  0x3b   : > { %4631 = vmatpush3.bf16.msra.mxu0 %v5085_v28  ;;  %4470 = vmatprep.subr.bf16.mxu1 %v5088_v48  ;;  %v1054_v13 = vshrl.u32 %v5422_v8, 16  ;;  %v1056_v17 = vshll.u32 %v5422_v8, 16  ;;  %v1063_v18 = vrot.slane %v1061_v2, 1  ;;  %v764_v19 = vrot.slane %v762_v3, 7 }
  0x3c   : > { %4664 = vmatprep.subr.bf16.mxu0 %v5410_v60  ;;  %v5435_v20 = vsel %vm992_vm2, %v1047_v24, %v1051_v53  ;;  %v666_v25 = vmax.f32 %v634_v9, 0.0  ;;  %v667_v26 = vmax.f32 %v635_v10, 0.0  ;;  %v769_v33 = vshrl.u32 %v708_v23, 16 }
  0x3d   : > { %4597 = vmatmul.mubr.msk.bf16.gmra.mrb[4].mxu0 %vm1209_vm4, %v5435_v20  ;;  %v1058_v27 = vrot.slane %v1056_v17, 1  ;;  %v767_v28 = vor.u32 %v765_v4, %v764_v19  ;;  %v5441_v31 = vsel %vm5289_vm3, %v764_v19, 0  ;;  %4440 = vmatprep.mubr.msk.bf16.mxu1 %vm1209_vm4, %v5435_v20  ;;  %v772_v34 = vshll.u32 %v708_v23, 16 }
  0x3e   : > { %v1073_v29 = vshll.u32 %v5441_v31, 16  ;;  %v709_v37 = vpack.c.bf16 %v667_v26, %v666_v25  ;;  %4471 = vmatpush3.bf16.msra.mxu1 %v5088_v48  ;;  %v5454_v41 = vsel %vm1668_vm5, %v1672_v32, %v1673_v16  ;;  %v1675_v42 = vrot.slane %v5315_v21, 1  ;;  %v4237_v25 = vld [vmem:[%s5228_s24 + $0x48] sm:$0xff]  }
  0x3f   : > { %v1059_v39 = vor.u32 %v1058_v27, %v1054_v13  ;;  %v5449_v40 = vsel %vm5289_vm3, 0, %v767_v28  ;;  %4504 = vmatprep.subr.bf16.mxu1 %v5429_v11  ;;  %v771_v48 = vrot.slane %v769_v33, 7  ;;  %v4194_v57 = vunpack.c.l.bf16 %v4236_v43 }
  0x40   : > { %v1066_v45 = vshrl.u32 %v5449_v40, 16  ;;  %v1068_v46 = vshll.u32 %v5449_v40, 16  ;;  %v1075_v47 = vrot.slane %v1073_v29, 1  ;;  %v776_v52 = vshrl.u32 %v709_v37, 16  ;;  %v4238_v29 = vld [vmem:[%s5228_s24 + $0x50] sm:$0xff]  }
  0x41   : > { %v5462_v49 = vsel %vm992_vm2, %v1059_v39, %v1063_v18  ;;  %v779_v53 = vshll.u32 %v709_v37, 16  ;;  %v5467_v6 = vsel %vm1668_vm5, %v1675_v42, %v1676_v22  ;;  %v774_v54 = vor.u32 %v772_v34, %v771_v48 }
  0x42   : > { %4600 = vmatprep.mubr.msk.bf16.mxu0 %vm1209_vm4, %v5462_v49  ;;  %v1070_v16 = vrot.slane %v1068_v46, 1  ;;  %4441 = vmatmul.mubr.msk.bf16.gmra.mrb[8].mxu1 %vm1209_vm4, %v5462_v49  ;;  %v5475_v55 = vsel %vm5289_vm3, %v771_v48, 0  ;;  %v778_v59 = vrot.slane %v776_v52, 7  ;;  %v4195_v12 = vunpack.c.h.bf16 %v4236_v43 }
  0x43   : > { %v1085_v58 = vshll.u32 %v5475_v55, 16  ;;  %v1678_v22 = vrot.slane %v5351_v56, 1  ;;  %v5481_v62 = vsel %vm5289_vm3, 0, %v774_v54  ;;  %v604_v1 = vmul.f32 %v4194_v57, %v5240_v7 }
  0x44   : > { %v1071_v61 = vor.u32 %v1070_v16, %v1066_v45  ;;  %v1679_v2 = vrot.slane %v5339_v50, 1  ;;  %v1078_v3 = vshrl.u32 %v5481_v62, 16  ;;  %v1080_v4 = vshll.u32 %v5481_v62, 16 }
  0x45   : > { %v1087_v5 = vrot.slane %v1085_v58, 1  ;;  %v781_v24 = vor.u32 %v779_v53, %v778_v59  ;;  %v5492_v10 = vsel %vm5289_vm3, %v778_v59, 0  ;;  %v605_v13 = vmul.f32 %v4195_v12, %v5240_v7 }
  0x46   : > { %v5488_v9 = vsel %vm992_vm2, %v1071_v61, %v1075_v47  ;;  %v636_v17 = vadd.f32 %v5250_v14, %v604_v1  ;;  %v1082_v50 = vrot.slane %v1080_v4, 1  ;;  %v1097_v19 = vshll.u32 %v5492_v10, 16  ;;  %v4239_v4 = vld [vmem:[%s5228_s24 + $0x58] sm:$0xff]  }
  0x47   : > { %4601 = vmatmul.mubr.msk.bf16.gmra.mrb[8].mxu0 %vm1209_vm4, %v5488_v9  ;;  %v5500_v18 = vsel %vm5289_vm3, 0, %v781_v24  ;;  %4444 = vmatprep.mubr.msk.bf16.mxu1 %vm1209_vm4, %v5488_v9  ;;  %v5506_v23 = vsel %vm1668_vm5, %v1678_v22, %v1679_v2  ;;  %v637_v28 = vadd.f32 %v5250_v14, %v605_v13  ;;  %v1681_v37 = vrot.slane %v5396_v44, 1 }
  0x48   : > { %v1090_v26 = vshrl.u32 %v5500_v18, 16  ;;  %v1092_v27 = vshll.u32 %v5500_v18, 16  ;;  %v668_v32 = vmax.f32 %v636_v17, 0.0  ;;  %v1083_v33 = vor.u32 %v1082_v50, %v1078_v3 }
  0x49   : > { %v1099_v34 = vrot.slane %v1097_v19, 1  ;;  %v1682_v39 = vrot.slane %v5389_v38, 1  ;;  %v669_v43 = vmax.f32 %v637_v28, 0.0  ;;  %v4198_v45 = vunpack.c.l.bf16 %v4237_v25 }
  0x4a   : > { %v1094_v42 = vrot.slane %v1092_v27, 1  ;;  %v4199_v46 = vunpack.c.h.bf16 %v4237_v25  ;;  %v5516_v47 = vsel %vm992_vm2, %v1083_v33, %v1087_v5  ;;  %v4202_v52 = vunpack.c.l.bf16 %v4238_v29 }
  0x4b   : > { %v5519_v48 = vsel %vm1668_vm5, %v1681_v37, %v1682_v39  ;;  %v4203_v53 = vunpack.c.h.bf16 %v4238_v29  ;;  %4604 = vmatprep.mubr.msk.bf16.mxu0 %vm1209_vm4, %v5516_v47  ;;  %4445 = vmatmul.mubr.msk.bf16.gmra.mrb[12].mxu1 %vm1209_vm4, %v5516_v47  ;;  %v710_v38 = vpack.c.bf16 %v669_v43, %v668_v32  ;;  %v606_v54 = vmul.f32 %v4198_v45, %v5240_v7  ;;  %v4240_v32 = vld [vmem:[%s5228_s24 + $0x60] sm:$0xff]  }
  0x4c   : > { %v1095_v16 = vor.u32 %v1094_v42, %v1090_v26  ;;  %v1684_v57 = vrot.slane %v5422_v8, 1  ;;  %v607_v58 = vmul.f32 %v4199_v46, %v5240_v7  ;;  %v608_v59 = vmul.f32 %v4202_v52, %v5240_v7 }
  0x4d   : > { %v609_v12 = vmul.f32 %v4203_v53, %v5240_v7  ;;  %v1685_v22 = vrot.slane %v5416_v63, 1  ;;  %v783_v1 = vshrl.u32 %v710_v38, 16  ;;  %v786_v2 = vshll.u32 %v710_v38, 16 }
  0x4e   : > { %v5532_v61 = vsel %vm992_vm2, %v1095_v16, %v1099_v34  ;;  %v638_v3 = vadd.f32 %v5250_v14, %v606_v54  ;;  %v639_v5 = vadd.f32 %v5250_v14, %v607_v58  ;;  %v640_v24 = vadd.f32 %v5250_v14, %v608_v59  ;;  %v5089_v58 = vld [vmem:[%s6327_s5 + $0xc8] sm:$0xff]  }
  0x4f   : > { %4605 = vmatmul.mubr.msk.bf16.gmra.mrb[12].mxu0 %vm1209_vm4, %v5532_v61  ;;  %4448 = vmatprep.mubr.msk.bf16.mxu1 %vm1209_vm4, %v5532_v61  ;;  %v641_v63 = vadd.f32 %v5250_v14, %v609_v12  ;;  %v785_v13 = vrot.slane %v783_v1, 7  ;;  %v5546_v50 = vsel %vm1668_vm5, %v1684_v57, %v1685_v22  ;;  %v1687_v19 = vrot.slane %v5449_v40, 1 }
  0x50   : > { %4632 = vmatprep.mubr.msk.bf16.mxu0 %vm1209_vm4, %v5454_v41  ;;  %v670_v17 = vmax.f32 %v638_v3, 0.0  ;;  %v671_v25 = vmax.f32 %v639_v5, 0.0  ;;  %v672_v26 = vmax.f32 %v640_v24, 0.0  ;;  %v4206_v28 = vunpack.c.l.bf16 %v4239_v4 }
  0x51   : > { %v673_v27 = vmax.f32 %v641_v63, 0.0  ;;  %v788_v29 = vor.u32 %v786_v2, %v785_v13  ;;  %v5552_v33 = vsel %vm5289_vm3, %v785_v13, 0  ;;  %v1688_v34 = vrot.slane %v5441_v31, 1 }
  0x52   : > { %v4207_v37 = vunpack.c.h.bf16 %v4239_v4  ;;  %v1109_v39 = vshll.u32 %v5552_v33, 16  ;;  %v711_v42 = vpack.c.bf16 %v671_v25, %v670_v17  ;;  %v610_v45 = vmul.f32 %v4206_v28, %v5240_v7 }
  0x53   : > { %v712_v43 = vpack.c.bf16 %v673_v27, %v672_v26  ;;  %v5559_v46 = vsel %vm5289_vm3, 0, %v788_v29  ;;  %v4210_v53 = vunpack.c.l.bf16 %v4240_v32  ;;  %v4211_v16 = vunpack.c.h.bf16 %v4240_v32 }
  0x54   : > { %v611_v52 = vmul.f32 %v4207_v37, %v5240_v7  ;;  %v1102_v38 = vshrl.u32 %v5559_v46, 16  ;;  %v1104_v54 = vshll.u32 %v5559_v46, 16  ;;  %v1111_v31 = vrot.slane %v1109_v39, 1 }
  0x55   : > { %v790_v57 = vshrl.u32 %v711_v42, 16  ;;  %v793_v59 = vshll.u32 %v711_v42, 16  ;;  %v797_v12 = vshrl.u32 %v712_v43, 16  ;;  %v800_v22 = vshll.u32 %v712_v43, 16 }
  0x56   : > { %v642_v1 = vadd.f32 %v5250_v14, %v610_v45  ;;  %v1106_v2 = vrot.slane %v1104_v54, 1  ;;  %v643_v4 = vadd.f32 %v5250_v14, %v611_v52  ;;  %v612_v5 = vmul.f32 %v4210_v53, %v5240_v7 }
  0x57   : > { %4633 = vmatmul.mubr.msk.bf16.vlgmr.msra.gmra.mrb[0].mxu0 %vm1209_vm4, %v5467_v6  ;;  %v792_v3 = vrot.slane %v790_v57, 7  ;;  %v799_v24 = vrot.slane %v797_v12, 7  ;;  %v5576_v63 = vsel %vm1668_vm5, %v1687_v19, %v1688_v34  ;;  %v613_v17 = vmul.f32 %v4211_v16, %v5240_v7  ;;  %v5093_v12 = vld [vmem:[%s6327_s5 + $0xd8] sm:$0xff]  }
  0x58   : > { %4665 = vmatpush3.bf16.msra.mxu0 %v5410_v60  ;;  %4636 = vmatprep.mubr.msk.bf16.mxu0 %vm1209_vm4, %v5506_v23  ;;  %v674_v13 = vmax.f32 %v642_v1, 0.0  ;;  %v1107_v25 = vor.u32 %v1106_v2, %v1102_v38  ;;  %v675_v28 = vmax.f32 %v643_v4, 0.0  ;;  %v5091_v60 = vld [vmem:[%s6327_s5 + $0xd0] sm:$0xff]   ;;  %v644_v34 = vadd.f32 %v5250_v14, %v612_v5 }
  0x59   : > { %v795_v26 = vor.u32 %v793_v59, %v792_v3  ;;  %v5581_v27 = vsel %vm5289_vm3, %v792_v3, 0  ;;  %4666 = vmatprep.subr.bf16.mxu0 %v5089_v58  ;;  %v802_v29 = vor.u32 %v800_v22, %v799_v24  ;;  %v5589_v19 = vsel %vm5289_vm3, %v799_v24, 0  ;;  %v4241_v59 = vld [vmem:[%s5228_s24 + $0x68] sm:$0xff]  }
  0x5a   : > { %v1121_v32 = vshll.u32 %v5581_v27, 16  ;;  %v5593_v37 = vsel %vm992_vm2, %v1107_v25, %v1111_v31  ;;  %v1133_v42 = vshll.u32 %v5589_v19, 16  ;;  %v713_v43 = vpack.c.bf16 %v675_v28, %v674_v13 }
  0x5b   : > { %v5597_v39 = vsel %vm5289_vm3, 0, %v795_v26  ;;  %4449 = vmatmul.mubr.msk.bf16.gmra.mrb[16].mxu1 %vm1209_vm4, %v5593_v37  ;;  %v5606_v53 = vsel %vm5289_vm3, 0, %v802_v29  ;;  %v1690_v16 = vrot.slane %v5481_v62, 1  ;;  %v645_v2 = vadd.f32 %v5250_v14, %v613_v17 }
  0x5c   : > { %v1114_v45 = vshrl.u32 %v5597_v39, 16  ;;  %v1116_v52 = vshll.u32 %v5597_v39, 16  ;;  %4667 = vmatpush3.bf16.msra.mxu0 %v5089_v58  ;;  %v1123_v38 = vrot.slane %v1121_v32, 1  ;;  %v1126_v54 = vshrl.u32 %v5606_v53, 16 }
  0x5d   : > { %v1128_v31 = vshll.u32 %v5606_v53, 16  ;;  %v804_v57 = vshrl.u32 %v713_v43, 16  ;;  %4668 = vmatprep.subr.bf16.mxu0 %v5091_v60  ;;  %v807_v1 = vshll.u32 %v713_v43, 16  ;;  %v676_v3 = vmax.f32 %v644_v34, 0.0 }
  0x5e   : > { %v1118_v22 = vrot.slane %v1116_v52, 1  ;;  %v1135_v4 = vrot.slane %v1133_v42, 1  ;;  %v1691_v24 = vrot.slane %v5475_v55, 1  ;;  %v677_v25 = vmax.f32 %v645_v2, 0.0  ;;  %v5630_v55 = vld [vmem:[%s6327_s5 + $0xe0] sm:$0xff]   ;;  %v4242_v52 = vld [vmem:[%s5228_s24 + $0x70] sm:$0xff]  }
  0x5f   : > { %4637 = vmatmul.mubr.msk.bf16.gmra.mrb[4].mxu0 %vm1209_vm4, %v5519_v48  ;;  %v1130_v58 = vrot.slane %v1128_v31, 1  ;;  %v806_v5 = vrot.slane %v804_v57, 7  ;;  %v1693_v26 = vrot.slane %v5500_v18, 1  ;;  %v4214_v28 = vunpack.c.l.bf16 %v4241_v59 }
  0x60   : > { %v1119_v13 = vor.u32 %v1118_v22, %v1114_v45  ;;  %4640 = vmatprep.mubr.msk.bf16.mxu0 %vm1209_vm4, %v5546_v50  ;;  %4669 = vmatpush3.bf16.msra.mxu0 %v5091_v60  ;;  %v1694_v34 = vrot.slane %v5492_v10, 1  ;;  %v714_v60 = vpack.c.bf16 %v677_v25, %v676_v3  ;;  %v5637_v45 = vsel %vm1668_vm5, %v1690_v16, %v1691_v24 }
  0x61   : > { %v1131_v17 = vor.u32 %v1130_v58, %v1126_v54  ;;  %v809_v32 = vor.u32 %v807_v1, %v806_v5  ;;  %v5624_v29 = vsel %vm5289_vm3, %v806_v5, 0  ;;  %4670 = vmatprep.subr.bf16.mxu0 %v5093_v12  ;;  %v4215_v31 = vunpack.c.h.bf16 %v4241_v59 }
  0x62   : > { %v5633_v42 = vsel %vm992_vm2, %v1119_v13, %v1123_v38  ;;  %v1145_v43 = vshll.u32 %v5624_v29, 16  ;;  %v614_v38 = vmul.f32 %v4214_v28, %v5240_v7  ;;  %v811_v1 = vshrl.u32 %v714_v60, 16 }
  0x63   : > { %6341 = vst [vmem:[#allocation2_spill] sm:$0xff] %v5633_v42  ;;  %4452 = vmatprep.mubr.msk.bf16.mxu1 %vm1209_vm4, %v5633_v42  ;;  %v5643_v10 = vsel %vm992_vm2, %v1131_v17, %v1135_v4  ;;  %v5647_v54 = vsel %vm5289_vm3, 0, %v809_v32  ;;  %v814_v2 = vshll.u32 %v714_v60, 16  ;;  %v615_v3 = vmul.f32 %v4215_v31, %v5240_v7 }
  0x64   : > { %6342 = vst [vmem:[#allocation3_spill] sm:$0xff] %v5643_v10  ;;  %4453 = vmatmul.mubr.msk.bf16.gmra.mrb[20].mxu1 %vm1209_vm4, %v5643_v10  ;;  %v1138_v16 = vshrl.u32 %v5647_v54, 16  ;;  %v1140_v57 = vshll.u32 %v5647_v54, 16  ;;  %v1147_v22 = vrot.slane %v1145_v43, 1  ;;  %4671 = vmatpush3.bf16.msra.mxu0 %v5093_v12  ;;  %v646_v58 = vadd.f32 %v5250_v14, %v614_v38 }
  0x65   : > { %v4218_v4 = vunpack.c.l.bf16 %v4242_v52  ;;  %4704 = vmatprep.subr.bf16.mxu0 %v5630_v55  ;;  %v813_v5 = vrot.slane %v811_v1, 7  ;;  %v4219_v24 = vunpack.c.h.bf16 %v4242_v52  ;;  %v1696_v13 = vrot.slane %v5559_v46, 1 }
  0x66   : > { %v1142_v59 = vrot.slane %v1140_v57, 1  ;;  %v647_v25 = vadd.f32 %v5250_v14, %v615_v3  ;;  %v678_v28 = vmax.f32 %v646_v58, 0.0  ;;  %v1697_v17 = vrot.slane %v5552_v33, 1 }
  0x67   : > { %4641 = vmatmul.mubr.msk.bf16.gmra.mrb[8].mxu0 %vm1209_vm4, %v5576_v63  ;;  %v616_v12 = vmul.f32 %v4218_v4, %v5240_v7  ;;  %v816_v43 = vor.u32 %v814_v2, %v813_v5  ;;  %v5665_v60 = vsel %vm5289_vm3, %v813_v5, 0  ;;  %v617_v52 = vmul.f32 %v4219_v24, %v5240_v7 }
  0x68   : > { %v1143_v32 = vor.u32 %v1142_v59, %v1138_v16  ;;  %4644 = vmatprep.mubr.msk.bf16.mxu0 %vm1209_vm4, %v5637_v45  ;;  %v1157_v31 = vshll.u32 %v5665_v60, 16  ;;  %v679_v38 = vmax.f32 %v647_v25, 0.0  ;;  %v5685_v58 = vsel %vm1668_vm5, %v1693_v26, %v1694_v34 }
  0x69   : > { %v648_v57 = vadd.f32 %v5250_v14, %v616_v12  ;;  %v5677_v33 = vsel %vm5289_vm3, 0, %v816_v43  ;;  %v649_v16 = vadd.f32 %v5250_v14, %v617_v52  ;;  %v5688_v59 = vsel %vm1668_vm5, %v1696_v13, %v1697_v17 }
  0x6a   : > { %v5673_v1 = vsel %vm992_vm2, %v1143_v32, %v1147_v22  ;;  %v1150_v7 = vshrl.u32 %v5677_v33, 16  ;;  %v1152_v2 = vshll.u32 %v5677_v33, 16  ;;  %v715_v3 = vpack.c.bf16 %v679_v38, %v678_v28  ;;  %v4243_v32 = vld [vmem:[%s5228_s24 + $0x78] sm:$0xff]   ;;  %s492_s24 = scalar_lea.vmem %s6330_s8, %s3901_s19 }
  0x6b   : > { %6343 = vst [vmem:[#allocation4_spill] sm:$0xff] %v5673_v1  ;;  %4456 = vmatprep.mubr.msk.bf16.mxu1 %vm1209_vm4, %v5673_v1  ;;  %v680_v22 = vmax.f32 %v648_v57, 0.0  ;;  %v681_v4 = vmax.f32 %v649_v16, 0.0  ;;  %v1159_v24 = vrot.slane %v1157_v31, 1  ;;  %v1699_v28 = vrot.slane %v5597_v39, 1 }
  0x6c   : > { %v1154_v5 = vrot.slane %v1152_v2, 1  ;;  %v818_v25 = vshrl.u32 %v715_v3, 16  ;;  %v821_v14 = vshll.u32 %v715_v3, 16  ;;  %v1700_v26 = vrot.slane %v5581_v27, 1 }
  0x6d   : > { %v716_v12 = vpack.c.bf16 %v681_v4, %v680_v22  ;;  %v1702_v13 = vrot.slane %v5606_v53, 1  ;;  %v1703_v17 = vrot.slane %v5589_v19, 1  ;;  %v4223_v22 = vunpack.c.h.bf16 %v4243_v32  ;;  %v5713_v19 = vld [vmem:[%s6325_s3] ss:$0 sm:$0xff] }
  0x6e   : > { %v1155_v43 = vor.u32 %v1154_v5, %v1150_v7  ;;  %v820_v52 = vrot.slane %v818_v25, 7  ;;  %v4222_v7 = vunpack.c.l.bf16 %v4243_v32  ;;  %v1709_v1 = vrot.slane %v5665_v60, 1 }
  0x6f   : > { %4645 = vmatmul.mubr.msk.bf16.gmra.mrb[12].mxu0 %vm1209_vm4, %v5685_v58  ;;  %v825_v34 = vshrl.u32 %v716_v12, 16  ;;  %v828_v38 = vshll.u32 %v716_v12, 16  ;;  %v5724_v32 = vsel %vm1668_vm5, %v1702_v13, %v1703_v17  ;;  %v1705_v17 = vrot.slane %v5647_v54, 1 }
  0x70   : > { %4648 = vmatprep.mubr.msk.bf16.mxu0 %vm1209_vm4, %v5688_v59  ;;  %v5700_v31 = vsel %vm992_vm2, %v1155_v43, %v1159_v24  ;;  %v823_v57 = vor.u32 %v821_v14, %v820_v52  ;;  %v916_v16 = vsel %vm5289_vm3, %v820_v52, 0  ;;  %v618_v4 = vmul.f32 %v5713_v19, %v4222_v7  ;;  %v5730_v52 = vld [vmem:[%s6326_s4] ss:$0 sm:$0xff] }
  0x71   : > { %6344 = vst [vmem:[#allocation5_spill] sm:$0xff] %v5700_v31  ;;  %4457 = vmatmul.mubr.msk.bf16.gmra.mrb[24].mxu1 %vm1209_vm4, %v5700_v31  ;;  %v1169_v27 = vshll.u32 %v916_v16, 16  ;;  %v827_v2 = vrot.slane %v825_v34, 7  ;;  %v5719_v14 = vsel %vm1668_vm5, %v1699_v28, %v1700_v26  ;;  %v619_v43 = vmul.f32 %v5713_v19, %v4223_v22 }
  0x72   : > { %v5708_v3 = vsel %vm5289_vm3, 0, %v823_v57  ;;  %v650_v34 = vadd.f32 %v5730_v52, %v618_v4  ;;  %v1708_v31 = vrot.slane %v5677_v33, 1 }
  0x73   : > { %v1162_v5 = vshrl.u32 %v5708_v3, 16  ;;  %v1164_v24 = vshll.u32 %v5708_v3, 16  ;;  %v830_v25 = vor.u32 %v828_v38, %v827_v2  ;;  %v917_v12 = vsel %vm5289_vm3, %v827_v2, 0 }
  0x74   : > { %v1171_v38 = vrot.slane %v1169_v27, 1  ;;  %v1181_v26 = vshll.u32 %v917_v12, 16  ;;  %v1706_v27 = vrot.slane %v5624_v29, 1  ;;  %v651_v22 = vadd.f32 %v5730_v52, %v619_v43 }
  0x75   : > { %v1166_v57 = vrot.slane %v1164_v24, 1  ;;  %v5735_v28 = vsel %vm5289_vm3, 0, %v830_v25  ;;  %v682_v4 = vmax.f32 %v650_v34, 0.0  ;;  %v5760_v34 = vsel %vm1668_vm5, %v1708_v31, %v1709_v1 }
  0x76   : > { %v1174_v7 = vshrl.u32 %v5735_v28, 16  ;;  %v1176_v13 = vshll.u32 %v5735_v28, 16  ;;  %v1183_v25 = vrot.slane %v1181_v26, 1  ;;  %v683_v42 = vmax.f32 %v651_v22, 0.0  ;;  %v5094_v22 = vld [vmem:[%s6327_s5 + $0x50] sm:$0xff]  }
  0x77   : > { %4649 = vmatmul.mubr.msk.bf16.gmra.mrb[16].mxu0 %vm1209_vm4, %v5719_v14  ;;  %v1167_v2 = vor.u32 %v1166_v57, %v1162_v5  ;;  %v5754_v57 = vsel %vm1668_vm5, %v1705_v17, %v1706_v27  ;;  %v1711_v26 = vrot.slane %v5708_v3, 1  ;;  %v1714_v1 = vrot.slane %v5735_v28, 1  ;;  %v5092_v17 = vld [vmem:[%s6327_s5 + $0x48] sm:$0xff]  }
  0x78   : > { %4652 = vmatprep.mubr.msk.bf16.mxu0 %vm1209_vm4, %v5724_v32  ;;  %v1178_v24 = vrot.slane %v1176_v13, 1  ;;  %v717_v29 = vpack.c.bf16 %v683_v42, %v682_v4  ;;  %v1715_v31 = vrot.slane %v917_v12, 1 }
  0x79   : > { %v5749_v10 = vsel %vm992_vm2, %v1167_v2, %v1171_v38 }
  0x7a   : > { %4460 = vmatprep.mubr.msk.bf16.mxu1 %vm1209_vm4, %v5749_v10  ;;  %v1179_v5 = vor.u32 %v1178_v24, %v1174_v7  ;;  %v832_v60 = vshrl.u32 %v717_v29, 16  ;;  %v835_v38 = vshll.u32 %v717_v29, 16  ;;  %v1712_v7 = vrot.slane %v916_v16, 1  ;;  %v5097_v29 = vld [vmem:[%s6327_s5 + $0xe8] sm:$0xff]  }
  0x7b   : > { %v5781_v27 = vsel %vm1668_vm5, %v1714_v1, %v1715_v31 }
  0x7c   : > { %v5757_v43 = vsel %vm992_vm2, %v1179_v5, %v1183_v25  ;;  %v834_v42 = vrot.slane %v832_v60, 7  ;;  %v5776_v2 = vsel %vm1668_vm5, %v1711_v26, %v1712_v7  ;;  %v5098_v5 = vld [vmem:[%s6327_s5 + $0x60] sm:$0xff]   ;;  %v5099_v60 = vld [vmem:[%s6327_s5 + $0xf0] sm:$0xff]  }
  0x7d   : > { %4461 = vmatmul.mubr.msk.bf16.gmra.mrb[28].mxu1 %vm1209_vm4, %v5757_v43 }
  0x7e   : > { %4472 = vmatprep.mubr.msk.bf16.mxu1 %vm1209_vm4, %v5326_v35  ;;  %v837_v13 = vor.u32 %v835_v38, %v834_v42  ;;  %v5789_v12 = vsel %vm5289_vm3, %v834_v42, 0  ;;  %v5101_v38 = vld [vmem:[%s6327_s5 + $0xf8] sm:$0xff]   ;;  %v4225_v42 = vld [vmem:[%s470_s20] sm:$0xff]  }
  0x7f   : > { %4653 = vmatmul.mubr.msk.bf16.gmra.mrb[20].mxu0 %vm1209_vm4, %v5754_v57  ;;  %v2436_v24 = vrot.slane %v5789_v12, 1  ;;  %v4226_v26 = vunpack.c.l.bf16 %v4225_v42  ;;  %v4227_v7 = vunpack.c.h.bf16 %v4225_v42 }
  0x80   : > { %4656 = vmatprep.mubr.msk.bf16.mxu0 %vm1209_vm4, %v5760_v34  ;;  %v5785_v16 = vsel %vm5289_vm3, 0, %v837_v13 }
  0x81   : > { %v2435_v4 = vrot.slane %v5785_v16, 1  ;;  %v688_v1 = vmul.f32 %v5713_v19, %v4226_v26  ;;  %v689_v31 = vmul.f32 %v5713_v19, %v4227_v7  ;;  %v1670_v19 = vrot.slane %v5322_v30, 1  ;;  %v5102_v26 = vld [vmem:[%s6327_s5 + $0x70] sm:$0xff]  }
  0x83   : > { %v5807_v25 = vsel %vm1668_vm5, %v2435_v4, %v2436_v24  ;;  %v690_v13 = vadd.f32 %v5730_v52, %v688_v1  ;;  %v1669_v24 = vrot.slane %v5326_v35, 1  ;;  %v5100_v35 = vld [vmem:[%s6327_s5 + $0x68] sm:$0xff]   ;;  %v5110_v1 = vld [vmem:[%s6327_s5 + $0x80] sm:$0xff]  }
  0x85   : > { %4473 = vmatmul.mubr.msk.bf16.vlgmr.msra.gmra.mrb[0].mxu1 %vm1209_vm4, %v5307_v15 }
  0x86   : > { %4505 = vmatpush3.bf16.msra.mxu1 %v5429_v11  ;;  %4476 = vmatprep.mubr.msk.bf16.mxu1 %vm1209_vm4, %v5315_v21  ;;  %v5096_v11 = vld [vmem:[%s6327_s5 + $0x58] sm:$0xff]  }
  0x87   : > { %4657 = vmatmul.mubr.msk.bf16.gmra.mrb[24].mxu0 %vm1209_vm4, %v5776_v2  ;;  %4506 = vmatprep.subr.bf16.mxu1 %v5092_v17 }
  0x88   : > { %4660 = vmatprep.mubr.msk.bf16.mxu0 %vm1209_vm4, %v5781_v27 }
  0x8a   : > { %4507 = vmatpush3.bf16.msra.mxu1 %v5092_v17  ;;  %v691_v17 = vadd.f32 %v5730_v52, %v689_v31  ;;  %v5105_v31 = vld [vmem:[%s6327_s5 + $0x108] sm:$0xff]  }
  0x8b   : > { %4508 = vmatprep.subr.bf16.mxu1 %v5094_v22 }
  0x8c   : > { %v693_v4 = vmax.f32 %v691_v17, 0.0  ;;  %v6348_v17 = vld [vmem:[#allocation5_spill] sm:$0xff] }
  0x8d   : > { %4477 = vmatmul.mubr.msk.bf16.gmra.mrb[4].mxu1 %vm1209_vm4, %v5351_v56 }
  0x8e   : > { %4480 = vmatprep.mubr.msk.bf16.mxu1 %vm1209_vm4, %v5396_v44  ;;  %4509 = vmatpush3.bf16.msra.mxu1 %v5094_v22  ;;  %v692_v22 = vmax.f32 %v690_v13, 0.0  ;;  %v700_v52 = vmul.f32 0.0, %v693_v4  ;;  %v5107_v13 = vld [vmem:[%s6327_s5 + $0x118] sm:$0xff]  }
  0x8f   : > { %4661 = vmatmul.mubr.msk.bf16.gmra.mrb[28].mxu0 %vm1209_vm4, %v5807_v25  ;;  %4510 = vmatprep.subr.bf16.mxu1 %v5096_v11 }
  0x90   : > { %4672 = vmatprep.mubr.msk.bf16.mxu0 %vm1209_vm4, %v5315_v21 }
  0x92   : > { %4511 = vmatpush3.bf16.msra.mxu1 %v5096_v11  ;;  %v699_v11 = vmul.f32 0.0, %v692_v22 }
  0x93   : > { %4544 = vmatprep.subr.bf16.mxu1 %v5098_v5 }
  0x95   : > { %4481 = vmatmul.mubr.msk.bf16.gmra.mrb[8].mxu1 %vm1209_vm4, %v5422_v8 }
  0x96   : > { %4484 = vmatprep.mubr.msk.bf16.mxu1 %vm1209_vm4, %v5449_v40 }
  0x97   : > { %4673 = vmatmul.mubr.msk.bf16.vlgmr.msra.gmra.mrb[0].mxu0 %vm1209_vm4, %v5351_v56 }
  0x98   : > { %4705 = vmatpush3.bf16.msra.mxu0 %v5630_v55  ;;  %4676 = vmatprep.mubr.msk.bf16.mxu0 %vm1209_vm4, %v5396_v44  ;;  %v5850_v55 = vld [vmem:[%s6327_s5 + $0x100] sm:$0xff]  }
  0x99   : > { %4706 = vmatprep.subr.bf16.mxu0 %v5097_v29 }
  0x9c   : > { %4707 = vmatpush3.bf16.msra.mxu0 %v5097_v29  ;;  %v1671_v29 = vsel %vm1668_vm5, %v1669_v24, %v1670_v19 }
  0x9d   : > { %4485 = vmatmul.mubr.msk.bf16.gmra.mrb[12].mxu1 %vm1209_vm4, %v5481_v62  ;;  %4708 = vmatprep.subr.bf16.mxu0 %v5099_v60 }
  0x9e   : > { %4488 = vmatprep.mubr.msk.bf16.mxu1 %vm1209_vm4, %v5500_v18 }
  0x9f   : > { %4677 = vmatmul.mubr.msk.bf16.gmra.mrb[4].mxu0 %vm1209_vm4, %v5422_v8 }
  0xa0   : > { %4680 = vmatprep.mubr.msk.bf16.mxu0 %vm1209_vm4, %v5449_v40  ;;  %4709 = vmatpush3.bf16.msra.mxu0 %v5099_v60  ;;  %v718_v60 = vpack.c.bf16 %v700_v52, %v699_v11 }
  0xa1   : > { %4710 = vmatprep.subr.bf16.mxu0 %v5101_v38 }
  0xa2   : > { %v839_v30 = vshrl.u32 %v718_v60, 16  ;;  %v842_v42 = vshll.u32 %v718_v60, 16 }
  0xa4   : > { %4711 = vmatpush3.bf16.msra.mxu0 %v5101_v38  ;;  %v5897_v38 = vrot.slane %v839_v30, 7  ;;  %v5113_v30 = vld [vmem:[%s6327_s5 + $0x98] sm:$0xff]  }
  0xa5   : > { %4489 = vmatmul.mubr.msk.bf16.gmra.mrb[16].mxu1 %vm1209_vm4, %v5559_v46  ;;  %4744 = vmatprep.subr.bf16.mxu0 %v5850_v55 }
  0xa6   : > { %4492 = vmatprep.mubr.msk.bf16.mxu1 %vm1209_vm4, %v5597_v39  ;;  %v844_v7 = vor.u32 %v842_v42, %v5897_v38  ;;  %v919_v24 = vsel %vm5289_vm3, %v5897_v38, 0 }
  0xa7   : > { %4681 = vmatmul.mubr.msk.bf16.gmra.mrb[8].mxu0 %vm1209_vm4, %v5481_v62  ;;  %v2885_v52 = vshll.u32 %v919_v24, 16 }
  0xa8   : > { %4684 = vmatprep.mubr.msk.bf16.mxu0 %vm1209_vm4, %v5500_v18 }
  0xa9   : > { %v2887_v60 = vrot.slane %v2885_v52, 1 }
  0xad   : > { %4493 = vmatmul.mubr.msk.bf16.gmra.mrb[20].mxu1 %vm1209_vm4, %v5606_v53 }
  0xae   : > { %4496 = vmatprep.mubr.msk.bf16.mxu1 %vm1209_vm4, %v5647_v54 }
  0xaf   : > { %4685 = vmatmul.mubr.msk.bf16.gmra.mrb[12].mxu0 %vm1209_vm4, %v5559_v46 }
  0xb0   : > { %4688 = vmatprep.mubr.msk.bf16.mxu0 %vm1209_vm4, %v5597_v39 }
  0xb5   : > { %4497 = vmatmul.mubr.msk.bf16.gmra.mrb[24].mxu1 %vm1209_vm4, %v5677_v33 }
  0xb6   : > { %4500 = vmatprep.mubr.msk.bf16.mxu1 %vm1209_vm4, %v5708_v3 }
  0xb7   : > { %4689 = vmatmul.mubr.msk.bf16.gmra.mrb[16].mxu0 %vm1209_vm4, %v5606_v53 }
  0xb8   : > { %4692 = vmatprep.mubr.msk.bf16.mxu0 %vm1209_vm4, %v5647_v54 }
  0xbd   : > { %4501 = vmatmul.mubr.msk.bf16.gmra.mrb[28].mxu1 %vm1209_vm4, %v5735_v28 }
  0xbe   : > { %4512 = vmatprep.mubr.msk.bf16.mxu1 %vm1209_vm4, %v1671_v29 }
  0xbf   : > { %4693 = vmatmul.mubr.msk.bf16.gmra.mrb[20].mxu0 %vm1209_vm4, %v5677_v33 }
  0xc0   : > { %4696 = vmatprep.mubr.msk.bf16.mxu0 %vm1209_vm4, %v5708_v3 }
  0xc5   : > { %4513 = vmatmul.mubr.msk.bf16.vlgmr.msra.gmra.mrb[0].mxu1 %vm1209_vm4, %v5454_v41  ;;  %v5104_v41 = vld [vmem:[%s6327_s5 + $0x78] sm:$0xff]  }
  0xc6   : > { %4545 = vmatpush3.bf16.msra.mxu1 %v5098_v5  ;;  %4516 = vmatprep.mubr.msk.bf16.mxu1 %vm1209_vm4, %v5467_v6  ;;  %v5916_v5 = vsel %vm5289_vm3, 0, %v844_v7 }
  0xc7   : > { %4697 = vmatmul.mubr.msk.bf16.gmra.mrb[24].mxu0 %vm1209_vm4, %v5735_v28  ;;  %4546 = vmatprep.subr.bf16.mxu1 %v5100_v35  ;;  %v2880_v22 = vshll.u32 %v5916_v5, 16  ;;  %v2878_v11 = vshrl.u32 %v5916_v5, 16 }
  0xc8   : > { %4700 = vmatprep.mubr.msk.bf16.mxu0 %vm1209_vm4, %v5785_v16 }
  0xca   : > { %4547 = vmatpush3.bf16.msra.mxu1 %v5100_v35 }
  0xcb   : > { %4548 = vmatprep.subr.bf16.mxu1 %v5102_v26 }
  0xcd   : > { %4517 = vmatmul.mubr.msk.bf16.gmra.mrb[4].mxu1 %vm1209_vm4, %v5506_v23 }
  0xce   : > { %4520 = vmatprep.mubr.msk.bf16.mxu1 %vm1209_vm4, %v5519_v48  ;;  %4549 = vmatpush3.bf16.msra.mxu1 %v5102_v26 }
  0xcf   : > { %4701 = vmatmul.mubr.msk.bf16.gmra.mrb[28].mxu0 %vm1209_vm4, %v5916_v5  ;;  %4550 = vmatprep.subr.bf16.mxu1 %v5104_v41 }
  0xd0   : > { %4712 = vmatprep.mubr.msk.bf16.mxu0 %vm1209_vm4, %v5343_v51  ;;  %v5106_v51 = vld [vmem:[%s6327_s5 + $0x110] sm:$0xff]  }
  0xd2   : > { %4551 = vmatpush3.bf16.msra.mxu1 %v5104_v41 }
  0xd3   : > { %4784 = vmatprep.subr.bf16.mxu1 %v5110_v1 }
  0xd5   : > { %4521 = vmatmul.mubr.msk.bf16.gmra.mrb[8].mxu1 %vm1209_vm4, %v5546_v50 }
  0xd6   : > { %4524 = vmatprep.mubr.msk.bf16.mxu1 %vm1209_vm4, %v5576_v63 }
  0xd7   : > { %4713 = vmatmul.mubr.msk.bf16.vlgmr.msra.gmra.mrb[0].mxu0 %vm1209_vm4, %v5385_v36  ;;  %v6345_v36 = vld [vmem:[#allocation2_spill] sm:$0xff] }
  0xd8   : > { %4745 = vmatpush3.bf16.msra.mxu0 %v5850_v55  ;;  %4716 = vmatprep.mubr.msk.bf16.mxu0 %vm1209_vm4, %v5435_v20  ;;  %v6346_v20 = vld [vmem:[#allocation3_spill] sm:$0xff]  ;;  %v2209_v55 = vshll.u32 %v5789_v12, 16  ;;  %v2882_v12 = vrot.slane %v2880_v22, 1 }
  0xd9   : > { %4746 = vmatprep.subr.bf16.mxu0 %v5105_v31 }
  0xda   : > { %v2211_v19 = vrot.slane %v2209_v55, 1  ;;  %v2883_v29 = vor.u32 %v2882_v12, %v2878_v11 }
  0xdc   : > { %4747 = vmatpush3.bf16.msra.mxu0 %v5105_v31 }
  0xdd   : > { %4525 = vmatmul.mubr.msk.bf16.gmra.mrb[12].mxu1 %vm1209_vm4, %v5637_v45  ;;  %4748 = vmatprep.subr.bf16.mxu0 %v5106_v51 }
  0xde   : > { %4528 = vmatprep.mubr.msk.bf16.mxu1 %vm1209_vm4, %v5685_v58 }
  0xdf   : > { %4717 = vmatmul.mubr.msk.bf16.gmra.mrb[4].mxu0 %vm1209_vm4, %v5462_v49  ;;  %v6347_v49 = vld [vmem:[#allocation4_spill] sm:$0xff] }
  0xe0   : > { %4720 = vmatprep.mubr.msk.bf16.mxu0 %vm1209_vm4, %v5488_v9  ;;  %4749 = vmatpush3.bf16.msra.mxu0 %v5106_v51  ;;  %v2204_v9 = vshll.u32 %v5785_v16, 16 }
  0xe1   : > { %4750 = vmatprep.subr.bf16.mxu0 %v5107_v13 }
  0xe4   : > { %4751 = vmatpush3.bf16.msra.mxu0 %v5107_v13 }
  0xe5   : > { %4529 = vmatmul.mubr.msk.bf16.gmra.mrb[16].mxu1 %vm1209_vm4, %v5688_v59 }
  0xe6   : > { %4532 = vmatprep.mubr.msk.bf16.mxu1 %vm1209_vm4, %v5719_v14 }
  0xe7   : > { %4721 = vmatmul.mubr.msk.bf16.gmra.mrb[8].mxu0 %vm1209_vm4, %v5516_v47  ;;  %v2202_v47 = vshrl.u32 %v5785_v16, 16 }
  0xe8   : > { %4724 = vmatprep.mubr.msk.bf16.mxu0 %vm1209_vm4, %v5532_v61  ;;  %v2206_v61 = vrot.slane %v2204_v9, 1 }
  0xea   : > { %v2207_v4 = vor.u32 %v2206_v61, %v2202_v47 }
  0xed   : > { %4533 = vmatmul.mubr.msk.bf16.gmra.mrb[20].mxu1 %vm1209_vm4, %v5724_v32 }
  0xee   : > { %4536 = vmatprep.mubr.msk.bf16.mxu1 %vm1209_vm4, %v5754_v57 }
  0xef   : > { %4725 = vmatmul.mubr.msk.bf16.gmra.mrb[12].mxu0 %vm1209_vm4, %v5593_v37 }
  0xf0   : > { %4728 = vmatprep.mubr.msk.bf16.mxu0 %vm1209_vm4, %v6345_v36 }
  0xf5   : > { %4537 = vmatmul.mubr.msk.bf16.gmra.mrb[24].mxu1 %vm1209_vm4, %v5760_v34 }
  0xf6   : > { %4540 = vmatprep.mubr.msk.bf16.mxu1 %vm1209_vm4, %v5776_v2 }
  0xf7   : > { %4729 = vmatmul.mubr.msk.bf16.gmra.mrb[16].mxu0 %vm1209_vm4, %v6346_v20 }
  0xf8   : > { %4732 = vmatprep.mubr.msk.bf16.mxu0 %vm1209_vm4, %v6347_v49 }
  0xfd   : > { %4541 = vmatmul.mubr.msk.bf16.gmra.mrb[28].mxu1 %vm1209_vm4, %v5781_v27 }
  0xfe   : > { %4552 = vmatprep.mubr.msk.bf16.mxu1 %vm1209_vm4, %v5307_v15  ;;  %v2212_v15 = vsel %vm992_vm2, %v2207_v4, %v2211_v19 }
  0xff   : > { %4733 = vmatmul.mubr.msk.bf16.gmra.mrb[20].mxu0 %vm1209_vm4, %v6348_v17 }
 0x100   : > { %4736 = vmatprep.mubr.msk.bf16.mxu0 %vm1209_vm4, %v5749_v10 }
 0x105   : > { %4553 = vmatmul.mubr.msk.bf16.vlgmr.msra.gmra.mrb[0].mxu1 %vm1209_vm4, %v5315_v21  ;;  %v5112_v21 = vld [vmem:[%s6327_s5 + $0x90] sm:$0xff]  }
 0x106   : > { %4788 = vmatpush3.bf16.msra.mxu1 %v5110_v1  ;;  %4556 = vmatprep.mubr.msk.bf16.mxu1 %vm1209_vm4, %v5351_v56  ;;  %v2888_v56 = vsel %vm992_vm2, %v2883_v29, %v2887_v60 }
 0x107   : > { %4737 = vmatmul.mubr.msk.bf16.gmra.mrb[24].mxu0 %vm1209_vm4, %v5757_v43  ;;  %4785 = vmatprep.subr.bf16.mxu1 %v5111_v0 }
 0x108   : > { %4740 = vmatprep.mubr.msk.bf16.mxu0 %vm1209_vm4, %v2212_v15 }
 0x10a   : > { %4789 = vmatpush3.bf16.msra.mxu1 %v5111_v0 }
 0x10b   : > { %4786 = vmatprep.subr.bf16.mxu1 %v5112_v21 }
 0x10d   : > { %4557 = vmatmul.mubr.msk.bf16.gmra.mrb[4].mxu1 %vm1209_vm4, %v5396_v44  ;;  %v3111_v44 = vrot.slane %v5916_v5, 1 }
 0x10e   : > { %4560 = vmatprep.mubr.msk.bf16.mxu1 %vm1209_vm4, %v5422_v8  ;;  %4790 = vmatpush3.bf16.msra.mxu1 %v5112_v21  ;;  %v3112_v8 = vrot.slane %v919_v24, 1 }
 0x10f   : > { %4741 = vmatmul.mubr.msk.bf16.gmra.mrb[28].mxu0 %vm1209_vm4, %v2888_v56  ;;  %4787 = vmatprep.subr.bf16.mxu1 %v5113_v30 }
 0x110   : > { %4752 = vmatprep.mubr.msk.bf16.mxu0 %vm1209_vm4, %v5467_v6 }
 0x112   : > { %4791 = vmatpush3.bf16.msra.mxu1 %v5113_v30 }
 0x115   : > { %4561 = vmatmul.mubr.msk.bf16.gmra.mrb[8].mxu1 %vm1209_vm4, %v5449_v40  ;;  %v3113_v40 = vsel %vm1668_vm5, %v3111_v44, %v3112_v8 }
 0x116   : > { %4564 = vmatprep.mubr.msk.bf16.mxu1 %vm1209_vm4, %v5481_v62 }
 0x117   : > { %4753 = vmatmul.mubr.msk.bf16.vlgmr.msra.gmra.mrb[0].mxu0 %vm1209_vm4, %v5506_v23 }
 0x118   : > { %4756 = vmatprep.mubr.msk.bf16.mxu0 %vm1209_vm4, %v5519_v48 }
 0x11d   : > { %4565 = vmatmul.mubr.msk.bf16.gmra.mrb[12].mxu1 %vm1209_vm4, %v5500_v18 }
 0x11e   : > { %4568 = vmatprep.mubr.msk.bf16.mxu1 %vm1209_vm4, %v5559_v46 }
 0x11f   : > { %4757 = vmatmul.mubr.msk.bf16.gmra.mrb[4].mxu0 %vm1209_vm4, %v5546_v50 }
 0x120   : > { %4760 = vmatprep.mubr.msk.bf16.mxu0 %vm1209_vm4, %v5576_v63 }
 0x125   : > { %4569 = vmatmul.mubr.msk.bf16.gmra.mrb[16].mxu1 %vm1209_vm4, %v5597_v39 }
 0x126   : > { %4572 = vmatprep.mubr.msk.bf16.mxu1 %vm1209_vm4, %v5606_v53 }
 0x127   : > { %4761 = vmatmul.mubr.msk.bf16.gmra.mrb[8].mxu0 %vm1209_vm4, %v5637_v45 }
 0x128   : > { %4764 = vmatprep.mubr.msk.bf16.mxu0 %vm1209_vm4, %v5685_v58 }
 0x12d   : > { %4573 = vmatmul.mubr.msk.bf16.gmra.mrb[20].mxu1 %vm1209_vm4, %v5647_v54 }
 0x12e   : > { %4576 = vmatprep.mubr.msk.bf16.mxu1 %vm1209_vm4, %v5677_v33 }
 0x12f   : > { %4765 = vmatmul.mubr.msk.bf16.gmra.mrb[12].mxu0 %vm1209_vm4, %v5688_v59 }
 0x130   : > { %4768 = vmatprep.mubr.msk.bf16.mxu0 %vm1209_vm4, %v5719_v14 }
 0x135   : > { %4577 = vmatmul.mubr.msk.bf16.gmra.mrb[24].mxu1 %vm1209_vm4, %v5708_v3 }
 0x136   : > { %4580 = vmatprep.mubr.msk.bf16.mxu1 %vm1209_vm4, %v5735_v28 }
 0x137   : > { %4769 = vmatmul.mubr.msk.bf16.gmra.mrb[16].mxu0 %vm1209_vm4, %v5724_v32 }
 0x138   : > { %4772 = vmatprep.mubr.msk.bf16.mxu0 %vm1209_vm4, %v5754_v57 }
 0x13d   : > { %4581 = vmatmul.mubr.msk.bf16.gmra.mrb[28].mxu1 %vm1209_vm4, %v5785_v16 }
 0x13e   : > { %4608 = vmatprep.mubr.msk.bf16.mxu1 %vm1209_vm4, %v5593_v37 }
 0x13f   : > { %4773 = vmatmul.mubr.msk.bf16.gmra.mrb[20].mxu0 %vm1209_vm4, %v5760_v34 }
 0x140   : > { %4776 = vmatprep.mubr.msk.bf16.mxu0 %vm1209_vm4, %v5776_v2 }
 0x145   : > { %4609 = vmatmul.mubr.msk.bf16.vlgmr.msra.gmra.mrb[16].mxu1 %vm1209_vm4, %v6345_v36 }
 0x146   : > { %4612 = vmatprep.mubr.msk.bf16.mxu1 %vm1209_vm4, %v6346_v20 }
 0x147   : > { %4777 = vmatmul.mubr.msk.bf16.gmra.mrb[24].mxu0 %vm1209_vm4, %v5781_v27 }
 0x148   : > { %4780 = vmatprep.mubr.msk.bf16.mxu0 %vm1209_vm4, %v5807_v25 }
 0x14d   : > { %4613 = vmatmul.mubr.msk.bf16.gmra.mrb[20].mxu1 %vm1209_vm4, %v6347_v49 }
 0x14e   : > { %4616 = vmatprep.mubr.msk.bf16.mxu1 %vm1209_vm4, %v6348_v17 }
 0x14f   : > { %4781 = vmatmul.mubr.msk.bf16.gmra.mrb[28].mxu0 %vm1209_vm4, %v3113_v40 }
 0x155   : > { %4617 = vmatmul.mubr.msk.bf16.gmra.mrb[24].mxu1 %vm1209_vm4, %v5749_v10  ;;  %v6097_v10 = vld [vmem:[%s6328_s6] ss:$0 sm:$0xff] }
 0x156   : > { %4620 = vmatprep.mubr.msk.bf16.mxu1 %vm1209_vm4, %v5757_v43 }
 0x15d   : > { %4621 = vmatmul.mubr.msk.bf16.gmra.mrb[28].mxu1 %vm1209_vm4, %v2212_v15 }
 0x1d8   : > { %v4554_v6 = vpop.f32.mrb[0].mxu1 }
 0x1d9   : > { %v2043_v62 = vpop.f32.mrb[1].mxu1 }
 0x1da   : > { %v4555_v18 = vpop.f32.mrb[2].mxu1 }
 0x1db   : > { %v2046_v23 = vpop.f32.mrb[3].mxu1 }
 0x1e0   : > { %v4558_v48 = vpop.f32.mrb[4].mxu1 }
 0x1e1   : > { %v2059_v50 = vpop.f32.mrb[5].mxu1 }
 0x1e2   : > { %v4559_v46 = vpop.f32.mrb[6].mxu1 }
 0x1e3   : > { %v2062_v63 = vpop.f32.mrb[7].mxu1 }
 0x1e8   : > { %v6088_v37 = vpop.f32.mrb[8].mxu1 }
 0x1e9   : > { %v6090_v39 = vpop.f32.mrb[9].mxu1 }
 0x1ea   : > { %v6092_v53 = vpop.f32.mrb[10].mxu1  ;;  %v4754_v45 = vpop.f32.mrb[0].mxu0 }
 0x1eb   : > { %v6099_v54 = vpop.f32.mrb[11].mxu1  ;;  %v4792_v33 = vadd.f32 %v4754_v45, %v4554_v6  ;;  %v3175_v58 = vpop.f32.mrb[1].mxu0 }
 0x1ec   : > { %v4793_v59 = vadd.f32 %v3175_v58, %v2043_v62  ;;  %v4755_v3 = vpop.f32.mrb[2].mxu0 }
 0x1ed   : > { %v3343_v14 = vadd.f32 %v4792_v33, %v6097_v10  ;;  %v4794_v32 = vadd.f32 %v4755_v3, %v4555_v18  ;;  %v3178_v28 = vpop.f32.mrb[3].mxu0 }
 0x1ee   : > { %v3341_v57 = vadd.f32 %v4793_v59, %v6097_v10  ;;  %v4795_v43 = vadd.f32 %v3178_v28, %v2046_v23 }
 0x1ef   : > { %v4126_v34 = vpack.c.bf16 %v3343_v14, %v3343_v14  ;;  %v3344_v2 = vadd.f32 %v4794_v32, %v6097_v10  ;;  %v3444_v42 = vmul.f32 %v3343_v14, %v3343_v14  ;;  %v3376_v47 = vsel %vm1209_vm4, %v3343_v14, 0.0 }
 0x1f0   : > { %v6110_v27 = vpop.f32.mrb[12].mxu1  ;;  %v3442_v16 = vmul.f32 %v3341_v57, %v3341_v57  ;;  %v4124_v25 = vpack.c.bf16 %v3341_v57, %v3341_v57  ;;  %v3342_v35 = vadd.f32 %v4795_v43, %v6097_v10  ;;  %v3373_v41 = vsel %vm1209_vm4, %v3341_v57, 0.0 }
 0x1f1   : > { %v6113_v38 = vpop.f32.mrb[13].mxu1  ;;  %3679 = vst.msk [vmem:[%s6106_s11 + $0x8] sm:$0xf] %vm3676_vm6, %v4126_v34  ;;  %v4127_v26 = vpack.c.bf16 %v3344_v2, %v3344_v2  ;;  %v3445_v36 = vmul.f32 %v3344_v2, %v3344_v2  ;;  %v3477_v52 = vsel %vm1209_vm4, %v3444_v42, 0.0  ;;  %v3378_v29 = vsel %vm1209_vm4, %v3344_v2, 0.0 }
 0x1f2   : > { %v6117_v7 = vpop.f32.mrb[14].mxu1  ;;  %3677 = vst.msk [vmem:[%s6106_s11] sm:$0xf] %vm3676_vm6, %v4124_v25  ;;  %v3374_v5 = vsel %vm1209_vm4, %v3342_v35, 0.0  ;;  %v3443_v1 = vmul.f32 %v3342_v35, %v3342_v35  ;;  %v4125_v31 = vpack.c.bf16 %v3342_v35, %v3342_v35  ;;  %v4758_v51 = vpop.f32.mrb[4].mxu0  ;;  %v3474_v61 = vsel %vm1209_vm4, %v3442_v16, 0.0 }
 0x1f3   : > { %v6123_v13 = vpop.f32.mrb[15].mxu1  ;;  %3680 = vst.msk [vmem:[%s6106_s11 + $0xc] sm:$0xf] %vm3676_vm6, %v4127_v26  ;;  %v3375_v20 = vadd.f32 %v3374_v5, %v3373_v41  ;;  %v4796_v49 = vadd.f32 %v4758_v51, %v4558_v48  ;;  %v3191_v9 = vpop.f32.mrb[5].mxu0  ;;  %v3479_v60 = vsel %vm1209_vm4, %v3445_v36, 0.0 }
 0x1f4   : > { %v3475_v55 = vsel %vm1209_vm4, %v3443_v1, 0.0  ;;  %3678 = vst.msk [vmem:[%s6106_s11 + $0x4] sm:$0xf] %vm3676_vm6, %v4125_v31  ;;  %v4797_v17 = vadd.f32 %v3191_v9, %v2059_v50  ;;  %v4759_v22 = vpop.f32.mrb[6].mxu0 }
 0x1f5   : > { %v3377_v4 = vadd.f32 %v3376_v47, %v3375_v20  ;;  %v3476_v19 = vadd.f32 %v3475_v55, %v3474_v61  ;;  %v3347_v24 = vadd.f32 %v4796_v49, %v6097_v10  ;;  %v4798_v11 = vadd.f32 %v4759_v22, %v4559_v46  ;;  %v3194_v12 = vpop.f32.mrb[7].mxu0 }
 0x1f6   : > { %v3345_v15 = vadd.f32 %v4797_v17, %v6097_v10  ;;  %v4799_v0 = vadd.f32 %v3194_v12, %v2062_v63 }
 0x1f7   : > { %v3478_v21 = vadd.f32 %v3477_v52, %v3476_v19  ;;  %v4130_v56 = vpack.c.bf16 %v3347_v24, %v3347_v24  ;;  %v3379_v30 = vadd.f32 %v3378_v29, %v3377_v4  ;;  %v3348_v62 = vadd.f32 %v4798_v11, %v6097_v10 }
 0x1f8   : > { %v3380_v44 = vsel %vm1209_vm4, %v3345_v15, 0.0  ;;  %v3446_v8 = vmul.f32 %v3345_v15, %v3345_v15  ;;  %v4128_v40 = vpack.c.bf16 %v3345_v15, %v3345_v15  ;;  %v3346_v18 = vadd.f32 %v4799_v0, %v6097_v10 }
 0x1f9   : > { %3683 = vst.msk [vmem:[%s6106_s11 + $0x18] sm:$0xf] %vm3676_vm6, %v4130_v56  ;;  %v3480_v6 = vadd.f32 %v3479_v60, %v3478_v21  ;;  %v3381_v23 = vadd.f32 %v3380_v44, %v3379_v30  ;;  %v3448_v46 = vmul.f32 %v3347_v24, %v3347_v24  ;;  %v4131_v45 = vpack.c.bf16 %v3348_v62, %v3348_v62 }
 0x1fa   : > { %v3481_v48 = vsel %vm1209_vm4, %v3446_v8, 0.0  ;;  %3681 = vst.msk [vmem:[%s6106_s11 + $0x10] sm:$0xf] %vm3676_vm6, %v4128_v40  ;;  %v4762_v50 = vpop.f32.mrb[8].mxu0  ;;  %v3382_v58 = vsel %vm1209_vm4, %v3346_v18, 0.0  ;;  %v3447_v59 = vmul.f32 %v3346_v18, %v3346_v18  ;;  %v4129_v3 = vpack.c.bf16 %v3346_v18, %v3346_v18 }
 0x1fb   : > { %v3482_v63 = vadd.f32 %v3481_v48, %v3480_v6  ;;  %v3207_v33 = vpop.f32.mrb[9].mxu0  ;;  %v4800_v14 = vadd.f32 %v4762_v50, %v6088_v37  ;;  %v3384_v28 = vsel %vm1209_vm4, %v3347_v24, 0.0  ;;  %3684 = vst.msk [vmem:[%s6106_s11 + $0x1c] sm:$0xf] %vm3676_vm6, %v4131_v45  ;;  %v3383_v57 = vadd.f32 %v3382_v58, %v3381_v23 }
 0x1fc   : > { %v4763_v32 = vpop.f32.mrb[10].mxu0  ;;  %v4801_v43 = vadd.f32 %v3207_v33, %v6090_v39  ;;  %v3449_v16 = vmul.f32 %v3348_v62, %v3348_v62  ;;  %v3483_v25 = vsel %vm1209_vm4, %v3447_v59, 0.0  ;;  %3682 = vst.msk [vmem:[%s6106_s11 + $0x14] sm:$0xf] %vm3676_vm6, %v4129_v3  ;;  %v3485_v39 = vsel %vm1209_vm4, %v3448_v46, 0.0 }
 0x1fd   : > { %v4802_v34 = vadd.f32 %v4763_v32, %v6092_v53  ;;  %v3210_v2 = vpop.f32.mrb[11].mxu0  ;;  %v3351_v35 = vadd.f32 %v4800_v14, %v6097_v10  ;;  %v3385_v42 = vadd.f32 %v3384_v28, %v3383_v57  ;;  %v3484_v26 = vadd.f32 %v3483_v25, %v3482_v63 }
 0x1fe   : > { %v4803_v37 = vadd.f32 %v3210_v2, %v6099_v54  ;;  %v3349_v41 = vadd.f32 %v4801_v43, %v6097_v10  ;;  %v3386_v53 = vsel %vm1209_vm4, %v3348_v62, 0.0  ;;  %v3487_v54 = vsel %vm1209_vm4, %v3449_v16, 0.0 }
 0x1ff   : > { %v3352_v5 = vadd.f32 %v4802_v34, %v6097_v10  ;;  %v4134_v1 = vpack.c.bf16 %v3351_v35, %v3351_v35  ;;  %v3486_v51 = vadd.f32 %v3485_v39, %v3484_v26  ;;  %v3387_v36 = vadd.f32 %v3386_v53, %v3385_v42 }
 0x200   : > { %v3350_v31 = vadd.f32 %v4803_v37, %v6097_v10  ;;  %v3388_v20 = vsel %vm1209_vm4, %v3349_v41, 0.0  ;;  %v3450_v49 = vmul.f32 %v3349_v41, %v3349_v41  ;;  %v3452_v9 = vmul.f32 %v3351_v35, %v3351_v35 }
 0x201   : > { %3687 = vst.msk [vmem:[%s6106_s11 + $0x28] sm:$0xf] %vm3676_vm6, %v4134_v1  ;;  %v4132_v47 = vpack.c.bf16 %v3349_v41, %v3349_v41  ;;  %v3389_v55 = vadd.f32 %v3388_v20, %v3387_v36  ;;  %v3488_v17 = vadd.f32 %v3487_v54, %v3486_v51  ;;  %v4135_v4 = vpack.c.bf16 %v3352_v5, %v3352_v5 }
 0x202   : > { %v4766_v61 = vpop.f32.mrb[12].mxu0  ;;  %v3489_v22 = vsel %vm1209_vm4, %v3450_v49, 0.0  ;;  %v3453_v24 = vmul.f32 %v3352_v5, %v3352_v5  ;;  %v3390_v11 = vsel %vm1209_vm4, %v3350_v31, 0.0  ;;  %v3451_v12 = vmul.f32 %v3350_v31, %v3350_v31 }
 0x203   : > { %v3223_v19 = vpop.f32.mrb[13].mxu0  ;;  %3685 = vst.msk [vmem:[%s6106_s11 + $0x20] sm:$0xf] %vm3676_vm6, %v4132_v47  ;;  %v4133_v52 = vpack.c.bf16 %v3350_v31, %v3350_v31  ;;  %v3490_v0 = vadd.f32 %v3489_v22, %v3488_v17  ;;  %3688 = vst.msk [vmem:[%s6106_s11 + $0x2c] sm:$0xf] %vm3676_vm6, %v4135_v4  ;;  %v3391_v29 = vadd.f32 %v3390_v11, %v3389_v55  ;;  %v3392_v30 = vsel %vm1209_vm4, %v3351_v35, 0.0 }
 0x204   : > { %v4767_v15 = vpop.f32.mrb[14].mxu0  ;;  %v4804_v60 = vadd.f32 %v4766_v61, %v6110_v27  ;;  %v4805_v21 = vadd.f32 %v3223_v19, %v6113_v38  ;;  %v3491_v44 = vsel %vm1209_vm4, %v3451_v12, 0.0  ;;  %v3493_v38 = vsel %vm1209_vm4, %v3452_v9, 0.0 }
 0x205   : > { %v3226_v56 = vpop.f32.mrb[15].mxu0  ;;  %3686 = vst.msk [vmem:[%s6106_s11 + $0x24] sm:$0xf] %vm3676_vm6, %v4133_v52  ;;  %v4806_v8 = vadd.f32 %v4767_v15, %v6117_v7  ;;  %v3393_v6 = vadd.f32 %v3392_v30, %v3391_v29  ;;  %v3492_v62 = vadd.f32 %v3491_v44, %v3490_v0  ;;  %v3394_v50 = vsel %vm1209_vm4, %v3352_v5, 0.0 }
 0x206   : > { %v4807_v40 = vadd.f32 %v3226_v56, %v6123_v13  ;;  %v3355_v18 = vadd.f32 %v4804_v60, %v6097_v10  ;;  %v3353_v27 = vadd.f32 %v4805_v21, %v6097_v10  ;;  %v3495_v7 = vsel %vm1209_vm4, %v3453_v24, 0.0 }
 0x207   : > { %v3356_v23 = vadd.f32 %v4806_v8, %v6097_v10  ;;  %v3494_v46 = vadd.f32 %v3493_v38, %v3492_v62  ;;  %v3395_v63 = vadd.f32 %v3394_v50, %v3393_v6 }
 0x208   : > { %v3354_v48 = vadd.f32 %v4807_v40, %v6097_v10  ;;  %v4138_v13 = vpack.c.bf16 %v3355_v18, %v3355_v18  ;;  %v3396_v45 = vsel %vm1209_vm4, %v3353_v27, 0.0  ;;  %v3454_v33 = vmul.f32 %v3353_v27, %v3353_v27 }
 0x209   : > { %v4136_v58 = vpack.c.bf16 %v3353_v27, %v3353_v27  ;;  %v3496_v3 = vadd.f32 %v3495_v7, %v3494_v46  ;;  %v3397_v32 = vadd.f32 %v3396_v45, %v3395_v63  ;;  %v4139_v57 = vpack.c.bf16 %v3356_v23, %v3356_v23 }
 0x20a   : > { %v4770_v59 = vpop.f32.mrb[16].mxu0  ;;  %3691 = vst.msk [vmem:[%s6106_s11 + $0x38] sm:$0xf] %vm3676_vm6, %v4138_v13  ;;  %v3497_v28 = vsel %vm1209_vm4, %v3454_v33, 0.0  ;;  %v3398_v43 = vsel %vm1209_vm4, %v3354_v48, 0.0  ;;  %v3456_v2 = vmul.f32 %v3355_v18, %v3355_v18  ;;  %v3455_v25 = vmul.f32 %v3354_v48, %v3354_v48 }
 0x20b   : > { %v3239_v14 = vpop.f32.mrb[17].mxu0  ;;  %3689 = vst.msk [vmem:[%s6106_s11 + $0x30] sm:$0xf] %vm3676_vm6, %v4136_v58  ;;  %v3498_v16 = vadd.f32 %v3497_v28, %v3496_v3  ;;  %v4137_v35 = vpack.c.bf16 %v3354_v48, %v3354_v48  ;;  %3692 = vst.msk [vmem:[%s6106_s11 + $0x3c] sm:$0xf] %vm3676_vm6, %v4139_v57  ;;  %v3399_v42 = vadd.f32 %v3398_v43, %v3397_v32  ;;  %v3400_v26 = vsel %vm1209_vm4, %v3355_v18, 0.0 }
 0x20c   : > { %v4771_v34 = vpop.f32.mrb[18].mxu0  ;;  %v3457_v41 = vmul.f32 %v3356_v23, %v3356_v23  ;;  %v3499_v5 = vsel %vm1209_vm4, %v3455_v25, 0.0  ;;  %v3501_v1 = vsel %vm1209_vm4, %v3456_v2, 0.0  ;;  %v3402_v31 = vsel %vm1209_vm4, %v3356_v23, 0.0 }
 0x20d   : > { %v3242_v37 = vpop.f32.mrb[19].mxu0  ;;  %3690 = vst.msk [vmem:[%s6106_s11 + $0x34] sm:$0xf] %vm3676_vm6, %v4137_v35  ;;  %v3401_v39 = vadd.f32 %v3400_v26, %v3399_v42  ;;  %v3500_v53 = vadd.f32 %v3499_v5, %v3498_v16 }
 0x20e   : > { %v3503_v49 = vsel %vm1209_vm4, %v3457_v41, 0.0 }
 0x20f   : > { %v3502_v51 = vadd.f32 %v3501_v1, %v3500_v53  ;;  %v3403_v36 = vadd.f32 %v3402_v31, %v3401_v39 }
 0x211   : > { %v3504_v9 = vadd.f32 %v3503_v49, %v3502_v51 }
 0x212   : > { %v4774_v20 = vpop.f32.mrb[20].mxu0 }
 0x213   : > { %v3255_v54 = vpop.f32.mrb[21].mxu0 }
 0x214   : > { %v4775_v47 = vpop.f32.mrb[22].mxu0 }
 0x215   : > { %v3258_v61 = vpop.f32.mrb[23].mxu0 }
 0x218   : > { %v4610_v55 = vpop.f32.mrb[16].mxu1 }
 0x219   : > { %v4808_v17 = vadd.f32 %v4770_v59, %v4610_v55  ;;  %v2338_v22 = vpop.f32.mrb[17].mxu1 }
 0x21a   : > { %v4809_v4 = vadd.f32 %v3239_v14, %v2338_v22  ;;  %v4611_v19 = vpop.f32.mrb[18].mxu1  ;;  %v6203_v24 = vpop.f32.mrb[24].mxu0 }
 0x21b   : > { %v3359_v11 = vadd.f32 %v4808_v17, %v6097_v10  ;;  %v4810_v12 = vadd.f32 %v4771_v34, %v4611_v19  ;;  %v2341_v52 = vpop.f32.mrb[19].mxu1  ;;  %v6206_v15 = vpop.f32.mrb[25].mxu0 }
 0x21c   : > { %v3357_v0 = vadd.f32 %v4809_v4, %v6097_v10  ;;  %v4811_v29 = vadd.f32 %v3242_v37, %v2341_v52  ;;  %v6209_v60 = vpop.f32.mrb[26].mxu0 }
 0x21d   : > { %v4142_v21 = vpack.c.bf16 %v3359_v11, %v3359_v11  ;;  %v3360_v56 = vadd.f32 %v4810_v12, %v6097_v10  ;;  %v6212_v30 = vpop.f32.mrb[27].mxu0  ;;  %v3460_v62 = vmul.f32 %v3359_v11, %v3359_v11  ;;  %v3408_v7 = vsel %vm1209_vm4, %v3359_v11, 0.0 }
 0x21e   : > { %v3404_v44 = vsel %vm1209_vm4, %v3357_v0, 0.0  ;;  %v3458_v8 = vmul.f32 %v3357_v0, %v3357_v0  ;;  %v4140_v40 = vpack.c.bf16 %v3357_v0, %v3357_v0  ;;  %v3358_v6 = vadd.f32 %v4811_v29, %v6097_v10 }
 0x21f   : > { %3695 = vst.msk [vmem:[%s6106_s11 + $0x48] sm:$0xf] %vm3676_vm6, %v4142_v21  ;;  %v3405_v18 = vadd.f32 %v3404_v44, %v3403_v36  ;;  %v4143_v38 = vpack.c.bf16 %v3360_v56, %v3360_v56  ;;  %v3461_v33 = vmul.f32 %v3360_v56, %v3360_v56  ;;  %v3509_v28 = vsel %vm1209_vm4, %v3460_v62, 0.0 }
 0x220   : > { %v3505_v27 = vsel %vm1209_vm4, %v3458_v8, 0.0  ;;  %3693 = vst.msk [vmem:[%s6106_s11 + $0x40] sm:$0xf] %vm3676_vm6, %v4140_v40  ;;  %v3406_v23 = vsel %vm1209_vm4, %v3358_v6, 0.0  ;;  %v3459_v48 = vmul.f32 %v3358_v6, %v3358_v6  ;;  %v4614_v50 = vpop.f32.mrb[20].mxu1  ;;  %v4141_v63 = vpack.c.bf16 %v3358_v6, %v3358_v6 }
 0x221   : > { %v3506_v46 = vadd.f32 %v3505_v27, %v3504_v9  ;;  %v3407_v13 = vadd.f32 %v3406_v23, %v3405_v18  ;;  %v2354_v45 = vpop.f32.mrb[21].mxu1  ;;  %3696 = vst.msk [vmem:[%s6106_s11 + $0x4c] sm:$0xf] %vm3676_vm6, %v4143_v38  ;;  %v4812_v59 = vadd.f32 %v4774_v20, %v4614_v50  ;;  %v3410_v25 = vsel %vm1209_vm4, %v3360_v56, 0.0 }
 0x222   : > { %v3507_v58 = vsel %vm1209_vm4, %v3459_v48, 0.0  ;;  %v4813_v3 = vadd.f32 %v3255_v54, %v2354_v45  ;;  %v4615_v14 = vpop.f32.mrb[22].mxu1  ;;  %v6226_v32 = vpop.f32.mrb[28].mxu0  ;;  %3694 = vst.msk [vmem:[%s6106_s11 + $0x44] sm:$0xf] %vm3676_vm6, %v4141_v63  ;;  %v3511_v1 = vsel %vm1209_vm4, %v3461_v33, 0.0 }
 0x223   : > { %v3409_v57 = vadd.f32 %v3408_v7, %v3407_v13  ;;  %v3508_v43 = vadd.f32 %v3507_v58, %v3506_v46  ;;  %v4814_v34 = vadd.f32 %v4775_v47, %v4615_v14  ;;  %v2357_v2 = vpop.f32.mrb[23].mxu1  ;;  %v6231_v16 = vpop.f32.mrb[29].mxu0  ;;  %v3363_v35 = vadd.f32 %v4812_v59, %v6097_v10 }
 0x224   : > { %v3361_v37 = vadd.f32 %v4813_v3, %v6097_v10  ;;  %v4815_v42 = vadd.f32 %v3258_v61, %v2357_v2  ;;  %v6236_v26 = vpop.f32.mrb[30].mxu0 }
 0x225   : > { %v3510_v41 = vadd.f32 %v3509_v28, %v3508_v43  ;;  %v3411_v5 = vadd.f32 %v3410_v25, %v3409_v57  ;;  %v3364_v39 = vadd.f32 %v4814_v34, %v6097_v10  ;;  %v6239_v53 = vpop.f32.mrb[31].mxu0  ;;  %v4146_v31 = vpack.c.bf16 %v3363_v35, %v3363_v35 }
 0x226   : > { %v3412_v51 = vsel %vm1209_vm4, %v3361_v37, 0.0  ;;  %v3462_v20 = vmul.f32 %v3361_v37, %v3361_v37  ;;  %v4144_v54 = vpack.c.bf16 %v3361_v37, %v3361_v37  ;;  %v3464_v61 = vmul.f32 %v3363_v35, %v3363_v35 }
 0x227   : > { %v3413_v36 = vadd.f32 %v3412_v51, %v3411_v5  ;;  %v3512_v49 = vadd.f32 %v3511_v1, %v3510_v41  ;;  %3699 = vst.msk [vmem:[%s6106_s11 + $0x58] sm:$0xf] %vm3676_vm6, %v4146_v31  ;;  %v4147_v9 = vpack.c.bf16 %v3364_v39, %v3364_v39  ;;  %v3362_v17 = vadd.f32 %v4815_v42, %v6097_v10 }
 0x228   : > { %v4618_v47 = vpop.f32.mrb[24].mxu1  ;;  %v3513_v55 = vsel %vm1209_vm4, %v3462_v20, 0.0  ;;  %3697 = vst.msk [vmem:[%s6106_s11 + $0x50] sm:$0xf] %vm3676_vm6, %v4144_v54  ;;  %v3465_v11 = vmul.f32 %v3364_v39, %v3364_v39  ;;  %v3416_v62 = vsel %vm1209_vm4, %v3363_v35, 0.0  ;;  %v3418_v38 = vsel %vm1209_vm4, %v3364_v39, 0.0 }
 0x229   : > { %v4816_v22 = vadd.f32 %v6203_v24, %v4618_v47  ;;  %v2370_v4 = vpop.f32.mrb[25].mxu1  ;;  %v3514_v19 = vadd.f32 %v3513_v55, %v3512_v49  ;;  %3700 = vst.msk [vmem:[%s6106_s11 + $0x5c] sm:$0xf] %vm3676_vm6, %v4147_v9  ;;  %v3414_v0 = vsel %vm1209_vm4, %v3362_v17, 0.0  ;;  %v3463_v29 = vmul.f32 %v3362_v17, %v3362_v17 }
 0x22a   : > { %v4817_v12 = vadd.f32 %v6206_v15, %v2370_v4  ;;  %v4619_v52 = vpop.f32.mrb[26].mxu1  ;;  %v4145_v21 = vpack.c.bf16 %v3362_v17, %v3362_v17  ;;  %v3415_v8 = vadd.f32 %v3414_v0, %v3413_v36  ;;  %v3517_v15 = vsel %vm1209_vm4, %v3464_v61, 0.0 }
 0x22b   : > { %v3367_v56 = vadd.f32 %v4816_v22, %v6097_v10  ;;  %v2373_v44 = vpop.f32.mrb[27].mxu1  ;;  %v4818_v40 = vadd.f32 %v6209_v60, %v4619_v52  ;;  %v3515_v18 = vsel %vm1209_vm4, %v3463_v29, 0.0  ;;  %v3519_v13 = vsel %vm1209_vm4, %v3465_v11, 0.0 }
 0x22c   : > { %v3365_v24 = vadd.f32 %v4817_v12, %v6097_v10  ;;  %v4819_v6 = vadd.f32 %v6212_v30, %v2373_v44  ;;  %3698 = vst.msk [vmem:[%s6106_s11 + $0x54] sm:$0xf] %vm3676_vm6, %v4145_v21  ;;  %v3417_v23 = vadd.f32 %v3416_v62, %v3415_v8  ;;  %v3516_v48 = vadd.f32 %v3515_v18, %v3514_v19 }
 0x22d   : > { %v4150_v27 = vpack.c.bf16 %v3367_v56, %v3367_v56  ;;  %v3368_v7 = vadd.f32 %v4818_v40, %v6097_v10  ;;  %v3424_v58 = vsel %vm1209_vm4, %v3367_v56, 0.0  ;;  %v3468_v35 = vmul.f32 %v3367_v56, %v3367_v56 }
 0x22e   : > { %v3466_v50 = vmul.f32 %v3365_v24, %v3365_v24  ;;  %v3420_v60 = vsel %vm1209_vm4, %v3365_v24, 0.0  ;;  %v4148_v30 = vpack.c.bf16 %v3365_v24, %v3365_v24  ;;  %v3366_v46 = vadd.f32 %v4819_v6, %v6097_v10 }
 0x22f   : > { %3703 = vst.msk [vmem:[%s6106_s11 + $0x68] sm:$0xf] %vm3676_vm6, %v4150_v27  ;;  %v3518_v63 = vadd.f32 %v3517_v15, %v3516_v48  ;;  %v3419_v45 = vadd.f32 %v3418_v38, %v3417_v23  ;;  %v4151_v3 = vpack.c.bf16 %v3368_v7, %v3368_v7  ;;  %v3469_v36 = vmul.f32 %v3368_v7, %v3368_v7 }
 0x230   : > { %v4622_v33 = vpop.f32.mrb[28].mxu1  ;;  %v3521_v59 = vsel %vm1209_vm4, %v3466_v50, 0.0  ;;  %3701 = vst.msk [vmem:[%s6106_s11 + $0x60] sm:$0xf] %vm3676_vm6, %v4148_v30  ;;  %v3422_v14 = vsel %vm1209_vm4, %v3366_v46, 0.0  ;;  %v3467_v34 = vmul.f32 %v3366_v46, %v3366_v46  ;;  %v4149_v2 = vpack.c.bf16 %v3366_v46, %v3366_v46 }
 0x231   : > { %v2386_v28 = vpop.f32.mrb[29].mxu1  ;;  %v3421_v57 = vadd.f32 %v3420_v60, %v3419_v45  ;;  %v3520_v43 = vadd.f32 %v3519_v13, %v3518_v63  ;;  %3704 = vst.msk [vmem:[%s6106_s11 + $0x6c] sm:$0xf] %vm3676_vm6, %v4151_v3  ;;  %v4820_v37 = vadd.f32 %v6226_v32, %v4622_v33  ;;  %v3525_v9 = vsel %vm1209_vm4, %v3468_v35, 0.0 }
 0x232   : > { %v4623_v25 = vpop.f32.mrb[30].mxu1  ;;  %v4821_v42 = vadd.f32 %v6231_v16, %v2386_v28  ;;  %v3523_v31 = vsel %vm1209_vm4, %v3467_v34, 0.0  ;;  %3702 = vst.msk [vmem:[%s6106_s11 + $0x64] sm:$0xf] %vm3676_vm6, %v4149_v2  ;;  %v3426_v47 = vsel %vm1209_vm4, %v3368_v7, 0.0  ;;  %v3527_v19 = vsel %vm1209_vm4, %v3469_v36, 0.0 }
 0x233   : > { %v4822_v41 = vadd.f32 %v6236_v26, %v4623_v25  ;;  %v2389_v5 = vpop.f32.mrb[31].mxu1  ;;  %v3522_v39 = vadd.f32 %v3521_v59, %v3520_v43  ;;  %v3423_v1 = vadd.f32 %v3422_v14, %v3421_v57  ;;  %v3371_v20 = vadd.f32 %v4820_v37, %v6097_v10 }
 0x234   : > { %v4823_v51 = vadd.f32 %v6239_v53, %v2389_v5  ;;  %v3369_v49 = vadd.f32 %v4821_v42, %v6097_v10 }
 0x235   : > { %v3372_v32 = vadd.f32 %v4822_v41, %v6097_v10  ;;  %v3425_v16 = vadd.f32 %v3424_v58, %v3423_v1  ;;  %v3524_v54 = vadd.f32 %v3523_v31, %v3522_v39  ;;  %v4154_v61 = vpack.c.bf16 %v3371_v20, %v3371_v20 }
 0x236   : > { %v3370_v26 = vadd.f32 %v4823_v51, %v6097_v10  ;;  %v3428_v53 = vsel %vm1209_vm4, %v3369_v49, 0.0  ;;  %v3470_v22 = vmul.f32 %v3369_v49, %v3369_v49  ;;  %v4152_v4 = vpack.c.bf16 %v3369_v49, %v3369_v49 }
 0x237   : > { %v3526_v55 = vadd.f32 %v3525_v9, %v3524_v54  ;;  %v3427_v17 = vadd.f32 %v3426_v47, %v3425_v16  ;;  %3707 = vst.msk [vmem:[%s6106_s11 + $0x78] sm:$0xf] %vm3676_vm6, %v4154_v61  ;;  %v4155_v11 = vpack.c.bf16 %v3372_v32, %v3372_v32  ;;  %v3472_v29 = vmul.f32 %v3371_v20, %v3371_v20 }
 0x238   : > { %v3529_v52 = vsel %vm1209_vm4, %v3470_v22, 0.0  ;;  %3705 = vst.msk [vmem:[%s6106_s11 + $0x70] sm:$0xf] %vm3676_vm6, %v4152_v4  ;;  %v3430_v0 = vsel %vm1209_vm4, %v3370_v26, 0.0  ;;  %v3471_v21 = vmul.f32 %v3370_v26, %v3370_v26  ;;  %v4153_v56 = vpack.c.bf16 %v3370_v26, %v3370_v26 }
 0x239   : > { %v3429_v12 = vadd.f32 %v3428_v53, %v3427_v17  ;;  %v3528_v10 = vadd.f32 %v3527_v19, %v3526_v55  ;;  %3708 = vst.msk [vmem:[%s6106_s11 + $0x7c] sm:$0xf] %vm3676_vm6, %v4155_v11  ;;  %v3432_v24 = vsel %vm1209_vm4, %v3371_v20, 0.0  ;;  %v3473_v40 = vmul.f32 %v3372_v32, %v3372_v32 }
 0x23a   : > { %v3531_v6 = vsel %vm1209_vm4, %v3471_v21, 0.0  ;;  %3706 = vst.msk [vmem:[%s6106_s11 + $0x74] sm:$0xf] %vm3676_vm6, %v4153_v56  ;;  %v3533_v18 = vsel %vm1209_vm4, %v3472_v29, 0.0  ;;  %v3434_v27 = vsel %vm1209_vm4, %v3372_v32, 0.0 }
 0x23b   : > { %v3530_v44 = vadd.f32 %v3529_v52, %v3528_v10  ;;  %v3431_v8 = vadd.f32 %v3430_v0, %v3429_v12  ;;  %v3535_v48 = vsel %vm1209_vm4, %v3473_v40, 0.0 }
 0x23d   : > { %v3433_v62 = vadd.f32 %v3432_v24, %v3431_v8  ;;  %v3532_v15 = vadd.f32 %v3531_v6, %v3530_v44 }
 0x23f   : > { %v3435_v38 = vadd.f32 %v3434_v27, %v3433_v62  ;;  %v3534_v23 = vadd.f32 %v3533_v18, %v3532_v15 }
 0x241   : > { %v3436_v50 = vrot.slane %v3435_v38, 4  ;;  %v3536_v60 = vadd.f32 %v3535_v48, %v3534_v23 }
 0x243   : > { %v3437_v30 = vadd.f32 %v3436_v50, %v3435_v38  ;;  %v3537_v7 = vrot.slane %v3536_v60, 4 }
 0x245   : > { %v3438_v46 = vrot.slane %v3437_v30, 2  ;;  %v3538_v13 = vadd.f32 %v3537_v7, %v3536_v60 }
 0x247   : > { %v3439_v63 = vadd.f32 %v3438_v46, %v3437_v30  ;;  %v3539_v45 = vrot.slane %v3538_v13, 2 }
 0x249   : > { %v3440_v33 = vrot.slane %v3439_v63, 1  ;;  %v3540_v58 = vadd.f32 %v3539_v45, %v3538_v13 }
 0x24b   : > { %v3541_v59 = vrot.slane %v3540_v58, 1  ;;  %v3441_v3 = vadd.f32 %v3440_v33, %v3439_v63 }
 0x24d   : > { %v3542_v14 = vadd.f32 %v3541_v59, %v3540_v58 }
 0x24f   : > { %v3544_v28 = vsel %vm881_vm0, %v3441_v3, %v3542_v14 }
 0x250   : > { %v3546_v57 = vsel %vm3545_vm7, %v3544_v28, 0.0 }
 0x251   : > { %3547 = vst.msk [vmem:[%s492_s24] sm:$0xff] %vm1209_vm4, %v3546_v57 }
 0x252 PF: > { %s19_s29 = sadd.s32 1, %s5136_s29   ;;  %s6349_s27 = smov %s5132_s28 }
 0x253   : > { %p16_p5 = scmp.ge.s32.totalorder %s19_s29, 4   ;;  %s6350_s28 = smov %s6352_s30 }
 0x255   :  { %18 = sbr.rel (!%p16_p5) target bundleno = 2 (0x2), region = 96 }

// kernel: _lambda_.33
= control target key start
LH: loop header
LB: loop body
LE: loop exit
PB: predicated region body
PF: predicated region fallthrough
CT: control target
= control target key end

     0   :  { %s4882_s27 = smov 0   ;;  %s4884_s28 = smov 0   ;;  %s5949_s0 = inlined_call_operand.vmem [shape: bf16[2,16,16,64], index: 0, kind: input, shape index: {}, may-alias: {0,1,2}]   ;;  %s5950_s1 = inlined_call_operand.vmem [shape: bf16[2,16,16,64], index: 1, kind: input, shape index: {}, may-alias: {0,1,2}]   ;;  %s5951_s2 = inlined_call_operand.vmem [shape: bf16[2,16,16,64], index: 2, kind: input, shape index: {}, may-alias: {0,1,2}]   ;;  %s5952_s3 = inlined_call_operand.vmem [shape: f32[1,64], index: 3, kind: input, shape index: {}]   ;;  %s5953_s4 = inlined_call_operand.vmem [shape: f32[1,64], index: 4, kind: input, shape index: {}]   ;;  %s5954_s5 = inlined_call_operand.vmem [shape: bf16[576,3], index: 5, kind: input, shape index: {}]   ;;  %s5955_s6 = inlined_call_operand.vmem [shape: f32[1,3], index: 6, kind: input, shape index: {}]   ;;  %s5956_s7 = inlined_call_operand.vmem [shape: f32[2,16,16,3], index: 7, kind: input, shape index: {}]   ;;  %s5957_s8 = inlined_call_operand.vmem [shape: f32[2,16,16,3], index: 8, kind: output, shape index: {}]  }
   0x1   :  { %s4886_s29 = smov 0  }
   0x2 LB: > { %s30_s30 = sadd.s32 1, %s4831_s28  ;;  %p3653_p0 = scmp.ge.s32.totalorder %s4835_s29, 1  ;;  %s4835_s29 = sphi %s4886_s29, %s18_s29   ;;  %s4831_s28 = sphi %s4884_s28, %s5977_s28   ;;  %s4827_s27 = sphi %s4882_s27, %s5976_s27  }
   0x3   : > { %p32_p1 = scmp.ge.s32.totalorder %s30_s30, 2  ;;  %p366_p2 = scmp.lt.s32.totalorder %s4835_s29, 3 }
   0x5   : > { %s5979_s30 = smov (%p32_p1, %s30_s30), 0  ;;  %p367_p3 = pnand %p3653_p0, %p366_p2 }
   0x7   : > { %370 = sbr.rel (%p367_p3) target bundleno = 571 (0x23b), region = 52 }
   0xe   : > { %v4771_v0 = vld [vmem:[%s5954_s5 + $0x80] sm:$0xff]   ;;  %p450_p4 = scmp.lt.s32.totalorder %s4827_s27, 1  ;;  %v4773_v2 = vld [vmem:[%s5954_s5 + $0x88] sm:$0xff]   ;;  %v4775_v4 = vld [vmem:[%s5954_s5 + $0x90] sm:$0xff]   ;;  %vm901_vm0 = vcmask 1040384   ;;  %vm1229_vm4 = vcmask 523264  }
   0xf   : > { %v4772_v1 = vld [vmem:[%s5954_s5 + $0x20] sm:$0xff]   ;;  %4283 = vmatprep.subr.bf16.mxu0 %v4771_v0  ;;  %v4774_v3 = vld [vmem:[%s5954_s5 + $0x28] sm:$0xff]   ;;  %v4776_v5 = vld [vmem:[%s5954_s5 + $0x30] sm:$0xff]   ;;  %vm902_vm1 = vsmask.f32 256  ;;  %vm1688_vm5 = vcmask 1046528  }
  0x10   : > { %s5981_s27 = smov (!%p450_p4, %s4827_s27), 1  ;;  %4123 = vmatprep.subr.bf16.mxu1 %v4772_v1  ;;  %4284 = vmatpush3.bf16.msra.mxu0 %v4771_v0  ;;  %v4777_v6 = vld [vmem:[%s5954_s5 + $0x98] sm:$0xff]   ;;  %v4939_v7 = vld [vmem:[%s5952_s3] ss:$0 sm:$0xff]  ;;  %vm1012_vm2 = vsmask.f32 7424  ;;  %vm4988_vm3 = vmand %vm901_vm0, %vm902_vm1 }
  0x11   : > { %4124 = vmatpush3.bf16.msra.mxu1 %v4772_v1  ;;  %4285 = vmatprep.subr.bf16.mxu0 %v4773_v2  ;;  %s4918_s19 = sshll.u32 %s5981_s27, 7  ;;  %v4778_v9 = vld [vmem:[%s5954_s5 + $0x38] sm:$0xff]   ;;  %v4949_v14 = vld [vmem:[%s5953_s4] ss:$0 sm:$0xff]  ;;  %v4810_v0 = vld [vmem:[%s5954_s5 + $0x88] sm:$0xff]   ;;  %s3853_s22 = sshll.u32 %s5981_s27, 8 }
  0x12   : > { %4125 = vmatprep.subr.bf16.mxu1 %v4774_v3  ;;  %s4927_s24 = scalar_lea.vmem %s5950_s1, %s4918_s19  ;;  %s458_s9 = scalar_lea.vmem %s5949_s0, %s4918_s19  ;;  %v4959_v24 = vld [vmem:[%s5954_s5 + $0xa0] sm:$0xff]   ;;  %vm3457_vm6 = vcmask 23552  }
  0x13   : > { %v3860_v8 = vld [vmem:[%s4927_s24] sm:$0xff]   ;;  %v3928_v12 = vld [vmem:[%s4927_s24 + $0x8] sm:$0xff]   ;;  %v3929_v25 = vld [vmem:[%s4927_s24 + $0x10] sm:$0xff]   ;;  %s3852_s14 = sadd.s32 120, %s4918_s19  ;;  %s5793_s26 = scalar_lea.vmem %s5956_s7, %s3853_s22 }
  0x14   : > { %4286 = vmatpush3.bf16.msra.mxu0 %v4773_v2  ;;  %v3861_v10 = vunpack.c.l.bf16 %v3860_v8  ;;  %v3862_v11 = vunpack.c.h.bf16 %v3860_v8  ;;  %v3856_v13 = vld [vmem:[%s458_s9] sm:$0xff]   ;;  %v3865_v15 = vunpack.c.l.bf16 %v3928_v12  ;;  %v3866_v16 = vunpack.c.h.bf16 %v3928_v12  ;;  %v3930_v35 = vld [vmem:[%s4927_s24 + $0x18] sm:$0xff]   ;;  %s486_s20 = scalar_lea.vmem %s5951_s2, %s3852_s14  ;;  %s5810_s12 = scalar_lea.vmem %s5957_s8, %s3853_s22 }
  0x15   : > { %4126 = vmatpush3.bf16.msra.mxu1 %v4774_v3  ;;  %4287 = vmatprep.subr.bf16.mxu0 %v4775_v4  ;;  %v3857_v17 = vunpack.c.l.bf16 %v3856_v13  ;;  %v3858_v18 = vunpack.c.h.bf16 %v3856_v13  ;;  %v4968_v29 = vld [vmem:[%s5954_s5] sm:$0xff]   ;;  %v3869_v30 = vunpack.c.l.bf16 %v3929_v25  ;;  %v3870_v34 = vunpack.c.h.bf16 %v3929_v25 }
  0x16   : > { %4127 = vmatprep.subr.bf16.mxu1 %v4776_v5  ;;  %v608_v19 = vmul.f32 %v3861_v10, %v4939_v7  ;;  %v609_v20 = vmul.f32 %v3862_v11, %v4939_v7  ;;  %v610_v21 = vmul.f32 %v3865_v15, %v4939_v7  ;;  %v611_v22 = vmul.f32 %v3866_v16, %v4939_v7  ;;  %v4982_v52 = vld [vmem:[%s4927_s24 + $0x20] sm:$0xff]  }
  0x17   : > { %v526_v23 = vmul.f32 %v3857_v17, %v4939_v7  ;;  %v527_v28 = vmul.f32 %v3858_v18, %v4939_v7  ;;  %v612_v39 = vmul.f32 %v3869_v30, %v4939_v7  ;;  %v613_v43 = vmul.f32 %v3870_v34, %v4939_v7 }
  0x18   : > { %4288 = vmatpush3.bf16.msra.mxu0 %v4775_v4  ;;  %v640_v26 = vadd.f32 %v4949_v14, %v608_v19  ;;  %v641_v27 = vadd.f32 %v4949_v14, %v609_v20  ;;  %v642_v31 = vadd.f32 %v4949_v14, %v610_v21  ;;  %v643_v32 = vadd.f32 %v4949_v14, %v611_v22 }
  0x19   : > { %4128 = vmatpush3.bf16.msra.mxu1 %v4776_v5  ;;  %4289 = vmatprep.subr.bf16.mxu0 %v4777_v6  ;;  %v534_v33 = vadd.f32 %v4949_v14, %v526_v23  ;;  %v535_v38 = vadd.f32 %v4949_v14, %v527_v28  ;;  %v644_v46 = vadd.f32 %v4949_v14, %v612_v39  ;;  %v3873_v47 = vunpack.c.l.bf16 %v3930_v35 }
  0x1a   : > { %4129 = vmatprep.subr.bf16.mxu1 %v4778_v9  ;;  %v672_v36 = vmax.f32 %v640_v26, 0.0  ;;  %v673_v37 = vmax.f32 %v641_v27, 0.0  ;;  %v674_v40 = vmax.f32 %v642_v31, 0.0  ;;  %v675_v41 = vmax.f32 %v643_v32, 0.0 }
  0x1b   : > { %v536_v42 = vmax.f32 %v534_v33, 0.0  ;;  %v537_v45 = vmax.f32 %v535_v38, 0.0  ;;  %v645_v50 = vadd.f32 %v4949_v14, %v613_v43  ;;  %v3874_v51 = vunpack.c.h.bf16 %v3930_v35 }
  0x1c   : > { %4290 = vmatpush3.bf16.msra.mxu0 %v4777_v6  ;;  %v722_v44 = vpack.c.bf16 %v673_v37, %v672_v36  ;;  %v723_v48 = vpack.c.bf16 %v675_v41, %v674_v40  ;;  %v676_v56 = vmax.f32 %v644_v46, 0.0  ;;  %v614_v60 = vmul.f32 %v3873_v47, %v4939_v7  ;;  %v3932_v46 = vld [vmem:[%s4927_s24 + $0x28] sm:$0xff]  }
  0x1d   : > { %4130 = vmatpush3.bf16.msra.mxu1 %v4778_v9  ;;  %4323 = vmatprep.subr.bf16.mxu0 %v4959_v24  ;;  %v542_v49 = vmul.f32 0.0, %v536_v42  ;;  %v543_v55 = vmul.f32 0.0, %v537_v45  ;;  %v677_v59 = vmax.f32 %v645_v50, 0.0  ;;  %v615_v63 = vmul.f32 %v3874_v51, %v4939_v7  ;;  %v4781_v45 = vld [vmem:[%s5954_s5 + $0xa8] sm:$0xff]  }
  0x1e   : > { %4163 = vmatprep.subr.bf16.mxu1 %v4968_v29  ;;  %v747_v53 = vshrl.u32 %v722_v44, 16  ;;  %v750_v54 = vshll.u32 %v722_v44, 16  ;;  %v754_v57 = vshrl.u32 %v723_v48, 16  ;;  %v757_v58 = vshll.u32 %v723_v48, 16 }
  0x1f   : > { %v721_v62 = vpack.c.bf16 %v543_v55, %v542_v49  ;;  %v724_v2 = vpack.c.bf16 %v677_v59, %v676_v56  ;;  %v646_v3 = vadd.f32 %v4949_v14, %v614_v60  ;;  %v3877_v4 = vunpack.c.l.bf16 %v4982_v52  ;;  %v4782_v59 = vld [vmem:[%s5954_s5 + $0x8] sm:$0xff]  }
  0x20   : > { %v749_v61 = vrot.slane %v747_v53, 7  ;;  %v756_v1 = vrot.slane %v754_v57, 7  ;;  %v3878_v13 = vunpack.c.h.bf16 %v4982_v52  ;;  %v647_v43 = vadd.f32 %v4949_v14, %v615_v63 }
  0x21   : > { %v740_v8 = vshrl.u32 %v721_v62, 16  ;;  %v743_v9 = vshll.u32 %v721_v62, 16  ;;  %v761_v31 = vshrl.u32 %v724_v2, 16  ;;  %v764_v32 = vshll.u32 %v724_v2, 16 }
  0x22   : > { %v752_v5 = vor.u32 %v750_v54, %v749_v61  ;;  %v4996_v6 = vsel %vm4988_vm3, %v749_v61, 0  ;;  %v759_v11 = vor.u32 %v757_v58, %v756_v1  ;;  %v5001_v12 = vsel %vm4988_vm3, %v756_v1, 0  ;;  %v3933_v1 = vld [vmem:[%s4927_s24 + $0x30] sm:$0xff]  }
  0x23   : > { %v1033_v10 = vshll.u32 %v4996_v6, 16  ;;  %v1693_v16 = vrot.slane %v4996_v6, 1  ;;  %v1045_v17 = vshll.u32 %v5001_v12, 16  ;;  %v742_v18 = vrot.slane %v740_v8, 7 }
  0x24   : > { %v5006_v15 = vsel %vm4988_vm3, 0, %v752_v5  ;;  %v5014_v21 = vsel %vm4988_vm3, 0, %v759_v11  ;;  %v1696_v22 = vrot.slane %v5001_v12, 1  ;;  %v763_v40 = vrot.slane %v761_v31, 7  ;;  %v4785_v31 = vld [vmem:[%s5954_s5 + $0x10] sm:$0xff]  }
  0x25   : > { %v1026_v19 = vshrl.u32 %v5006_v15, 16  ;;  %v1028_v20 = vshll.u32 %v5006_v15, 16  ;;  %v1035_v23 = vrot.slane %v1033_v10, 1  ;;  %v1038_v25 = vshrl.u32 %v5014_v21, 16 }
  0x26   : > { %v1040_v26 = vshll.u32 %v5014_v21, 16  ;;  %v745_v27 = vor.u32 %v743_v9, %v742_v18  ;;  %v5021_v30 = vsel %vm4988_vm3, %v742_v18, 0  ;;  %v1047_v34 = vrot.slane %v1045_v17, 1 }
  0x27   : > { %v1030_v28 = vrot.slane %v1028_v20, 1  ;;  %v1021_v36 = vshll.u32 %v5021_v30, 16  ;;  %v678_v44 = vmax.f32 %v646_v3, 0.0  ;;  %v766_v49 = vor.u32 %v764_v32, %v763_v40 }
  0x28   : > { %v1042_v33 = vrot.slane %v1040_v26, 1  ;;  %v5025_v35 = vsel %vm4988_vm3, 0, %v745_v27  ;;  %v5038_v50 = vsel %vm4988_vm3, %v763_v40, 0  ;;  %v679_v53 = vmax.f32 %v647_v43, 0.0 }
  0x29   : > { %v1031_v37 = vor.u32 %v1030_v28, %v1026_v19  ;;  %v1014_v38 = vshrl.u32 %v5025_v35, 16  ;;  %v1016_v39 = vshll.u32 %v5025_v35, 16  ;;  %v1023_v42 = vrot.slane %v1021_v36, 1  ;;  %v4784_v28 = vld [vmem:[%s5954_s5 + $0xb8] sm:$0xff]  }
  0x2a   : > { %v1043_v41 = vor.u32 %v1042_v33, %v1038_v25  ;;  %v1057_v52 = vshll.u32 %v5038_v50, 16  ;;  %v616_v54 = vmul.f32 %v3877_v4, %v4939_v7  ;;  %v5050_v56 = vsel %vm4988_vm3, 0, %v766_v49 }
  0x2b   : > { %v1036_v47 = vsel %vm1012_vm2, %v1031_v37, %v1035_v23  ;;  %v1018_v48 = vrot.slane %v1016_v39, 1  ;;  %v617_v57 = vmul.f32 %v3878_v13, %v4939_v7  ;;  %v3881_v58 = vunpack.c.l.bf16 %v3932_v46  ;;  %v3934_v13 = vld [vmem:[%s4927_s24 + $0x38] sm:$0xff]  }
  0x2c   : > { %4291 = vmatprep.mubr.msk.bf16.mxu0 %vm1229_vm4, %v1036_v47  ;;  %v5042_v51 = vsel %vm1012_vm2, %v1043_v41, %v1047_v34  ;;  %v1050_v60 = vshrl.u32 %v5050_v56, 16  ;;  %v1052_v61 = vshll.u32 %v5050_v56, 16  ;;  %v1059_v62 = vrot.slane %v1057_v52, 1 }
  0x2d   : > { %4292 = vmatmul.mubr.msk.bf16.vlgmr.msra.gmra.mrb[0].mxu0 %vm1229_vm4, %v5042_v51  ;;  %v1019_v55 = vor.u32 %v1018_v48, %v1014_v38  ;;  %v725_v63 = vpack.c.bf16 %v679_v53, %v678_v44  ;;  %v648_v3 = vadd.f32 %v4949_v14, %v616_v54  ;;  %v649_v4 = vadd.f32 %v4949_v14, %v617_v57  ;;  %v4787_v48 = vld [vmem:[%s5954_s5 + $0x18] sm:$0xff]  }
  0x2e   : > { %4324 = vmatpush3.bf16.msra.mxu0 %v4959_v24  ;;  %v3882_v5 = vunpack.c.h.bf16 %v3932_v46  ;;  %v4783_v24 = vld [vmem:[%s5954_s5 + $0xb0] sm:$0xff]   ;;  %v1054_v8 = vrot.slane %v1052_v61, 1  ;;  %v618_v11 = vmul.f32 %v3881_v58, %v4939_v7  ;;  %v3885_v20 = vunpack.c.l.bf16 %v3933_v1 }
  0x2f   : > { %v1024_v2 = vsel %vm1012_vm2, %v1019_v55, %v1023_v42  ;;  %4325 = vmatprep.subr.bf16.mxu0 %v4781_v45  ;;  %v768_v9 = vshrl.u32 %v725_v63, 16  ;;  %v771_v10 = vshll.u32 %v725_v63, 16  ;;  %v680_v17 = vmax.f32 %v648_v3, 0.0 }
  0x30   : > { %4131 = vmatprep.mubr.msk.bf16.mxu1 %vm1229_vm4, %v1024_v2  ;;  %v681_v18 = vmax.f32 %v649_v4, 0.0  ;;  %v619_v19 = vmul.f32 %v3882_v5, %v4939_v7  ;;  %v1055_v23 = vor.u32 %v1054_v8, %v1050_v60  ;;  %v650_v26 = vadd.f32 %v4949_v14, %v618_v11  ;;  %v5109_v60 = vld [vmem:[%s5954_s5 + $0xc0] sm:$0xff]  }
  0x31   : > { %4132 = vmatmul.mubr.msk.bf16.vlgmr.msra.gmra.mrb[0].mxu1 %vm1229_vm4, %v1036_v47  ;;  %v770_v25 = vrot.slane %v768_v9, 7  ;;  %v3886_v27 = vunpack.c.h.bf16 %v3933_v1  ;;  %v620_v33 = vmul.f32 %v3885_v20, %v4939_v7  ;;  %v3889_v34 = vunpack.c.l.bf16 %v3934_v13  ;;  %v5128_v11 = vld [vmem:[%s5954_s5 + $0x40] sm:$0xff]  }
  0x32   : > { %4164 = vmatpush3.bf16.msra.mxu1 %v4968_v29  ;;  %4135 = vmatprep.mubr.msk.bf16.mxu1 %vm1229_vm4, %v5042_v51  ;;  %v726_v32 = vpack.c.bf16 %v681_v18, %v680_v17  ;;  %v651_v29 = vadd.f32 %v4949_v14, %v619_v19  ;;  %v5084_v36 = vsel %vm1012_vm2, %v1055_v23, %v1059_v62  ;;  %v682_v39 = vmax.f32 %v650_v26, 0.0 }
  0x33   : > { %4326 = vmatpush3.bf16.msra.mxu0 %v4781_v45  ;;  %4165 = vmatprep.subr.bf16.mxu1 %v4782_v59  ;;  %v773_v37 = vor.u32 %v771_v10, %v770_v25  ;;  %v5088_v38 = vsel %vm4988_vm3, %v770_v25, 0  ;;  %v621_v45 = vmul.f32 %v3886_v27, %v4939_v7  ;;  %v652_v46 = vadd.f32 %v4949_v14, %v620_v33 }
  0x34   : > { %4327 = vmatprep.subr.bf16.mxu0 %v4783_v24  ;;  %4295 = vmatprep.mubr.msk.bf16.mxu0 %vm1229_vm4, %v5084_v36  ;;  %v1069_v40 = vshll.u32 %v5088_v38, 16  ;;  %v775_v41 = vshrl.u32 %v726_v32, 16  ;;  %v778_v42 = vshll.u32 %v726_v32, 16  ;;  %v683_v43 = vmax.f32 %v651_v29, 0.0 }
  0x35   : > { %v5095_v44 = vsel %vm4988_vm3, 0, %v773_v37  ;;  %v3890_v47 = vunpack.c.h.bf16 %v3934_v13  ;;  %v653_v57 = vadd.f32 %v4949_v14, %v621_v45  ;;  %v684_v58 = vmax.f32 %v652_v46, 0.0 }
  0x36   : > { %4166 = vmatpush3.bf16.msra.mxu1 %v4782_v59  ;;  %v1062_v49 = vshrl.u32 %v5095_v44, 16  ;;  %v1064_v52 = vshll.u32 %v5095_v44, 16  ;;  %v1071_v53 = vrot.slane %v1069_v40, 1  ;;  %v777_v54 = vrot.slane %v775_v41, 7 }
  0x37   : > { %4328 = vmatpush3.bf16.msra.mxu0 %v4783_v24  ;;  %4167 = vmatprep.subr.bf16.mxu1 %v4785_v31  ;;  %v727_v55 = vpack.c.bf16 %v683_v43, %v682_v39  ;;  %v622_v59 = vmul.f32 %v3889_v34, %v4939_v7  ;;  %v623_v1 = vmul.f32 %v3890_v47, %v4939_v7  ;;  %v685_v5 = vmax.f32 %v653_v57, 0.0  ;;  %v3935_v43 = vld [vmem:[%s4927_s24 + $0x40] sm:$0xff]  }
  0x38   : > { %4329 = vmatprep.subr.bf16.mxu0 %v4784_v28  ;;  %v1066_v61 = vrot.slane %v1064_v52, 1  ;;  %v780_v62 = vor.u32 %v778_v42, %v777_v54  ;;  %v5115_v63 = vsel %vm4988_vm3, %v777_v54, 0  ;;  %v1692_v32 = vrot.slane %v5006_v15, 1 }
  0x39   : > { %4136 = vmatmul.mubr.msk.bf16.gmra.mrb[4].mxu1 %vm1229_vm4, %v5084_v36  ;;  %v1081_v2 = vshll.u32 %v5115_v63, 16  ;;  %v782_v3 = vshrl.u32 %v727_v55, 16  ;;  %v785_v4 = vshll.u32 %v727_v55, 16  ;;  %v654_v9 = vadd.f32 %v4949_v14, %v622_v59 }
  0x3a   : > { %4168 = vmatpush3.bf16.msra.mxu1 %v4785_v31  ;;  %v1067_v24 = vor.u32 %v1066_v61, %v1062_v49  ;;  %v5121_v8 = vsel %vm4988_vm3, 0, %v780_v62  ;;  %v655_v10 = vadd.f32 %v4949_v14, %v623_v1  ;;  %v728_v23 = vpack.c.bf16 %v685_v5, %v684_v58 }
  0x3b   : > { %4330 = vmatpush3.bf16.msra.mxu0 %v4784_v28  ;;  %4169 = vmatprep.subr.bf16.mxu1 %v4787_v48  ;;  %v1074_v13 = vshrl.u32 %v5121_v8, 16  ;;  %v1076_v17 = vshll.u32 %v5121_v8, 16  ;;  %v1083_v18 = vrot.slane %v1081_v2, 1  ;;  %v784_v19 = vrot.slane %v782_v3, 7 }
  0x3c   : > { %4363 = vmatprep.subr.bf16.mxu0 %v5109_v60  ;;  %v5134_v20 = vsel %vm1012_vm2, %v1067_v24, %v1071_v53  ;;  %v686_v25 = vmax.f32 %v654_v9, 0.0  ;;  %v687_v26 = vmax.f32 %v655_v10, 0.0  ;;  %v789_v33 = vshrl.u32 %v728_v23, 16 }
  0x3d   : > { %4296 = vmatmul.mubr.msk.bf16.gmra.mrb[4].mxu0 %vm1229_vm4, %v5134_v20  ;;  %v1078_v27 = vrot.slane %v1076_v17, 1  ;;  %v787_v28 = vor.u32 %v785_v4, %v784_v19  ;;  %v5140_v31 = vsel %vm4988_vm3, %v784_v19, 0  ;;  %4139 = vmatprep.mubr.msk.bf16.mxu1 %vm1229_vm4, %v5134_v20  ;;  %v792_v34 = vshll.u32 %v728_v23, 16 }
  0x3e   : > { %v1093_v29 = vshll.u32 %v5140_v31, 16  ;;  %v729_v37 = vpack.c.bf16 %v687_v26, %v686_v25  ;;  %4170 = vmatpush3.bf16.msra.mxu1 %v4787_v48  ;;  %v5153_v41 = vsel %vm1688_vm5, %v1692_v32, %v1693_v16  ;;  %v1695_v42 = vrot.slane %v5014_v21, 1  ;;  %v3936_v25 = vld [vmem:[%s4927_s24 + $0x48] sm:$0xff]  }
  0x3f   : > { %v1079_v39 = vor.u32 %v1078_v27, %v1074_v13  ;;  %v5148_v40 = vsel %vm4988_vm3, 0, %v787_v28  ;;  %4203 = vmatprep.subr.bf16.mxu1 %v5128_v11  ;;  %v791_v48 = vrot.slane %v789_v33, 7  ;;  %v3893_v57 = vunpack.c.l.bf16 %v3935_v43 }
  0x40   : > { %v1086_v45 = vshrl.u32 %v5148_v40, 16  ;;  %v1088_v46 = vshll.u32 %v5148_v40, 16  ;;  %v1095_v47 = vrot.slane %v1093_v29, 1  ;;  %v796_v52 = vshrl.u32 %v729_v37, 16  ;;  %v3937_v29 = vld [vmem:[%s4927_s24 + $0x50] sm:$0xff]  }
  0x41   : > { %v5161_v49 = vsel %vm1012_vm2, %v1079_v39, %v1083_v18  ;;  %v799_v53 = vshll.u32 %v729_v37, 16  ;;  %v5166_v6 = vsel %vm1688_vm5, %v1695_v42, %v1696_v22  ;;  %v794_v54 = vor.u32 %v792_v34, %v791_v48 }
  0x42   : > { %4299 = vmatprep.mubr.msk.bf16.mxu0 %vm1229_vm4, %v5161_v49  ;;  %v1090_v16 = vrot.slane %v1088_v46, 1  ;;  %4140 = vmatmul.mubr.msk.bf16.gmra.mrb[8].mxu1 %vm1229_vm4, %v5161_v49  ;;  %v5174_v55 = vsel %vm4988_vm3, %v791_v48, 0  ;;  %v798_v59 = vrot.slane %v796_v52, 7  ;;  %v3894_v12 = vunpack.c.h.bf16 %v3935_v43 }
  0x43   : > { %v1105_v58 = vshll.u32 %v5174_v55, 16  ;;  %v1698_v22 = vrot.slane %v5050_v56, 1  ;;  %v5180_v62 = vsel %vm4988_vm3, 0, %v794_v54  ;;  %v624_v1 = vmul.f32 %v3893_v57, %v4939_v7 }
  0x44   : > { %v1091_v61 = vor.u32 %v1090_v16, %v1086_v45  ;;  %v1699_v2 = vrot.slane %v5038_v50, 1  ;;  %v1098_v3 = vshrl.u32 %v5180_v62, 16  ;;  %v1100_v4 = vshll.u32 %v5180_v62, 16 }
  0x45   : > { %v1107_v5 = vrot.slane %v1105_v58, 1  ;;  %v801_v24 = vor.u32 %v799_v53, %v798_v59  ;;  %v5191_v10 = vsel %vm4988_vm3, %v798_v59, 0  ;;  %v625_v13 = vmul.f32 %v3894_v12, %v4939_v7 }
  0x46   : > { %v5187_v9 = vsel %vm1012_vm2, %v1091_v61, %v1095_v47  ;;  %v656_v17 = vadd.f32 %v4949_v14, %v624_v1  ;;  %v1102_v50 = vrot.slane %v1100_v4, 1  ;;  %v1117_v19 = vshll.u32 %v5191_v10, 16  ;;  %v3938_v4 = vld [vmem:[%s4927_s24 + $0x58] sm:$0xff]  }
  0x47   : > { %4300 = vmatmul.mubr.msk.bf16.gmra.mrb[8].mxu0 %vm1229_vm4, %v5187_v9  ;;  %v5199_v18 = vsel %vm4988_vm3, 0, %v801_v24  ;;  %4143 = vmatprep.mubr.msk.bf16.mxu1 %vm1229_vm4, %v5187_v9  ;;  %v5205_v23 = vsel %vm1688_vm5, %v1698_v22, %v1699_v2  ;;  %v657_v28 = vadd.f32 %v4949_v14, %v625_v13  ;;  %v1701_v37 = vrot.slane %v5095_v44, 1 }
  0x48   : > { %v1110_v26 = vshrl.u32 %v5199_v18, 16  ;;  %v1112_v27 = vshll.u32 %v5199_v18, 16  ;;  %v688_v32 = vmax.f32 %v656_v17, 0.0  ;;  %v1103_v33 = vor.u32 %v1102_v50, %v1098_v3 }
  0x49   : > { %v1119_v34 = vrot.slane %v1117_v19, 1  ;;  %v1702_v39 = vrot.slane %v5088_v38, 1  ;;  %v689_v43 = vmax.f32 %v657_v28, 0.0  ;;  %v3897_v45 = vunpack.c.l.bf16 %v3936_v25 }
  0x4a   : > { %v1114_v42 = vrot.slane %v1112_v27, 1  ;;  %v3898_v46 = vunpack.c.h.bf16 %v3936_v25  ;;  %v5215_v47 = vsel %vm1012_vm2, %v1103_v33, %v1107_v5  ;;  %v3901_v52 = vunpack.c.l.bf16 %v3937_v29 }
  0x4b   : > { %v5218_v48 = vsel %vm1688_vm5, %v1701_v37, %v1702_v39  ;;  %v3902_v53 = vunpack.c.h.bf16 %v3937_v29  ;;  %4303 = vmatprep.mubr.msk.bf16.mxu0 %vm1229_vm4, %v5215_v47  ;;  %4144 = vmatmul.mubr.msk.bf16.gmra.mrb[12].mxu1 %vm1229_vm4, %v5215_v47  ;;  %v730_v38 = vpack.c.bf16 %v689_v43, %v688_v32  ;;  %v626_v54 = vmul.f32 %v3897_v45, %v4939_v7  ;;  %v3939_v32 = vld [vmem:[%s4927_s24 + $0x60] sm:$0xff]  }
  0x4c   : > { %v1115_v16 = vor.u32 %v1114_v42, %v1110_v26  ;;  %v1704_v57 = vrot.slane %v5121_v8, 1  ;;  %v627_v58 = vmul.f32 %v3898_v46, %v4939_v7  ;;  %v628_v59 = vmul.f32 %v3901_v52, %v4939_v7 }
  0x4d   : > { %v629_v12 = vmul.f32 %v3902_v53, %v4939_v7  ;;  %v1705_v22 = vrot.slane %v5115_v63, 1  ;;  %v803_v1 = vshrl.u32 %v730_v38, 16  ;;  %v806_v2 = vshll.u32 %v730_v38, 16 }
  0x4e   : > { %v5231_v61 = vsel %vm1012_vm2, %v1115_v16, %v1119_v34  ;;  %v658_v3 = vadd.f32 %v4949_v14, %v626_v54  ;;  %v659_v5 = vadd.f32 %v4949_v14, %v627_v58  ;;  %v660_v24 = vadd.f32 %v4949_v14, %v628_v59  ;;  %v4788_v58 = vld [vmem:[%s5954_s5 + $0xc8] sm:$0xff]  }
  0x4f   : > { %4304 = vmatmul.mubr.msk.bf16.gmra.mrb[12].mxu0 %vm1229_vm4, %v5231_v61  ;;  %4147 = vmatprep.mubr.msk.bf16.mxu1 %vm1229_vm4, %v5231_v61  ;;  %v661_v63 = vadd.f32 %v4949_v14, %v629_v12  ;;  %v805_v13 = vrot.slane %v803_v1, 7  ;;  %v5245_v50 = vsel %vm1688_vm5, %v1704_v57, %v1705_v22  ;;  %v1707_v19 = vrot.slane %v5148_v40, 1 }
  0x50   : > { %4331 = vmatprep.mubr.msk.bf16.mxu0 %vm1229_vm4, %v5153_v41  ;;  %v690_v17 = vmax.f32 %v658_v3, 0.0  ;;  %v691_v25 = vmax.f32 %v659_v5, 0.0  ;;  %v692_v26 = vmax.f32 %v660_v24, 0.0  ;;  %v3905_v28 = vunpack.c.l.bf16 %v3938_v4 }
  0x51   : > { %v693_v27 = vmax.f32 %v661_v63, 0.0  ;;  %v808_v29 = vor.u32 %v806_v2, %v805_v13  ;;  %v5251_v33 = vsel %vm4988_vm3, %v805_v13, 0  ;;  %v1708_v34 = vrot.slane %v5140_v31, 1 }
  0x52   : > { %v3906_v37 = vunpack.c.h.bf16 %v3938_v4  ;;  %v1129_v39 = vshll.u32 %v5251_v33, 16  ;;  %v731_v42 = vpack.c.bf16 %v691_v25, %v690_v17  ;;  %v630_v45 = vmul.f32 %v3905_v28, %v4939_v7 }
  0x53   : > { %v732_v43 = vpack.c.bf16 %v693_v27, %v692_v26  ;;  %v5258_v46 = vsel %vm4988_vm3, 0, %v808_v29  ;;  %v3909_v53 = vunpack.c.l.bf16 %v3939_v32  ;;  %v3910_v16 = vunpack.c.h.bf16 %v3939_v32 }
  0x54   : > { %v631_v52 = vmul.f32 %v3906_v37, %v4939_v7  ;;  %v1122_v38 = vshrl.u32 %v5258_v46, 16  ;;  %v1124_v54 = vshll.u32 %v5258_v46, 16  ;;  %v1131_v31 = vrot.slane %v1129_v39, 1 }
  0x55   : > { %v810_v57 = vshrl.u32 %v731_v42, 16  ;;  %v813_v59 = vshll.u32 %v731_v42, 16  ;;  %v817_v12 = vshrl.u32 %v732_v43, 16  ;;  %v820_v22 = vshll.u32 %v732_v43, 16 }
  0x56   : > { %v662_v1 = vadd.f32 %v4949_v14, %v630_v45  ;;  %v1126_v2 = vrot.slane %v1124_v54, 1  ;;  %v663_v4 = vadd.f32 %v4949_v14, %v631_v52  ;;  %v632_v5 = vmul.f32 %v3909_v53, %v4939_v7 }
  0x57   : > { %4332 = vmatmul.mubr.msk.bf16.vlgmr.msra.gmra.mrb[0].mxu0 %vm1229_vm4, %v5166_v6  ;;  %v812_v3 = vrot.slane %v810_v57, 7  ;;  %v819_v24 = vrot.slane %v817_v12, 7  ;;  %v5275_v63 = vsel %vm1688_vm5, %v1707_v19, %v1708_v34  ;;  %v633_v17 = vmul.f32 %v3910_v16, %v4939_v7  ;;  %v4792_v12 = vld [vmem:[%s5954_s5 + $0xd8] sm:$0xff]  }
  0x58   : > { %4364 = vmatpush3.bf16.msra.mxu0 %v5109_v60  ;;  %4335 = vmatprep.mubr.msk.bf16.mxu0 %vm1229_vm4, %v5205_v23  ;;  %v694_v13 = vmax.f32 %v662_v1, 0.0  ;;  %v1127_v25 = vor.u32 %v1126_v2, %v1122_v38  ;;  %v695_v28 = vmax.f32 %v663_v4, 0.0  ;;  %v4790_v60 = vld [vmem:[%s5954_s5 + $0xd0] sm:$0xff]   ;;  %v664_v34 = vadd.f32 %v4949_v14, %v632_v5 }
  0x59   : > { %v815_v26 = vor.u32 %v813_v59, %v812_v3  ;;  %v5280_v27 = vsel %vm4988_vm3, %v812_v3, 0  ;;  %4365 = vmatprep.subr.bf16.mxu0 %v4788_v58  ;;  %v822_v29 = vor.u32 %v820_v22, %v819_v24  ;;  %v5288_v19 = vsel %vm4988_vm3, %v819_v24, 0  ;;  %v3940_v59 = vld [vmem:[%s4927_s24 + $0x68] sm:$0xff]  }
  0x5a   : > { %v1141_v32 = vshll.u32 %v5280_v27, 16  ;;  %v5292_v37 = vsel %vm1012_vm2, %v1127_v25, %v1131_v31  ;;  %v1153_v42 = vshll.u32 %v5288_v19, 16  ;;  %v733_v43 = vpack.c.bf16 %v695_v28, %v694_v13 }
  0x5b   : > { %v5296_v39 = vsel %vm4988_vm3, 0, %v815_v26  ;;  %4148 = vmatmul.mubr.msk.bf16.gmra.mrb[16].mxu1 %vm1229_vm4, %v5292_v37  ;;  %v5305_v53 = vsel %vm4988_vm3, 0, %v822_v29  ;;  %v1710_v16 = vrot.slane %v5180_v62, 1  ;;  %v665_v2 = vadd.f32 %v4949_v14, %v633_v17 }
  0x5c   : > { %v1134_v45 = vshrl.u32 %v5296_v39, 16  ;;  %v1136_v52 = vshll.u32 %v5296_v39, 16  ;;  %4366 = vmatpush3.bf16.msra.mxu0 %v4788_v58  ;;  %v1143_v38 = vrot.slane %v1141_v32, 1  ;;  %v1146_v54 = vshrl.u32 %v5305_v53, 16 }
  0x5d   : > { %v1148_v31 = vshll.u32 %v5305_v53, 16  ;;  %v824_v57 = vshrl.u32 %v733_v43, 16  ;;  %4367 = vmatprep.subr.bf16.mxu0 %v4790_v60  ;;  %v827_v1 = vshll.u32 %v733_v43, 16  ;;  %v696_v3 = vmax.f32 %v664_v34, 0.0 }
  0x5e   : > { %v1138_v22 = vrot.slane %v1136_v52, 1  ;;  %v1155_v4 = vrot.slane %v1153_v42, 1  ;;  %v1711_v24 = vrot.slane %v5174_v55, 1  ;;  %v697_v25 = vmax.f32 %v665_v2, 0.0  ;;  %v5329_v55 = vld [vmem:[%s5954_s5 + $0xe0] sm:$0xff]   ;;  %v3941_v52 = vld [vmem:[%s4927_s24 + $0x70] sm:$0xff]  }
  0x5f   : > { %4336 = vmatmul.mubr.msk.bf16.gmra.mrb[4].mxu0 %vm1229_vm4, %v5218_v48  ;;  %v1150_v58 = vrot.slane %v1148_v31, 1  ;;  %v826_v5 = vrot.slane %v824_v57, 7  ;;  %v1713_v26 = vrot.slane %v5199_v18, 1  ;;  %v3913_v28 = vunpack.c.l.bf16 %v3940_v59 }
  0x60   : > { %v1139_v13 = vor.u32 %v1138_v22, %v1134_v45  ;;  %4339 = vmatprep.mubr.msk.bf16.mxu0 %vm1229_vm4, %v5245_v50  ;;  %4368 = vmatpush3.bf16.msra.mxu0 %v4790_v60  ;;  %v1714_v34 = vrot.slane %v5191_v10, 1  ;;  %v734_v60 = vpack.c.bf16 %v697_v25, %v696_v3  ;;  %v5336_v45 = vsel %vm1688_vm5, %v1710_v16, %v1711_v24 }
  0x61   : > { %v1151_v17 = vor.u32 %v1150_v58, %v1146_v54  ;;  %v829_v32 = vor.u32 %v827_v1, %v826_v5  ;;  %v5323_v29 = vsel %vm4988_vm3, %v826_v5, 0  ;;  %4369 = vmatprep.subr.bf16.mxu0 %v4792_v12  ;;  %v3914_v31 = vunpack.c.h.bf16 %v3940_v59 }
  0x62   : > { %v5332_v42 = vsel %vm1012_vm2, %v1139_v13, %v1143_v38  ;;  %v1165_v43 = vshll.u32 %v5323_v29, 16  ;;  %v634_v38 = vmul.f32 %v3913_v28, %v4939_v7  ;;  %v831_v1 = vshrl.u32 %v734_v60, 16 }
  0x63   : > { %5968 = vst [vmem:[#allocation2_spill] sm:$0xff] %v5332_v42  ;;  %4151 = vmatprep.mubr.msk.bf16.mxu1 %vm1229_vm4, %v5332_v42  ;;  %v5342_v10 = vsel %vm1012_vm2, %v1151_v17, %v1155_v4  ;;  %v5346_v54 = vsel %vm4988_vm3, 0, %v829_v32  ;;  %v834_v2 = vshll.u32 %v734_v60, 16  ;;  %v635_v3 = vmul.f32 %v3914_v31, %v4939_v7 }
  0x64   : > { %5969 = vst [vmem:[#allocation3_spill] sm:$0xff] %v5342_v10  ;;  %4152 = vmatmul.mubr.msk.bf16.gmra.mrb[20].mxu1 %vm1229_vm4, %v5342_v10  ;;  %v1158_v16 = vshrl.u32 %v5346_v54, 16  ;;  %v1160_v57 = vshll.u32 %v5346_v54, 16  ;;  %v1167_v22 = vrot.slane %v1165_v43, 1  ;;  %4370 = vmatpush3.bf16.msra.mxu0 %v4792_v12  ;;  %v666_v58 = vadd.f32 %v4949_v14, %v634_v38 }
  0x65   : > { %v3917_v4 = vunpack.c.l.bf16 %v3941_v52  ;;  %4403 = vmatprep.subr.bf16.mxu0 %v5329_v55  ;;  %v833_v5 = vrot.slane %v831_v1, 7  ;;  %v3918_v24 = vunpack.c.h.bf16 %v3941_v52  ;;  %v1716_v13 = vrot.slane %v5258_v46, 1 }
  0x66   : > { %v1162_v59 = vrot.slane %v1160_v57, 1  ;;  %v667_v25 = vadd.f32 %v4949_v14, %v635_v3  ;;  %v698_v28 = vmax.f32 %v666_v58, 0.0  ;;  %v1717_v17 = vrot.slane %v5251_v33, 1 }
  0x67   : > { %4340 = vmatmul.mubr.msk.bf16.gmra.mrb[8].mxu0 %vm1229_vm4, %v5275_v63  ;;  %v636_v12 = vmul.f32 %v3917_v4, %v4939_v7  ;;  %v836_v43 = vor.u32 %v834_v2, %v833_v5  ;;  %v5364_v60 = vsel %vm4988_vm3, %v833_v5, 0  ;;  %v637_v52 = vmul.f32 %v3918_v24, %v4939_v7 }
  0x68   : > { %v1163_v32 = vor.u32 %v1162_v59, %v1158_v16  ;;  %4343 = vmatprep.mubr.msk.bf16.mxu0 %vm1229_vm4, %v5336_v45  ;;  %v1177_v31 = vshll.u32 %v5364_v60, 16  ;;  %v699_v38 = vmax.f32 %v667_v25, 0.0  ;;  %v5384_v58 = vsel %vm1688_vm5, %v1713_v26, %v1714_v34 }
  0x69   : > { %v668_v57 = vadd.f32 %v4949_v14, %v636_v12  ;;  %v5376_v33 = vsel %vm4988_vm3, 0, %v836_v43  ;;  %v669_v16 = vadd.f32 %v4949_v14, %v637_v52  ;;  %v5387_v59 = vsel %vm1688_vm5, %v1716_v13, %v1717_v17 }
  0x6a   : > { %v5372_v1 = vsel %vm1012_vm2, %v1163_v32, %v1167_v22  ;;  %v1170_v7 = vshrl.u32 %v5376_v33, 16  ;;  %v1172_v2 = vshll.u32 %v5376_v33, 16  ;;  %v735_v3 = vpack.c.bf16 %v699_v38, %v698_v28  ;;  %v3942_v32 = vld [vmem:[%s4927_s24 + $0x78] sm:$0xff]  }
  0x6b   : > { %5970 = vst [vmem:[#allocation4_spill] sm:$0xff] %v5372_v1  ;;  %4155 = vmatprep.mubr.msk.bf16.mxu1 %vm1229_vm4, %v5372_v1  ;;  %v700_v22 = vmax.f32 %v668_v57, 0.0  ;;  %v701_v4 = vmax.f32 %v669_v16, 0.0  ;;  %v1179_v24 = vrot.slane %v1177_v31, 1  ;;  %v1719_v28 = vrot.slane %v5296_v39, 1 }
  0x6c   : > { %v1174_v5 = vrot.slane %v1172_v2, 1  ;;  %v838_v25 = vshrl.u32 %v735_v3, 16  ;;  %v841_v14 = vshll.u32 %v735_v3, 16  ;;  %v1720_v26 = vrot.slane %v5280_v27, 1 }
  0x6d   : > { %v736_v12 = vpack.c.bf16 %v701_v4, %v700_v22  ;;  %v1722_v13 = vrot.slane %v5305_v53, 1  ;;  %v1723_v17 = vrot.slane %v5288_v19, 1  ;;  %v3922_v22 = vunpack.c.h.bf16 %v3942_v32  ;;  %v5412_v19 = vld [vmem:[%s5952_s3] ss:$0 sm:$0xff] }
  0x6e   : > { %v1175_v43 = vor.u32 %v1174_v5, %v1170_v7  ;;  %v840_v52 = vrot.slane %v838_v25, 7  ;;  %v3921_v7 = vunpack.c.l.bf16 %v3942_v32  ;;  %v1729_v1 = vrot.slane %v5364_v60, 1 }
  0x6f   : > { %4344 = vmatmul.mubr.msk.bf16.gmra.mrb[12].mxu0 %vm1229_vm4, %v5384_v58  ;;  %v845_v34 = vshrl.u32 %v736_v12, 16  ;;  %v848_v38 = vshll.u32 %v736_v12, 16  ;;  %v5423_v32 = vsel %vm1688_vm5, %v1722_v13, %v1723_v17  ;;  %v1725_v17 = vrot.slane %v5346_v54, 1 }
  0x70   : > { %4347 = vmatprep.mubr.msk.bf16.mxu0 %vm1229_vm4, %v5387_v59  ;;  %v5399_v31 = vsel %vm1012_vm2, %v1175_v43, %v1179_v24  ;;  %v843_v57 = vor.u32 %v841_v14, %v840_v52  ;;  %v936_v16 = vsel %vm4988_vm3, %v840_v52, 0  ;;  %v638_v4 = vmul.f32 %v5412_v19, %v3921_v7  ;;  %v5429_v52 = vld [vmem:[%s5953_s4] ss:$0 sm:$0xff] }
  0x71   : > { %5971 = vst [vmem:[#allocation5_spill] sm:$0xff] %v5399_v31  ;;  %4156 = vmatmul.mubr.msk.bf16.gmra.mrb[24].mxu1 %vm1229_vm4, %v5399_v31  ;;  %v1189_v27 = vshll.u32 %v936_v16, 16  ;;  %v847_v2 = vrot.slane %v845_v34, 7  ;;  %v5418_v14 = vsel %vm1688_vm5, %v1719_v28, %v1720_v26  ;;  %v639_v43 = vmul.f32 %v5412_v19, %v3922_v22 }
  0x72   : > { %v5407_v3 = vsel %vm4988_vm3, 0, %v843_v57  ;;  %v670_v34 = vadd.f32 %v5429_v52, %v638_v4  ;;  %v1728_v31 = vrot.slane %v5376_v33, 1 }
  0x73   : > { %v1182_v5 = vshrl.u32 %v5407_v3, 16  ;;  %v1184_v24 = vshll.u32 %v5407_v3, 16  ;;  %v850_v25 = vor.u32 %v848_v38, %v847_v2  ;;  %v937_v12 = vsel %vm4988_vm3, %v847_v2, 0 }
  0x74   : > { %v1191_v38 = vrot.slane %v1189_v27, 1  ;;  %v1201_v26 = vshll.u32 %v937_v12, 16  ;;  %v1726_v27 = vrot.slane %v5323_v29, 1  ;;  %v671_v22 = vadd.f32 %v5429_v52, %v639_v43 }
  0x75   : > { %v1186_v57 = vrot.slane %v1184_v24, 1  ;;  %v5434_v28 = vsel %vm4988_vm3, 0, %v850_v25  ;;  %v702_v4 = vmax.f32 %v670_v34, 0.0  ;;  %v5459_v34 = vsel %vm1688_vm5, %v1728_v31, %v1729_v1 }
  0x76   : > { %v1194_v7 = vshrl.u32 %v5434_v28, 16  ;;  %v1196_v13 = vshll.u32 %v5434_v28, 16  ;;  %v1203_v25 = vrot.slane %v1201_v26, 1  ;;  %v703_v42 = vmax.f32 %v671_v22, 0.0  ;;  %v4793_v22 = vld [vmem:[%s5954_s5 + $0x50] sm:$0xff]  }
  0x77   : > { %4348 = vmatmul.mubr.msk.bf16.gmra.mrb[16].mxu0 %vm1229_vm4, %v5418_v14  ;;  %v1187_v2 = vor.u32 %v1186_v57, %v1182_v5  ;;  %v5453_v57 = vsel %vm1688_vm5, %v1725_v17, %v1726_v27  ;;  %v1731_v26 = vrot.slane %v5407_v3, 1  ;;  %v1734_v1 = vrot.slane %v5434_v28, 1  ;;  %v4791_v17 = vld [vmem:[%s5954_s5 + $0x48] sm:$0xff]  }
  0x78   : > { %4351 = vmatprep.mubr.msk.bf16.mxu0 %vm1229_vm4, %v5423_v32  ;;  %v1198_v24 = vrot.slane %v1196_v13, 1  ;;  %v737_v29 = vpack.c.bf16 %v703_v42, %v702_v4  ;;  %v1735_v31 = vrot.slane %v937_v12, 1 }
  0x79   : > { %v5448_v10 = vsel %vm1012_vm2, %v1187_v2, %v1191_v38 }
  0x7a   : > { %4159 = vmatprep.mubr.msk.bf16.mxu1 %vm1229_vm4, %v5448_v10  ;;  %v1199_v5 = vor.u32 %v1198_v24, %v1194_v7  ;;  %v852_v60 = vshrl.u32 %v737_v29, 16  ;;  %v855_v38 = vshll.u32 %v737_v29, 16  ;;  %v1732_v7 = vrot.slane %v936_v16, 1  ;;  %v4796_v29 = vld [vmem:[%s5954_s5 + $0xe8] sm:$0xff]  }
  0x7b   : > { %v5480_v27 = vsel %vm1688_vm5, %v1734_v1, %v1735_v31 }
  0x7c   : > { %v5456_v43 = vsel %vm1012_vm2, %v1199_v5, %v1203_v25  ;;  %v854_v42 = vrot.slane %v852_v60, 7  ;;  %v5475_v2 = vsel %vm1688_vm5, %v1731_v26, %v1732_v7  ;;  %v4797_v5 = vld [vmem:[%s5954_s5 + $0x60] sm:$0xff]   ;;  %v4798_v60 = vld [vmem:[%s5954_s5 + $0xf0] sm:$0xff]  }
  0x7d   : > { %4160 = vmatmul.mubr.msk.bf16.gmra.mrb[28].mxu1 %vm1229_vm4, %v5456_v43 }
  0x7e   : > { %4171 = vmatprep.mubr.msk.bf16.mxu1 %vm1229_vm4, %v5025_v35  ;;  %v857_v13 = vor.u32 %v855_v38, %v854_v42  ;;  %v5488_v12 = vsel %vm4988_vm3, %v854_v42, 0  ;;  %v4800_v38 = vld [vmem:[%s5954_s5 + $0xf8] sm:$0xff]   ;;  %v3924_v42 = vld [vmem:[%s486_s20] sm:$0xff]  }
  0x7f   : > { %4352 = vmatmul.mubr.msk.bf16.gmra.mrb[20].mxu0 %vm1229_vm4, %v5453_v57  ;;  %v2456_v24 = vrot.slane %v5488_v12, 1  ;;  %v3925_v26 = vunpack.c.l.bf16 %v3924_v42  ;;  %v3926_v7 = vunpack.c.h.bf16 %v3924_v42 }
  0x80   : > { %4355 = vmatprep.mubr.msk.bf16.mxu0 %vm1229_vm4, %v5459_v34  ;;  %v5484_v16 = vsel %vm4988_vm3, 0, %v857_v13 }
  0x81   : > { %v2455_v4 = vrot.slane %v5484_v16, 1  ;;  %v708_v1 = vmul.f32 %v5412_v19, %v3925_v26  ;;  %v709_v31 = vmul.f32 %v5412_v19, %v3926_v7  ;;  %v1690_v19 = vrot.slane %v5021_v30, 1  ;;  %v4801_v26 = vld [vmem:[%s5954_s5 + $0x70] sm:$0xff]  }
  0x83   : > { %v5506_v25 = vsel %vm1688_vm5, %v2455_v4, %v2456_v24  ;;  %v710_v13 = vadd.f32 %v5429_v52, %v708_v1  ;;  %v1689_v24 = vrot.slane %v5025_v35, 1  ;;  %v4799_v35 = vld [vmem:[%s5954_s5 + $0x68] sm:$0xff]   ;;  %v4809_v1 = vld [vmem:[%s5954_s5 + $0x80] sm:$0xff]  }
  0x85   : > { %4172 = vmatmul.mubr.msk.bf16.vlgmr.msra.gmra.mrb[0].mxu1 %vm1229_vm4, %v5006_v15 }
  0x86   : > { %4204 = vmatpush3.bf16.msra.mxu1 %v5128_v11  ;;  %4175 = vmatprep.mubr.msk.bf16.mxu1 %vm1229_vm4, %v5014_v21  ;;  %v4795_v11 = vld [vmem:[%s5954_s5 + $0x58] sm:$0xff]  }
  0x87   : > { %4356 = vmatmul.mubr.msk.bf16.gmra.mrb[24].mxu0 %vm1229_vm4, %v5475_v2  ;;  %4205 = vmatprep.subr.bf16.mxu1 %v4791_v17 }
  0x88   : > { %4359 = vmatprep.mubr.msk.bf16.mxu0 %vm1229_vm4, %v5480_v27 }
  0x8a   : > { %4206 = vmatpush3.bf16.msra.mxu1 %v4791_v17  ;;  %v711_v17 = vadd.f32 %v5429_v52, %v709_v31  ;;  %v4804_v31 = vld [vmem:[%s5954_s5 + $0x108] sm:$0xff]  }
  0x8b   : > { %4207 = vmatprep.subr.bf16.mxu1 %v4793_v22 }
  0x8c   : > { %v713_v4 = vmax.f32 %v711_v17, 0.0  ;;  %v5975_v17 = vld [vmem:[#allocation5_spill] sm:$0xff] }
  0x8d   : > { %4176 = vmatmul.mubr.msk.bf16.gmra.mrb[4].mxu1 %vm1229_vm4, %v5050_v56 }
  0x8e   : > { %4179 = vmatprep.mubr.msk.bf16.mxu1 %vm1229_vm4, %v5095_v44  ;;  %4208 = vmatpush3.bf16.msra.mxu1 %v4793_v22  ;;  %v712_v22 = vmax.f32 %v710_v13, 0.0  ;;  %v720_v52 = vmul.f32 0.0, %v713_v4  ;;  %v4806_v13 = vld [vmem:[%s5954_s5 + $0x118] sm:$0xff]  }
  0x8f   : > { %4360 = vmatmul.mubr.msk.bf16.gmra.mrb[28].mxu0 %vm1229_vm4, %v5506_v25  ;;  %4209 = vmatprep.subr.bf16.mxu1 %v4795_v11 }
  0x90   : > { %4371 = vmatprep.mubr.msk.bf16.mxu0 %vm1229_vm4, %v5014_v21 }
  0x92   : > { %4210 = vmatpush3.bf16.msra.mxu1 %v4795_v11  ;;  %v719_v11 = vmul.f32 0.0, %v712_v22 }
  0x93   : > { %4243 = vmatprep.subr.bf16.mxu1 %v4797_v5 }
  0x95   : > { %4180 = vmatmul.mubr.msk.bf16.gmra.mrb[8].mxu1 %vm1229_vm4, %v5121_v8 }
  0x96   : > { %4183 = vmatprep.mubr.msk.bf16.mxu1 %vm1229_vm4, %v5148_v40 }
  0x97   : > { %4372 = vmatmul.mubr.msk.bf16.vlgmr.msra.gmra.mrb[0].mxu0 %vm1229_vm4, %v5050_v56 }
  0x98   : > { %4404 = vmatpush3.bf16.msra.mxu0 %v5329_v55  ;;  %4375 = vmatprep.mubr.msk.bf16.mxu0 %vm1229_vm4, %v5095_v44  ;;  %v5549_v55 = vld [vmem:[%s5954_s5 + $0x100] sm:$0xff]  }
  0x99   : > { %4405 = vmatprep.subr.bf16.mxu0 %v4796_v29 }
  0x9c   : > { %4406 = vmatpush3.bf16.msra.mxu0 %v4796_v29  ;;  %v1691_v29 = vsel %vm1688_vm5, %v1689_v24, %v1690_v19 }
  0x9d   : > { %4184 = vmatmul.mubr.msk.bf16.gmra.mrb[12].mxu1 %vm1229_vm4, %v5180_v62  ;;  %4407 = vmatprep.subr.bf16.mxu0 %v4798_v60 }
  0x9e   : > { %4187 = vmatprep.mubr.msk.bf16.mxu1 %vm1229_vm4, %v5199_v18 }
  0x9f   : > { %4376 = vmatmul.mubr.msk.bf16.gmra.mrb[4].mxu0 %vm1229_vm4, %v5121_v8 }
  0xa0   : > { %4379 = vmatprep.mubr.msk.bf16.mxu0 %vm1229_vm4, %v5148_v40  ;;  %4408 = vmatpush3.bf16.msra.mxu0 %v4798_v60  ;;  %v738_v60 = vpack.c.bf16 %v720_v52, %v719_v11 }
  0xa1   : > { %4409 = vmatprep.subr.bf16.mxu0 %v4800_v38 }
  0xa2   : > { %v859_v30 = vshrl.u32 %v738_v60, 16  ;;  %v862_v42 = vshll.u32 %v738_v60, 16 }
  0xa4   : > { %4410 = vmatpush3.bf16.msra.mxu0 %v4800_v38  ;;  %v5596_v38 = vrot.slane %v859_v30, 7  ;;  %v4812_v30 = vld [vmem:[%s5954_s5 + $0x98] sm:$0xff]  }
  0xa5   : > { %4188 = vmatmul.mubr.msk.bf16.gmra.mrb[16].mxu1 %vm1229_vm4, %v5258_v46  ;;  %4443 = vmatprep.subr.bf16.mxu0 %v5549_v55 }
  0xa6   : > { %4191 = vmatprep.mubr.msk.bf16.mxu1 %vm1229_vm4, %v5296_v39  ;;  %v864_v7 = vor.u32 %v862_v42, %v5596_v38  ;;  %v939_v24 = vsel %vm4988_vm3, %v5596_v38, 0 }
  0xa7   : > { %4380 = vmatmul.mubr.msk.bf16.gmra.mrb[8].mxu0 %vm1229_vm4, %v5180_v62  ;;  %v2905_v52 = vshll.u32 %v939_v24, 16 }
  0xa8   : > { %4383 = vmatprep.mubr.msk.bf16.mxu0 %vm1229_vm4, %v5199_v18 }
  0xa9   : > { %v2907_v60 = vrot.slane %v2905_v52, 1 }
  0xad   : > { %4192 = vmatmul.mubr.msk.bf16.gmra.mrb[20].mxu1 %vm1229_vm4, %v5305_v53 }
  0xae   : > { %4195 = vmatprep.mubr.msk.bf16.mxu1 %vm1229_vm4, %v5346_v54 }
  0xaf   : > { %4384 = vmatmul.mubr.msk.bf16.gmra.mrb[12].mxu0 %vm1229_vm4, %v5258_v46 }
  0xb0   : > { %4387 = vmatprep.mubr.msk.bf16.mxu0 %vm1229_vm4, %v5296_v39 }
  0xb5   : > { %4196 = vmatmul.mubr.msk.bf16.gmra.mrb[24].mxu1 %vm1229_vm4, %v5376_v33 }
  0xb6   : > { %4199 = vmatprep.mubr.msk.bf16.mxu1 %vm1229_vm4, %v5407_v3 }
  0xb7   : > { %4388 = vmatmul.mubr.msk.bf16.gmra.mrb[16].mxu0 %vm1229_vm4, %v5305_v53 }
  0xb8   : > { %4391 = vmatprep.mubr.msk.bf16.mxu0 %vm1229_vm4, %v5346_v54 }
  0xbd   : > { %4200 = vmatmul.mubr.msk.bf16.gmra.mrb[28].mxu1 %vm1229_vm4, %v5434_v28 }
  0xbe   : > { %4211 = vmatprep.mubr.msk.bf16.mxu1 %vm1229_vm4, %v1691_v29 }
  0xbf   : > { %4392 = vmatmul.mubr.msk.bf16.gmra.mrb[20].mxu0 %vm1229_vm4, %v5376_v33 }
  0xc0   : > { %4395 = vmatprep.mubr.msk.bf16.mxu0 %vm1229_vm4, %v5407_v3 }
  0xc5   : > { %4212 = vmatmul.mubr.msk.bf16.vlgmr.msra.gmra.mrb[0].mxu1 %vm1229_vm4, %v5153_v41  ;;  %v4803_v41 = vld [vmem:[%s5954_s5 + $0x78] sm:$0xff]  }
  0xc6   : > { %4244 = vmatpush3.bf16.msra.mxu1 %v4797_v5  ;;  %4215 = vmatprep.mubr.msk.bf16.mxu1 %vm1229_vm4, %v5166_v6  ;;  %v5615_v5 = vsel %vm4988_vm3, 0, %v864_v7 }
  0xc7   : > { %4396 = vmatmul.mubr.msk.bf16.gmra.mrb[24].mxu0 %vm1229_vm4, %v5434_v28  ;;  %4245 = vmatprep.subr.bf16.mxu1 %v4799_v35  ;;  %v2900_v22 = vshll.u32 %v5615_v5, 16  ;;  %v2898_v11 = vshrl.u32 %v5615_v5, 16 }
  0xc8   : > { %4399 = vmatprep.mubr.msk.bf16.mxu0 %vm1229_vm4, %v5484_v16 }
  0xca   : > { %4246 = vmatpush3.bf16.msra.mxu1 %v4799_v35  ;;  %v3394_v35 = vld [vmem:[%s5793_s26 + $0x8] sm:$0xff] }
  0xcb   : > { %4247 = vmatprep.subr.bf16.mxu1 %v4801_v26 }
  0xcd   : > { %4216 = vmatmul.mubr.msk.bf16.gmra.mrb[4].mxu1 %vm1229_vm4, %v5205_v23 }
  0xce   : > { %4219 = vmatprep.mubr.msk.bf16.mxu1 %vm1229_vm4, %v5218_v48  ;;  %4248 = vmatpush3.bf16.msra.mxu1 %v4801_v26 }
  0xcf   : > { %4400 = vmatmul.mubr.msk.bf16.gmra.mrb[28].mxu0 %vm1229_vm4, %v5615_v5  ;;  %4249 = vmatprep.subr.bf16.mxu1 %v4803_v41 }
  0xd0   : > { %4411 = vmatprep.mubr.msk.bf16.mxu0 %vm1229_vm4, %v5042_v51  ;;  %v4805_v51 = vld [vmem:[%s5954_s5 + $0x110] sm:$0xff]  }
  0xd2   : > { %4250 = vmatpush3.bf16.msra.mxu1 %v4803_v41 }
  0xd3   : > { %4483 = vmatprep.subr.bf16.mxu1 %v4809_v1 }
  0xd5   : > { %4220 = vmatmul.mubr.msk.bf16.gmra.mrb[8].mxu1 %vm1229_vm4, %v5245_v50 }
  0xd6   : > { %4223 = vmatprep.mubr.msk.bf16.mxu1 %vm1229_vm4, %v5275_v63 }
  0xd7   : > { %4412 = vmatmul.mubr.msk.bf16.vlgmr.msra.gmra.mrb[0].mxu0 %vm1229_vm4, %v5084_v36  ;;  %v5972_v36 = vld [vmem:[#allocation2_spill] sm:$0xff] }
  0xd8   : > { %4444 = vmatpush3.bf16.msra.mxu0 %v5549_v55  ;;  %4415 = vmatprep.mubr.msk.bf16.mxu0 %vm1229_vm4, %v5134_v20  ;;  %v5973_v20 = vld [vmem:[#allocation3_spill] sm:$0xff]  ;;  %v2229_v55 = vshll.u32 %v5488_v12, 16  ;;  %v2902_v12 = vrot.slane %v2900_v22, 1 }
  0xd9   : > { %4445 = vmatprep.subr.bf16.mxu0 %v4804_v31 }
  0xda   : > { %v2231_v19 = vrot.slane %v2229_v55, 1  ;;  %v2903_v29 = vor.u32 %v2902_v12, %v2898_v11  ;;  %v3398_v12 = vld [vmem:[%s5793_s26 + $0x28] sm:$0xff] }
  0xdc   : > { %4446 = vmatpush3.bf16.msra.mxu0 %v4804_v31 }
  0xdd   : > { %4224 = vmatmul.mubr.msk.bf16.gmra.mrb[12].mxu1 %vm1229_vm4, %v5336_v45  ;;  %4447 = vmatprep.subr.bf16.mxu0 %v4805_v51 }
  0xde   : > { %4227 = vmatprep.mubr.msk.bf16.mxu1 %vm1229_vm4, %v5384_v58 }
  0xdf   : > { %4416 = vmatmul.mubr.msk.bf16.gmra.mrb[4].mxu0 %vm1229_vm4, %v5161_v49  ;;  %v5974_v49 = vld [vmem:[#allocation4_spill] sm:$0xff] }
  0xe0   : > { %4419 = vmatprep.mubr.msk.bf16.mxu0 %vm1229_vm4, %v5187_v9  ;;  %4448 = vmatpush3.bf16.msra.mxu0 %v4805_v51  ;;  %v2224_v9 = vshll.u32 %v5484_v16, 16 }
  0xe1   : > { %4449 = vmatprep.subr.bf16.mxu0 %v4806_v13 }
  0xe4   : > { %4450 = vmatpush3.bf16.msra.mxu0 %v4806_v13 }
  0xe5   : > { %4228 = vmatmul.mubr.msk.bf16.gmra.mrb[16].mxu1 %vm1229_vm4, %v5387_v59 }
  0xe6   : > { %4231 = vmatprep.mubr.msk.bf16.mxu1 %vm1229_vm4, %v5418_v14 }
  0xe7   : > { %4420 = vmatmul.mubr.msk.bf16.gmra.mrb[8].mxu0 %vm1229_vm4, %v5215_v47  ;;  %v2222_v47 = vshrl.u32 %v5484_v16, 16 }
  0xe8   : > { %4423 = vmatprep.mubr.msk.bf16.mxu0 %vm1229_vm4, %v5231_v61  ;;  %v2226_v61 = vrot.slane %v2224_v9, 1 }
  0xea   : > { %v2227_v4 = vor.u32 %v2226_v61, %v2222_v47  ;;  %v3397_v61 = vld [vmem:[%s5793_s26 + $0x20] sm:$0xff] }
  0xed   : > { %4232 = vmatmul.mubr.msk.bf16.gmra.mrb[20].mxu1 %vm1229_vm4, %v5423_v32 }
  0xee   : > { %4235 = vmatprep.mubr.msk.bf16.mxu1 %vm1229_vm4, %v5453_v57 }
  0xef   : > { %4424 = vmatmul.mubr.msk.bf16.gmra.mrb[12].mxu0 %vm1229_vm4, %v5292_v37 }
  0xf0   : > { %4427 = vmatprep.mubr.msk.bf16.mxu0 %vm1229_vm4, %v5972_v36 }
  0xf5   : > { %4236 = vmatmul.mubr.msk.bf16.gmra.mrb[24].mxu1 %vm1229_vm4, %v5459_v34 }
  0xf6   : > { %4239 = vmatprep.mubr.msk.bf16.mxu1 %vm1229_vm4, %v5475_v2 }
  0xf7   : > { %4428 = vmatmul.mubr.msk.bf16.gmra.mrb[16].mxu0 %vm1229_vm4, %v5973_v20 }
  0xf8   : > { %4431 = vmatprep.mubr.msk.bf16.mxu0 %vm1229_vm4, %v5974_v49 }
  0xfd   : > { %4240 = vmatmul.mubr.msk.bf16.gmra.mrb[28].mxu1 %vm1229_vm4, %v5480_v27 }
  0xfe   : > { %4251 = vmatprep.mubr.msk.bf16.mxu1 %vm1229_vm4, %v5006_v15  ;;  %v2232_v15 = vsel %vm1012_vm2, %v2227_v4, %v2231_v19  ;;  %v3400_v4 = vld [vmem:[%s5793_s26 + $0x38] sm:$0xff] }
  0xff   : > { %4432 = vmatmul.mubr.msk.bf16.gmra.mrb[20].mxu0 %vm1229_vm4, %v5975_v17 }
 0x100   : > { %4435 = vmatprep.mubr.msk.bf16.mxu0 %vm1229_vm4, %v5448_v10 }
 0x105   : > { %4252 = vmatmul.mubr.msk.bf16.vlgmr.msra.gmra.mrb[0].mxu1 %vm1229_vm4, %v5014_v21  ;;  %v4811_v21 = vld [vmem:[%s5954_s5 + $0x90] sm:$0xff]  }
 0x106   : > { %4487 = vmatpush3.bf16.msra.mxu1 %v4809_v1  ;;  %4255 = vmatprep.mubr.msk.bf16.mxu1 %vm1229_vm4, %v5050_v56  ;;  %v2908_v56 = vsel %vm1012_vm2, %v2903_v29, %v2907_v60 }
 0x107   : > { %4436 = vmatmul.mubr.msk.bf16.gmra.mrb[24].mxu0 %vm1229_vm4, %v5456_v43  ;;  %4484 = vmatprep.subr.bf16.mxu1 %v4810_v0 }
 0x108   : > { %4439 = vmatprep.mubr.msk.bf16.mxu0 %vm1229_vm4, %v2232_v15 }
 0x10a   : > { %4488 = vmatpush3.bf16.msra.mxu1 %v4810_v0 }
 0x10b   : > { %4485 = vmatprep.subr.bf16.mxu1 %v4811_v21 }
 0x10d   : > { %4256 = vmatmul.mubr.msk.bf16.gmra.mrb[4].mxu1 %vm1229_vm4, %v5095_v44  ;;  %v3131_v44 = vrot.slane %v5615_v5, 1 }
 0x10e   : > { %4259 = vmatprep.mubr.msk.bf16.mxu1 %vm1229_vm4, %v5121_v8  ;;  %4489 = vmatpush3.bf16.msra.mxu1 %v4811_v21  ;;  %v3132_v8 = vrot.slane %v939_v24, 1 }
 0x10f   : > { %4440 = vmatmul.mubr.msk.bf16.gmra.mrb[28].mxu0 %vm1229_vm4, %v2908_v56  ;;  %4486 = vmatprep.subr.bf16.mxu1 %v4812_v30 }
 0x110   : > { %4451 = vmatprep.mubr.msk.bf16.mxu0 %vm1229_vm4, %v5166_v6 }
 0x112   : > { %4490 = vmatpush3.bf16.msra.mxu1 %v4812_v30  ;;  %v3403_v30 = vld [vmem:[%s5793_s26 + $0x50] sm:$0xff] }
 0x115   : > { %4260 = vmatmul.mubr.msk.bf16.gmra.mrb[8].mxu1 %vm1229_vm4, %v5148_v40  ;;  %v3133_v40 = vsel %vm1688_vm5, %v3131_v44, %v3132_v8 }
 0x116   : > { %4263 = vmatprep.mubr.msk.bf16.mxu1 %vm1229_vm4, %v5180_v62 }
 0x117   : > { %4452 = vmatmul.mubr.msk.bf16.vlgmr.msra.gmra.mrb[0].mxu0 %vm1229_vm4, %v5205_v23 }
 0x118   : > { %4455 = vmatprep.mubr.msk.bf16.mxu0 %vm1229_vm4, %v5218_v48 }
 0x11d   : > { %4264 = vmatmul.mubr.msk.bf16.gmra.mrb[12].mxu1 %vm1229_vm4, %v5199_v18 }
 0x11e   : > { %4267 = vmatprep.mubr.msk.bf16.mxu1 %vm1229_vm4, %v5258_v46 }
 0x11f   : > { %4456 = vmatmul.mubr.msk.bf16.gmra.mrb[4].mxu0 %vm1229_vm4, %v5245_v50 }
 0x120   : > { %4459 = vmatprep.mubr.msk.bf16.mxu0 %vm1229_vm4, %v5275_v63 }
 0x125   : > { %4268 = vmatmul.mubr.msk.bf16.gmra.mrb[16].mxu1 %vm1229_vm4, %v5296_v39 }
 0x126   : > { %4271 = vmatprep.mubr.msk.bf16.mxu1 %vm1229_vm4, %v5305_v53 }
 0x127   : > { %4460 = vmatmul.mubr.msk.bf16.gmra.mrb[8].mxu0 %vm1229_vm4, %v5336_v45 }
 0x128   : > { %4463 = vmatprep.mubr.msk.bf16.mxu0 %vm1229_vm4, %v5384_v58 }
 0x12d   : > { %4272 = vmatmul.mubr.msk.bf16.gmra.mrb[20].mxu1 %vm1229_vm4, %v5346_v54 }
 0x12e   : > { %4275 = vmatprep.mubr.msk.bf16.mxu1 %vm1229_vm4, %v5376_v33 }
 0x12f   : > { %4464 = vmatmul.mubr.msk.bf16.gmra.mrb[12].mxu0 %vm1229_vm4, %v5387_v59  ;;  %v3395_v59 = vld [vmem:[%s5793_s26 + $0x10] sm:$0xff] }
 0x130   : > { %4467 = vmatprep.mubr.msk.bf16.mxu0 %vm1229_vm4, %v5418_v14 }
 0x135   : > { %4276 = vmatmul.mubr.msk.bf16.gmra.mrb[24].mxu1 %vm1229_vm4, %v5407_v3 }
 0x136   : > { %4279 = vmatprep.mubr.msk.bf16.mxu1 %vm1229_vm4, %v5434_v28  ;;  %v3393_v28 = vld [vmem:[%s5793_s26] sm:$0xff] }
 0x137   : > { %4468 = vmatmul.mubr.msk.bf16.gmra.mrb[16].mxu0 %vm1229_vm4, %v5423_v32 }
 0x138   : > { %4471 = vmatprep.mubr.msk.bf16.mxu0 %vm1229_vm4, %v5453_v57 }
 0x13d   : > { %4280 = vmatmul.mubr.msk.bf16.gmra.mrb[28].mxu1 %vm1229_vm4, %v5484_v16 }
 0x13e   : > { %4307 = vmatprep.mubr.msk.bf16.mxu1 %vm1229_vm4, %v5292_v37 }
 0x13f   : > { %4472 = vmatmul.mubr.msk.bf16.gmra.mrb[20].mxu0 %vm1229_vm4, %v5459_v34 }
 0x140   : > { %4475 = vmatprep.mubr.msk.bf16.mxu0 %vm1229_vm4, %v5475_v2  ;;  %v3396_v2 = vld [vmem:[%s5793_s26 + $0x18] sm:$0xff] }
 0x145   : > { %4308 = vmatmul.mubr.msk.bf16.vlgmr.msra.gmra.mrb[16].mxu1 %vm1229_vm4, %v5972_v36 }
 0x146   : > { %4311 = vmatprep.mubr.msk.bf16.mxu1 %vm1229_vm4, %v5973_v20  ;;  %v3399_v20 = vld [vmem:[%s5793_s26 + $0x30] sm:$0xff] }
 0x147   : > { %4476 = vmatmul.mubr.msk.bf16.gmra.mrb[24].mxu0 %vm1229_vm4, %v5480_v27 }
 0x148   : > { %4479 = vmatprep.mubr.msk.bf16.mxu0 %vm1229_vm4, %v5506_v25 }
 0x14d   : > { %4312 = vmatmul.mubr.msk.bf16.gmra.mrb[20].mxu1 %vm1229_vm4, %v5974_v49 }
 0x14e   : > { %4315 = vmatprep.mubr.msk.bf16.mxu1 %vm1229_vm4, %v5975_v17 }
 0x14f   : > { %4480 = vmatmul.mubr.msk.bf16.gmra.mrb[28].mxu0 %vm1229_vm4, %v3133_v40 }
 0x155   : > { %4316 = vmatmul.mubr.msk.bf16.gmra.mrb[24].mxu1 %vm1229_vm4, %v5448_v10  ;;  %v5800_v10 = vld [vmem:[%s5955_s6] ss:$0 sm:$0xff] }
 0x156   : > { %4319 = vmatprep.mubr.msk.bf16.mxu1 %vm1229_vm4, %v5456_v43 }
 0x15d   : > { %4320 = vmatmul.mubr.msk.bf16.gmra.mrb[28].mxu1 %vm1229_vm4, %v2232_v15 }
 0x1d8   : > { %v4253_v6 = vpop.f32.mrb[0].mxu1 }
 0x1d9   : > { %v2063_v62 = vpop.f32.mrb[1].mxu1 }
 0x1da   : > { %v4254_v18 = vpop.f32.mrb[2].mxu1 }
 0x1db   : > { %v2066_v23 = vpop.f32.mrb[3].mxu1 }
 0x1e0   : > { %v4257_v48 = vpop.f32.mrb[4].mxu1 }
 0x1e1   : > { %v2079_v50 = vpop.f32.mrb[5].mxu1 }
 0x1e2   : > { %v4258_v46 = vpop.f32.mrb[6].mxu1 }
 0x1e3   : > { %v2082_v63 = vpop.f32.mrb[7].mxu1 }
 0x1e8   : > { %v4261_v37 = vpop.f32.mrb[8].mxu1 }
 0x1e9   : > { %v5788_v39 = vpop.f32.mrb[9].mxu1 }
 0x1ea   : > { %v5795_v53 = vpop.f32.mrb[10].mxu1  ;;  %v4453_v45 = vpop.f32.mrb[0].mxu0 }
 0x1eb   : > { %v5802_v54 = vpop.f32.mrb[11].mxu1  ;;  %v4491_v33 = vadd.f32 %v4453_v45, %v4253_v6  ;;  %v3195_v58 = vpop.f32.mrb[1].mxu0  ;;  %v3401_v6 = vld [vmem:[%s5793_s26 + $0x40] sm:$0xff] }
 0x1ec   : > { %v4492_v3 = vadd.f32 %v3195_v58, %v2063_v62  ;;  %v4454_v14 = vpop.f32.mrb[2].mxu0 }
 0x1ed   : > { %v3363_v32 = vadd.f32 %v4491_v33, %v5800_v10  ;;  %v4493_v57 = vadd.f32 %v4454_v14, %v4254_v18  ;;  %v3198_v43 = vpop.f32.mrb[3].mxu0 }
 0x1ee   : > { %v3361_v34 = vadd.f32 %v4492_v3, %v5800_v10  ;;  %v4494_v27 = vadd.f32 %v3198_v43, %v2066_v23  ;;  %v3407_v3 = vld [vmem:[%s5793_s26 + $0x70] sm:$0xff] }
 0x1ef   : > { %v3427_v16 = vsub.f32 %v3395_v59, %v3363_v32  ;;  %v3364_v25 = vadd.f32 %v4493_v57, %v5800_v10  ;;  %v3405_v57 = vld [vmem:[%s5793_s26 + $0x60] sm:$0xff] }
 0x1f0   : > { %v4265_v38 = vpop.f32.mrb[12].mxu1  ;;  %v3425_v42 = vsub.f32 %v3393_v28, %v3361_v34  ;;  %v3362_v26 = vadd.f32 %v4494_v27, %v5800_v10  ;;  %v3408_v27 = vld [vmem:[%s5793_s26 + $0x78] sm:$0xff] }
 0x1f1   : > { %v2111_v7 = vpop.f32.mrb[13].mxu1  ;;  %3460 = vst.msk [vmem:[%s5810_s12 + $0x10] sm:$0xff] %vm3457_vm6, %v3427_v16  ;;  %v3428_v41 = vsub.f32 %v3396_v2, %v3364_v25 }
 0x1f2   : > { %v4266_v5 = vpop.f32.mrb[14].mxu1  ;;  %3458 = vst.msk [vmem:[%s5810_s12] sm:$0xff] %vm3457_vm6, %v3425_v42  ;;  %v3426_v1 = vsub.f32 %v3394_v35, %v3362_v26  ;;  %v4457_v31 = vpop.f32.mrb[4].mxu0 }
 0x1f3   : > { %v2114_v51 = vpop.f32.mrb[15].mxu1  ;;  %3461 = vst.msk [vmem:[%s5810_s12 + $0x18] sm:$0xff] %vm3457_vm6, %v3428_v41  ;;  %v4495_v13 = vadd.f32 %v4457_v31, %v4257_v48  ;;  %v3211_v36 = vpop.f32.mrb[5].mxu0  ;;  %v3404_v48 = vld [vmem:[%s5793_s26 + $0x58] sm:$0xff] }
 0x1f4   : > { %3459 = vst.msk [vmem:[%s5810_s12 + $0x8] sm:$0xff] %vm3457_vm6, %v3426_v1  ;;  %v4496_v49 = vadd.f32 %v3211_v36, %v2079_v50  ;;  %v4458_v9 = vpop.f32.mrb[6].mxu0 }
 0x1f5   : > { %v3367_v47 = vadd.f32 %v4495_v13, %v5800_v10  ;;  %v4497_v55 = vadd.f32 %v4458_v9, %v4258_v46  ;;  %v3214_v17 = vpop.f32.mrb[7].mxu0 }
 0x1f6   : > { %v3365_v22 = vadd.f32 %v4496_v49, %v5800_v10  ;;  %v4498_v19 = vadd.f32 %v3214_v17, %v2082_v63 }
 0x1f7   : > { %v3431_v24 = vsub.f32 %v3399_v20, %v3367_v47  ;;  %v3368_v11 = vadd.f32 %v4497_v55, %v5800_v10  ;;  %v3411_v55 = vld [vmem:[%s5793_s26 + $0x90] sm:$0xff] }
 0x1f8   : > { %v3429_v52 = vsub.f32 %v3397_v61, %v3365_v22  ;;  %v3366_v15 = vadd.f32 %v4498_v19, %v5800_v10 }
 0x1f9   : > { %3464 = vst.msk [vmem:[%s5810_s12 + $0x30] sm:$0xff] %vm3457_vm6, %v3431_v24  ;;  %v3432_v0 = vsub.f32 %v3400_v4, %v3368_v11  ;;  %v3409_v24 = vld [vmem:[%s5793_s26 + $0x80] sm:$0xff] }
 0x1fa   : > { %3462 = vst.msk [vmem:[%s5810_s12 + $0x20] sm:$0xff] %vm3457_vm6, %v3429_v52  ;;  %v3430_v29 = vsub.f32 %v3398_v12, %v3366_v15  ;;  %v4461_v60 = vpop.f32.mrb[8].mxu0 }
 0x1fb   : > { %3465 = vst.msk [vmem:[%s5810_s12 + $0x38] sm:$0xff] %vm3457_vm6, %v3432_v0  ;;  %v4499_v21 = vadd.f32 %v4461_v60, %v4261_v37  ;;  %v3227_v56 = vpop.f32.mrb[9].mxu0  ;;  %v3402_v37 = vld [vmem:[%s5793_s26 + $0x48] sm:$0xff]  ;;  %v3412_v0 = vld [vmem:[%s5793_s26 + $0x98] sm:$0xff] }
 0x1fc   : > { %3463 = vst.msk [vmem:[%s5810_s12 + $0x28] sm:$0xff] %vm3457_vm6, %v3430_v29  ;;  %v4500_v44 = vadd.f32 %v3227_v56, %v5788_v39  ;;  %v4462_v8 = vpop.f32.mrb[10].mxu0 }
 0x1fd   : > { %v3371_v40 = vadd.f32 %v4499_v21, %v5800_v10  ;;  %v4501_v62 = vadd.f32 %v4462_v8, %v5795_v53  ;;  %v3230_v18 = vpop.f32.mrb[11].mxu0 }
 0x1fe   : > { %v3369_v23 = vadd.f32 %v4500_v44, %v5800_v10  ;;  %v4502_v50 = vadd.f32 %v3230_v18, %v5802_v54 }
 0x1ff   : > { %v3435_v46 = vsub.f32 %v3403_v30, %v3371_v40  ;;  %v3372_v63 = vadd.f32 %v4501_v62, %v5800_v10  ;;  %v3410_v30 = vld [vmem:[%s5793_s26 + $0x88] sm:$0xff] }
 0x200   : > { %v3433_v39 = vsub.f32 %v3401_v6, %v3369_v23  ;;  %v3370_v45 = vadd.f32 %v4502_v50, %v5800_v10  ;;  %v3415_v50 = vld [vmem:[%s5793_s26 + $0xb0] sm:$0xff] }
 0x201   : > { %3468 = vst.msk [vmem:[%s5810_s12 + $0x50] sm:$0xff] %vm3457_vm6, %v3435_v46  ;;  %v3436_v33 = vsub.f32 %v3404_v48, %v3372_v63 }
 0x202   : > { %3466 = vst.msk [vmem:[%s5810_s12 + $0x40] sm:$0xff] %vm3457_vm6, %v3433_v39  ;;  %v3434_v53 = vsub.f32 %v3402_v37, %v3370_v45  ;;  %v4465_v58 = vpop.f32.mrb[12].mxu0  ;;  %v3413_v45 = vld [vmem:[%s5793_s26 + $0xa0] sm:$0xff] }
 0x203   : > { %3469 = vst.msk [vmem:[%s5810_s12 + $0x58] sm:$0xff] %vm3457_vm6, %v3436_v33  ;;  %v4503_v54 = vadd.f32 %v4465_v58, %v4265_v38  ;;  %v3243_v59 = vpop.f32.mrb[13].mxu0  ;;  %v3406_v38 = vld [vmem:[%s5793_s26 + $0x68] sm:$0xff] }
 0x204   : > { %3467 = vst.msk [vmem:[%s5810_s12 + $0x48] sm:$0xff] %vm3457_vm6, %v3434_v53  ;;  %v4504_v14 = vadd.f32 %v3243_v59, %v2111_v7  ;;  %v4466_v32 = vpop.f32.mrb[14].mxu0  ;;  %v3416_v59 = vld [vmem:[%s5793_s26 + $0xb8] sm:$0xff] }
 0x205   : > { %v3375_v28 = vadd.f32 %v4503_v54, %v5800_v10  ;;  %v4505_v43 = vadd.f32 %v4466_v32, %v4266_v5  ;;  %v3246_v34 = vpop.f32.mrb[15].mxu0 }
 0x206   : > { %v3373_v2 = vadd.f32 %v4504_v14, %v5800_v10  ;;  %v4506_v16 = vadd.f32 %v3246_v34, %v2114_v51 }
 0x207   : > { %v3439_v25 = vsub.f32 %v3407_v3, %v3375_v28  ;;  %v3376_v35 = vadd.f32 %v4505_v43, %v5800_v10 }
 0x208   : > { %v3437_v42 = vsub.f32 %v3405_v57, %v3373_v2  ;;  %v3374_v26 = vadd.f32 %v4506_v16, %v5800_v10  ;;  %v3414_v57 = vld [vmem:[%s5793_s26 + $0xa8] sm:$0xff] }
 0x209   : > { %3472 = vst.msk [vmem:[%s5810_s12 + $0x70] sm:$0xff] %vm3457_vm6, %v3439_v25  ;;  %v3440_v7 = vsub.f32 %v3408_v27, %v3376_v35 }
 0x20a   : > { %3470 = vst.msk [vmem:[%s5810_s12 + $0x60] sm:$0xff] %vm3457_vm6, %v3437_v42  ;;  %v3438_v41 = vsub.f32 %v3406_v38, %v3374_v26  ;;  %v4469_v5 = vpop.f32.mrb[16].mxu0  ;;  %v3419_v42 = vld [vmem:[%s5793_s26 + $0xd0] sm:$0xff] }
 0x20b   : > { %3473 = vst.msk [vmem:[%s5810_s12 + $0x78] sm:$0xff] %vm3457_vm6, %v3440_v7  ;;  %v3259_v1 = vpop.f32.mrb[17].mxu0 }
 0x20c   : > { %3471 = vst.msk [vmem:[%s5810_s12 + $0x68] sm:$0xff] %vm3457_vm6, %v3438_v41  ;;  %v4470_v31 = vpop.f32.mrb[18].mxu0 }
 0x20d   : > { %v3262_v51 = vpop.f32.mrb[19].mxu0 }
 0x212   : > { %v4473_v13 = vpop.f32.mrb[20].mxu0 }
 0x213   : > { %v3275_v36 = vpop.f32.mrb[21].mxu0 }
 0x214   : > { %v4474_v20 = vpop.f32.mrb[22].mxu0 }
 0x215   : > { %v3278_v49 = vpop.f32.mrb[23].mxu0 }
 0x218   : > { %v4309_v9 = vpop.f32.mrb[16].mxu1 }
 0x219   : > { %v4507_v47 = vadd.f32 %v4469_v5, %v4309_v9  ;;  %v2358_v61 = vpop.f32.mrb[17].mxu1  ;;  %v3417_v5 = vld [vmem:[%s5793_s26 + $0xc0] sm:$0xff]  ;;  %v3418_v9 = vld [vmem:[%s5793_s26 + $0xc8] sm:$0xff] }
 0x21a   : > { %v4508_v17 = vadd.f32 %v3259_v1, %v2358_v61  ;;  %v4310_v22 = vpop.f32.mrb[18].mxu1  ;;  %v4477_v4 = vpop.f32.mrb[24].mxu0 }
 0x21b   : > { %v3379_v19 = vadd.f32 %v4507_v47, %v5800_v10  ;;  %v4509_v11 = vadd.f32 %v4470_v31, %v4310_v22  ;;  %v2361_v12 = vpop.f32.mrb[19].mxu1  ;;  %v3291_v52 = vpop.f32.mrb[25].mxu0 }
 0x21c   : > { %v3377_v15 = vadd.f32 %v4508_v17, %v5800_v10  ;;  %v4510_v29 = vadd.f32 %v3262_v51, %v2361_v12  ;;  %v4478_v60 = vpop.f32.mrb[26].mxu0 }
 0x21d   : > { %v3443_v21 = vsub.f32 %v3411_v55, %v3379_v19  ;;  %v3380_v56 = vadd.f32 %v4509_v11, %v5800_v10  ;;  %v3294_v44 = vpop.f32.mrb[27].mxu0 }
 0x21e   : > { %v3441_v8 = vsub.f32 %v3409_v24, %v3377_v15  ;;  %v3378_v40 = vadd.f32 %v4510_v29, %v5800_v10  ;;  %v3423_v24 = vld [vmem:[%s5793_s26 + $0xf0] sm:$0xff]  ;;  %v3421_v15 = vld [vmem:[%s5793_s26 + $0xe0] sm:$0xff] }
 0x21f   : > { %3476 = vst.msk [vmem:[%s5810_s12 + $0x90] sm:$0xff] %vm3457_vm6, %v3443_v21  ;;  %v3444_v6 = vsub.f32 %v3412_v0, %v3380_v56  ;;  %v3424_v21 = vld [vmem:[%s5793_s26 + $0xf8] sm:$0xff] }
 0x220   : > { %3474 = vst.msk [vmem:[%s5810_s12 + $0x80] sm:$0xff] %vm3457_vm6, %v3441_v8  ;;  %v3442_v62 = vsub.f32 %v3410_v30, %v3378_v40  ;;  %v4313_v18 = vpop.f32.mrb[20].mxu1  ;;  %v3422_v8 = vld [vmem:[%s5793_s26 + $0xe8] sm:$0xff] }
 0x221   : > { %3477 = vst.msk [vmem:[%s5810_s12 + $0x98] sm:$0xff] %vm3457_vm6, %v3444_v6  ;;  %v4511_v23 = vadd.f32 %v4473_v13, %v4313_v18  ;;  %v2374_v48 = vpop.f32.mrb[21].mxu1  ;;  %v3420_v13 = vld [vmem:[%s5793_s26 + $0xd8] sm:$0xff] }
 0x222   : > { %3475 = vst.msk [vmem:[%s5810_s12 + $0x88] sm:$0xff] %vm3457_vm6, %v3442_v62  ;;  %v4512_v46 = vadd.f32 %v3275_v36, %v2374_v48  ;;  %v4314_v63 = vpop.f32.mrb[22].mxu1  ;;  %v4481_v37 = vpop.f32.mrb[28].mxu0 }
 0x223   : > { %v3383_v39 = vadd.f32 %v4511_v23, %v5800_v10  ;;  %v4513_v33 = vadd.f32 %v4474_v20, %v4314_v63  ;;  %v2377_v53 = vpop.f32.mrb[23].mxu1  ;;  %v3307_v58 = vpop.f32.mrb[29].mxu0 }
 0x224   : > { %v3381_v54 = vadd.f32 %v4512_v46, %v5800_v10  ;;  %v4514_v3 = vadd.f32 %v3278_v49, %v2377_v53  ;;  %v4482_v14 = vpop.f32.mrb[30].mxu0 }
 0x225   : > { %v3447_v32 = vsub.f32 %v3415_v50, %v3383_v39  ;;  %v3384_v28 = vadd.f32 %v4513_v33, %v5800_v10  ;;  %v3310_v43 = vpop.f32.mrb[31].mxu0 }
 0x226   : > { %v3445_v34 = vsub.f32 %v3413_v45, %v3381_v54  ;;  %v3382_v2 = vadd.f32 %v4514_v3, %v5800_v10 }
 0x227   : > { %3480 = vst.msk [vmem:[%s5810_s12 + $0xb0] sm:$0xff] %vm3457_vm6, %v3447_v32  ;;  %v3448_v27 = vsub.f32 %v3416_v59, %v3384_v28 }
 0x228   : > { %3478 = vst.msk [vmem:[%s5810_s12 + $0xa0] sm:$0xff] %vm3457_vm6, %v3445_v34  ;;  %v3446_v16 = vsub.f32 %v3414_v57, %v3382_v2  ;;  %v4317_v25 = vpop.f32.mrb[24].mxu1 }
 0x229   : > { %3481 = vst.msk [vmem:[%s5810_s12 + $0xb8] sm:$0xff] %vm3457_vm6, %v3448_v27  ;;  %v4515_v35 = vadd.f32 %v4477_v4, %v4317_v25  ;;  %v2390_v38 = vpop.f32.mrb[25].mxu1 }
 0x22a   : > { %3479 = vst.msk [vmem:[%s5810_s12 + $0xa8] sm:$0xff] %vm3457_vm6, %v3446_v16  ;;  %v4516_v26 = vadd.f32 %v3291_v52, %v2390_v38  ;;  %v4318_v7 = vpop.f32.mrb[26].mxu1 }
 0x22b   : > { %v3387_v41 = vadd.f32 %v4515_v35, %v5800_v10  ;;  %v4517_v1 = vadd.f32 %v4478_v60, %v4318_v7  ;;  %v2393_v31 = vpop.f32.mrb[27].mxu1 }
 0x22c   : > { %v3385_v51 = vadd.f32 %v4516_v26, %v5800_v10  ;;  %v4518_v36 = vadd.f32 %v3294_v44, %v2393_v31 }
 0x22d   : > { %v3451_v20 = vsub.f32 %v3419_v42, %v3387_v41  ;;  %v3388_v49 = vadd.f32 %v4517_v1, %v5800_v10 }
 0x22e   : > { %v3449_v47 = vsub.f32 %v3417_v5, %v3385_v51  ;;  %v3386_v61 = vadd.f32 %v4518_v36, %v5800_v10 }
 0x22f   : > { %3484 = vst.msk [vmem:[%s5810_s12 + $0xd0] sm:$0xff] %vm3457_vm6, %v3451_v20  ;;  %v3452_v55 = vsub.f32 %v3420_v13, %v3388_v49 }
 0x230   : > { %3482 = vst.msk [vmem:[%s5810_s12 + $0xc0] sm:$0xff] %vm3457_vm6, %v3449_v47  ;;  %v3450_v17 = vsub.f32 %v3418_v9, %v3386_v61  ;;  %v4321_v22 = vpop.f32.mrb[28].mxu1 }
 0x231   : > { %3485 = vst.msk [vmem:[%s5810_s12 + $0xd8] sm:$0xff] %vm3457_vm6, %v3452_v55  ;;  %v4519_v4 = vadd.f32 %v4481_v37, %v4321_v22  ;;  %v2406_v19 = vpop.f32.mrb[29].mxu1 }
 0x232   : > { %3483 = vst.msk [vmem:[%s5810_s12 + $0xc8] sm:$0xff] %vm3457_vm6, %v3450_v17  ;;  %v4520_v11 = vadd.f32 %v3307_v58, %v2406_v19  ;;  %v4322_v12 = vpop.f32.mrb[30].mxu1 }
 0x233   : > { %v3391_v52 = vadd.f32 %v4519_v4, %v5800_v10  ;;  %v4521_v0 = vadd.f32 %v4482_v14, %v4322_v12  ;;  %v2409_v29 = vpop.f32.mrb[31].mxu1 }
 0x234   : > { %v3389_v60 = vadd.f32 %v4520_v11, %v5800_v10  ;;  %v4522_v56 = vadd.f32 %v3310_v43, %v2409_v29 }
 0x235   : > { %v3455_v30 = vsub.f32 %v3423_v24, %v3391_v52  ;;  %v3392_v44 = vadd.f32 %v4521_v0, %v5800_v10 }
 0x236   : > { %v3453_v40 = vsub.f32 %v3421_v15, %v3389_v60  ;;  %v3390_v6 = vadd.f32 %v4522_v56, %v5800_v10 }
 0x237   : > { %3488 = vst.msk [vmem:[%s5810_s12 + $0xf0] sm:$0xff] %vm3457_vm6, %v3455_v30  ;;  %v3456_v62 = vsub.f32 %v3424_v21, %v3392_v44 }
 0x238   : > { %3486 = vst.msk [vmem:[%s5810_s12 + $0xe0] sm:$0xff] %vm3457_vm6, %v3453_v40  ;;  %v3454_v18 = vsub.f32 %v3422_v8, %v3390_v6 }
 0x239   : > { %3489 = vst.msk [vmem:[%s5810_s12 + $0xf8] sm:$0xff] %vm3457_vm6, %v3456_v62 }
 0x23a   : > { %3487 = vst.msk [vmem:[%s5810_s12 + $0xe8] sm:$0xff] %vm3457_vm6, %v3454_v18 }
 0x23b PF: > { %s18_s29 = sadd.s32 1, %s4835_s29   ;;  %s5976_s27 = smov %s4831_s28 }
 0x23c   : > { %p15_p5 = scmp.ge.s32.totalorder %s18_s29, 4   ;;  %s5977_s28 = smov %s5979_s30 }
 0x23e   :  { %17 = sbr.rel (!%p15_p5) target bundleno = 2 (0x2), region = 91 }

</bundles_post_ra>
